<compile_context>
chip_gen: v6e
topology: v6e:2x2x1
jax: 0.10.0
libtpu: 0.0.40
codegen_flags: <defaults>
</compile_context>

<pallas_src>
import jax
import jax.numpy as jnp
from jax.experimental import pallas as pl
from jax.experimental.pallas import tpu as pltpu

EPS = 1e-5


# ---------------------------------------------------------------------------
# Fully fused Down kernel (single invocation, everything resident in VMEM)
# ---------------------------------------------------------------------------
def make_down_kernel(N, Cin, H, W, Mid, Cout):
    Ho, Wo = H // 2, W // 2
    M = N * Ho * Wo  # batch folded into the matmul M dimension (on lanes)

    def conv_bn_relu(feat, wt_ref, p_ref, c_in):
        # feat: (N, Ho, Wo, c_in)   wt_ref: (c_out, 9*c_in)   p_ref: (c_out, 3)
        # --- halo padding as a value (no scratch buffer, no readback) ---
        zr = jnp.zeros((N, 1, Wo, c_in), jnp.float32)
        zc = jnp.zeros((N, Ho + 2, 1, c_in), jnp.float32)
        padded = jnp.concatenate([zr, feat, zr], axis=1)          # (N, Ho+2, Wo,   c_in)
        padded = jnp.concatenate([zc, padded, zc], axis=2)        # (N, Ho+2, Wo+2, c_in)
        # --- im2col: 9 shifted views, concatenated along the K (lane) axis ---
        cols = [padded[:, ky:ky + Ho, kx:kx + Wo, :].reshape(M, c_in)
                for ky in range(3) for kx in range(3)]
        patches = jnp.concatenate(cols, axis=1)                   # (M, 9*c_in)
        # --- transposed ("NT") matmul: (c_out, K) x (M, K)^T -> (c_out, M=128 lanes)
        yT = jax.lax.dot_general(
            wt_ref[...], patches,
            dimension_numbers=(((1,), (1,)), ((), ())),
            preferred_element_type=jnp.float32)                   # (c_out, M)
        b = p_ref[:, 0:1]
        g = p_ref[:, 1:2]
        be = p_ref[:, 2:3]
        yT = yT + b                                               # per-sublane bias bcast
        # --- BatchNorm (training-mode batch stats, centered variance) + ReLU ---
        mean = jnp.mean(yT, axis=1, keepdims=True)                # lane-axis reduce
        var = jnp.mean((yT - mean) ** 2, axis=1, keepdims=True)   # biased variance
        scale = g * jax.lax.rsqrt(var + EPS)
        shift = be - mean * scale
        return jnp.maximum(yT * scale + shift, 0.0)               # (c_out, M)

    def kernel(x_ref, w1t_ref, p1_ref, w2t_ref, p2_ref, o_ref):
        # ---- NCHW -> NHWC inside the kernel (no extra XLA dispatch / HBM trip) ----
        xv = x_ref[...]                                           # (N, Cin, H*W)
        planes = [jnp.transpose(xv[n]).reshape(H, W, Cin) for n in range(N)]
        x_nhwc = jnp.stack(planes, axis=0)                        # (N, H, W, Cin)

        # ---- 2x2 max-pool, stride 2 (lane dim Cin untouched) ----
        x5 = x_nhwc.reshape(N * Ho, 2, Wo, 2, Cin)
        pooled = jnp.max(jnp.max(x5, axis=3), axis=1)             # (N*Ho, Wo, Cin)
        pooled = pooled.reshape(N, Ho, Wo, Cin)

        # ---- conv1 + BN + ReLU (activations live as one (Mid, 128) vreg) ----
        a1T = conv_bn_relu(pooled, w1t_ref, p1_ref, Cin)          # (Mid, M)

        # ---- back to spatial layout for conv2's im2col (single 1-vreg transpose) ----
        a1 = jnp.transpose(a1T).reshape(N, Ho, Wo, Mid)           # (N, Ho, Wo, Mid)

        # ---- conv2 + BN + ReLU ----
        outT = conv_bn_relu(a1, w2t_ref, p2_ref, Mid)             # (Cout, M)

        # ---- lane-dense output store: (Cout, N*Ho*Wo) = (8, 128) ----
        o_ref[...] = outT.astype(o_ref.dtype)

    return kernel


# ---------------------------------------------------------------------------
# Down forward (Pallas path): one fused pallas_call, 5 packed inputs
# ---------------------------------------------------------------------------
def down_forward(x_nchw, params):
    (w1, b1, g1, be1), (w2, b2, g2, be2) = params
    N, Cin, H, W = x_nchw.shape
    assert H % 2 == 0 and W % 2 == 0, "Down expects even spatial dims"
    Ho, Wo = H // 2, W // 2
    Mid = w1.shape[-1]
    Cout = w2.shape[-1]
    M = N * Ho * Wo

    # Free contiguous reshape (no transpose, no layout change in HBM).
    x3 = x_nchw.reshape(N, Cin, H * W).astype(jnp.float32)
    # HWIO (ky, kx, ci, co) row-major reshape matches the im2col column order;
    # transpose once (tiny, wrapper-side) so the kernel does an NT matmul.
    w1t = w1.reshape(9 * Cin, Mid).T.astype(jnp.float32)          # (Mid,  9*Cin)
    w2t = w2.reshape(9 * Mid, Cout).T.astype(jnp.float32)         # (Cout, 9*Mid)
    # Pack bias / gamma / beta per layer into one (C, 3) slab.
    p1 = jnp.stack([b1, g1, be1], axis=1).astype(jnp.float32)     # (Mid, 3)
    p2 = jnp.stack([b2, g2, be2], axis=1).astype(jnp.float32)     # (Cout, 3)

    vmem = pl.BlockSpec(memory_space=pltpu.MemorySpace.VMEM)
    kernel = make_down_kernel(N, Cin, H, W, Mid, Cout)

    out2d = pl.pallas_call(
        kernel,
        out_shape=jax.ShapeDtypeStruct((Cout, M), jnp.float32),   # lane-dense (8, 128)
        in_specs=[vmem] * 5,
        out_specs=vmem,
    )(x3, w1t, p1, w2t, p2)

    # Cheap wrapper-side rearrangement back to NCHW.
    return jnp.transpose(out2d.reshape(Cout, N, Ho, Wo), (1, 0, 2, 3))


# ---------------------------------------------------------------------------
# Pure-JAX reference (mirrors the PyTorch module in training mode)
# ---------------------------------------------------------------------------
def ref_forward(x_nchw, params):
    N, C, H, W = x_nchw.shape
    x = x_nchw.reshape(N, C, H // 2, 2, W // 2, 2).max(axis=(3, 5))
    for (w, b, gamma, beta) in params:
        w_oihw = jnp.transpose(w, (3, 2, 0, 1))
        y = jax.lax.conv_general_dilated(
            x, w_oihw, (1, 1), ((1, 1), (1, 1)),
            dimension_numbers=('NCHW', 'OIHW', 'NCHW'),
        ) + b[None, :, None, None]
        mean = jnp.mean(y, axis=(0, 2, 3), keepdims=True)
        var = jnp.mean((y - mean) ** 2, axis=(0, 2, 3), keepdims=True)
        yn = (y - mean) / jnp.sqrt(var + EPS)
        x = jnp.maximum(gamma[None, :, None, None] * yn
                        + beta[None, :, None, None], 0.0)
    return x


if __name__ == "__main__":
    in_ch, mid_ch, out_ch = 4, 8, 8          # Down(4, 8): mid_channels == out_channels
    N, H, W = 2, 16, 16

    key = jax.random.PRNGKey(0)
    kx, kw1, kb1, kg1, kbe1, kw2, kb2, kg2, kbe2 = jax.random.split(key, 9)

    x = jax.random.normal(kx, (N, in_ch, H, W), dtype=jnp.float32)

    # Conv weights in HWIO; non-trivial BN affine params to exercise the path.
    w1 = jax.random.normal(kw1, (3, 3, in_ch, mid_ch), jnp.float32) * 0.1
    b1 = jax.random.normal(kb1, (mid_ch,), jnp.float32) * 0.1
    g1 = 1.0 + 0.1 * jax.random.normal(kg1, (mid_ch,), jnp.float32)
    be1 = 0.1 * jax.random.normal(kbe1, (mid_ch,), jnp.float32)

    w2 = jax.random.normal(kw2, (3, 3, mid_ch, out_ch), jnp.float32) * 0.1
    b2 = jax.random.normal(kb2, (out_ch,), jnp.float32) * 0.1
    g2 = 1.0 + 0.1 * jax.random.normal(kg2, (out_ch,), jnp.float32)
    be2 = 0.1 * jax.random.normal(kbe2, (out_ch,), jnp.float32)

    params = [(w1, b1, g1, be1), (w2, b2, g2, be2)]

    down = jax.jit(down_forward)
    out = jax.block_until_ready(down(x, params))

    ref = ref_forward(x, params)
    assert out.shape == (N, out_ch, H // 2, W // 2), out.shape
    assert jnp.allclose(out, ref, rtol=1e-3, atol=2e-3), (
        float(jnp.max(jnp.abs(out - ref))))

    print("KERNEL_OK")
</pallas_src>

<mosaic_0001>
module attributes {stable_mosaic.version = 11 : i64} {
  func.func @kernel(%arg0: memref<2x4x256xf32, #tpu.memory_space<vmem>>, %arg1: memref<8x36xf32, #tpu.memory_space<vmem>>, %arg2: memref<8x3xf32, #tpu.memory_space<vmem>>, %arg3: memref<8x72xf32, #tpu.memory_space<vmem>>, %arg4: memref<8x3xf32, #tpu.memory_space<vmem>>, %arg5: memref<8x128xf32, #tpu.memory_space<vmem>>) attributes {dimension_semantics = [], scalar_prefetch = 0 : i64, scratch_operands = 0 : i64, tpu.core_type = #tpu.core_type<tc>} {
    %c0 = arith.constant 0 : index
    %c0_0 = arith.constant 0 : index
    %c0_1 = arith.constant 0 : index
    %0 = vector.load %arg0[%c0, %c0_0, %c0_1] : memref<2x4x256xf32, #tpu.memory_space<vmem>>, vector<2x4x256xf32>
    %1 = vector.extract_strided_slice %0 {offsets = [0, 0, 0], sizes = [1, 4, 256], strides = [1, 1, 1]} : vector<2x4x256xf32> to vector<1x4x256xf32>
    %2 = vector.shape_cast %1 : vector<1x4x256xf32> to vector<4x256xf32>
    %3 = tpu.transpose %2, [1, 0] : vector<4x256xf32> -> vector<256x4xf32>
    %4 = vector.shape_cast %3 : vector<256x4xf32> to vector<16x16x4xf32>
    %5 = vector.extract_strided_slice %0 {offsets = [1, 0, 0], sizes = [1, 4, 256], strides = [1, 1, 1]} : vector<2x4x256xf32> to vector<1x4x256xf32>
    %6 = vector.shape_cast %5 : vector<1x4x256xf32> to vector<4x256xf32>
    %7 = tpu.transpose %6, [1, 0] : vector<4x256xf32> -> vector<256x4xf32>
    %8 = vector.shape_cast %7 : vector<256x4xf32> to vector<16x16x4xf32>
    %9 = vector.shape_cast %4 : vector<16x16x4xf32> to vector<1x16x16x4xf32>
    %10 = vector.shape_cast %8 : vector<16x16x4xf32> to vector<1x16x16x4xf32>
    %11 = tpu.concatenate %9, %10 in 0 : vector<1x16x16x4xf32>, vector<1x16x16x4xf32> -> vector<2x16x16x4xf32>
    %12 = vector.shape_cast %11 : vector<2x16x16x4xf32> to vector<16x2x8x2x4xf32>
    %cst = arith.constant dense<0xFF800000> : vector<16x2x8x4xf32>
    %13 = vector.multi_reduction <maximumf>, %12, %cst [3] : vector<16x2x8x2x4xf32> to vector<16x2x8x4xf32>
    %cst_2 = arith.constant dense<0xFF800000> : vector<16x8x4xf32>
    %14 = vector.multi_reduction <maximumf>, %13, %cst_2 [1] : vector<16x2x8x4xf32> to vector<16x8x4xf32>
    %15 = vector.shape_cast %14 : vector<16x8x4xf32> to vector<2x8x8x4xf32>
    %cst_3 = arith.constant 0.000000e+00 : f32
    %16 = vector.broadcast %cst_3 : f32 to vector<2x1x8x4xf32>
    %cst_4 = arith.constant 0.000000e+00 : f32
    %17 = vector.broadcast %cst_4 : f32 to vector<2x10x1x4xf32>
    %18 = tpu.concatenate %16, %15, %16 in 1 : vector<2x1x8x4xf32>, vector<2x8x8x4xf32>, vector<2x1x8x4xf32> -> vector<2x10x8x4xf32>
    %19 = tpu.concatenate %17, %18, %17 in 2 : vector<2x10x1x4xf32>, vector<2x10x8x4xf32>, vector<2x10x1x4xf32> -> vector<2x10x10x4xf32>
    %20 = vector.extract_strided_slice %19 {offsets = [0, 0, 0, 0], sizes = [2, 8, 8, 4], strides = [1, 1, 1, 1]} : vector<2x10x10x4xf32> to vector<2x8x8x4xf32>
    %21 = vector.shape_cast %20 : vector<2x8x8x4xf32> to vector<128x4xf32>
    %22 = vector.extract_strided_slice %19 {offsets = [0, 0, 1, 0], sizes = [2, 8, 8, 4], strides = [1, 1, 1, 1]} : vector<2x10x10x4xf32> to vector<2x8x8x4xf32>
    %23 = vector.shape_cast %22 : vector<2x8x8x4xf32> to vector<128x4xf32>
    %24 = vector.extract_strided_slice %19 {offsets = [0, 0, 2, 0], sizes = [2, 8, 8, 4], strides = [1, 1, 1, 1]} : vector<2x10x10x4xf32> to vector<2x8x8x4xf32>
    %25 = vector.shape_cast %24 : vector<2x8x8x4xf32> to vector<128x4xf32>
    %26 = vector.extract_strided_slice %19 {offsets = [0, 1, 0, 0], sizes = [2, 8, 8, 4], strides = [1, 1, 1, 1]} : vector<2x10x10x4xf32> to vector<2x8x8x4xf32>
    %27 = vector.shape_cast %26 : vector<2x8x8x4xf32> to vector<128x4xf32>
    %28 = vector.extract_strided_slice %19 {offsets = [0, 1, 1, 0], sizes = [2, 8, 8, 4], strides = [1, 1, 1, 1]} : vector<2x10x10x4xf32> to vector<2x8x8x4xf32>
    %29 = vector.shape_cast %28 : vector<2x8x8x4xf32> to vector<128x4xf32>
    %30 = vector.extract_strided_slice %19 {offsets = [0, 1, 2, 0], sizes = [2, 8, 8, 4], strides = [1, 1, 1, 1]} : vector<2x10x10x4xf32> to vector<2x8x8x4xf32>
    %31 = vector.shape_cast %30 : vector<2x8x8x4xf32> to vector<128x4xf32>
    %32 = vector.extract_strided_slice %19 {offsets = [0, 2, 0, 0], sizes = [2, 8, 8, 4], strides = [1, 1, 1, 1]} : vector<2x10x10x4xf32> to vector<2x8x8x4xf32>
    %33 = vector.shape_cast %32 : vector<2x8x8x4xf32> to vector<128x4xf32>
    %34 = vector.extract_strided_slice %19 {offsets = [0, 2, 1, 0], sizes = [2, 8, 8, 4], strides = [1, 1, 1, 1]} : vector<2x10x10x4xf32> to vector<2x8x8x4xf32>
    %35 = vector.shape_cast %34 : vector<2x8x8x4xf32> to vector<128x4xf32>
    %36 = vector.extract_strided_slice %19 {offsets = [0, 2, 2, 0], sizes = [2, 8, 8, 4], strides = [1, 1, 1, 1]} : vector<2x10x10x4xf32> to vector<2x8x8x4xf32>
    %37 = vector.shape_cast %36 : vector<2x8x8x4xf32> to vector<128x4xf32>
    %38 = tpu.concatenate %21, %23, %25, %27, %29, %31, %33, %35, %37 in 1 : vector<128x4xf32>, vector<128x4xf32>, vector<128x4xf32>, vector<128x4xf32>, vector<128x4xf32>, vector<128x4xf32>, vector<128x4xf32>, vector<128x4xf32>, vector<128x4xf32> -> vector<128x36xf32>
    %c0_5 = arith.constant 0 : index
    %c0_6 = arith.constant 0 : index
    %39 = vector.load %arg1[%c0_5, %c0_6] : memref<8x36xf32, #tpu.memory_space<vmem>>, vector<8x36xf32>
    %cst_7 = arith.constant dense<0.000000e+00> : vector<8x128xf32>
    %40 = tpu.matmul %39, %38, %cst_7 {dimension_numbers = #tpu.dot_dimension_numbers<[1], [1], [0], [0], [0, 0, 1, 0], [], []>} : vector<8x36xf32>, vector<128x36xf32>, vector<8x128xf32> -> vector<8x128xf32>
    %c0_8 = arith.constant 0 : index
    %c0_9 = arith.constant 0 : index
    %41 = vector.load %arg2[%c0_8, %c0_9] : memref<8x3xf32, #tpu.memory_space<vmem>>, vector<8x1xf32>
    %c0_10 = arith.constant 0 : index
    %c1 = arith.constant 1 : index
    %42 = vector.load %arg2[%c0_10, %c1] : memref<8x3xf32, #tpu.memory_space<vmem>>, vector<8x1xf32>
    %c0_11 = arith.constant 0 : index
    %c2 = arith.constant 2 : index
    %43 = vector.load %arg2[%c0_11, %c2] : memref<8x3xf32, #tpu.memory_space<vmem>>, vector<8x1xf32>
    %44 = vector.broadcast %41 : vector<8x1xf32> to vector<8x128xf32>
    %45 = arith.addf %40, %44 : vector<8x128xf32>
    %cst_12 = arith.constant dense<0.000000e+00> : vector<8xf32>
    %46 = vector.multi_reduction <add>, %45, %cst_12 [1] : vector<8x128xf32> to vector<8xf32>
    %47 = vector.shape_cast %46 : vector<8xf32> to vector<8x1xf32>
    %cst_13 = arith.constant 1.280000e+02 : f32
    %48 = vector.broadcast %cst_13 : f32 to vector<8x1xf32>
    %49 = arith.divf %47, %48 : vector<8x1xf32>
    %50 = vector.broadcast %49 : vector<8x1xf32> to vector<8x128xf32>
    %51 = arith.subf %45, %50 : vector<8x128xf32>
    %52 = arith.mulf %51, %51 : vector<8x128xf32>
    %cst_14 = arith.constant dense<0.000000e+00> : vector<8xf32>
    %53 = vector.multi_reduction <add>, %52, %cst_14 [1] : vector<8x128xf32> to vector<8xf32>
    %54 = vector.shape_cast %53 : vector<8xf32> to vector<8x1xf32>
    %cst_15 = arith.constant 1.280000e+02 : f32
    %55 = vector.broadcast %cst_15 : f32 to vector<8x1xf32>
    %56 = arith.divf %54, %55 : vector<8x1xf32>
    %cst_16 = arith.constant 9.99999974E-6 : f32
    %57 = vector.broadcast %cst_16 : f32 to vector<8x1xf32>
    %58 = arith.addf %56, %57 : vector<8x1xf32>
    %59 = math.rsqrt %58 : vector<8x1xf32>
    %60 = arith.mulf %42, %59 : vector<8x1xf32>
    %61 = arith.mulf %49, %60 : vector<8x1xf32>
    %62 = arith.subf %43, %61 : vector<8x1xf32>
    %63 = vector.broadcast %60 : vector<8x1xf32> to vector<8x128xf32>
    %64 = arith.mulf %45, %63 : vector<8x128xf32>
    %65 = vector.broadcast %62 : vector<8x1xf32> to vector<8x128xf32>
    %66 = arith.addf %64, %65 : vector<8x128xf32>
    %cst_17 = arith.constant 0.000000e+00 : f32
    %67 = vector.broadcast %cst_17 : f32 to vector<8x128xf32>
    %68 = arith.maximumf %66, %67 : vector<8x128xf32>
    %69 = tpu.transpose %68, [1, 0] : vector<8x128xf32> -> vector<128x8xf32>
    %70 = vector.shape_cast %69 : vector<128x8xf32> to vector<2x8x8x8xf32>
    %cst_18 = arith.constant 0.000000e+00 : f32
    %71 = vector.broadcast %cst_18 : f32 to vector<2x1x8x8xf32>
    %cst_19 = arith.constant 0.000000e+00 : f32
    %72 = vector.broadcast %cst_19 : f32 to vector<2x10x1x8xf32>
    %73 = tpu.concatenate %71, %70, %71 in 1 : vector<2x1x8x8xf32>, vector<2x8x8x8xf32>, vector<2x1x8x8xf32> -> vector<2x10x8x8xf32>
    %74 = tpu.concatenate %72, %73, %72 in 2 : vector<2x10x1x8xf32>, vector<2x10x8x8xf32>, vector<2x10x1x8xf32> -> vector<2x10x10x8xf32>
    %75 = vector.extract_strided_slice %74 {offsets = [0, 0, 0, 0], sizes = [2, 8, 8, 8], strides = [1, 1, 1, 1]} : vector<2x10x10x8xf32> to vector<2x8x8x8xf32>
    %76 = vector.shape_cast %75 : vector<2x8x8x8xf32> to vector<128x8xf32>
    %77 = vector.extract_strided_slice %74 {offsets = [0, 0, 1, 0], sizes = [2, 8, 8, 8], strides = [1, 1, 1, 1]} : vector<2x10x10x8xf32> to vector<2x8x8x8xf32>
    %78 = vector.shape_cast %77 : vector<2x8x8x8xf32> to vector<128x8xf32>
    %79 = vector.extract_strided_slice %74 {offsets = [0, 0, 2, 0], sizes = [2, 8, 8, 8], strides = [1, 1, 1, 1]} : vector<2x10x10x8xf32> to vector<2x8x8x8xf32>
    %80 = vector.shape_cast %79 : vector<2x8x8x8xf32> to vector<128x8xf32>
    %81 = vector.extract_strided_slice %74 {offsets = [0, 1, 0, 0], sizes = [2, 8, 8, 8], strides = [1, 1, 1, 1]} : vector<2x10x10x8xf32> to vector<2x8x8x8xf32>
    %82 = vector.shape_cast %81 : vector<2x8x8x8xf32> to vector<128x8xf32>
    %83 = vector.extract_strided_slice %74 {offsets = [0, 1, 1, 0], sizes = [2, 8, 8, 8], strides = [1, 1, 1, 1]} : vector<2x10x10x8xf32> to vector<2x8x8x8xf32>
    %84 = vector.shape_cast %83 : vector<2x8x8x8xf32> to vector<128x8xf32>
    %85 = vector.extract_strided_slice %74 {offsets = [0, 1, 2, 0], sizes = [2, 8, 8, 8], strides = [1, 1, 1, 1]} : vector<2x10x10x8xf32> to vector<2x8x8x8xf32>
    %86 = vector.shape_cast %85 : vector<2x8x8x8xf32> to vector<128x8xf32>
    %87 = vector.extract_strided_slice %74 {offsets = [0, 2, 0, 0], sizes = [2, 8, 8, 8], strides = [1, 1, 1, 1]} : vector<2x10x10x8xf32> to vector<2x8x8x8xf32>
    %88 = vector.shape_cast %87 : vector<2x8x8x8xf32> to vector<128x8xf32>
    %89 = vector.extract_strided_slice %74 {offsets = [0, 2, 1, 0], sizes = [2, 8, 8, 8], strides = [1, 1, 1, 1]} : vector<2x10x10x8xf32> to vector<2x8x8x8xf32>
    %90 = vector.shape_cast %89 : vector<2x8x8x8xf32> to vector<128x8xf32>
    %91 = vector.extract_strided_slice %74 {offsets = [0, 2, 2, 0], sizes = [2, 8, 8, 8], strides = [1, 1, 1, 1]} : vector<2x10x10x8xf32> to vector<2x8x8x8xf32>
    %92 = vector.shape_cast %91 : vector<2x8x8x8xf32> to vector<128x8xf32>
    %93 = tpu.concatenate %76, %78, %80, %82, %84, %86, %88, %90, %92 in 1 : vector<128x8xf32>, vector<128x8xf32>, vector<128x8xf32>, vector<128x8xf32>, vector<128x8xf32>, vector<128x8xf32>, vector<128x8xf32>, vector<128x8xf32>, vector<128x8xf32> -> vector<128x72xf32>
    %c0_20 = arith.constant 0 : index
    %c0_21 = arith.constant 0 : index
    %94 = vector.load %arg3[%c0_20, %c0_21] : memref<8x72xf32, #tpu.memory_space<vmem>>, vector<8x72xf32>
    %cst_22 = arith.constant dense<0.000000e+00> : vector<8x128xf32>
    %95 = tpu.matmul %94, %93, %cst_22 {dimension_numbers = #tpu.dot_dimension_numbers<[1], [1], [0], [0], [0, 0, 1, 0], [], []>} : vector<8x72xf32>, vector<128x72xf32>, vector<8x128xf32> -> vector<8x128xf32>
    %c0_23 = arith.constant 0 : index
    %c0_24 = arith.constant 0 : index
    %96 = vector.load %arg4[%c0_23, %c0_24] : memref<8x3xf32, #tpu.memory_space<vmem>>, vector<8x1xf32>
    %c0_25 = arith.constant 0 : index
    %c1_26 = arith.constant 1 : index
    %97 = vector.load %arg4[%c0_25, %c1_26] : memref<8x3xf32, #tpu.memory_space<vmem>>, vector<8x1xf32>
    %c0_27 = arith.constant 0 : index
    %c2_28 = arith.constant 2 : index
    %98 = vector.load %arg4[%c0_27, %c2_28] : memref<8x3xf32, #tpu.memory_space<vmem>>, vector<8x1xf32>
    %99 = vector.broadcast %96 : vector<8x1xf32> to vector<8x128xf32>
    %100 = arith.addf %95, %99 : vector<8x128xf32>
    %cst_29 = arith.constant dense<0.000000e+00> : vector<8xf32>
    %101 = vector.multi_reduction <add>, %100, %cst_29 [1] : vector<8x128xf32> to vector<8xf32>
    %102 = vector.shape_cast %101 : vector<8xf32> to vector<8x1xf32>
    %cst_30 = arith.constant 1.280000e+02 : f32
    %103 = vector.broadcast %cst_30 : f32 to vector<8x1xf32>
    %104 = arith.divf %102, %103 : vector<8x1xf32>
    %105 = vector.broadcast %104 : vector<8x1xf32> to vector<8x128xf32>
    %106 = arith.subf %100, %105 : vector<8x128xf32>
    %107 = arith.mulf %106, %106 : vector<8x128xf32>
    %cst_31 = arith.constant dense<0.000000e+00> : vector<8xf32>
    %108 = vector.multi_reduction <add>, %107, %cst_31 [1] : vector<8x128xf32> to vector<8xf32>
    %109 = vector.shape_cast %108 : vector<8xf32> to vector<8x1xf32>
    %cst_32 = arith.constant 1.280000e+02 : f32
    %110 = vector.broadcast %cst_32 : f32 to vector<8x1xf32>
    %111 = arith.divf %109, %110 : vector<8x1xf32>
    %cst_33 = arith.constant 9.99999974E-6 : f32
    %112 = vector.broadcast %cst_33 : f32 to vector<8x1xf32>
    %113 = arith.addf %111, %112 : vector<8x1xf32>
    %114 = math.rsqrt %113 : vector<8x1xf32>
    %115 = arith.mulf %97, %114 : vector<8x1xf32>
    %116 = arith.mulf %104, %115 : vector<8x1xf32>
    %117 = arith.subf %98, %116 : vector<8x1xf32>
    %118 = vector.broadcast %115 : vector<8x1xf32> to vector<8x128xf32>
    %119 = arith.mulf %100, %118 : vector<8x128xf32>
    %120 = vector.broadcast %117 : vector<8x1xf32> to vector<8x128xf32>
    %121 = arith.addf %119, %120 : vector<8x128xf32>
    %cst_34 = arith.constant 0.000000e+00 : f32
    %122 = vector.broadcast %cst_34 : f32 to vector<8x128xf32>
    %123 = arith.maximumf %121, %122 : vector<8x128xf32>
    %c0_35 = arith.constant 0 : index
    %c0_36 = arith.constant 0 : index
    %124 = vector.load %arg5[%c0_35, %c0_36] : memref<8x128xf32, #tpu.memory_space<vmem>>, vector<8x128xf32>
    tpu.vector_store %arg5[%c0_35, %c0_36], %123 {strides = array<i32>} : memref<8x128xf32, #tpu.memory_space<vmem>>, vector<8x128xf32>,
    return
  }
}

</mosaic_0001>

<bundles_post_ra>
// kernel: down_forward.1
= control target key start
LH: loop header
LB: loop body
LE: loop exit
PB: predicated region body
PF: predicated region fallthrough
CT: control target
= control target key end

     0   :  { %v5931_v4 = vmov 1983009808   ;;  %v224_v6 = vlaneseq  ;;  %vm1564_vm0 = vcmask 25600   ;;  %vm3357_vm1 = vcmask 31744   ;;  %s5933_s22 = smov 8   ;;  %s5934_s23 = smov 12   ;;  %s9140_s0 = inlined_call_operand.vmem [shape: f32[2,4,256], index: 0, kind: input, shape index: {}]   ;;  %s9141_s2 = inlined_call_operand.vmem [shape: f32[8,3], index: 2, kind: input, shape index: {}]   ;;  %s9142_s1 = inlined_call_operand.vmem [shape: f32[8,36], index: 1, kind: input, shape index: {}]   ;;  %s9143_s4 = inlined_call_operand.vmem [shape: f32[8,3], index: 4, kind: input, shape index: {}]   ;;  %s9144_s3 = inlined_call_operand.vmem [shape: f32[8,72], index: 3, kind: input, shape index: {}]   ;;  %s9145_s5 = inlined_call_operand.vmem [shape: f32[8,128], index: 5, kind: output, shape index: {}]  }
   0x1   :  { %v21_v0 = vld [vmem:[%s9140_s0 + $0x8] sm:$0xff]  ;;  %v20_v1 = vld [vmem:[%s9140_s0] sm:$0xff]  ;;  %v222_v5 = vunpack.c.l.s4 %v5931_v4  ;;  %vm9260_vm2 = vcmask 1041409   ;;  %vm3872_vm3 = vcmask 1042434   ;;  %vm3874_vm4 = vcmask 1043459   ;;  %s5932_s0 = smov 4  }
   0x2   :  { %v90_v2 = vcombine.high %v21_v0, %v21_v0  ;;  %v23_v3 = vcombine.high %v20_v1, %v20_v1  ;;  %v225_v8 = vshrl.u32 %v224_v6, 7  ;;  %vm3876_vm5 = vcmask 1044484   ;;  %s5935_s24 = smov 20   ;;  %s5936_s25 = smov 16  }
   0x3   :  { %v223_v7 = vunpack.c.0.s8 %v222_v5  ;;  %vm3878_vm6 = vcmask 1045509   ;;  %vm3880_vm7 = vcmask 1046534   ;;  %vm9262_vm8 = vcmask 1047559   ;;  %s5938_s26 = smov 24   ;;  %s5939_s27 = smov 28  }
   0x4   :  { %124 = vxpose.xlu0.b32.start.end [1/1] (short) %v90_v2, 128  ;;  %57 = vxpose.xlu1.b32.start.end [1/1] (short) %v23_v3, 128  ;;  %vm9263_vm9 = vcmask 1040384   ;;  %vm4089_vm10 = vcmask 1046528   ;;  %vm9261_vm11 = vcmask 1045504   ;;  %s5940_s28 = smov 32   ;;  %vm4581_vm12 = vcmask 64512   ;;  %s5945_s7 = smov 56  }
   0x5   :  { %v5986_v10 = vsub.s32 %v223_v7, %v225_v8  ;;  %vm9266_vm13 = vcmask 97280   ;;  %vm9267_vm14 = vcmask 130048   ;;  %vm9265_vm15 = vcmask 162816   ;;  %s5946_s8 = smov 64   ;;  %s5948_s9 = smov 1  }
   0x6   :  { %s5949_s10 = smov 40  }
  0x41   :  { %92 = vxpose.xlu0.b32.start.end [1/1] (short) %v21_v0, 128  ;;  %25 = vxpose.xlu1.b32.start.end [1/1] (short) %v20_v1, 128 }
  0x80   :  { %v140_v9 = vpop.trf.xlu0 }
  0x81   :  { %v1043_v12 = vrot.slane %v140_v9, %v5986_v10  ;;  %v1036_v13 = vcombine.high %v140_v9, %v140_v9 }
  0x83   :  { %v1051_v14 = vcombine.high %v1043_v12, %v1043_v12  ;;  %v1050_v16 = vrot.slane %v1036_v13, %v5986_v10  ;;  %v2909_v17 = vsel %vm1564_vm0, %v1043_v12, -inf }
  0x84   :  { %v141_v11 = vpop.trf.xlu0  ;;  %v2910_v23 = vrot.slane %v2909_v17, 4 }
  0x85   :  { %v2916_v19 = vsel %vm1564_vm0, %v1051_v14, -inf  ;;  %v1053_v20 = vcombine.high %v141_v11, %v141_v11  ;;  %v1052_v22 = vcombine.high %v1050_v16, %v1050_v16  ;;  %v2923_v25 = vsel %vm1564_vm0, %v1050_v16, -inf }
  0x86   :  { %v2917_v24 = vrot.slane %v2916_v19, 4  ;;  %v1060_v27 = vrot.slane %v141_v11, %v5986_v10  ;;  %v2911_v30 = vmax.f32 %v2909_v17, %v2910_v23  ;;  %v2924_v31 = vrot.slane %v2923_v25, 4 }
  0x87   :  { %v1067_v28 = vrot.slane %v1053_v20, %v5986_v10  ;;  %v2930_v32 = vsel %vm1564_vm0, %v1052_v22, -inf }
  0x88   :  { %v142_v15 = vpop.trf.xlu0  ;;  %v2918_v33 = vmax.f32 %v2916_v19, %v2917_v24  ;;  %v1068_v35 = vcombine.high %v1060_v27, %v1060_v27  ;;  %v2931_v39 = vrot.slane %v2930_v32, 4  ;;  %v2912_v41 = vrot.slane %v2911_v30, 2 }
  0x89   :  { %v1077_v18 = vrot.slane %v142_v15, %v5986_v10  ;;  %v1070_v21 = vcombine.high %v142_v15, %v142_v15  ;;  %v1069_v36 = vcombine.high %v1067_v28, %v1067_v28  ;;  %v2925_v42 = vmax.f32 %v2923_v25, %v2924_v31 }
  0x8a   :  { %v2937_v43 = vsel %vm1564_vm0, %v1060_v27, -inf  ;;  %v2919_v45 = vrot.slane %v2918_v33, 2  ;;  %v2951_v46 = vsel %vm1564_vm0, %v1067_v28, -inf  ;;  %v2944_v49 = vsel %vm1564_vm0, %v1068_v35, -inf }
  0x8b   :  { %v1085_v26 = vcombine.high %v1077_v18, %v1077_v18  ;;  %v1084_v29 = vrot.slane %v1070_v21, %v5986_v10  ;;  %v2965_v40 = vsel %vm1564_vm0, %v1077_v18, -inf  ;;  %v2958_v50 = vsel %vm1564_vm0, %v1069_v36, -inf }
  0x8c   :  { %v143_v38 = vpop.trf.xlu0  ;;  %v2966_v51 = vrot.slane %v2965_v40, 4  ;;  %v2932_v53 = vmax.f32 %v2930_v32, %v2931_v39  ;;  %v2938_v54 = vrot.slane %v2937_v43, 4  ;;  %v2952_v55 = vrot.slane %v2951_v46, 4 }
  0x8d   :  { %v2972_v34 = vsel %vm1564_vm0, %v1085_v26, -inf  ;;  %v1086_v37 = vcombine.high %v1084_v29, %v1084_v29  ;;  %v2979_v47 = vsel %vm1564_vm0, %v1084_v29, -inf  ;;  %v1094_v48 = vrot.slane %v143_v38, %v5986_v10 }
  0x8e   :  { %v2973_v44 = vrot.slane %v2972_v34, 4  ;;  %v2980_v57 = vrot.slane %v2979_v47, 4  ;;  %v2945_v58 = vrot.slane %v2944_v49, 4  ;;  %v2959_v59 = vrot.slane %v2958_v50, 4 }
  0x8f   :  { %v2986_v52 = vsel %vm1564_vm0, %v1086_v37, -inf  ;;  %v1102_v61 = vcombine.high %v1094_v48, %v1094_v48  ;;  %v2913_v62 = vmax.f32 %v2911_v30, %v2912_v41  ;;  %v2920_v63 = vmax.f32 %v2918_v33, %v2919_v45 }
  0x90   :  { %v2974_v56 = vmax.f32 %v2972_v34, %v2973_v44  ;;  %v2987_v60 = vrot.slane %v2986_v52, 4  ;;  %v2926_v0 = vrot.slane %v2925_v42, 2  ;;  %v2967_v1 = vmax.f32 %v2965_v40, %v2966_v51  ;;  %v144_v45 = vpop.trf.xlu0 }
  0x91   :  { %v2933_v2 = vrot.slane %v2932_v53, 2  ;;  %v2939_v3 = vmax.f32 %v2937_v43, %v2938_v54  ;;  %v1087_v4 = vcombine.high %v143_v38, %v143_v38  ;;  %v2953_v5 = vmax.f32 %v2951_v46, %v2952_v55 }
  0x92   :  { %v2975_v6 = vrot.slane %v2974_v56, 2  ;;  %v2981_v7 = vmax.f32 %v2979_v47, %v2980_v57  ;;  %v2993_v8 = vsel %vm1564_vm0, %v1094_v48, -inf  ;;  %v2946_v9 = vmax.f32 %v2944_v49, %v2945_v58 }
  0x93   :  { %v2960_v11 = vmax.f32 %v2958_v50, %v2959_v59  ;;  %v2988_v12 = vmax.f32 %v2986_v52, %v2987_v60  ;;  %v3000_v13 = vsel %vm1564_vm0, %v1102_v61, -inf  ;;  %v2914_v14 = vrot.slane %v2913_v62, 1 }
  0x94   :  { %v2921_v15 = vrot.slane %v2920_v63, 1  ;;  %v2927_v16 = vmax.f32 %v2925_v42, %v2926_v0  ;;  %v2968_v17 = vrot.slane %v2967_v1, 2  ;;  %v2934_v18 = vmax.f32 %v2932_v53, %v2933_v2 }
  0x95   :  { %v2940_v19 = vrot.slane %v2939_v3, 2  ;;  %v1101_v20 = vrot.slane %v1087_v4, %v5986_v10  ;;  %v2994_v21 = vrot.slane %v2993_v8, 4  ;;  %v2976_v22 = vmax.f32 %v2974_v56, %v2975_v6  ;;  %v145_v6 = vpop.trf.xlu0 }
  0x96   :  { %v2982_v23 = vrot.slane %v2981_v7, 2  ;;  %v3001_v24 = vrot.slane %v3000_v13, 4  ;;  %v2947_v25 = vrot.slane %v2946_v9, 2  ;;  %v2954_v26 = vrot.slane %v2953_v5, 2 }
  0x97   :  { %v2961_v27 = vrot.slane %v2960_v11, 2  ;;  %v2989_v28 = vrot.slane %v2988_v12, 2  ;;  %v2915_v29 = vmax.f32 %v2913_v62, %v2914_v14  ;;  %v2922_v30 = vmax.f32 %v2920_v63, %v2921_v15 }
  0x98   :  { %v2928_v31 = vrot.slane %v2927_v16, 1  ;;  %v2969_v32 = vmax.f32 %v2967_v1, %v2968_v17  ;;  %v2935_v33 = vrot.slane %v2934_v18, 1  ;;  %v2941_v34 = vmax.f32 %v2939_v3, %v2940_v19 }
  0x99   :  { %v2995_v35 = vmax.f32 %v2993_v8, %v2994_v21  ;;  %v3007_v36 = vsel %vm1564_vm0, %v1101_v20, -inf  ;;  %v2977_v37 = vrot.slane %v2976_v22, 1  ;;  %v2983_v38 = vmax.f32 %v2981_v7, %v2982_v23 }
  0x9a   :  { %v1103_v39 = vcombine.high %v1101_v20, %v1101_v20  ;;  %v3002_v40 = vmax.f32 %v3000_v13, %v3001_v24  ;;  %v2948_v41 = vmax.f32 %v2946_v9, %v2947_v25  ;;  %v2955_v42 = vmax.f32 %v2953_v5, %v2954_v26 }
  0x9b   :  { %v2962_v43 = vmax.f32 %v2960_v11, %v2961_v27  ;;  %v2990_v44 = vmax.f32 %v2988_v12, %v2989_v28  ;;  %v2929_v46 = vmax.f32 %v2927_v16, %v2928_v31  ;;  %v3646_v47 = vsel %vm3357_vm1, %v2915_v29, -inf }
  0x9c   :  { %v2970_v48 = vrot.slane %v2969_v32, 1  ;;  %v3008_v49 = vrot.slane %v3007_v36, 4  ;;  %v2936_v50 = vmax.f32 %v2934_v18, %v2935_v33  ;;  %v3649_v51 = vsel %vm3357_vm1, %v2922_v30, -inf }
  0x9d   :  { %v2942_v52 = vrot.slane %v2941_v34, 1  ;;  %v2996_v53 = vrot.slane %v2995_v35, 2  ;;  %v2978_v54 = vmax.f32 %v2976_v22, %v2977_v37  ;;  %v2984_v55 = vrot.slane %v2983_v38, 1 }
  0x9e   :  { %v3003_v56 = vrot.slane %v3002_v40, 2  ;;  %v3014_v57 = vsel %vm1564_vm0, %v1103_v39, -inf  ;;  %v2949_v58 = vrot.slane %v2948_v41, 1  ;;  %v2956_v59 = vrot.slane %v2955_v42, 1 }
  0x9f   :  { %v2963_v60 = vrot.slane %v2962_v43, 1  ;;  %v2991_v61 = vrot.slane %v2990_v44, 1  ;;  %v2971_v62 = vmax.f32 %v2969_v32, %v2970_v48  ;;  %v3009_v63 = vmax.f32 %v3007_v36, %v3008_v49  ;;  %v146_v32 = vpop.trf.xlu0 }
  0xa0   :  { %v1104_v0 = vcombine.high %v144_v45, %v144_v45  ;;  %v1111_v1 = vrot.slane %v144_v45, %v5986_v10  ;;  %v3652_v2 = vsel %vm3357_vm1, %v2929_v46, -inf  ;;  %v6017_v3 = vsel %vm3357_vm1, %v2936_v50, -inf }
  0xa1   :  { %9270 = vst [vmem:[#allocation2_spill] sm:$0xff] %v6017_v3  ;;  %v2997_v4 = vmax.f32 %v2995_v35, %v2996_v53  ;;  %v3015_v5 = vrot.slane %v3014_v57, 4  ;;  %v2943_v7 = vmax.f32 %v2941_v34, %v2942_v52  ;;  %v2985_v8 = vmax.f32 %v2983_v38, %v2984_v55 }
  0xa2   :  { %v3650_v9 = vsel %vm3357_vm1, %v2978_v54, -inf  ;;  %v3004_v11 = vmax.f32 %v3002_v40, %v3003_v56  ;;  %v2950_v12 = vmax.f32 %v2948_v41, %v2949_v58  ;;  %v2957_v13 = vmax.f32 %v2955_v42, %v2956_v59 }
  0xa3   :  { %v6020_v14 = vmax.f32 %v2962_v43, %v2963_v60  ;;  %v2992_v15 = vmax.f32 %v2990_v44, %v2991_v61  ;;  %v3647_v16 = vsel %vm3357_vm1, %v2971_v62, -inf  ;;  %v3010_v17 = vrot.slane %v3009_v63, 2 }
  0xa4   :  { %v1118_v18 = vrot.slane %v1104_v0, %v5986_v10  ;;  %v1119_v19 = vcombine.high %v1111_v1, %v1111_v1  ;;  %v3651_v20 = vmax.f32 %v3649_v51, %v3650_v9  ;;  %v2998_v21 = vrot.slane %v2997_v4, 1 }
  0xa5   :  { %9271 = vst [vmem:[#allocation3_spill] sm:$0xff] %v6020_v14  ;;  %v3016_v22 = vmax.f32 %v3014_v57, %v3015_v5  ;;  %v3021_v23 = vsel %vm1564_vm0, %v1111_v1, -inf  ;;  %v3653_v24 = vsel %vm3357_vm1, %v2985_v8, -inf  ;;  %v3005_v25 = vrot.slane %v3004_v11, 1  ;;  %v147_v1 = vpop.trf.xlu0 }
  0xa6   :  { %v1121_v26 = vcombine.high %v145_v6, %v145_v6  ;;  %v1128_v27 = vrot.slane %v145_v6, %v5986_v10  ;;  %v6028_v28 = vsel %vm3357_vm1, %v2943_v7, -inf  ;;  %v6031_v29 = vsel %vm3357_vm1, %v2957_v13, -inf }
  0xa7   :  { %9272 = vst [vmem:[#allocation4_spill] sm:$0xff] %v6028_v28  ;;  %9273 = vst [vmem:[#allocation5_spill] sm:$0xff] %v6031_v29  ;;  %v3648_v30 = vmax.f32 %v3646_v47, %v3647_v16  ;;  %v6034_v31 = vsel %vm3357_vm1, %v2992_v15, -inf  ;;  %v3011_v33 = vmax.f32 %v3009_v63, %v3010_v17  ;;  %v1120_v34 = vcombine.high %v1118_v18, %v1118_v18 }
  0xa8   :  { %9274 = vst [vmem:[#allocation6_spill] sm:$0xff] %v6034_v31  ;;  %v3022_v35 = vrot.slane %v3021_v23, 4  ;;  %v3028_v36 = vsel %vm1564_vm0, %v1119_v19, -inf  ;;  %v3654_v37 = vmax.f32 %v3652_v2, %v3653_v24  ;;  %v2999_v39 = vmax.f32 %v2997_v4, %v2998_v21 }
  0xa9   :  { %v3961_v38 = vsel %vm9260_vm2, %v3651_v20, %v3648_v30  ;;  %v3017_v40 = vrot.slane %v3016_v22, 2  ;;  %v3006_v41 = vmax.f32 %v3004_v11, %v3005_v25  ;;  %v1135_v42 = vrot.slane %v1121_v26, %v5986_v10 }
  0xaa   :  { %v1136_v43 = vcombine.high %v1128_v27, %v1128_v27  ;;  %v1138_v44 = vcombine.high %v146_v32, %v146_v32  ;;  %v6040_v45 = vsel %vm3357_vm1, %v2950_v12, -inf  ;;  %v3029_v47 = vrot.slane %v3028_v36, 4 }
  0xab   :  { %9275 = vst [vmem:[#allocation7_spill] sm:$0xff] %v6040_v45  ;;  %v1145_v48 = vrot.slane %v146_v32, %v5986_v10  ;;  %v3012_v49 = vrot.slane %v3011_v33, 1  ;;  %v3023_v50 = vmax.f32 %v3021_v23, %v3022_v35  ;;  %v3035_v51 = vsel %vm1564_vm0, %v1118_v18, -inf }
  0xac   :  { %v3042_v52 = vsel %vm1564_vm0, %v1120_v34, -inf  ;;  %v6048_v53 = vsel %vm3872_vm3, %v3654_v37, %v3961_v38  ;;  %v3018_v54 = vmax.f32 %v3016_v22, %v3017_v40  ;;  %v6051_v55 = vsel %vm3357_vm1, %v2999_v39, -inf }
  0xad   :  { %9276 = vst [vmem:[#allocation8_spill] sm:$0xff] %v6048_v53  ;;  %9277 = vst [vmem:[#allocation9_spill] sm:$0xff] %v6051_v55  ;;  %v3049_v56 = vsel %vm1564_vm0, %v1128_v27, -inf  ;;  %v6055_v57 = vsel %vm3357_vm1, %v3006_v41, -inf  ;;  %v1137_v58 = vcombine.high %v1135_v42, %v1135_v42  ;;  %v3056_v59 = vsel %vm1564_vm0, %v1136_v43, -inf }
  0xae   :  { %9278 = vst [vmem:[#allocation10_spill] sm:$0xff] %v6055_v57  ;;  %v1152_v60 = vrot.slane %v1138_v44, %v5986_v10  ;;  %v3030_v61 = vmax.f32 %v3028_v36, %v3029_v47  ;;  %v3036_v62 = vrot.slane %v3035_v51, 4  ;;  %v3043_v63 = vrot.slane %v3042_v52, 4 }
  0xaf   :  { %v1153_v0 = vcombine.high %v1145_v48, %v1145_v48  ;;  %v3013_v2 = vmax.f32 %v3011_v33, %v3012_v49  ;;  %v3024_v5 = vrot.slane %v3023_v50, 2  ;;  %v3050_v6 = vrot.slane %v3049_v56, 4 }
  0xb0   :  { %v3019_v7 = vrot.slane %v3018_v54, 1  ;;  %v3057_v9 = vrot.slane %v3056_v59, 4  ;;  %v3077_v11 = vsel %vm1564_vm0, %v1145_v48, -inf  ;;  %v3063_v12 = vsel %vm1564_vm0, %v1135_v42, -inf }
  0xb1   :  { %v3070_v13 = vsel %vm1564_vm0, %v1137_v58, -inf  ;;  %v1154_v15 = vcombine.high %v1152_v60, %v1152_v60  ;;  %v1162_v16 = vrot.slane %v147_v1, %v5986_v10  ;;  %v3031_v17 = vrot.slane %v3030_v61, 2 }
  0xb2   :  { %v3037_v18 = vmax.f32 %v3035_v51, %v3036_v62  ;;  %v3044_v19 = vmax.f32 %v3042_v52, %v3043_v63  ;;  %v3084_v20 = vsel %vm1564_vm0, %v1153_v0, -inf  ;;  %v3025_v21 = vmax.f32 %v3023_v50, %v3024_v5 }
  0xb3   :  { %v3051_v22 = vmax.f32 %v3049_v56, %v3050_v6  ;;  %v3078_v23 = vrot.slane %v3077_v11, 4  ;;  %v3091_v24 = vsel %vm1564_vm0, %v1152_v60, -inf  ;;  %v6069_v25 = vmax.f32 %v3018_v54, %v3019_v7 }
  0xb4   :  { %v3058_v26 = vmax.f32 %v3056_v59, %v3057_v9  ;;  %v3064_v27 = vrot.slane %v3063_v12, 4  ;;  %v3071_v30 = vrot.slane %v3070_v13, 4  ;;  %v3085_v32 = vrot.slane %v3084_v20, 4 }
  0xb5   :  { %9279 = vst [vmem:[#allocation11_spill] sm:$0xff] %v6069_v25  ;;  %v3098_v33 = vsel %vm1564_vm0, %v1154_v15, -inf  ;;  %v1155_v34 = vcombine.high %v147_v1, %v147_v1  ;;  %v1170_v35 = vcombine.high %v1162_v16, %v1162_v16  ;;  %v3032_v36 = vmax.f32 %v3030_v61, %v3031_v17 }
  0xb6   :  { %v3038_v37 = vrot.slane %v3037_v18, 2  ;;  %v3045_v38 = vrot.slane %v3044_v19, 2  ;;  %v3092_v39 = vrot.slane %v3091_v24, 4  ;;  %v6073_v40 = vsel %vm3357_vm1, %v3013_v2, -inf }
  0xb7   :  { %9280 = vst [vmem:[#allocation12_spill] sm:$0xff] %v6073_v40  ;;  %v3026_v41 = vrot.slane %v3025_v21, 1  ;;  %v3052_v42 = vrot.slane %v3051_v22, 2  ;;  %v3079_v43 = vmax.f32 %v3077_v11, %v3078_v23  ;;  %v3059_v44 = vrot.slane %v3058_v26, 2  ;;  %v148_v23 = vpop.trf.xlu0 }
  0xb8   :  { %v3065_v47 = vmax.f32 %v3063_v12, %v3064_v27  ;;  %v3099_v48 = vrot.slane %v3098_v33, 4  ;;  %v3105_v49 = vsel %vm1564_vm0, %v1162_v16, -inf  ;;  %v3072_v50 = vmax.f32 %v3070_v13, %v3071_v30 }
  0xb9   :  { %v3086_v51 = vmax.f32 %v3084_v20, %v3085_v32  ;;  %v1169_v52 = vrot.slane %v1155_v34, %v5986_v10  ;;  %v3112_v54 = vsel %vm1564_vm0, %v1170_v35, -inf  ;;  %v3033_v56 = vrot.slane %v3032_v36, 1 }
  0xba   :  { %v3039_v58 = vmax.f32 %v3037_v18, %v3038_v37  ;;  %v3046_v59 = vmax.f32 %v3044_v19, %v3045_v38  ;;  %v3093_v60 = vmax.f32 %v3091_v24, %v3092_v39  ;;  %v3027_v62 = vmax.f32 %v3025_v21, %v3026_v41 }
  0xbb   :  { %v3080_v63 = vrot.slane %v3079_v43, 2  ;;  %v3106_v0 = vrot.slane %v3105_v49, 4  ;;  %v3053_v1 = vmax.f32 %v3051_v22, %v3052_v42  ;;  %v3066_v2 = vrot.slane %v3065_v47, 2 }
  0xbc   :  { %v3100_v5 = vmax.f32 %v3098_v33, %v3099_v48  ;;  %v3113_v6 = vrot.slane %v3112_v54, 4  ;;  %v3060_v7 = vmax.f32 %v3058_v26, %v3059_v44  ;;  %v3073_v9 = vrot.slane %v3072_v50, 2 }
  0xbd   :  { %v3087_v11 = vrot.slane %v3086_v51, 2  ;;  %v3119_v12 = vsel %vm1564_vm0, %v1169_v52, -inf  ;;  %v3034_v13 = vmax.f32 %v3032_v36, %v3033_v56  ;;  %v3040_v15 = vrot.slane %v3039_v58, 1 }
  0xbe   :  { %v3047_v16 = vrot.slane %v3046_v59, 1  ;;  %v3094_v17 = vrot.slane %v3093_v60, 2  ;;  %v6082_v18 = vsel %vm3357_vm1, %v3027_v62, -inf  ;;  %v3081_v19 = vmax.f32 %v3079_v43, %v3080_v63 }
  0xbf   :  { %v1171_v20 = vcombine.high %v1169_v52, %v1169_v52  ;;  %v3107_v21 = vmax.f32 %v3105_v49, %v3106_v0  ;;  %v3067_v22 = vmax.f32 %v3065_v47, %v3066_v2  ;;  %v3101_v24 = vrot.slane %v3100_v5, 2 }
  0xc0   :  { %v3114_v27 = vmax.f32 %v3112_v54, %v3113_v6  ;;  %v3120_v30 = vrot.slane %v3119_v12, 4  ;;  %v3054_v26 = vrot.slane %v3053_v1, 1  ;;  %v3061_v32 = vrot.slane %v3060_v7, 1 }
  0xc1   :  { %v3074_v33 = vmax.f32 %v3072_v50, %v3073_v9  ;;  %v3088_v34 = vmax.f32 %v3086_v51, %v3087_v11  ;;  %v3041_v35 = vmax.f32 %v3039_v58, %v3040_v15  ;;  %v3048_v36 = vmax.f32 %v3046_v59, %v3047_v16  ;;  %v149_v51 = vpop.trf.xlu0 }
  0xc2   :  { %v6085_v37 = vsel %vm3357_vm1, %v3034_v13, -inf  ;;  %v3095_v38 = vmax.f32 %v3093_v60, %v3094_v17  ;;  %v3082_v39 = vrot.slane %v3081_v19, 1  ;;  %v3108_v41 = vrot.slane %v3107_v21, 2 }
  0xc3   :  { %v3126_v42 = vsel %vm1564_vm0, %v1171_v20, -inf  ;;  %v1172_v43 = vcombine.high %v148_v23, %v148_v23  ;;  %v3068_v44 = vrot.slane %v3067_v22, 1  ;;  %v3102_v47 = vmax.f32 %v3100_v5, %v3101_v24 }
  0xc4   :  { %v3115_v48 = vrot.slane %v3114_v27, 2  ;;  %v3121_v49 = vmax.f32 %v3119_v12, %v3120_v30  ;;  %v3055_v52 = vmax.f32 %v3053_v1, %v3054_v26  ;;  %v3062_v54 = vmax.f32 %v3060_v7, %v3061_v32 }
  0xc5   :  { %v3075_v56 = vrot.slane %v3074_v33, 1  ;;  %v3089_v50 = vrot.slane %v3088_v34, 1  ;;  %v6089_v58 = vsel %vm3357_vm1, %v3041_v35, -inf  ;;  %v3096_v59 = vrot.slane %v3095_v38, 1 }
  0xc6   :  { %v3127_v62 = vrot.slane %v3126_v42, 4  ;;  %v1179_v60 = vrot.slane %v148_v23, %v5986_v10  ;;  %v6093_v63 = vsel %vm3357_vm1, %v3048_v36, -inf  ;;  %v3083_v0 = vmax.f32 %v3081_v19, %v3082_v39 }
  0xc7   :  { %9281 = vst [vmem:[#allocation13_spill] sm:$0xff] %v6093_v63  ;;  %v3109_v2 = vmax.f32 %v3107_v21, %v3108_v41  ;;  %v1186_v5 = vrot.slane %v1172_v43, %v5986_v10  ;;  %v3069_v6 = vmax.f32 %v3067_v22, %v3068_v44  ;;  %v3103_v1 = vrot.slane %v3102_v47, 1 }
  0xc8   :  { %v3116_v7 = vmax.f32 %v3114_v27, %v3115_v48  ;;  %v3122_v9 = vrot.slane %v3121_v49, 2  ;;  %v6096_v11 = vmax.f32 %v3074_v33, %v3075_v56  ;;  %v6099_v12 = vsel %vm3357_vm1, %v3055_v52, -inf  ;;  %v150_v27 = vpop.trf.xlu0 }
  0xc9   :  { %9283 = vst [vmem:[#allocation15_spill] sm:$0xff] %v6099_v12  ;;  %v6102_v13 = vsel %vm3357_vm1, %v3062_v54, -inf  ;;  %v3090_v15 = vmax.f32 %v3088_v34, %v3089_v50  ;;  %v3097_v16 = vmax.f32 %v3095_v38, %v3096_v59  ;;  %v3128_v17 = vmax.f32 %v3126_v42, %v3127_v62 }
  0xca   :  { %9282 = vst [vmem:[#allocation14_spill] sm:$0xff] %v6096_v11  ;;  %9284 = vst [vmem:[#allocation16_spill] sm:$0xff] %v6102_v13  ;;  %v1187_v20 = vcombine.high %v1179_v60, %v1179_v60  ;;  %v3133_v19 = vsel %vm1564_vm0, %v1179_v60, -inf  ;;  %v3671_v21 = vsel %vm3357_vm1, %v3083_v0, -inf  ;;  %v3110_v23 = vrot.slane %v3109_v2, 1 }
  0xcb   :  { %v1188_v22 = vcombine.high %v1186_v5, %v1186_v5  ;;  %v1196_v24 = vrot.slane %v149_v51, %v5986_v10  ;;  %v6108_v30 = vsel %vm3357_vm1, %v3069_v6, -inf  ;;  %v3104_v26 = vmax.f32 %v3102_v47, %v3103_v1 }
  0xcc   :  { %9285 = vst [vmem:[#allocation17_spill] sm:$0xff] %v6108_v30  ;;  %v3117_v32 = vrot.slane %v3116_v7, 1  ;;  %v3123_v33 = vmax.f32 %v3121_v49, %v3122_v9  ;;  %v3674_v34 = vsel %vm3357_vm1, %v3090_v15, -inf  ;;  %v3134_v35 = vrot.slane %v3133_v19, 4 }
  0xcd   :  { %v3147_v36 = vsel %vm1564_vm0, %v1186_v5, -inf  ;;  %v1189_v38 = vcombine.high %v149_v51, %v149_v51  ;;  %v3672_v39 = vmax.f32 %v6082_v18, %v3671_v21  ;;  %v3129_v41 = vrot.slane %v3128_v17, 2 }
  0xce   :  { %v3140_v42 = vsel %vm1564_vm0, %v1187_v20, -inf  ;;  %v1206_v43 = vcombine.high %v150_v27, %v150_v27  ;;  %v3677_v44 = vsel %vm3357_vm1, %v3097_v16, -inf  ;;  %v3111_v48 = vmax.f32 %v3109_v2, %v3110_v23 }
  0xcf   :  { %v3154_v52 = vsel %vm1564_vm0, %v1188_v22, -inf  ;;  %v1204_v47 = vcombine.high %v1196_v24, %v1196_v24  ;;  %v3675_v49 = vmax.f32 %v6085_v37, %v3674_v34  ;;  %v6118_v54 = vsel %vm3357_vm1, %v3104_v26, -inf }
  0xd0   :  { %9286 = vst [vmem:[#allocation18_spill] sm:$0xff] %v6118_v54  ;;  %v3148_v56 = vrot.slane %v3147_v36, 4  ;;  %v1213_v50 = vrot.slane %v150_v27, %v5986_v10  ;;  %v3135_v51 = vmax.f32 %v3133_v19, %v3134_v35  ;;  %v3141_v18 = vrot.slane %v3140_v42, 4 }
  0xd1   :  { %v1203_v59 = vrot.slane %v1189_v38, %v5986_v10  ;;  %v3161_v62 = vsel %vm1564_vm0, %v1196_v24, -inf  ;;  %v3678_v60 = vmax.f32 %v6089_v58, %v3677_v44  ;;  %v3118_v0 = vmax.f32 %v3116_v7, %v3117_v32 }
  0xd2   :  { %v3155_v2 = vrot.slane %v3154_v52, 4  ;;  %v1220_v5 = vrot.slane %v1206_v43, %v5986_v10  ;;  %v3124_v6 = vrot.slane %v3123_v33, 1  ;;  %v6128_v1 = vsel %vm3357_vm1, %v3111_v48, -inf }
  0xd3   :  { %9287 = vst [vmem:[#allocation19_spill] sm:$0xff] %v6128_v1  ;;  %v3168_v9 = vsel %vm1564_vm0, %v1204_v47, -inf  ;;  %v3968_v15 = vsel %vm9260_vm2, %v3675_v49, %v3672_v39  ;;  %v3149_v16 = vmax.f32 %v3147_v36, %v3148_v56  ;;  %v3162_v20 = vrot.slane %v3161_v62, 4 }
  0xd4   :  { %v1221_v19 = vcombine.high %v1213_v50, %v1213_v50  ;;  %v3136_v21 = vrot.slane %v3135_v51, 2  ;;  %v3142_v58 = vmax.f32 %v3140_v42, %v3141_v18  ;;  %v1205_v7 = vcombine.high %v1203_v59, %v1203_v59  ;;  %v151_v18 = vpop.trf.xlu0 }
  0xd5   :  { %v3175_v23 = vsel %vm1564_vm0, %v1203_v59, -inf  ;;  %v3130_v22 = vmax.f32 %v3128_v17, %v3129_v41  ;;  %v3156_v24 = vmax.f32 %v3154_v52, %v3155_v2  ;;  %v3169_v27 = vrot.slane %v3168_v9, 4 }
  0xd6   :  { %v1222_v26 = vcombine.high %v1220_v5, %v1220_v5  ;;  %v6134_v32 = vsel %vm3872_vm3, %v3678_v60, %v3968_v15  ;;  %v6139_v35 = vsel %vm3357_vm1, %v3118_v0, -inf  ;;  %v3189_v36 = vsel %vm1564_vm0, %v1213_v50, -inf }
  0xd7   :  { %9288 = vst [vmem:[#allocation20_spill] sm:$0xff] %v6134_v32  ;;  %9289 = vst [vmem:[#allocation21_spill] sm:$0xff] %v6139_v35  ;;  %v3150_v38 = vrot.slane %v3149_v16, 2  ;;  %v3163_v39 = vmax.f32 %v3161_v62, %v3162_v20  ;;  %v3176_v42 = vrot.slane %v3175_v23, 4  ;;  %v3196_v43 = vsel %vm1564_vm0, %v1221_v19, -inf }
  0xd8   :  { %v3137_v17 = vmax.f32 %v3135_v51, %v3136_v21  ;;  %v3143_v41 = vrot.slane %v3142_v58, 2  ;;  %v3182_v44 = vsel %vm1564_vm0, %v1205_v7, -inf  ;;  %v3203_v48 = vsel %vm1564_vm0, %v1220_v5, -inf }
  0xd9   :  { %v3157_v52 = vrot.slane %v3156_v24, 2  ;;  %v3170_v47 = vmax.f32 %v3168_v9, %v3169_v27  ;;  %v3190_v49 = vrot.slane %v3189_v36, 4  ;;  %v3210_v56 = vsel %vm1564_vm0, %v1222_v26, -inf }
  0xda   :  { %v3125_v59 = vmax.f32 %v3123_v33, %v3124_v6  ;;  %v3131_v60 = vrot.slane %v3130_v22, 1  ;;  %v3197_v62 = vrot.slane %v3196_v43, 4  ;;  %v3151_v0 = vmax.f32 %v3149_v16, %v3150_v38 }
  0xdb   :  { %v3164_v2 = vrot.slane %v3163_v39, 2  ;;  %v3177_v51 = vmax.f32 %v3175_v23, %v3176_v42  ;;  %v3204_v15 = vrot.slane %v3203_v48, 4  ;;  %v3144_v20 = vmax.f32 %v3142_v58, %v3143_v41 }
  0xdc   :  { %v3183_v19 = vrot.slane %v3182_v44, 4  ;;  %v3211_v21 = vrot.slane %v3210_v56, 4  ;;  %v1230_v5 = vrot.slane %v151_v18, %v5986_v10  ;;  %v3138_v9 = vrot.slane %v3137_v17, 1 }
  0xdd   :  { %v3158_v7 = vmax.f32 %v3156_v24, %v3157_v52  ;;  %v3171_v27 = vrot.slane %v3170_v47, 2  ;;  %v3191_v26 = vmax.f32 %v3189_v36, %v3190_v49  ;;  %v6149_v61 = vmax.f32 %v3130_v22, %v3131_v60 }
  0xde   :  { %v6152_v33 = vsel %vm3357_vm1, %v3125_v59, -inf  ;;  %v3198_v6 = vmax.f32 %v3196_v43, %v3197_v62  ;;  %v1223_v8 = vcombine.high %v151_v18, %v151_v18  ;;  %v3152_v16 = vrot.slane %v3151_v0, 1  ;;  %v152_v62 = vpop.trf.xlu0 }
  0xdf   :  { %9290 = vst [vmem:[#allocation22_spill] sm:$0xff] %v6149_v61  ;;  %9291 = vst [vmem:[#allocation23_spill] sm:$0xff] %v6152_v33  ;;  %v3165_v38 = vmax.f32 %v3163_v39, %v3164_v2  ;;  %v3178_v23 = vrot.slane %v3177_v51, 2  ;;  %v3205_v42 = vmax.f32 %v3203_v48, %v3204_v15  ;;  %v3145_v58 = vrot.slane %v3144_v20, 1 }
  0xe0   :  { %v3184_v41 = vmax.f32 %v3182_v44, %v3183_v19  ;;  %v3212_v4 = vmax.f32 %v3210_v56, %v3211_v21  ;;  %v3217_v46 = vsel %vm1564_vm0, %v1230_v5, -inf  ;;  %v3139_v50 = vmax.f32 %v3137_v17, %v3138_v9 }
  0xe1   :  { %v3159_v24 = vrot.slane %v3158_v7, 1  ;;  %v3172_v52 = vmax.f32 %v3170_v47, %v3171_v27  ;;  %v3192_v36 = vrot.slane %v3191_v26, 2  ;;  %v3199_v49 = vrot.slane %v3198_v6, 2 }
  0xe2   :  { %v1237_v43 = vrot.slane %v1223_v8, %v5986_v10  ;;  %v1238_v18 = vcombine.high %v1230_v5, %v1230_v5  ;;  %v3153_v59 = vmax.f32 %v3151_v0, %v3152_v16  ;;  %v3166_v39 = vrot.slane %v3165_v38, 1 }
  0xe3   :  { %v3206_v60 = vrot.slane %v3205_v42, 2  ;;  %v3218_v48 = vrot.slane %v3217_v46, 4  ;;  %v3146_v44 = vmax.f32 %v3144_v20, %v3145_v58  ;;  %v3179_v56 = vmax.f32 %v3177_v51, %v3178_v23 }
  0xe4   :  { %v3185_v2 = vrot.slane %v3184_v41, 2  ;;  %v3213_v15 = vrot.slane %v3212_v4, 2  ;;  %v3160_v17 = vmax.f32 %v3158_v7, %v3159_v24  ;;  %v6159_v47 = vsel %vm3357_vm1, %v3139_v50, -inf }
  0xe5   :  { %v3173_v19 = vrot.slane %v3172_v52, 1  ;;  %v3193_v21 = vmax.f32 %v3191_v26, %v3192_v36  ;;  %v3200_v9 = vmax.f32 %v3198_v6, %v3199_v49  ;;  %v1239_v27 = vcombine.high %v1237_v43, %v1237_v43 }
  0xe6   :  { %v3224_v8 = vsel %vm1564_vm0, %v1238_v18, -inf  ;;  %v1240_v5 = vcombine.high %v152_v62, %v152_v62  ;;  %v3207_v0 = vmax.f32 %v3205_v42, %v3206_v60  ;;  %v3219_v16 = vmax.f32 %v3217_v46, %v3218_v48 }
  0xe7   :  { %v3231_v22 = vsel %vm1564_vm0, %v1237_v43, -inf  ;;  %v1247_v20 = vrot.slane %v152_v62, %v5986_v10  ;;  %v6165_v51 = vsel %vm3357_vm1, %v3153_v59, -inf  ;;  %v3180_v7 = vrot.slane %v3179_v56, 1 }
  0xe8   :  { %v3186_v23 = vmax.f32 %v3184_v41, %v3185_v2  ;;  %v3214_v50 = vmax.f32 %v3212_v4, %v3213_v15  ;;  %v3167_v58 = vmax.f32 %v3165_v38, %v3166_v39  ;;  %v3174_v24 = vmax.f32 %v3172_v52, %v3173_v19  ;;  %v153_v2 = vpop.trf.xlu0 }
  0xe9   :  { %v3194_v26 = vrot.slane %v3193_v21, 1  ;;  %v3225_v6 = vrot.slane %v3224_v8, 4  ;;  %v6168_v36 = vsel %vm3357_vm1, %v3146_v44, -inf  ;;  %v3201_v49 = vrot.slane %v3200_v9, 1 }
  0xea   :  { %v3232_v42 = vrot.slane %v3231_v22, 4  ;;  %v3238_v46 = vsel %vm1564_vm0, %v1239_v27, -inf  ;;  %v3208_v43 = vrot.slane %v3207_v0, 1  ;;  %v3220_v18 = vrot.slane %v3219_v16, 2 }
  0xeb   :  { %v1254_v60 = vrot.slane %v1240_v5, %v5986_v10  ;;  %v1255_v59 = vcombine.high %v1247_v20, %v1247_v20  ;;  %v6173_v48 = vsel %vm3357_vm1, %v3160_v17, -inf  ;;  %v3181_v4 = vmax.f32 %v3179_v56, %v3180_v7 }
  0xec   :  { %v3187_v38 = vrot.slane %v3186_v23, 1  ;;  %v3215_v41 = vrot.slane %v3214_v50, 1  ;;  %v6176_v52 = vsel %vm3357_vm1, %v3167_v58, -inf  ;;  %v6179_v39 = vsel %vm3357_vm1, %v3174_v24, -inf }
  0xed   :  { %v3195_v62 = vmax.f32 %v3193_v21, %v3194_v26  ;;  %v3226_v44 = vmax.f32 %v3224_v8, %v3225_v6  ;;  %v3202_v15 = vmax.f32 %v3200_v9, %v3201_v49  ;;  %v3233_v19 = vmax.f32 %v3231_v22, %v3232_v42 }
  0xee   :  { %v3239_v27 = vrot.slane %v3238_v46, 4  ;;  %v3245_v5 = vsel %vm1564_vm0, %v1247_v20, -inf  ;;  %v3209_v34 = vmax.f32 %v3207_v0, %v3208_v43  ;;  %v3221_v17 = vmax.f32 %v3219_v16, %v3220_v18 }
  0xef   :  { %v1256_v37 = vcombine.high %v1254_v60, %v1254_v60  ;;  %v3252_v56 = vsel %vm1564_vm0, %v1255_v59, -inf  ;;  %v6183_v7 = vmax.f32 %v3186_v23, %v3187_v38  ;;  %v6186_v58 = vsel %vm3357_vm1, %v3181_v4, -inf  ;;  %v154_v4 = vpop.trf.xlu0 }
  0xf0   :  { %v3216_v24 = vmax.f32 %v3214_v50, %v3215_v41  ;;  %v1264_v21 = vrot.slane %v153_v2, %v5986_v10  ;;  %v3227_v8 = vrot.slane %v3226_v44, 2  ;;  %v3246_v26 = vrot.slane %v3245_v5, 4 }
  0xf1   :  { %v3259_v22 = vsel %vm1564_vm0, %v1254_v60, -inf  ;;  %v1257_v9 = vcombine.high %v153_v2, %v153_v2  ;;  %v3695_v20 = vsel %vm3357_vm1, %v3195_v62, -inf  ;;  %v3698_v0 = vsel %vm3357_vm1, %v3202_v15, -inf }
  0xf2   :  { %v3234_v16 = vrot.slane %v3233_v19, 2  ;;  %v3253_v6 = vrot.slane %v3252_v56, 4  ;;  %v3701_v23 = vsel %vm3357_vm1, %v3209_v34, -inf  ;;  %v3222_v49 = vrot.slane %v3221_v17, 1 }
  0xf3   :  { %v3240_v42 = vmax.f32 %v3238_v46, %v3239_v27  ;;  %v3266_v43 = vsel %vm1564_vm0, %v1256_v37, -inf  ;;  %v6195_v50 = vsel %vm3357_vm1, %v3216_v24, -inf  ;;  %v3260_v18 = vrot.slane %v3259_v22, 4 }
  0xf4   :  { %v1272_v59 = vcombine.high %v1264_v21, %v1264_v21  ;;  %v3273_v60 = vsel %vm1564_vm0, %v1264_v21, -inf  ;;  %v3696_v38 = vmax.f32 %v6159_v47, %v3695_v20  ;;  %v3699_v41 = vmax.f32 %v6168_v36, %v3698_v0 }
  0xf5   :  { %v3247_v62 = vmax.f32 %v3245_v5, %v3246_v26  ;;  %v1271_v2 = vrot.slane %v1257_v9, %v5986_v10  ;;  %v3702_v34 = vmax.f32 %v6165_v51, %v3701_v23  ;;  %v3228_v46 = vmax.f32 %v3226_v44, %v3227_v8 }
  0xf6   :  { %v3254_v15 = vmax.f32 %v3252_v56, %v3253_v6  ;;  %v3267_v37 = vrot.slane %v3266_v43, 4  ;;  %v3274_v24 = vrot.slane %v3273_v60, 4  ;;  %v1274_v40 = vcombine.high %v154_v4, %v154_v4 }
  0xf7   :  { %v1281_v21 = vrot.slane %v154_v4, %v5986_v10  ;;  %v3223_v29 = vmax.f32 %v3221_v17, %v3222_v49  ;;  %v3235_v57 = vmax.f32 %v3233_v19, %v3234_v16  ;;  %v3261_v47 = vmax.f32 %v3259_v22, %v3260_v18 }
  0xf8   :  { %v3280_v36 = vsel %vm1564_vm0, %v1272_v59, -inf  ;;  %v3975_v5 = vsel %vm9260_vm2, %v3699_v41, %v3696_v38  ;;  %v3241_v26 = vrot.slane %v3240_v42, 2  ;;  %v3248_v9 = vrot.slane %v3247_v62, 2 }
  0xf9   :  { %v3287_v51 = vsel %vm1564_vm0, %v1271_v2, -inf  ;;  %v3229_v44 = vrot.slane %v3228_v46, 1  ;;  %v3255_v56 = vrot.slane %v3254_v15, 2  ;;  %v3268_v8 = vmax.f32 %v3266_v43, %v3267_v37 }
  0xfa   :  { %v1273_v20 = vcombine.high %v1271_v2, %v1271_v2  ;;  %v3275_v0 = vmax.f32 %v3273_v60, %v3274_v24  ;;  %v3281_v6 = vrot.slane %v3280_v36, 4  ;;  %v1288_v23 = vrot.slane %v1274_v40, %v5986_v10 }
  0xfb   :  { %v1289_v4 = vcombine.high %v1281_v21, %v1281_v21  ;;  %v6210_v19 = vsel %vm3872_vm3, %v3702_v34, %v3975_v5  ;;  %v3236_v17 = vrot.slane %v3235_v57, 1  ;;  %v3262_v22 = vrot.slane %v3261_v47, 2 }
  0xfc   :  { %v3288_v16 = vrot.slane %v3287_v51, 4  ;;  %v3242_v49 = vmax.f32 %v3240_v42, %v3241_v26  ;;  %v6213_v18 = vsel %vm3357_vm1, %v3223_v29, -inf  ;;  %v3249_v59 = vmax.f32 %v3247_v62, %v3248_v9 }
  0xfd   :  { %v3301_v38 = vsel %vm1564_vm0, %v1281_v21, -inf  ;;  %v3230_v43 = vmax.f32 %v3228_v46, %v3229_v44  ;;  %v3256_v41 = vmax.f32 %v3254_v15, %v3255_v56  ;;  %v3269_v60 = vrot.slane %v3268_v8, 2 }
  0xfe   :  { %v3294_v2 = vsel %vm1564_vm0, %v1273_v20, -inf  ;;  %v3276_v40 = vrot.slane %v3275_v0, 2  ;;  %v3282_v37 = vmax.f32 %v3280_v36, %v3281_v6  ;;  %v1290_v24 = vcombine.high %v1288_v23, %v1288_v23 }
  0xff   :  { %v3308_v34 = vsel %vm1564_vm0, %v1289_v4, -inf  ;;  %v3263_v5 = vmax.f32 %v3261_v47, %v3262_v22  ;;  %v3289_v27 = vmax.f32 %v3287_v51, %v3288_v16  ;;  %v3302_v45 = vrot.slane %v3301_v38, 4 }
 0x100   :  { %v3315_v42 = vsel %vm1564_vm0, %v1288_v23, -inf  ;;  %v3237_v29 = vmax.f32 %v3235_v57, %v3236_v17  ;;  %v3243_v26 = vrot.slane %v3242_v49, 1  ;;  %v3250_v62 = vrot.slane %v3249_v59, 1 }
 0x101   :  { %v3295_v9 = vrot.slane %v3294_v2, 4  ;;  %v6220_v46 = vsel %vm3357_vm1, %v3230_v43, -inf  ;;  %v3257_v15 = vrot.slane %v3256_v41, 1  ;;  %v3270_v21 = vmax.f32 %v3268_v8, %v3269_v60  ;;  %v155_v8 = vpop.trf.xlu0 }
 0x102   :  { %v3309_v44 = vrot.slane %v3308_v34, 4  ;;  %v3277_v56 = vmax.f32 %v3275_v0, %v3276_v40  ;;  %v3283_v36 = vrot.slane %v3282_v37, 2  ;;  %v3316_v20 = vrot.slane %v3315_v42, 4 }
 0x103   :  { %v3322_v6 = vsel %vm1564_vm0, %v1290_v24, -inf  ;;  %v3264_v51 = vrot.slane %v3263_v5, 1  ;;  %v3290_v23 = vrot.slane %v3289_v27, 2  ;;  %v3303_v57 = vmax.f32 %v3301_v38, %v3302_v45 }
 0x104   :  { %v6225_v4 = vmax.f32 %v3242_v49, %v3243_v26  ;;  %v3251_v22 = vmax.f32 %v3249_v59, %v3250_v62  ;;  %v3296_v16 = vmax.f32 %v3294_v2, %v3295_v9  ;;  %v6230_v0 = vsel %vm3357_vm1, %v3237_v29, -inf  ;;  %v73_v62 = vpop.trf.xlu1 }
 0x105   :  { %v3271_v43 = vrot.slane %v3270_v21, 1  ;;  %v3310_v60 = vmax.f32 %v3308_v34, %v3309_v44  ;;  %v3323_v40 = vrot.slane %v3322_v6, 4  ;;  %v3258_v24 = vmax.f32 %v3256_v41, %v3257_v15 }
 0x106   :  { %v3278_v55 = vrot.slane %v3277_v56, 1  ;;  %v3284_v47 = vmax.f32 %v3282_v37, %v3283_v36  ;;  %v3317_v28 = vmax.f32 %v3315_v42, %v3316_v20  ;;  %v3265_v14 = vmax.f32 %v3263_v5, %v3264_v51 }
 0x107   :  { %v3291_v45 = vmax.f32 %v3289_v27, %v3290_v23  ;;  %v3304_v49 = vrot.slane %v3303_v57, 2  ;;  %v1298_v38 = vrot.slane %v155_v8, %v5986_v10  ;;  %v6236_v2 = vsel %vm3357_vm1, %v3251_v22, -inf  ;;  %v108_v23 = vpop.trf.xlu0 }
 0x108   :  { %v3297_v29 = vrot.slane %v3296_v16, 2  ;;  %v1291_v26 = vcombine.high %v155_v8, %v155_v8  ;;  %v3272_v34 = vmax.f32 %v3270_v21, %v3271_v43  ;;  %v3311_v9 = vrot.slane %v3310_v60, 2  ;;  %v74_v12 = vpop.trf.xlu1 }
 0x109   :  { %v3324_v41 = vmax.f32 %v3322_v6, %v3323_v40  ;;  %v492_v15 = vcombine.high %v73_v62, %v73_v62  ;;  %v6239_v37 = vsel %vm3357_vm1, %v3258_v24, -inf  ;;  %v3279_v27 = vmax.f32 %v3277_v56, %v3278_v55 }
 0x10a   :  { %v3285_v5 = vrot.slane %v3284_v47, 1  ;;  %v3318_v42 = vrot.slane %v3317_v28, 2  ;;  %v6242_v44 = vsel %vm3357_vm1, %v3265_v14, -inf  ;;  %v3292_v36 = vrot.slane %v3291_v45, 1 }
 0x10b   :  { %v3305_v20 = vmax.f32 %v3303_v57, %v3304_v49  ;;  %v1306_v51 = vcombine.high %v1298_v38, %v1298_v38  ;;  %v6244_v22 = vmax.f32 %v3296_v16, %v3297_v29  ;;  %v1305_v21 = vrot.slane %v1291_v26, %v5986_v10 }
 0x10c   :  { %v3329_v6 = vsel %vm1564_vm0, %v1298_v38, -inf  ;;  %v499_v8 = vrot.slane %v73_v62, %v5986_v10  ;;  %v6250_v43 = vsel %vm3357_vm1, %v3272_v34, -inf  ;;  %v3312_v55 = vmax.f32 %v3310_v60, %v3311_v9 }
 0x10d   :  { %v3325_v56 = vrot.slane %v3324_v41, 2  ;;  %v506_v14 = vrot.slane %v492_v15, %v5986_v10  ;;  %v3286_v40 = vmax.f32 %v3284_v47, %v3285_v5  ;;  %v6254_v57 = vsel %vm3357_vm1, %v3279_v27, -inf }
 0x10e   :  { %v3319_v24 = vmax.f32 %v3317_v28, %v3318_v42  ;;  %v771_v16 = vrot.slane %v108_v23, %v5986_v10  ;;  %v3306_v49 = vrot.slane %v3305_v20, 1  ;;  %v3330_v29 = vrot.slane %v3329_v6, 4 }
 0x10f   :  { %v3336_v38 = vsel %vm1564_vm0, %v1306_v51, -inf  ;;  %v764_v26 = vcombine.high %v108_v23, %v108_v23  ;;  %v6258_v62 = vmax.f32 %v3291_v45, %v3292_v36  ;;  %v1307_v60 = vcombine.high %v1305_v21, %v1305_v21 }
 0x110   :  { %v507_v9 = vcombine.high %v499_v8, %v499_v8  ;;  %v3313_v59 = vrot.slane %v3312_v55, 1  ;;  %v3326_v15 = vmax.f32 %v3324_v41, %v3325_v56  ;;  %v3343_v47 = vsel %vm1564_vm0, %v1305_v21, -inf }
 0x111   :  { %v508_v27 = vcombine.high %v506_v14, %v506_v14  ;;  %v6263_v28 = vsel %vm3357_vm1, %v3286_v40, -inf  ;;  %v3320_v5 = vrot.slane %v3319_v24, 1  ;;  %v3337_v42 = vrot.slane %v3336_v38, 4 }
 0x112   :  { %v779_v17 = vcombine.high %v771_v16, %v771_v16  ;;  %v3307_v31 = vmax.f32 %v3305_v20, %v3306_v49  ;;  %v3331_v51 = vmax.f32 %v3329_v6, %v3330_v29  ;;  %v2013_v45 = vsel %vm1564_vm0, %v499_v8, -inf }
 0x113   :  { %v778_v36 = vrot.slane %v764_v26, %v5986_v10  ;;  %v3344_v23 = vrot.slane %v3343_v47, 4  ;;  %v3350_v34 = vsel %vm1564_vm0, %v1307_v60, -inf  ;;  %v2020_v41 = vsel %vm1564_vm0, %v507_v9, -inf }
 0x114   :  { %v2027_v21 = vsel %vm1564_vm0, %v506_v14, -inf  ;;  %v3314_v56 = vmax.f32 %v3312_v55, %v3313_v59  ;;  %v3327_v3 = vrot.slane %v3326_v15, 1  ;;  %v2034_v40 = vsel %vm1564_vm0, %v508_v27, -inf }
 0x115   :  { %v2461_v53 = vsel %vm1564_vm0, %v771_v16, -inf  ;;  %v3321_v25 = vmax.f32 %v3319_v24, %v3320_v5  ;;  %v3338_v20 = vmax.f32 %v3336_v38, %v3337_v42  ;;  %v2014_v6 = vrot.slane %v2013_v45, 4 }
 0x116   :  { %v2468_v8 = vsel %vm1564_vm0, %v779_v17, -inf  ;;  %v3719_v49 = vsel %vm3357_vm1, %v3307_v31, -inf  ;;  %v2021_v29 = vrot.slane %v2020_v41, 4  ;;  %v2028_v26 = vrot.slane %v2027_v21, 4 }
 0x117   :  { %v780_v60 = vcombine.high %v778_v36, %v778_v36  ;;  %v3332_v33 = vrot.slane %v3331_v51, 2  ;;  %v3345_v9 = vmax.f32 %v3343_v47, %v3344_v23  ;;  %v2035_v30 = vrot.slane %v2034_v40, 4 }
 0x118   :  { %v2462_v14 = vrot.slane %v2461_v53, 4  ;;  %v3328_v59 = vmax.f32 %v3326_v15, %v3327_v3  ;;  %v3722_v55 = vsel %vm3357_vm1, %v3314_v56, -inf  ;;  %v3351_v27 = vrot.slane %v3350_v34, 4 }
 0x119   :  { %v2469_v35 = vrot.slane %v2468_v8, 4  ;;  %v3720_v24 = vmax.f32 %v6236_v2, %v3719_v49  ;;  %v3339_v16 = vrot.slane %v3338_v20, 2  ;;  %v2015_v38 = vmax.f32 %v2013_v45, %v2014_v6 }
 0x11a   :  { %v2475_v17 = vsel %vm1564_vm0, %v778_v36, -inf  ;;  %v6278_v31 = vsel %vm3357_vm1, %v3321_v25, -inf  ;;  %v2022_v5 = vmax.f32 %v2020_v41, %v2021_v29  ;;  %v2029_v42 = vmax.f32 %v2027_v21, %v2028_v26 }
 0x11b   :  { %v2482_v47 = vsel %vm1564_vm0, %v780_v60, -inf  ;;  %v3723_v23 = vmax.f32 %v6239_v37, %v3722_v55  ;;  %v3333_v3 = vmax.f32 %v3331_v51, %v3332_v33  ;;  %v2036_v15 = vmax.f32 %v2034_v40, %v2035_v30 }
 0x11c   :  { %v2463_v56 = vmax.f32 %v2461_v53, %v2462_v14  ;;  %v6283_v13 = vsel %vm3357_vm1, %v3328_v59, -inf  ;;  %v3346_v2 = vrot.slane %v3345_v9, 2  ;;  %v2470_v49 = vmax.f32 %v2468_v8, %v2469_v35 }
 0x11d   :  { %v2476_v45 = vrot.slane %v2475_v17, 4  ;;  %v3340_v6 = vmax.f32 %v3338_v20, %v3339_v16  ;;  %v3352_v36 = vmax.f32 %v3350_v34, %v3351_v27  ;;  %v2016_v1 = vrot.slane %v2015_v38, 2 }
 0x11e   :  { %v2483_v25 = vrot.slane %v2482_v47, 4  ;;  %v2023_v21 = vrot.slane %v2022_v5, 2  ;;  %v2030_v29 = vrot.slane %v2029_v42, 2  ;;  %v516_v33 = vrot.slane %v74_v12, %v5986_v10 }
 0x11f   :  { %v2037_v30 = vrot.slane %v2036_v15, 2  ;;  %v2464_v37 = vrot.slane %v2463_v56, 2  ;;  %v509_v51 = vcombine.high %v74_v12, %v74_v12  ;;  %v3334_v35 = vrot.slane %v3333_v3, 1 }
 0x120   :  { %v3347_v40 = vmax.f32 %v3345_v9, %v3346_v2  ;;  %v2471_v20 = vrot.slane %v2470_v49, 2  ;;  %v2477_v34 = vmax.f32 %v2475_v17, %v2476_v45  ;;  %v3341_v8 = vrot.slane %v3340_v6, 1 }
 0x121   :  { %v3353_v26 = vrot.slane %v3352_v36, 2  ;;  %v2017_v60 = vmax.f32 %v2015_v38, %v2016_v1  ;;  %v2484_v14 = vmax.f32 %v2482_v47, %v2483_v25  ;;  %v2024_v59 = vmax.f32 %v2022_v5, %v2023_v21 }
 0x122   :  { %v2031_v55 = vmax.f32 %v2029_v42, %v2030_v29  ;;  %v524_v27 = vcombine.high %v516_v33, %v516_v33  ;;  %v2041_v16 = vsel %vm1564_vm0, %v516_v33, -inf  ;;  %v6292_v41 = vsel %vm9260_vm2, %v3723_v23, %v3720_v24 }
 0x123   :  { %v2038_v53 = vmax.f32 %v2036_v15, %v2037_v30  ;;  %v2465_v54 = vmax.f32 %v2463_v56, %v2464_v37  ;;  %v523_v12 = vrot.slane %v509_v51, %v5986_v10  ;;  %v3335_v63 = vmax.f32 %v3333_v3, %v3334_v35 }
 0x124   :  { %v3348_v9 = vrot.slane %v3347_v40, 1  ;;  %v2472_v2 = vmax.f32 %v2470_v49, %v2471_v20  ;;  %v2478_v17 = vrot.slane %v2477_v34, 2  ;;  %v3342_v45 = vmax.f32 %v3340_v6, %v3341_v8 }
 0x125   :  { %v6295_v32 = vmax.f32 %v3352_v36, %v3353_v26  ;;  %v2485_v1 = vrot.slane %v2484_v14, 2  ;;  %v2042_v38 = vrot.slane %v2041_v16, 4  ;;  %v2018_v5 = vrot.slane %v2017_v60, 1  ;;  %v109_v36 = vpop.trf.xlu0 }
 0x126   :  { %v2025_v42 = vrot.slane %v2024_v59, 1  ;;  %v2032_v47 = vrot.slane %v2031_v55, 1  ;;  %v2048_v25 = vsel %vm1564_vm0, %v524_v27, -inf  ;;  %v2039_v24 = vrot.slane %v2038_v53, 1 }
 0x127   :  { %v2466_v23 = vrot.slane %v2465_v54, 1  ;;  %v525_v15 = vcombine.high %v523_v12, %v523_v12  ;;  %v2055_v56 = vsel %vm1564_vm0, %v523_v12, -inf  ;;  %v6299_v21 = vmax.f32 %v3347_v40, %v3348_v9 }
 0x128   :  { %v6302_v3 = vsel %vm3357_vm1, %v3335_v63, -inf  ;;  %v2473_v49 = vrot.slane %v2472_v2, 1  ;;  %v2479_v6 = vmax.f32 %v2477_v34, %v2478_v17  ;;  %v2486_v33 = vmax.f32 %v2484_v14, %v2485_v1 }
 0x129   :  { %v2043_v30 = vmax.f32 %v2041_v16, %v2042_v38  ;;  %v2049_v37 = vrot.slane %v2048_v25, 4  ;;  %v2019_v51 = vmax.f32 %v2017_v60, %v2018_v5  ;;  %v2026_v35 = vmax.f32 %v2024_v59, %v2025_v42 }
 0x12a   :  { %v2033_v20 = vmax.f32 %v2031_v55, %v2032_v47  ;;  %v2056_v8 = vrot.slane %v2055_v56, 4  ;;  %v2040_v26 = vmax.f32 %v2038_v53, %v2039_v24  ;;  %v2467_v27 = vmax.f32 %v2465_v54, %v2466_v23 }
 0x12b   :  { %v2062_v40 = vsel %vm1564_vm0, %v525_v15, -inf  ;;  %v788_v12 = vrot.slane %v109_v36, %v5986_v10  ;;  %v2474_v34 = vmax.f32 %v2472_v2, %v2473_v49  ;;  %v2480_v9 = vrot.slane %v2479_v6, 1 }
 0x12c   :  { %v781_v17 = vcombine.high %v109_v36, %v109_v36  ;;  %v6310_v14 = vsel %vm3357_vm1, %v3342_v45, -inf  ;;  %v2487_v16 = vrot.slane %v2486_v33, 1  ;;  %v2044_v60 = vrot.slane %v2043_v30, 2 }
 0x12d   :  { %v2050_v59 = vmax.f32 %v2048_v25, %v2049_v37  ;;  %v6313_v55 = vsel %vm3357_vm1, %v2019_v51, -inf  ;;  %v6316_v54 = vsel %vm3357_vm1, %v2026_v35, -inf  ;;  %v2057_v53 = vmax.f32 %v2055_v56, %v2056_v8  ;;  %v75_v8 = vpop.trf.xlu1 }
 0x12e   :  { %v2063_v1 = vrot.slane %v2062_v40, 4  ;;  %v6319_v38 = vsel %vm3357_vm1, %v2033_v20, -inf  ;;  %v6322_v2 = vsel %vm3357_vm1, %v2040_v26, -inf  ;;  %v6325_v45 = vsel %vm3357_vm1, %v2467_v27, -inf }
 0x12f   :  { %9292 = vst [vmem:[#allocation24_spill] sm:$0xff] %v6322_v2  ;;  %v796_v5 = vcombine.high %v788_v12, %v788_v12  ;;  %v6327_v42 = vmax.f32 %v2479_v6, %v2480_v9  ;;  %v6330_v47 = vsel %vm3357_vm1, %v2474_v34, -inf  ;;  %v795_v25 = vrot.slane %v781_v17, %v5986_v10 }
 0x130   :  { %v3716_v24 = vsel %vm3357_vm1, %v6225_v4, -inf  ;;  %v6335_v23 = vmax.f32 %v2486_v33, %v2487_v16  ;;  %v6337_v15 = vmax.f32 %v2043_v30, %v2044_v60  ;;  %v2051_v56 = vrot.slane %v2050_v59, 2 }
 0x131   :  { %v2489_v49 = vsel %vm1564_vm0, %v788_v12, -inf  ;;  %v2058_v36 = vrot.slane %v2057_v53, 2  ;;  %v6340_v37 = vmax.f32 %v2062_v40, %v2063_v1  ;;  %v3715_v6 = vsel %vm3357_vm1, %v6183_v7, -inf }
 0x132   :  { %v2496_v51 = vsel %vm1564_vm0, %v796_v5, -inf  ;;  %v3717_v35 = vmax.f32 %v3715_v6, %v3716_v24  ;;  %v9293_v4 = vmax.f32 %v6173_v48, %v6195_v50  ;;  %v2490_v30 = vrot.slane %v2489_v49, 4  ;;  %v110_v6 = vpop.trf.xlu0 }
 0x133   :  { %v2503_v20 = vsel %vm1564_vm0, %v795_v25, -inf  ;;  %v9294_v26 = vmax.f32 %v6176_v52, %v6213_v18  ;;  %v526_v27 = vcombine.high %v75_v8, %v75_v8  ;;  %v533_v40 = vrot.slane %v75_v8, %v5986_v10 }
 0x134   :  { %v3977_v33 = vsel %vm3874_vm4, %v9293_v4, %v6210_v19  ;;  %v9295_v12 = vmax.f32 %v6179_v39, %v6220_v46  ;;  %v797_v50 = vcombine.high %v795_v25, %v795_v25  ;;  %v2497_v19 = vrot.slane %v2496_v51, 4 }
 0x135   :  { %v3978_v7 = vsel %vm3876_vm5, %v9294_v26, %v3977_v33  ;;  %v9296_v34 = vmax.f32 %v6186_v58, %v6230_v0  ;;  %v2046_v52 = vrot.slane %v6337_v15, 1  ;;  %v2052_v18 = vmax.f32 %v2050_v59, %v2051_v56 }
 0x136   :  { %v3979_v48 = vsel %vm3878_vm6, %v9295_v12, %v3978_v7  ;;  %v2504_v17 = vrot.slane %v2503_v20, 4  ;;  %v2059_v60 = vmax.f32 %v2057_v53, %v2058_v36  ;;  %v2065_v1 = vrot.slane %v6340_v37, 2 }
 0x137   :  { %v3980_v9 = vsel %vm3880_vm7, %v9296_v34, %v3979_v48  ;;  %v2491_v39 = vmax.f32 %v2489_v49, %v2490_v30  ;;  %v540_v5 = vrot.slane %v526_v27, %v5986_v10  ;;  %v541_v25 = vcombine.high %v533_v40, %v533_v40 }
 0x138   :  { %v3981_v16 = vsel %vm9262_vm8, %v3717_v35, %v3980_v9  ;;  %v2069_v24 = vsel %vm1564_vm0, %v533_v40, -inf  ;;  %v2498_v58 = vmax.f32 %v2496_v51, %v2497_v19  ;;  %v2510_v0 = vsel %vm1564_vm0, %v797_v50, -inf }
 0x139   :  { %v4005_v46 = vrot.slane %v3981_v16, 7  ;;  %v2505_v53 = vmax.f32 %v2503_v20, %v2504_v17  ;;  %v2070_v4 = vrot.slane %v2069_v24, 4  ;;  %v805_v33 = vrot.slane %v110_v6, %v5986_v10 }
 0x13a   :  { %v542_v8 = vcombine.high %v540_v5, %v540_v5  ;;  %v2076_v51 = vsel %vm1564_vm0, %v541_v25, -inf  ;;  %v2511_v7 = vrot.slane %v2510_v0, 4  ;;  %v2083_v20 = vsel %vm1564_vm0, %v540_v5, -inf }
 0x13b   :  { %v6371_v59 = vsel %vm9263_vm9, 0.0, %v4005_v46  ;;  %v4057_v56 = vsel %vm9263_vm9, %v4005_v46, 0.0  ;;  %v798_v27 = vcombine.high %v110_v6, %v110_v6  ;;  %v6389_v12 = vsel %vm3357_vm1, %v6327_v42, -inf }
 0x13c   :  { %9297 = vst [vmem:[#allocation25_spill] sm:$0xff] %v6371_v59  ;;  %v4132_v36 = vrot.slane %v6371_v59, 1  ;;  %v4133_v49 = vrot.slane %v4057_v56, 1  ;;  %v4178_v35 = vrot.slane %v6371_v59, 2  ;;  %v4179_v30 = vrot.slane %v4057_v56, 2 }
 0x13d   :  { %v2053_v48 = vrot.slane %v2052_v18, 1  ;;  %v2492_v50 = vrot.slane %v2491_v39, 2  ;;  %v2499_v19 = vrot.slane %v2498_v58, 2  ;;  %v2047_v34 = vmax.f32 %v6337_v15, %v2046_v52 }
 0x13e   :  { %v6379_v26 = vsel %vm4089_vm10, %v4132_v36, %v4133_v49  ;;  %v6385_v40 = vsel %vm9261_vm11, %v4178_v35, %v4179_v30  ;;  %v2071_v9 = vmax.f32 %v2069_v24, %v2070_v4  ;;  %v2077_v17 = vrot.slane %v2076_v51, 4 }
 0x13f   :  { %9298 = vst [vmem:[#allocation26_spill] sm:$0xff] %v6379_v26  ;;  %4225 = vrot.lane.b32.xlu0 %v6379_v26, %s5932_s0  ;;  %9299 = vst [vmem:[#allocation27_spill] sm:$0xff] %v6385_v40  ;;  %4270 = vrot.lane.b32.xlu1 %v6385_v40, %s5933_s22  ;;  %v813_v16 = vcombine.high %v805_v33, %v805_v33  ;;  %v2060_v46 = vrot.slane %v2059_v60, 1  ;;  %v2066_v5 = vmax.f32 %v6340_v37, %v2065_v1 }
 0x140   :  { %v2084_v25 = vrot.slane %v2083_v20, 4  ;;  %v2090_v6 = vsel %vm1564_vm0, %v542_v8, -inf  ;;  %v2506_v42 = vrot.slane %v2505_v53, 2  ;;  %v2512_v56 = vmax.f32 %v2510_v0, %v2511_v7 }
 0x141   :  { %v812_v36 = vrot.slane %v798_v27, %v5986_v10  ;;  %v2517_v49 = vsel %vm1564_vm0, %v805_v33, -inf  ;;  %v6400_v35 = vsel %vm3357_vm1, %v6335_v23, -inf  ;;  %v2054_v15 = vmax.f32 %v2052_v18, %v2053_v48 }
 0x142   :  { %9300 = vst [vmem:[#allocation28_spill] sm:$0xff] %v6400_v35  ;;  %v2493_v52 = vmax.f32 %v2491_v39, %v2492_v50  ;;  %v2500_v24 = vmax.f32 %v2498_v58, %v2499_v19  ;;  %v2072_v4 = vrot.slane %v2071_v9, 2  ;;  %v2078_v30 = vmax.f32 %v2076_v51, %v2077_v17  ;;  %v76_v17 = vpop.trf.xlu1 }
 0x143   :  { %v2091_v63 = vrot.slane %v2090_v6, 4  ;;  %v2524_v37 = vsel %vm1564_vm0, %v813_v16, -inf  ;;  %v2067_v1 = vrot.slane %v2066_v5, 1  ;;  %v6404_v8 = vsel %vm3357_vm1, %v2047_v34, -inf }
 0x144   :  { %9301 = vst [vmem:[#allocation29_spill] sm:$0xff] %v6404_v8  ;;  %v2085_v0 = vmax.f32 %v2083_v20, %v2084_v25  ;;  %v2518_v7 = vrot.slane %v2517_v49, 4  ;;  %v2061_v27 = vmax.f32 %v2059_v60, %v2060_v46  ;;  %v2507_v33 = vmax.f32 %v2505_v53, %v2506_v42 }
 0x145   :  { %v2513_v29 = vrot.slane %v2512_v56, 2  ;;  %v814_v40 = vcombine.high %v812_v36, %v812_v36  ;;  %v6407_v23 = vsel %vm3357_vm1, %v2054_v15, -inf  ;;  %v2494_v18 = vrot.slane %v2493_v52, 1 }
 0x146   :  { %9302 = vst [vmem:[#allocation30_spill] sm:$0xff] %v6407_v23  ;;  %v2501_v39 = vrot.slane %v2500_v24, 1  ;;  %v2525_v58 = vrot.slane %v2524_v37, 4  ;;  %v2073_v51 = vmax.f32 %v2071_v9, %v2072_v4  ;;  %v2079_v48 = vrot.slane %v2078_v30, 2 }
 0x147   :  { %v2092_v50 = vmax.f32 %v2090_v6, %v2091_v63  ;;  %v2531_v19 = vsel %vm1564_vm0, %v812_v36, -inf  ;;  %v2068_v34 = vmax.f32 %v2066_v5, %v2067_v1  ;;  %v2086_v16 = vrot.slane %v2085_v0, 2 }
 0x148   :  { %v2519_v20 = vmax.f32 %v2517_v49, %v2518_v7  ;;  %v543_v25 = vcombine.high %v76_v17, %v76_v17  ;;  %v2508_v60 = vrot.slane %v2507_v33, 1  ;;  %v2514_v53 = vmax.f32 %v2512_v56, %v2513_v29 }
 0x149   :  { %v2538_v46 = vsel %vm1564_vm0, %v814_v40, -inf  ;;  %v550_v42 = vrot.slane %v76_v17, %v5986_v10  ;;  %v2495_v15 = vmax.f32 %v2493_v52, %v2494_v18  ;;  %v2502_v26 = vmax.f32 %v2500_v24, %v2501_v39 }
 0x14a   :  { %v2526_v59 = vmax.f32 %v2524_v37, %v2525_v58  ;;  %v2532_v61 = vrot.slane %v2531_v19, 4  ;;  %v6413_v9 = vsel %vm3357_vm1, %v2061_v27, -inf  ;;  %v2074_v63 = vrot.slane %v2073_v51, 1  ;;  %v111_v27 = vpop.trf.xlu0 }
 0x14b   :  { %9303 = vst [vmem:[#allocation31_spill] sm:$0xff] %v6413_v9  ;;  %v2080_v6 = vmax.f32 %v2078_v30, %v2079_v48  ;;  %v2093_v36 = vrot.slane %v2092_v50, 2  ;;  %v2087_v5 = vmax.f32 %v2085_v0, %v2086_v16  ;;  %v2520_v4 = vrot.slane %v2519_v20, 2 }
 0x14c   :  { %v2539_v49 = vrot.slane %v2538_v46, 4  ;;  %v557_v1 = vrot.slane %v543_v25, %v5986_v10  ;;  %v6417_v29 = vsel %vm3357_vm1, %v2068_v34, -inf  ;;  %v2509_v40 = vmax.f32 %v2507_v33, %v2508_v60 }
 0x14d   :  { %9304 = vst [vmem:[#allocation32_spill] sm:$0xff] %v6417_v29  ;;  %v2515_v56 = vrot.slane %v2514_v53, 1  ;;  %v558_v52 = vcombine.high %v550_v42, %v550_v42  ;;  %v6420_v24 = vsel %vm3357_vm1, %v2495_v15, -inf  ;;  %v6423_v37 = vsel %vm3357_vm1, %v2502_v26, -inf }
 0x14e   :  { %9305 = vst [vmem:[#allocation33_spill] sm:$0xff] %v6420_v24  ;;  %9306 = vst [vmem:[#allocation34_spill] sm:$0xff] %v6423_v37  ;;  %v2527_v7 = vrot.slane %v2526_v59, 2  ;;  %v2533_v30 = vmax.f32 %v2531_v19, %v2532_v61  ;;  %v2075_v0 = vmax.f32 %v2073_v51, %v2074_v63  ;;  %v2081_v18 = vrot.slane %v2080_v6, 1 }
 0x14f   :  { %v2094_v39 = vmax.f32 %v2092_v50, %v2093_v36  ;;  %v2097_v58 = vsel %vm1564_vm0, %v550_v42, -inf  ;;  %v2088_v48 = vrot.slane %v2087_v5, 1  ;;  %v2521_v17 = vmax.f32 %v2519_v20, %v2520_v4 }
 0x150   :  { %v2540_v34 = vmax.f32 %v2538_v46, %v2539_v49  ;;  %v559_v33 = vcombine.high %v557_v1, %v557_v1  ;;  %v2104_v16 = vsel %vm1564_vm0, %v558_v52, -inf  ;;  %v2111_v25 = vsel %vm1564_vm0, %v557_v1, -inf }
 0x151   :  { %v815_v60 = vcombine.high %v111_v27, %v111_v27  ;;  %v822_v26 = vrot.slane %v111_v27, %v5986_v10  ;;  %v2516_v15 = vmax.f32 %v2514_v53, %v2515_v56  ;;  %v2528_v29 = vmax.f32 %v2526_v59, %v2527_v7 }
 0x152   :  { %v2534_v61 = vrot.slane %v2533_v30, 2  ;;  %v2098_v19 = vrot.slane %v2097_v58, 4  ;;  %v6430_v51 = vsel %vm3357_vm1, %v2509_v40, -inf  ;;  %v2082_v50 = vmax.f32 %v2080_v6, %v2081_v18 }
 0x153   :  { %9307 = vst [vmem:[#allocation35_spill] sm:$0xff] %v6430_v51  ;;  %v2095_v42 = vrot.slane %v2094_v39, 1  ;;  %v6433_v20 = vsel %vm3357_vm1, %v2075_v0, -inf  ;;  %v2089_v46 = vmax.f32 %v2087_v5, %v2088_v48  ;;  %v2105_v63 = vrot.slane %v2104_v16, 4 }
 0x154   :  { %v2112_v36 = vrot.slane %v2111_v25, 4  ;;  %v2118_v4 = vsel %vm1564_vm0, %v559_v33, -inf  ;;  %v2522_v49 = vrot.slane %v2521_v17, 1  ;;  %v2541_v1 = vrot.slane %v2540_v34, 2 }
 0x155   :  { %v829_v53 = vrot.slane %v815_v60, %v5986_v10  ;;  %v830_v59 = vcombine.high %v822_v26, %v822_v26  ;;  %v6438_v56 = vsel %vm3357_vm1, %v2516_v15, -inf  ;;  %v2529_v40 = vrot.slane %v2528_v29, 1 }
 0x156   :  { %9308 = vst [vmem:[#allocation36_spill] sm:$0xff] %v6438_v56  ;;  %v2535_v52 = vmax.f32 %v2533_v30, %v2534_v61  ;;  %v2099_v6 = vmax.f32 %v2097_v58, %v2098_v19  ;;  %v2096_v7 = vmax.f32 %v2094_v39, %v2095_v42  ;;  %v3456_v27 = vmax.f32 %v6313_v55, %v6433_v20  ;;  %v77_v19 = vpop.trf.xlu1 }
 0x157   :  { %v3458_v5 = vsel %vm3357_vm1, %v2082_v50, -inf  ;;  %v2119_v0 = vrot.slane %v2118_v4, 4  ;;  %v6444_v18 = vsel %vm3357_vm1, %v2089_v46, -inf  ;;  %v2106_v48 = vmax.f32 %v2104_v16, %v2105_v63 }
 0x158   :  { %v2113_v33 = vmax.f32 %v2111_v25, %v2112_v36  ;;  %v2545_v60 = vsel %vm1564_vm0, %v822_v26, -inf  ;;  %v2523_v11 = vmax.f32 %v2521_v17, %v2522_v49  ;;  %v2542_v15 = vmax.f32 %v2540_v34, %v2541_v1 }
 0x159   :  { %v831_v56 = vcombine.high %v829_v53, %v829_v53  ;;  %v2552_v30 = vsel %vm1564_vm0, %v830_v59, -inf  ;;  %v2530_v58 = vmax.f32 %v2528_v29, %v2529_v40  ;;  %v2536_v39 = vrot.slane %v2535_v52, 1 }
 0x15a   :  { %v2100_v61 = vrot.slane %v2099_v6, 2  ;;  %v2559_v55 = vsel %vm1564_vm0, %v829_v53, -inf  ;;  %v3459_v50 = vmax.f32 %v6316_v54, %v3458_v5  ;;  %v2120_v42 = vmax.f32 %v2118_v4, %v2119_v0 }
 0x15b   :  { %v2546_v20 = vrot.slane %v2545_v60, 4  ;;  %v560_v46 = vcombine.high %v77_v19, %v77_v19  ;;  %v3462_v16 = vmax.f32 %v6319_v38, %v6444_v18  ;;  %v2107_v25 = vrot.slane %v2106_v48, 2 }
 0x15c   :  { %v2114_v17 = vrot.slane %v2113_v33, 2  ;;  %v2553_v34 = vrot.slane %v2552_v30, 4  ;;  %v2543_v26 = vrot.slane %v2542_v15, 1  ;;  %v3551_v63 = vsel %vm3357_vm1, %v2523_v11, -inf }
 0x15d   :  { %v2560_v29 = vrot.slane %v2559_v55, 4  ;;  %v2566_v36 = vsel %vm1564_vm0, %v831_v56, -inf  ;;  %v2537_v49 = vmax.f32 %v2535_v52, %v2536_v39  ;;  %v3554_v1 = vsel %vm3357_vm1, %v2530_v58, -inf }
 0x15e   :  { %v2101_v53 = vmax.f32 %v2099_v6, %v2100_v61  ;;  %v567_v54 = vrot.slane %v77_v19, %v5986_v10  ;;  %v6457_v4 = vsel %vm3357_vm1, %v2096_v7, -inf  ;;  %v2121_v59 = vrot.slane %v2120_v42, 2 }
 0x15f   :  { %9309 = vst [vmem:[#allocation37_spill] sm:$0xff] %v6457_v4  ;;  %v2547_v38 = vmax.f32 %v2545_v60, %v2546_v20  ;;  %v574_v40 = vrot.slane %v560_v46, %v5986_v10  ;;  %v2108_v5 = vmax.f32 %v2106_v48, %v2107_v25  ;;  %v2115_v0 = vmax.f32 %v2113_v33, %v2114_v17 }
 0x160   :  { %v2554_v18 = vmax.f32 %v2552_v30, %v2553_v34  ;;  %v2567_v11 = vrot.slane %v2566_v36, 4  ;;  %v2544_v51 = vmax.f32 %v2542_v15, %v2543_v26  ;;  %v3552_v56 = vmax.f32 %v6325_v45, %v3551_v63 }
 0x161   :  { %v3555_v52 = vmax.f32 %v6330_v47, %v3554_v1  ;;  %v2561_v58 = vmax.f32 %v2559_v55, %v2560_v29  ;;  %v3557_v6 = vsel %vm3357_vm1, %v2537_v49, -inf  ;;  %v2102_v39 = vrot.slane %v2101_v53, 1 }
 0x162   :  { %v575_v61 = vcombine.high %v567_v54, %v567_v54  ;;  %v2125_v7 = vsel %vm1564_vm0, %v567_v54, -inf  ;;  %v2122_v19 = vmax.f32 %v2120_v42, %v2121_v59  ;;  %v2548_v60 = vrot.slane %v2547_v38, 2 }
 0x163   :  { %v576_v20 = vcombine.high %v574_v40, %v574_v40  ;;  %v2139_v48 = vsel %vm1564_vm0, %v574_v40, -inf  ;;  %v2109_v33 = vrot.slane %v2108_v5, 1  ;;  %v2116_v30 = vrot.slane %v2115_v0, 1 }
 0x164   :  { %v2555_v46 = vrot.slane %v2554_v18, 2  ;;  %v2568_v15 = vmax.f32 %v2566_v36, %v2567_v11  ;;  %v3905_v45 = vsel %vm9260_vm2, %v3459_v50, %v3456_v27  ;;  %v3558_v47 = vmax.f32 %v6389_v12, %v3557_v6 }
 0x165   :  { %v2562_v55 = vrot.slane %v2561_v58, 2  ;;  %v2126_v25 = vrot.slane %v2125_v7, 4  ;;  %v6468_v17 = vsel %vm3357_vm1, %v2544_v51, -inf  ;;  %v3933_v34 = vsel %vm9260_vm2, %v3555_v52, %v3552_v56  ;;  %v112_v52 = vpop.trf.xlu0 }
 0x166   :  { %9310 = vst [vmem:[#allocation38_spill] sm:$0xff] %v6468_v17  ;;  %v2132_v42 = vsel %vm1564_vm0, %v575_v61, -inf  ;;  %v2140_v26 = vrot.slane %v2139_v48, 4  ;;  %v2103_v63 = vmax.f32 %v2101_v53, %v2102_v39  ;;  %v2123_v29 = vrot.slane %v2122_v19, 1 }
 0x167   :  { %v2549_v49 = vmax.f32 %v2547_v38, %v2548_v60  ;;  %v2146_v1 = vsel %vm1564_vm0, %v576_v20, -inf  ;;  %v2110_v36 = vmax.f32 %v2108_v5, %v2109_v33  ;;  %v2117_v54 = vmax.f32 %v2115_v0, %v2116_v30 }
 0x168   :  { %v2556_v27 = vmax.f32 %v2554_v18, %v2555_v46  ;;  %v2569_v50 = vrot.slane %v2568_v15, 2  ;;  %v2563_v59 = vmax.f32 %v2561_v58, %v2562_v55  ;;  %v2127_v51 = vmax.f32 %v2125_v7, %v2126_v25 }
 0x169   :  { %v2133_v40 = vrot.slane %v2132_v42, 4  ;;  %v6476_v11 = vsel %vm3872_vm3, %v3462_v16, %v3905_v45  ;;  %v2141_v56 = vmax.f32 %v2139_v48, %v2140_v26  ;;  %v2147_v38 = vrot.slane %v2146_v1, 4 }
 0x16a   :  { %9311 = vst [vmem:[#allocation39_spill] sm:$0xff] %v6476_v11  ;;  %v6481_v5 = vsel %vm3872_vm3, %v3558_v47, %v3933_v34  ;;  %v2124_v0 = vmax.f32 %v2122_v19, %v2123_v29  ;;  %v6484_v18 = vsel %vm3357_vm1, %v2103_v63, -inf  ;;  %v2550_v6 = vrot.slane %v2549_v49, 1 }
 0x16b   :  { %9312 = vst [vmem:[#allocation40_spill] sm:$0xff] %v6481_v5  ;;  %9313 = vst [vmem:[#allocation41_spill] sm:$0xff] %v6484_v18  ;;  %v6487_v58 = vsel %vm3357_vm1, %v2110_v36, -inf  ;;  %v6490_v16 = vsel %vm3357_vm1, %v2117_v54, -inf  ;;  %v2557_v39 = vrot.slane %v2556_v27, 1  ;;  %v2570_v61 = vmax.f32 %v2568_v15, %v2569_v50 }
 0x16c   :  { %9314 = vst [vmem:[#allocation42_spill] sm:$0xff] %v6487_v58  ;;  %9315 = vst [vmem:[#allocation43_spill] sm:$0xff] %v6490_v16  ;;  %v2564_v7 = vrot.slane %v2563_v59, 1  ;;  %v2128_v60 = vrot.slane %v2127_v51, 2  ;;  %v2134_v20 = vmax.f32 %v2132_v42, %v2133_v40  ;;  %v832_v48 = vcombine.high %v112_v52, %v112_v52 }
 0x16d   :  { %v2142_v19 = vrot.slane %v2141_v56, 2  ;;  %v2148_v30 = vmax.f32 %v2146_v1, %v2147_v38  ;;  %v839_v46 = vrot.slane %v112_v52, %v5986_v10  ;;  %v6500_v55 = vsel %vm3357_vm1, %v2124_v0, -inf }
 0x16e   :  { %9316 = vst [vmem:[#allocation44_spill] sm:$0xff] %v6500_v55  ;;  %v2551_v15 = vmax.f32 %v2549_v49, %v2550_v6  ;;  %v2558_v25 = vmax.f32 %v2556_v27, %v2557_v39  ;;  %v2571_v34 = vrot.slane %v2570_v61, 1  ;;  %v9317_v42 = vrot.slane %v6244_v22, 1  ;;  %v78_v39 = vpop.trf.xlu1 }
 0x16f   :  { %v9318_v63 = vrot.slane %v6295_v32, 1  ;;  %v2565_v1 = vmax.f32 %v2563_v59, %v2564_v7  ;;  %v2129_v36 = vmax.f32 %v2127_v51, %v2128_v60  ;;  %v2135_v54 = vrot.slane %v2134_v20, 2 }
 0x170   :  { %v3300_v26 = vmax.f32 %v6244_v22, %v9317_v42  ;;  %v846_v50 = vrot.slane %v832_v48, %v5986_v10  ;;  %v2143_v40 = vmax.f32 %v2141_v56, %v2142_v19  ;;  %v2149_v38 = vrot.slane %v2148_v30, 2 }
 0x171   :  { %v3356_v29 = vmax.f32 %v6295_v32, %v9318_v63  ;;  %v847_v52 = vcombine.high %v839_v46, %v839_v46  ;;  %v3735_v49 = vmax.f32 %v6263_v28, %v6310_v14  ;;  %v3736_v27 = vsel %vm3357_vm1, %v6258_v62, -inf }
 0x172   :  { %v3737_v22 = vsel %vm3357_vm1, %v6299_v21, -inf  ;;  %v9319_v32 = vmax.f32 %v6242_v44, %v6278_v31  ;;  %v2572_v51 = vmax.f32 %v2570_v61, %v2571_v34  ;;  %v2573_v56 = vsel %vm1564_vm0, %v839_v46, -inf }
 0x173   :  { %v3740_v0 = vsel %vm3357_vm1, %v3356_v29, -inf  ;;  %v3738_v6 = vmax.f32 %v3736_v27, %v3737_v22  ;;  %v3739_v28 = vsel %vm3357_vm1, %v3300_v26, -inf  ;;  %v6524_v14 = vsel %vm3357_vm1, %v2551_v15, -inf }
 0x174   :  { %v3983_v59 = vsel %vm3872_vm3, %v9319_v32, %v6292_v41  ;;  %9320 = vst [vmem:[#allocation45_spill] sm:$0xff] %v6524_v14  ;;  %v848_v62 = vcombine.high %v846_v50, %v846_v50  ;;  %v3741_v21 = vmax.f32 %v3739_v28, %v3740_v0  ;;  %v9321_v7 = vmax.f32 %v6250_v43, %v6283_v13 }
 0x175   :  { %v2130_v44 = vrot.slane %v2129_v36, 1  ;;  %v2580_v31 = vsel %vm1564_vm0, %v847_v52, -inf  ;;  %v584_v41 = vrot.slane %v78_v39, %v5986_v10  ;;  %v9322_v61 = vmax.f32 %v6254_v57, %v6302_v3 }
 0x176   :  { %v3984_v60 = vsel %vm3874_vm4, %v9321_v7, %v3983_v59  ;;  %v2574_v19 = vrot.slane %v2573_v56, 4  ;;  %v2587_v46 = vsel %vm1564_vm0, %v846_v50, -inf  ;;  %v577_v15 = vcombine.high %v78_v39, %v78_v39 }
 0x177   :  { %v3985_v48 = vsel %vm3876_vm5, %v9322_v61, %v3984_v60  ;;  %v6539_v13 = vsel %vm3357_vm1, %v2558_v25, -inf  ;;  %v6542_v43 = vsel %vm3357_vm1, %v2565_v1, -inf  ;;  %v2136_v42 = vmax.f32 %v2134_v20, %v2135_v54  ;;  %v113_v54 = vpop.trf.xlu0 }
 0x178   :  { %v3986_v34 = vsel %vm3878_vm6, %v3735_v49, %v3985_v48  ;;  %9323 = vst [vmem:[#allocation46_spill] sm:$0xff] %v6539_v13  ;;  %9324 = vst [vmem:[#allocation47_spill] sm:$0xff] %v6542_v43  ;;  %v2150_v63 = vmax.f32 %v2148_v30, %v2149_v38  ;;  %v2581_v29 = vrot.slane %v2580_v31, 4  ;;  %v2594_v57 = vsel %vm1564_vm0, %v848_v62, -inf }
 0x179   :  { %v3987_v26 = vsel %vm3880_vm7, %v3738_v6, %v3986_v34  ;;  %v2144_v50 = vrot.slane %v2143_v40, 1  ;;  %v2588_v52 = vrot.slane %v2587_v46, 4  ;;  %v592_v27 = vcombine.high %v584_v41, %v584_v41 }
 0x17a   :  { %v6547_v3 = vsel %vm9262_vm8, %v3741_v21, %v3987_v26  ;;  %v2131_v1 = vmax.f32 %v2129_v36, %v2130_v44  ;;  %v2575_v22 = vmax.f32 %v2573_v56, %v2574_v19  ;;  %v591_v20 = vrot.slane %v577_v15, %v5986_v10 }
 0x17b   :  { %v4006_v49 = vrot.slane %v6547_v3, 7  ;;  %v2595_v32 = vrot.slane %v2594_v57, 4  ;;  %v2137_v6 = vrot.slane %v2136_v42, 1  ;;  %v2151_v28 = vrot.slane %v2150_v63, 1 }
 0x17c   :  { %v2582_v62 = vmax.f32 %v2580_v31, %v2581_v29  ;;  %v2153_v36 = vsel %vm1564_vm0, %v584_v41, -inf  ;;  %v2145_v56 = vmax.f32 %v2143_v40, %v2144_v50  ;;  %v2589_v39 = vmax.f32 %v2587_v46, %v2588_v52  ;;  %v79_v29 = vpop.trf.xlu1 }
 0x17d   :  { %v6560_v59 = vsel %vm9263_vm9, 0.0, %v4006_v49  ;;  %v2160_v21 = vsel %vm1564_vm0, %v592_v27, -inf  ;;  %v849_v7 = vcombine.high %v113_v54, %v113_v54  ;;  %v6567_v60 = vsel %vm3357_vm1, %v2572_v51, -inf }
 0x17e   :  { %4317 = vrot.lane.b32.xlu1 %v6560_v59, %s5934_s23  ;;  %9326 = vst [vmem:[#allocation48_spill] sm:$0xff] %v6567_v60  ;;  %v6570_v44 = vsel %vm3357_vm1, %v2131_v1, -inf  ;;  %v2576_v61 = vrot.slane %v2575_v22, 2  ;;  %v593_v48 = vcombine.high %v591_v20, %v591_v20  ;;  %v2596_v31 = vmax.f32 %v2594_v57, %v2595_v32 }
 0x17f   :  { %v2154_v19 = vrot.slane %v2153_v36, 4  ;;  %v2167_v41 = vsel %vm1564_vm0, %v591_v20, -inf  ;;  %v856_v15 = vrot.slane %v113_v54, %v5986_v10  ;;  %v2138_v34 = vmax.f32 %v2136_v42, %v2137_v6 }
 0x180   :  { %v2152_v40 = vmax.f32 %v2150_v63, %v2151_v28  ;;  %v2583_v46 = vrot.slane %v2582_v62, 2  ;;  %v2161_v26 = vrot.slane %v2160_v21, 4  ;;  %v6575_v50 = vsel %vm3357_vm1, %v2145_v56, -inf }
 0x181   :  { %9327 = vst [vmem:[#allocation49_spill] sm:$0xff] %v6575_v50  ;;  %v2590_v51 = vrot.slane %v2589_v39, 2  ;;  %v863_v52 = vrot.slane %v849_v7, %v5986_v10  ;;  %v601_v27 = vrot.slane %v79_v29, %v5986_v10  ;;  %v2577_v1 = vmax.f32 %v2575_v22, %v2576_v61 }
 0x182   :  { %v2168_v57 = vrot.slane %v2167_v41, 4  ;;  %v2174_v32 = vsel %vm1564_vm0, %v593_v48, -inf  ;;  %v594_v20 = vcombine.high %v79_v29, %v79_v29  ;;  %v2597_v47 = vrot.slane %v2596_v31, 2 }
 0x183   :  { %v2155_v54 = vmax.f32 %v2153_v36, %v2154_v19  ;;  %v864_v42 = vcombine.high %v856_v15, %v856_v15  ;;  %v2601_v63 = vsel %vm1564_vm0, %v856_v15, -inf  ;;  %v6582_v6 = vsel %vm3357_vm1, %v2138_v34, -inf }
 0x184   :  { %v6585_v28 = vsel %vm3357_vm1, %v2152_v40, -inf  ;;  %v2584_v56 = vmax.f32 %v2582_v62, %v2583_v46  ;;  %v2162_v7 = vmax.f32 %v2160_v21, %v2161_v26  ;;  %v2591_v45 = vmax.f32 %v2589_v39, %v2590_v51 }
 0x185   :  { %9328 = vst [vmem:[#allocation50_spill] sm:$0xff] %v6585_v28  ;;  %v2175_v33 = vrot.slane %v2174_v32, 4  ;;  %v2615_v22 = vsel %vm1564_vm0, %v863_v52, -inf  ;;  %v609_v61 = vcombine.high %v601_v27, %v601_v27  ;;  %v2578_v48 = vrot.slane %v2577_v1, 1 }
 0x186   :  { %v2169_v29 = vmax.f32 %v2167_v41, %v2168_v57  ;;  %v2602_v12 = vrot.slane %v2601_v63, 4  ;;  %v608_v36 = vrot.slane %v594_v20, %v5986_v10  ;;  %v2598_v19 = vmax.f32 %v2596_v31, %v2597_v47 }
 0x187   :  { %v2156_v15 = vrot.slane %v2155_v54, 2  ;;  %v865_v0 = vcombine.high %v863_v52, %v863_v52  ;;  %v2608_v34 = vsel %vm1564_vm0, %v864_v42, -inf  ;;  %v2585_v30 = vrot.slane %v2584_v56, 1 }
 0x188   :  { %v2163_v40 = vrot.slane %v2162_v7, 2  ;;  %v2616_v25 = vrot.slane %v2615_v22, 4  ;;  %v4058_v62 = vsel %vm9263_vm9, %v4006_v49, 0.0  ;;  %v2592_v39 = vrot.slane %v2591_v45, 1 }
 0x189   :  { %v2176_v21 = vmax.f32 %v2174_v32, %v2175_v33  ;;  %v2181_v46 = vsel %vm1564_vm0, %v601_v27, -inf  ;;  %v2188_v41 = vsel %vm1564_vm0, %v609_v61, -inf  ;;  %v2170_v26 = vrot.slane %v2169_v29, 2 }
 0x18a   :  { %v2603_v51 = vmax.f32 %v2601_v63, %v2602_v12  ;;  %v2609_v47 = vrot.slane %v2608_v34, 4  ;;  %v610_v31 = vcombine.high %v608_v36, %v608_v36  ;;  %v2622_v52 = vsel %vm1564_vm0, %v865_v0, -inf }
 0x18b   :  { %v4194_v57 = vrot.slane %v6560_v59, 2  ;;  %v4195_v20 = vrot.slane %v4058_v62, 2  ;;  %v4188_v42 = vrot.slane %v6560_v59, 1  ;;  %v2617_v3 = vmax.f32 %v2615_v22, %v2616_v25 }
 0x18c   :  { %v2182_v53 = vrot.slane %v2181_v46, 4  ;;  %v2189_v49 = vrot.slane %v2188_v41, 4  ;;  %v4189_v16 = vrot.slane %v4058_v62, 1  ;;  %v2599_v33 = vrot.slane %v2598_v19, 1 }
 0x18d   :  { %v2157_v32 = vmax.f32 %v2155_v54, %v2156_v15  ;;  %v2164_v27 = vmax.f32 %v2162_v7, %v2163_v40  ;;  %v6599_v61 = vsel %vm9261_vm11, %v4194_v57, %v4195_v20  ;;  %v2177_v12 = vrot.slane %v2176_v21, 2 }
 0x18e   :  { %v2195_v63 = vsel %vm1564_vm0, %v608_v36, -inf  ;;  %v2202_v0 = vsel %vm1564_vm0, %v610_v31, -inf  ;;  %4413 = vrot.lane.b32.xlu0 %v6599_v61, %s5935_s24  ;;  %v6606_v25 = vsel %vm4089_vm10, %v4188_v42, %v4189_v16  ;;  %v2579_v22 = vmax.f32 %v2577_v1, %v2578_v48  ;;  %v114_v1 = vpop.trf.xlu0 }
 0x18f   :  { %v2171_v62 = vmax.f32 %v2169_v29, %v2170_v26  ;;  %v2604_v9 = vrot.slane %v2603_v51, 2  ;;  %v2623_v54 = vrot.slane %v2622_v52, 4  ;;  %4365 = vrot.lane.b32.xlu1 %v6606_v25, %s5936_s25  ;;  %v2610_v7 = vmax.f32 %v2608_v34, %v2609_v47 }
 0x190   :  { %v2618_v15 = vrot.slane %v2617_v3, 2  ;;  %v2183_v36 = vmax.f32 %v2181_v46, %v2182_v53  ;;  %v2190_v40 = vmax.f32 %v2188_v41, %v2189_v49  ;;  %v2586_v31 = vmax.f32 %v2584_v56, %v2585_v30 }
 0x191   :  { %v2593_v57 = vmax.f32 %v2591_v45, %v2592_v39  ;;  %v2196_v20 = vrot.slane %v2195_v63, 4  ;;  %v2203_v55 = vrot.slane %v2202_v0, 4  ;;  %v2600_v58 = vmax.f32 %v2598_v19, %v2599_v33 }
 0x192   :  { %v2158_v23 = vrot.slane %v2157_v32, 1  ;;  %v2165_v16 = vrot.slane %v2164_v27, 1  ;;  %v2178_v42 = vmax.f32 %v2176_v21, %v2177_v12  ;;  %v6611_v48 = vsel %vm3357_vm1, %v2579_v22, -inf }
 0x193   :  { %v2172_v29 = vrot.slane %v2171_v62, 1  ;;  %v2605_v26 = vmax.f32 %v2603_v51, %v2604_v9  ;;  %v2624_v18 = vmax.f32 %v2622_v52, %v2623_v54  ;;  %v2611_v8 = vrot.slane %v2610_v7, 2 }
 0x194   :  { %v2619_v34 = vmax.f32 %v2617_v3, %v2618_v15  ;;  %v2184_v47 = vrot.slane %v2183_v36, 2  ;;  %v2191_v53 = vrot.slane %v2190_v40, 2  ;;  %v6614_v30 = vsel %vm3357_vm1, %v2586_v31, -inf }
 0x195   :  { %v2197_v45 = vmax.f32 %v2195_v63, %v2196_v20  ;;  %v2204_v56 = vmax.f32 %v2202_v0, %v2203_v55  ;;  %v873_v19 = vrot.slane %v114_v1, %v5986_v10  ;;  %v2159_v39 = vmax.f32 %v2157_v32, %v2158_v23  ;;  %v80_v20 = vpop.trf.xlu1 }
 0x196   :  { %v2166_v21 = vmax.f32 %v2164_v27, %v2165_v16  ;;  %v2179_v46 = vrot.slane %v2178_v42, 1  ;;  %v866_v41 = vcombine.high %v114_v1, %v114_v1  ;;  %v6618_v49 = vsel %vm3357_vm1, %v2593_v57, -inf }
 0x197   :  { %v2173_v9 = vmax.f32 %v2171_v62, %v2172_v29  ;;  %v2606_v51 = vrot.slane %v2605_v26, 1  ;;  %v2625_v52 = vrot.slane %v2624_v18, 2  ;;  %v2612_v3 = vmax.f32 %v2610_v7, %v2611_v8 }
 0x198   :  { %v2620_v33 = vrot.slane %v2619_v34, 1  ;;  %v2185_v12 = vmax.f32 %v2183_v36, %v2184_v47  ;;  %v2192_v22 = vmax.f32 %v2190_v40, %v2191_v53  ;;  %v6621_v54 = vsel %vm3357_vm1, %v2600_v58, -inf }
 0x199   :  { %9329 = vst [vmem:[#allocation51_spill] sm:$0xff] %v6621_v54  ;;  %v2198_v55 = vrot.slane %v2197_v45, 2  ;;  %v2205_v63 = vrot.slane %v2204_v56, 2  ;;  %v881_v0 = vcombine.high %v873_v19, %v873_v19  ;;  %v6623_v23 = vmax.f32 %v2178_v42, %v2179_v46 }
 0x19a   :  { %v6626_v32 = vsel %vm3357_vm1, %v2159_v39, -inf  ;;  %v6629_v27 = vsel %vm3357_vm1, %v2166_v21, -inf  ;;  %v880_v62 = vrot.slane %v866_v41, %v5986_v10  ;;  %v6633_v8 = vsel %vm3357_vm1, %v2173_v9, -inf  ;;  %v9335_v21 = vld [vmem:[#allocation22_spill] sm:$0xff] }
 0x19b   :  { %9330 = vst [vmem:[#allocation52_spill] sm:$0xff] %v6623_v23  ;;  %9331 = vst [vmem:[#allocation53_spill] sm:$0xff] %v6626_v32  ;;  %v2607_v7 = vmax.f32 %v2605_v26, %v2606_v51  ;;  %v2626_v15 = vmax.f32 %v2624_v18, %v2625_v52  ;;  %v2629_v58 = vsel %vm1564_vm0, %v873_v19, -inf  ;;  %v2613_v36 = vrot.slane %v2612_v3, 1  ;;  %v9334_v19 = vld [vmem:[#allocation14_spill] sm:$0xff] }
 0x19c   :  { %9332 = vst [vmem:[#allocation54_spill] sm:$0xff] %v6629_v27  ;;  %9333 = vst [vmem:[#allocation55_spill] sm:$0xff] %v6633_v8  ;;  %v6636_v40 = vmax.f32 %v2619_v34, %v2620_v33  ;;  %v2186_v31 = vrot.slane %v2185_v12, 1  ;;  %v2193_v57 = vrot.slane %v2192_v22, 1  ;;  %v2199_v16 = vmax.f32 %v2197_v45, %v2198_v55  ;;  %v9336_v45 = vld [vmem:[#allocation20_spill] sm:$0xff]  ;;  %v9338_v41 = vld [vmem:[#allocation18_spill] sm:$0xff] }
 0x19d   :  { %v2206_v42 = vmax.f32 %v2204_v56, %v2205_v63  ;;  %v2636_v1 = vsel %vm1564_vm0, %v881_v0, -inf  ;;  %v611_v29 = vcombine.high %v80_v20, %v80_v20  ;;  %v2630_v47 = vrot.slane %v2629_v58, 4  ;;  %v9337_v56 = vld [vmem:[#allocation13_spill] sm:$0xff]  ;;  %v9340_v63 = vld [vmem:[#allocation15_spill] sm:$0xff] }
 0x19e   :  { %v2643_v53 = vsel %vm1564_vm0, %v880_v62, -inf  ;;  %v618_v39 = vrot.slane %v80_v20, %v5986_v10  ;;  %v9175_v26 = vmov 0.0   ;;  %v3691_v34 = vsel %vm3357_vm1, %v9334_v19, -inf  ;;  %v9341_v0 = vld [vmem:[#allocation19_spill] sm:$0xff] }
 0x19f   :  { %v6642_v18 = vrot.slane %v9175_v26, 7  ;;  %v3692_v46 = vsel %vm3357_vm1, %v9335_v21, -inf  ;;  %v9339_v9 = vmax.f32 %v9337_v56, %v9338_v41  ;;  %5830 = vmatprep.subr.mxu0 %v9175_v26  ;;  %5865 = vmatprep.subr.mxu1 %v9175_v26  ;;  %v882_v52 = vcombine.high %v880_v62, %v880_v62  ;;  %v9345_v41 = vld [vmem:[#allocation21_spill] sm:$0xff] }
 0x1a0   :  { %v2637_v33 = vrot.slane %v2636_v1, 4  ;;  %v3693_v55 = vmax.f32 %v3691_v34, %v3692_v46  ;;  %v9342_v20 = vmax.f32 %v9340_v63, %v9341_v0  ;;  %v2644_v23 = vrot.slane %v2643_v53, 4  ;;  %v9347_v46 = vld [vmem:[#allocation17_spill] sm:$0xff] }
 0x1a1   :  { %v3970_v51 = vsel %vm3874_vm4, %v9339_v9, %v9336_v45  ;;  %v625_v21 = vrot.slane %v611_v29, %v5986_v10  ;;  %v6662_v56 = vsel %vm9263_vm9, 0.0, %v6642_v18  ;;  %v9344_v45 = vld [vmem:[#allocation16_spill] sm:$0xff]  ;;  %v2627_v62 = vrot.slane %v2626_v15, 1 }
 0x1a2   :  { %v3971_v19 = vsel %vm3876_vm5, %v9342_v20, %v3970_v51  ;;  %9343 = vst [vmem:[#allocation14_spill] sm:$0xff] %v6662_v56  ;;  %v9346_v9 = vmax.f32 %v9344_v45, %v9345_v41  ;;  %v2631_v8 = vmax.f32 %v2629_v58, %v2630_v47  ;;  %v626_v34 = vcombine.high %v618_v39, %v618_v39  ;;  %v9348_v51 = vld [vmem:[#allocation23_spill] sm:$0xff] }
 0x1a3   :  { %4445 = vrot.lane.b32.xlu0 %v6662_v56, %s5938_s26  ;;  %v9349_v63 = vmax.f32 %v9347_v46, %v9348_v51  ;;  %v2614_v0 = vmax.f32 %v2612_v3, %v2613_v36  ;;  %v2187_v20 = vmax.f32 %v2185_v12, %v2186_v31  ;;  %v2194_v4 = vmax.f32 %v2192_v22, %v2193_v57  ;;  %v115_v36 = vpop.trf.xlu0 }
 0x1a4   :  { %v3972_v26 = vsel %vm3878_vm6, %v9346_v9, %v3971_v19  ;;  %v2638_v45 = vmax.f32 %v2636_v1, %v2637_v33  ;;  %v2650_v19 = vsel %vm1564_vm0, %v882_v52, -inf  ;;  %v2209_v58 = vsel %vm1564_vm0, %v618_v39, -inf }
 0x1a5   :  { %v3973_v29 = vsel %vm3880_vm7, %v9349_v63, %v3972_v26  ;;  %v2200_v41 = vrot.slane %v2199_v16, 1  ;;  %v2207_v9 = vrot.slane %v2206_v42, 1  ;;  %v2645_v11 = vmax.f32 %v2643_v53, %v2644_v23 }
 0x1a6   :  { %v3974_v2 = vsel %vm9262_vm8, %v3693_v55, %v3973_v29  ;;  %v627_v43 = vcombine.high %v625_v21, %v625_v21  ;;  %v2632_v38 = vrot.slane %v2631_v8, 2  ;;  %v2216_v46 = vsel %vm1564_vm0, %v626_v34, -inf }
 0x1a7   :  { %v4004_v47 = vrot.slane %v3974_v2, 7  ;;  %v2651_v12 = vrot.slane %v2650_v19, 4  ;;  %v2210_v22 = vrot.slane %v2209_v58, 4  ;;  %v2628_v57 = vmax.f32 %v2626_v15, %v2627_v62 }
 0x1a8   :  { %v6687_v23 = vsel %vm3357_vm1, %v2607_v7, -inf  ;;  %v3479_v1 = vsel %vm3357_vm1, %v2187_v20, -inf  ;;  %v2639_v53 = vrot.slane %v2638_v45, 2  ;;  %v2201_v39 = vmax.f32 %v2199_v16, %v2200_v41 }
 0x1a9   :  { %v6679_v26 = vsel %vm9263_vm9, 0.0, %v4004_v47  ;;  %v6682_v3 = vsel %vm9263_vm9, %v4004_v47, 0.0  ;;  %9351 = vst [vmem:[#allocation20_spill] sm:$0xff] %v6687_v23  ;;  %v3482_v52 = vsel %vm3357_vm1, %v2194_v4, -inf  ;;  %v2646_v33 = vrot.slane %v2645_v11, 2 }
 0x1aa   :  { %9350 = vst [vmem:[#allocation22_spill] sm:$0xff] %v6679_v26  ;;  %v4129_v31 = vrot.slane %v6679_v26, 1  ;;  %v4130_v2 = vrot.slane %v6682_v3, 1  ;;  %v2208_v34 = vmax.f32 %v2206_v42, %v2207_v9  ;;  %v2633_v51 = vmax.f32 %v2631_v8, %v2632_v38 }
 0x1ab   :  { %v2217_v63 = vrot.slane %v2216_v46, 4  ;;  %v890_v29 = vrot.slane %v115_v36, %v5986_v10  ;;  %v2652_v7 = vmax.f32 %v2650_v19, %v2651_v12  ;;  %v2211_v15 = vmax.f32 %v2209_v58, %v2210_v22 }
 0x1ac   :  { %v6692_v55 = vsel %vm4089_vm10, %v4129_v31, %v4130_v2  ;;  %v2223_v62 = vsel %vm1564_vm0, %v625_v21, -inf  ;;  %v2230_v16 = vsel %vm1564_vm0, %v627_v43, -inf  ;;  %v3480_v4 = vmax.f32 %v6570_v44, %v3479_v1 }
 0x1ad   :  { %4223 = vrot.lane.b32.xlu1 %v6692_v55, %s5932_s0  ;;  %v3483_v20 = vmax.f32 %v6582_v6, %v3482_v52  ;;  %v2640_v47 = vmax.f32 %v2638_v45, %v2639_v53  ;;  %v883_v41 = vcombine.high %v115_v36, %v115_v36  ;;  %v6702_v38 = vsel %vm3357_vm1, %v2614_v0, -inf }
 0x1ae   :  { %9352 = vst [vmem:[#allocation13_spill] sm:$0xff] %v6702_v38  ;;  %v6706_v8 = vsel %vm3357_vm1, %v6636_v40, -inf  ;;  %v6709_v42 = vsel %vm3357_vm1, %v2201_v39, -inf  ;;  %v2647_v19 = vmax.f32 %v2645_v11, %v2646_v33  ;;  %v2634_v21 = vrot.slane %v2633_v51, 1 }
 0x1af   :  { %9353 = vst [vmem:[#allocation18_spill] sm:$0xff] %v6706_v8  ;;  %9354 = vst [vmem:[#allocation15_spill] sm:$0xff] %v6709_v42  ;;  %v2218_v58 = vmax.f32 %v2216_v46, %v2217_v63  ;;  %v2224_v43 = vrot.slane %v2223_v62, 4  ;;  %v2231_v9 = vrot.slane %v2230_v16, 4  ;;  %v6712_v44 = vsel %vm3357_vm1, %v2628_v57, -inf }
 0x1b0   :  { %9355 = vst [vmem:[#allocation19_spill] sm:$0xff] %v6712_v44  ;;  %v2653_v6 = vrot.slane %v2652_v7, 2  ;;  %v2212_v45 = vrot.slane %v2211_v15, 2  ;;  %v898_v12 = vcombine.high %v890_v29, %v890_v29  ;;  %v6715_v0 = vsel %vm3357_vm1, %v2208_v34, -inf }
 0x1b1   :  { %9356 = vst [vmem:[#allocation16_spill] sm:$0xff] %v6715_v0  ;;  %v6718_v40 = vsel %vm9260_vm2, %v3483_v20, %v3480_v4  ;;  %v2641_v22 = vrot.slane %v2640_v47, 1  ;;  %v897_v36 = vrot.slane %v883_v41, %v5986_v10  ;;  %v2648_v46 = vrot.slane %v2647_v19, 1 }
 0x1b2   :  { %9357 = vst [vmem:[#allocation21_spill] sm:$0xff] %v6718_v40  ;;  %v2657_v31 = vsel %vm1564_vm0, %v890_v29, -inf  ;;  %v6726_v2 = vsel %vm9263_vm9, %v6642_v18, 0.0  ;;  %v2635_v57 = vmax.f32 %v2633_v51, %v2634_v21  ;;  %v2219_v1 = vrot.slane %v2218_v58, 2  ;;  %v81_v18 = vpop.trf.xlu1 }
 0x1b3   :  { %v2225_v53 = vmax.f32 %v2223_v62, %v2224_v43  ;;  %v2232_v39 = vmax.f32 %v2230_v16, %v2231_v9  ;;  %v2654_v52 = vmax.f32 %v2652_v7, %v2653_v6  ;;  %v2213_v33 = vmax.f32 %v2211_v15, %v2212_v45 }
 0x1b4   :  { %v2664_v34 = vsel %vm1564_vm0, %v898_v12, -inf  ;;  %v4090_v63 = vrot.slane %v6662_v56, 1  ;;  %v2642_v4 = vmax.f32 %v2640_v47, %v2641_v22  ;;  %v899_v20 = vcombine.high %v897_v36, %v897_v36 }
 0x1b5   :  { %v2658_v41 = vrot.slane %v2657_v31, 4  ;;  %v4091_v11 = vrot.slane %v6726_v2, 1  ;;  %v2649_v29 = vmax.f32 %v2647_v19, %v2648_v46  ;;  %v2671_v42 = vsel %vm1564_vm0, %v897_v36, -inf }
 0x1b6   :  { %v4175_v51 = vrot.slane %v6679_v26, 2  ;;  %v4176_v62 = vrot.slane %v6682_v3, 2  ;;  %v2665_v16 = vrot.slane %v2664_v34, 4  ;;  %v628_v7 = vcombine.high %v81_v18, %v81_v18 }
 0x1b7   :  { %v635_v15 = vrot.slane %v81_v18, %v5986_v10  ;;  %v6736_v21 = vsel %vm4089_vm10, %v4090_v63, %v4091_v11  ;;  %v2655_v47 = vrot.slane %v2654_v52, 1  ;;  %v2220_v43 = vmax.f32 %v2218_v58, %v2219_v1 }
 0x1b8   :  { %9358 = vst [vmem:[#allocation17_spill] sm:$0xff] %v6736_v21  ;;  %v2226_v9 = vrot.slane %v2225_v53, 2  ;;  %4490 = vrot.lane.b32.xlu0 %v6736_v21, %s5939_s27  ;;  %v6741_v19 = vsel %vm9261_vm11, %v4175_v51, %v4176_v62  ;;  %v2659_v6 = vmax.f32 %v2657_v31, %v2658_v41  ;;  %v2672_v45 = vrot.slane %v2671_v42, 4 }
 0x1b9   :  { %v2678_v3 = vsel %vm1564_vm0, %v899_v20, -inf  ;;  %v2237_v12 = vsel %vm1564_vm0, %v635_v15, -inf  ;;  %4268 = vrot.lane.b32.xlu1 %v6741_v19, %s5933_s22  ;;  %v3575_v22 = vsel %vm3357_vm1, %v2635_v57, -inf  ;;  %v3578_v58 = vsel %vm3357_vm1, %v2642_v4, -inf  ;;  %v9359_v4 = vld [vmem:[#allocation25_spill] sm:$0xff]  ;;  %v116_v20 = vpop.trf.xlu0 }
 0x1ba   :  { %v2214_v36 = vrot.slane %v2213_v33, 1  ;;  %v2233_v11 = vrot.slane %v2232_v39, 2  ;;  %v3581_v46 = vsel %vm3357_vm1, %v2649_v29, -inf  ;;  %v2666_v1 = vmax.f32 %v2664_v34, %v2665_v16 }
 0x1bb   :  { %v642_v63 = vrot.slane %v628_v7, %v5986_v10  ;;  %v643_v31 = vcombine.high %v635_v15, %v635_v15  ;;  %v2656_v41 = vmax.f32 %v2654_v52, %v2655_v47  ;;  %v2679_v18 = vrot.slane %v2678_v3, 4 }
 0x1bc   :  { %v2238_v51 = vrot.slane %v2237_v12, 4  ;;  %v2221_v62 = vrot.slane %v2220_v43, 1  ;;  %v2227_v21 = vmax.f32 %v2225_v53, %v2226_v9  ;;  %v2660_v50 = vrot.slane %v2659_v6, 2 }
 0x1bd   :  { %v2673_v57 = vmax.f32 %v2671_v42, %v2672_v45  ;;  %4315 = vrot.lane.b32.xlu1 %v9359_v4, %s5934_s23  ;;  %v3576_v40 = vmax.f32 %v6611_v48, %v3575_v22  ;;  %v3579_v34 = vmax.f32 %v6614_v30, %v3578_v58  ;;  %v3582_v29 = vmax.f32 %v6618_v49, %v3581_v46  ;;  %v9361_v49 = vld [vmem:[#allocation26_spill] sm:$0xff] }
 0x1be   :  { %v2234_v16 = vmax.f32 %v2232_v39, %v2233_v11  ;;  %v2215_v7 = vmax.f32 %v2213_v33, %v2214_v36  ;;  %v2667_v15 = vrot.slane %v2666_v1, 2  ;;  %v2244_v52 = vsel %vm1564_vm0, %v643_v31, -inf }
 0x1bf   :  { %v2251_v47 = vsel %vm1564_vm0, %v642_v63, -inf  ;;  %v6761_v53 = vsel %vm3357_vm1, %v2656_v41, -inf  ;;  %v2680_v42 = vmax.f32 %v2678_v3, %v2679_v18  ;;  %v644_v9 = vcombine.high %v642_v63, %v642_v63 }
 0x1c0   :  { %9360 = vst [vmem:[#allocation23_spill] sm:$0xff] %v6761_v53  ;;  %v2239_v45 = vmax.f32 %v2237_v12, %v2238_v51  ;;  %v2222_v0 = vmax.f32 %v2220_v43, %v2221_v62  ;;  %v2228_v48 = vrot.slane %v2227_v21, 1  ;;  %v2661_v22 = vmax.f32 %v2659_v6, %v2660_v50 }
 0x1c1   :  { %v2674_v30 = vrot.slane %v2673_v57, 2  ;;  %4363 = vrot.lane.b32.xlu1 %v9361_v49, %s5936_s25  ;;  %v3940_v39 = vsel %vm9260_vm2, %v3579_v34, %v3576_v40  ;;  %v2235_v33 = vrot.slane %v2234_v16, 1  ;;  %v2245_v58 = vrot.slane %v2244_v52, 4 }
 0x1c2   :  { %v2252_v36 = vrot.slane %v2251_v47, 4  ;;  %v6769_v3 = vsel %vm3357_vm1, %v2215_v7, -inf  ;;  %v2668_v12 = vmax.f32 %v2666_v1, %v2667_v15  ;;  %v900_v46 = vcombine.high %v116_v20, %v116_v20 }
 0x1c3   :  { %9362 = vst [vmem:[#allocation26_spill] sm:$0xff] %v6769_v3  ;;  %v2681_v43 = vrot.slane %v2680_v42, 2  ;;  %v2240_v63 = vrot.slane %v2239_v45, 2  ;;  %v2258_v50 = vsel %vm1564_vm0, %v644_v9, -inf  ;;  %v907_v6 = vrot.slane %v116_v20, %v5986_v10 }
 0x1c4   :  { %v6774_v31 = vsel %vm3872_vm3, %v3582_v29, %v3940_v39  ;;  %v6777_v40 = vsel %vm3357_vm1, %v2222_v0, -inf  ;;  %v2662_v41 = vrot.slane %v2661_v22, 1  ;;  %v2675_v18 = vmax.f32 %v2673_v57, %v2674_v30 }
 0x1c5   :  { %9363 = vst [vmem:[#allocation56_spill] sm:$0xff] %v6774_v31  ;;  %9364 = vst [vmem:[#allocation57_spill] sm:$0xff] %v6777_v40  ;;  %v2229_v51 = vmax.f32 %v2227_v21, %v2228_v48  ;;  %v6779_v62 = vmax.f32 %v2234_v16, %v2235_v33  ;;  %v2246_v34 = vmax.f32 %v2244_v52, %v2245_v58  ;;  %v2669_v15 = vrot.slane %v2668_v12, 1 }
 0x1c6   :  { %v2253_v1 = vmax.f32 %v2251_v47, %v2252_v36  ;;  %v2259_v9 = vrot.slane %v2258_v50, 4  ;;  %v914_v20 = vrot.slane %v900_v46, %v5986_v10  ;;  %v2682_v11 = vmax.f32 %v2680_v42, %v2681_v43  ;;  %v82_v47 = vpop.trf.xlu1 }
 0x1c7   :  { %9365 = vst [vmem:[#allocation58_spill] sm:$0xff] %v6779_v62  ;;  %v2241_v29 = vmax.f32 %v2239_v45, %v2240_v63  ;;  %v2685_v39 = vsel %vm1564_vm0, %v907_v6, -inf  ;;  %v4136_v0 = vrot.slane %v6662_v56, 2  ;;  %v2663_v57 = vmax.f32 %v2661_v22, %v2662_v41 }
 0x1c8   :  { %v2676_v16 = vrot.slane %v2675_v18, 1  ;;  %v915_v52 = vcombine.high %v907_v6, %v907_v6  ;;  %v2247_v48 = vrot.slane %v2246_v34, 2  ;;  %v2254_v30 = vrot.slane %v2253_v1, 2 }
 0x1c9   :  { %v652_v33 = vrot.slane %v82_v47, %v5986_v10  ;;  %v4137_v58 = vrot.slane %v6726_v2, 2  ;;  %v2260_v36 = vmax.f32 %v2258_v50, %v2259_v9  ;;  %v2686_v42 = vrot.slane %v2685_v39, 4 }
 0x1ca   :  { %v2699_v45 = vsel %vm1564_vm0, %v914_v20, -inf  ;;  %v645_v46 = vcombine.high %v82_v47, %v82_v47  ;;  %v2670_v43 = vmax.f32 %v2668_v12, %v2669_v15  ;;  %v2683_v63 = vrot.slane %v2682_v11, 1  ;;  %v83_v3 = vpop.trf.xlu1 }
 0x1cb   :  { %v2242_v7 = vrot.slane %v2241_v29, 1  ;;  %v6792_v21 = vsel %vm9261_vm11, %v4136_v0, %v4137_v58  ;;  %v2677_v22 = vmax.f32 %v2675_v18, %v2676_v16  ;;  %v6795_v6 = vsel %vm3357_vm1, %v2663_v57, -inf }
 0x1cc   :  { %9366 = vst [vmem:[#allocation59_spill] sm:$0xff] %v6792_v21  ;;  %9367 = vst [vmem:[#allocation60_spill] sm:$0xff] %v6795_v6  ;;  %v916_v41 = vcombine.high %v914_v20, %v914_v20  ;;  %v2692_v56 = vsel %vm1564_vm0, %v915_v52, -inf  ;;  %4535 = vrot.lane.b32.xlu0 %v6792_v21, %s5940_s28  ;;  %v2248_v2 = vmax.f32 %v2246_v34, %v2247_v48  ;;  %v2700_v9 = vrot.slane %v2699_v45, 4 }
 0x1cd   :  { %v2255_v50 = vmax.f32 %v2253_v1, %v2254_v30  ;;  %v660_v12 = vcombine.high %v652_v33, %v652_v33  ;;  %v6801_v15 = vsel %vm3357_vm1, %v2229_v51, -inf  ;;  %v2261_v0 = vrot.slane %v2260_v36, 2 }
 0x1ce   :  { %9368 = vst [vmem:[#allocation61_spill] sm:$0xff] %v6801_v15  ;;  %v2687_v47 = vmax.f32 %v2685_v39, %v2686_v42  ;;  %v659_v18 = vrot.slane %v645_v46, %v5986_v10  ;;  %v2684_v57 = vmax.f32 %v2682_v11, %v2683_v63  ;;  %v6807_v16 = vsel %vm3357_vm1, %v2670_v43, -inf  ;;  %v9371_v39 = vld [vmem:[#allocation27_spill] sm:$0xff]  ;;  %v117_v46 = vpop.trf.xlu0 }
 0x1cf   :  { %9369 = vst [vmem:[#allocation62_spill] sm:$0xff] %v6807_v16  ;;  %v2693_v52 = vrot.slane %v2692_v56, 4  ;;  %v6810_v34 = vsel %vm3357_vm1, %v2677_v22, -inf  ;;  %v2243_v1 = vmax.f32 %v2241_v29, %v2242_v7  ;;  %v2706_v48 = vsel %vm1564_vm0, %v916_v41, -inf }
 0x1d0   :  { %9370 = vst [vmem:[#allocation63_spill] sm:$0xff] %v6810_v34  ;;  %v2265_v51 = vsel %vm1564_vm0, %v652_v33, -inf  ;;  %4411 = vrot.lane.b32.xlu0 %v9371_v39, %s5935_s24  ;;  %v2249_v30 = vrot.slane %v2248_v2, 1  ;;  %v2256_v11 = vrot.slane %v2255_v50, 1  ;;  %v2701_v58 = vmax.f32 %v2699_v45, %v2700_v9 }
 0x1d1   :  { %v2272_v42 = vsel %vm1564_vm0, %v660_v12, -inf  ;;  %v2262_v63 = vmax.f32 %v2260_v36, %v2261_v0  ;;  %v2688_v22 = vrot.slane %v2687_v47, 2  ;;  %v661_v20 = vcombine.high %v659_v18, %v659_v18 }
 0x1d2   :  { %v2694_v7 = vmax.f32 %v2692_v56, %v2693_v52  ;;  %v2707_v29 = vrot.slane %v2706_v48, 4  ;;  %v2266_v41 = vrot.slane %v2265_v51, 4  ;;  %v2279_v33 = vsel %vm1564_vm0, %v659_v18, -inf }
 0x1d3   :  { %v6823_v40 = vsel %vm3357_vm1, %v2684_v57, -inf  ;;  %v2273_v45 = vrot.slane %v2272_v42, 4  ;;  %v924_v9 = vrot.slane %v117_v46, %v5986_v10  ;;  %v2250_v36 = vmax.f32 %v2248_v2, %v2249_v30 }
 0x1d4   :  { %9372 = vst [vmem:[#allocation27_spill] sm:$0xff] %v6823_v40  ;;  %4459 = vrot.lane.b32.xlu0 %v6560_v59, %s5938_s26  ;;  %v2257_v12 = vmax.f32 %v2255_v50, %v2256_v11  ;;  %v2702_v0 = vrot.slane %v2701_v58, 2  ;;  %v917_v56 = vcombine.high %v117_v46, %v117_v46  ;;  %v2263_v52 = vrot.slane %v2262_v63, 1 }
 0x1d5   :  { %v6829_v43 = vsel %vm3357_vm1, %v2243_v1, -inf  ;;  %v2689_v18 = vmax.f32 %v2687_v47, %v2688_v22  ;;  %v2280_v27 = vrot.slane %v2279_v33, 4  ;;  %v2695_v21 = vrot.slane %v2694_v7, 2 }
 0x1d6   :  { %v2708_v62 = vmax.f32 %v2706_v48, %v2707_v29  ;;  %v2267_v57 = vmax.f32 %v2265_v51, %v2266_v41  ;;  %v2286_v15 = vsel %vm1564_vm0, %v661_v20, -inf  ;;  %v2274_v32 = vmax.f32 %v2272_v42, %v2273_v45 }
 0x1d7   :  { %v932_v28 = vcombine.high %v924_v9, %v924_v9  ;;  %v2713_v59 = vsel %vm1564_vm0, %v924_v9, -inf  ;;  %v669_v2 = vrot.slane %v83_v3, %v5986_v10  ;;  %v6837_v50 = vsel %vm3357_vm1, %v2250_v36, -inf }
 0x1d8   :  { %4504 = vrot.lane.b32.xlu0 %v6606_v25, %s5939_s27  ;;  %v6840_v47 = vsel %vm3357_vm1, %v2257_v12, -inf  ;;  %v2703_v1 = vmax.f32 %v2701_v58, %v2702_v0  ;;  %v931_v48 = vrot.slane %v917_v56, %v5986_v10  ;;  %v2281_v20 = vmax.f32 %v2279_v33, %v2280_v27 }
 0x1d9   :  { %9373 = vst [vmem:[#allocation64_spill] sm:$0xff] %v6840_v47  ;;  %v2287_v51 = vrot.slane %v2286_v15, 4  ;;  %v662_v30 = vcombine.high %v83_v3, %v83_v3  ;;  %v2293_v11 = vsel %vm1564_vm0, %v669_v2, -inf  ;;  %v2264_v42 = vmax.f32 %v2262_v63, %v2263_v52 }
 0x1da   :  { %v2690_v46 = vrot.slane %v2689_v18, 1  ;;  %v2709_v22 = vrot.slane %v2708_v62, 2  ;;  %v2714_v29 = vrot.slane %v2713_v59, 4  ;;  %v2696_v41 = vmax.f32 %v2694_v7, %v2695_v21 }
 0x1db   :  { %v2268_v25 = vrot.slane %v2267_v57, 2  ;;  %v2275_v45 = vrot.slane %v2274_v32, 2  ;;  %v2720_v9 = vsel %vm1564_vm0, %v932_v28, -inf  ;;  %v933_v58 = vcombine.high %v931_v48, %v931_v48 }
 0x1dc   :  { %4549 = vrot.lane.b32.xlu0 %v6599_v61, %s5940_s28  ;;  %v2727_v36 = vsel %vm1564_vm0, %v931_v48, -inf  ;;  %v677_v27 = vcombine.high %v669_v2, %v669_v2  ;;  %v2294_v33 = vrot.slane %v2293_v11, 4  ;;  %v2704_v3 = vrot.slane %v2703_v1, 1 }
 0x1dd   :  { %v2282_v12 = vrot.slane %v2281_v20, 2  ;;  %v2288_v0 = vmax.f32 %v2286_v15, %v2287_v51  ;;  %v676_v63 = vrot.slane %v662_v30, %v5986_v10  ;;  %v6850_v56 = vsel %vm3357_vm1, %v2264_v42, -inf }
 0x1de   :  { %9374 = vst [vmem:[#allocation65_spill] sm:$0xff] %v6850_v56  ;;  %v2710_v21 = vmax.f32 %v2708_v62, %v2709_v22  ;;  %v2715_v7 = vmax.f32 %v2713_v59, %v2714_v29  ;;  %v2721_v52 = vrot.slane %v2720_v9, 4  ;;  %v2691_v28 = vmax.f32 %v2689_v18, %v2690_v46 }
 0x1df   :  { %v2697_v13 = vrot.slane %v2696_v41, 1  ;;  %v2269_v37 = vmax.f32 %v2267_v57, %v2268_v25  ;;  %v2728_v61 = vrot.slane %v2727_v36, 4  ;;  %v2276_v2 = vmax.f32 %v2274_v32, %v2275_v45 }
 0x1e0   :  { %4409 = vrot.lane.b32.xlu0 %v6741_v19, %s5935_s24  ;;  %v2734_v48 = vsel %vm1564_vm0, %v933_v58, -inf  ;;  %v2295_v60 = vmax.f32 %v2293_v11, %v2294_v33  ;;  %v2300_v15 = vsel %vm1564_vm0, %v677_v27, -inf  ;;  %v2705_v51 = vmax.f32 %v2703_v1, %v2704_v3  ;;  %v118_v33 = vpop.trf.xlu0 }
 0x1e1   :  { %v2283_v30 = vmax.f32 %v2281_v20, %v2282_v12  ;;  %v2289_v42 = vrot.slane %v2288_v0, 2  ;;  %v678_v14 = vcombine.high %v676_v63, %v676_v63  ;;  %v2711_v62 = vrot.slane %v2710_v21, 1 }
 0x1e2   :  { %v2716_v59 = vrot.slane %v2715_v7, 2  ;;  %v2722_v22 = vmax.f32 %v2720_v9, %v2721_v52  ;;  %v2307_v18 = vsel %vm1564_vm0, %v676_v63, -inf  ;;  %v2270_v57 = vrot.slane %v2269_v37, 1 }
 0x1e3   :  { %v2729_v46 = vmax.f32 %v2727_v36, %v2728_v61  ;;  %v2735_v29 = vrot.slane %v2734_v48, 4  ;;  %v2301_v25 = vrot.slane %v2300_v15, 4  ;;  %v2698_v32 = vmax.f32 %v2696_v41, %v2697_v13 }
 0x1e4   :  { %4457 = vrot.lane.b32.xlu0 %v9359_v4, %s5938_s26  ;;  %v6860_v11 = vsel %vm3357_vm1, %v2691_v28, -inf  ;;  %v2277_v1 = vrot.slane %v2276_v2, 1  ;;  %v2296_v20 = vrot.slane %v2295_v60, 2  ;;  %v2284_v45 = vrot.slane %v2283_v30, 1 }
 0x1e5   :  { %v2290_v58 = vmax.f32 %v2288_v0, %v2289_v42  ;;  %v2308_v27 = vrot.slane %v2307_v18, 4  ;;  %v2314_v9 = vsel %vm1564_vm0, %v678_v14, -inf  ;;  %v2712_v3 = vmax.f32 %v2710_v21, %v2711_v62 }
 0x1e6   :  { %v6864_v36 = vsel %vm3357_vm1, %v2705_v51, -inf  ;;  %v2717_v12 = vmax.f32 %v2715_v7, %v2716_v59  ;;  %v2723_v63 = vrot.slane %v2722_v22, 2  ;;  %v2271_v52 = vmax.f32 %v2269_v37, %v2270_v57 }
 0x1e7   :  { %v2730_v61 = vrot.slane %v2729_v46, 2  ;;  %v2736_v13 = vmax.f32 %v2734_v48, %v2735_v29  ;;  %v2302_v41 = vmax.f32 %v2300_v15, %v2301_v25  ;;  %v2278_v28 = vmax.f32 %v2276_v2, %v2277_v1 }
 0x1e8   :  { %4502 = vrot.lane.b32.xlu0 %v9361_v49, %s5939_s27  ;;  %v2297_v24 = vmax.f32 %v2295_v60, %v2296_v20  ;;  %v2315_v0 = vrot.slane %v2314_v9, 4  ;;  %v934_v42 = vcombine.high %v118_v33, %v118_v33  ;;  %v2285_v17 = vmax.f32 %v2283_v30, %v2284_v45  ;;  %v9379_v20 = vld [vmem:[#allocation11_spill] sm:$0xff] }
 0x1e9   :  { %v2291_v14 = vrot.slane %v2290_v58, 1  ;;  %v2309_v35 = vmax.f32 %v2307_v18, %v2308_v27  ;;  %v941_v21 = vrot.slane %v118_v33, %v5986_v10  ;;  %v6870_v51 = vsel %vm3357_vm1, %v2698_v32, -inf }
 0x1ea   :  { %v6873_v37 = vsel %vm3357_vm1, %v2712_v3, -inf  ;;  %v2718_v7 = vrot.slane %v2717_v12, 1  ;;  %v2724_v48 = vmax.f32 %v2722_v22, %v2723_v63  ;;  %v6876_v15 = vsel %vm3357_vm1, %v2271_v52, -inf  ;;  %v9381_v3 = vld [vmem:[#allocation2_spill] sm:$0xff] }
 0x1eb   :  { %9375 = vst [vmem:[#allocation66_spill] sm:$0xff] %v6876_v15  ;;  %v2731_v49 = vmax.f32 %v2729_v46, %v2730_v61  ;;  %v2737_v60 = vrot.slane %v2736_v13, 2  ;;  %v2303_v2 = vrot.slane %v2302_v41, 2  ;;  %v6881_v30 = vsel %vm3357_vm1, %v2278_v28, -inf  ;;  %v9382_v63 = vld [vmem:[#allocation6_spill] sm:$0xff] }
 0x1ec   :  { %4547 = vrot.lane.b32.xlu0 %v9371_v39, %s5940_s28  ;;  %9376 = vst [vmem:[#allocation67_spill] sm:$0xff] %v6881_v30  ;;  %v2298_v62 = vrot.slane %v2297_v24, 1  ;;  %v2316_v59 = vmax.f32 %v2314_v9, %v2315_v0  ;;  %v948_v18 = vrot.slane %v934_v42, %v5986_v10  ;;  %v6884_v57 = vmax.f32 %v2290_v58, %v2291_v14  ;;  %v9380_v9 = vld [vmem:[#allocation8_spill] sm:$0xff]  ;;  %v84_v0 = vpop.trf.xlu1 }
 0x1ed   :  { %v6887_v22 = vsel %vm3357_vm1, %v2285_v17, -inf  ;;  %v2310_v29 = vrot.slane %v2309_v35, 2  ;;  %v949_v25 = vcombine.high %v941_v21, %v941_v21  ;;  %v2719_v46 = vmax.f32 %v2717_v12, %v2718_v7  ;;  %v9384_v12 = vld [vmem:[#allocation3_spill] sm:$0xff] }
 0x1ee   :  { %9377 = vst [vmem:[#allocation68_spill] sm:$0xff] %v6884_v57  ;;  %9378 = vst [vmem:[#allocation69_spill] sm:$0xff] %v6887_v22  ;;  %v2725_v32 = vrot.slane %v2724_v48, 1  ;;  %v2741_v1 = vsel %vm1564_vm0, %v941_v21, -inf  ;;  %v3668_v39 = vsel %vm3357_vm1, %v9379_v20, -inf  ;;  %v2732_v45 = vrot.slane %v2731_v49, 1 }
 0x1ef   :  { %v2738_v27 = vmax.f32 %v2736_v13, %v2737_v60  ;;  %v2304_v33 = vmax.f32 %v2302_v41, %v2303_v2  ;;  %v9383_v58 = vmax.f32 %v9381_v3, %v9382_v63  ;;  %v2299_v17 = vmax.f32 %v2297_v24, %v2298_v62  ;;  %v9385_v20 = vld [vmem:[#allocation4_spill] sm:$0xff]  ;;  %v9386_v3 = vld [vmem:[#allocation9_spill] sm:$0xff]  ;;  %v9388_v57 = vld [vmem:[#allocation7_spill] sm:$0xff] }
 0x1f0   :  { %v2317_v61 = vrot.slane %v2316_v59, 2  ;;  %v950_v28 = vcombine.high %v948_v18, %v948_v18  ;;  %v3667_v42 = vsel %vm3357_vm1, %v9384_v12, -inf  ;;  %v2742_v14 = vrot.slane %v2741_v1, 4  ;;  %v9389_v12 = vld [vmem:[#allocation10_spill] sm:$0xff] }
 0x1f1   :  { %v3963_v52 = vsel %vm3874_vm4, %v9383_v58, %v9380_v9  ;;  %v2748_v21 = vsel %vm1564_vm0, %v949_v25, -inf  ;;  %v686_v7 = vrot.slane %v84_v0, %v5986_v10  ;;  %v3669_v13 = vmax.f32 %v3667_v42, %v3668_v39 }
 0x1f2   :  { %v2726_v41 = vmax.f32 %v2724_v48, %v2725_v32  ;;  %v2311_v60 = vmax.f32 %v2309_v35, %v2310_v29  ;;  %v679_v2 = vcombine.high %v84_v0, %v84_v0  ;;  %v9387_v63 = vmax.f32 %v9385_v20, %v9386_v3  ;;  %v9391_v35 = vld [vmem:[#allocation5_spill] sm:$0xff]  ;;  %v9392_v29 = vld [vmem:[#allocation12_spill] sm:$0xff] }
 0x1f3   :  { %v2733_v62 = vmax.f32 %v2731_v49, %v2732_v45  ;;  %v2305_v9 = vrot.slane %v2304_v33, 1  ;;  %v2755_v58 = vsel %vm1564_vm0, %v948_v18, -inf  ;;  %v9390_v22 = vmax.f32 %v9388_v57, %v9389_v12 }
 0x1f4   :  { %v3964_v24 = vsel %vm3876_vm5, %v9387_v63, %v3963_v52  ;;  %v2318_v5 = vmax.f32 %v2316_v59, %v2317_v61  ;;  %v2749_v4 = vrot.slane %v2748_v21, 4  ;;  %v2762_v48 = vsel %vm1564_vm0, %v950_v28, -inf }
 0x1f5   :  { %v3965_v25 = vsel %vm3878_vm6, %v9390_v22, %v3964_v24  ;;  %v9393_v32 = vmax.f32 %v9391_v35, %v9392_v29  ;;  %v2739_v0 = vrot.slane %v2738_v27, 1  ;;  %v2743_v52 = vmax.f32 %v2741_v1, %v2742_v14  ;;  %v119_v24 = vpop.trf.xlu0 }
 0x1f6   :  { %v694_v49 = vcombine.high %v686_v7, %v686_v7  ;;  %v6917_v18 = vsel %vm3357_vm1, %v2719_v46, -inf  ;;  %v2756_v57 = vrot.slane %v2755_v58, 4  ;;  %v693_v22 = vrot.slane %v679_v2, %v5986_v10 }
 0x1f7   :  { %v3966_v39 = vsel %vm3880_vm7, %v9393_v32, %v3965_v25  ;;  %9394 = vst [vmem:[#allocation11_spill] sm:$0xff] %v6917_v18  ;;  %v2306_v61 = vmax.f32 %v2304_v33, %v2305_v9  ;;  %v2312_v42 = vrot.slane %v2311_v60, 1  ;;  %v2763_v28 = vrot.slane %v2762_v48, 4 }
 0x1f8   :  { %v3967_v45 = vsel %vm9262_vm8, %v3669_v13, %v3966_v39  ;;  %v2321_v20 = vsel %vm1564_vm0, %v686_v7, -inf  ;;  %v2319_v3 = vrot.slane %v2318_v5, 1  ;;  %v2750_v63 = vmax.f32 %v2748_v21, %v2749_v4 }
 0x1f9   :  { %v4003_v59 = vrot.slane %v3967_v45, 7  ;;  %v2744_v46 = vrot.slane %v2743_v52, 2  ;;  %v2328_v13 = vsel %vm1564_vm0, %v694_v49, -inf  ;;  %v6931_v9 = vsel %vm3357_vm1, %v2299_v17, -inf }
 0x1fa   :  { %v2757_v7 = vmax.f32 %v2755_v58, %v2756_v57  ;;  %v2322_v12 = vrot.slane %v2321_v20, 4  ;;  %v2335_v4 = vsel %vm1564_vm0, %v693_v22, -inf  ;;  %v2313_v21 = vmax.f32 %v2311_v60, %v2312_v42 }
 0x1fb   :  { %v6922_v1 = vsel %vm9263_vm9, 0.0, %v4003_v59  ;;  %v6925_v14 = vsel %vm9263_vm9, %v4003_v59, 0.0  ;;  %v2764_v25 = vmax.f32 %v2762_v48, %v2763_v28  ;;  %v951_v35 = vcombine.high %v119_v24, %v119_v24 }
 0x1fc   :  { %9395 = vst [vmem:[#allocation8_spill] sm:$0xff] %v6922_v1  ;;  %v4126_v2 = vrot.slane %v6922_v1, 1  ;;  %v4127_v33 = vrot.slane %v6925_v14, 1  ;;  %v2740_v32 = vmax.f32 %v2738_v27, %v2739_v0  ;;  %v2320_v39 = vmax.f32 %v2318_v5, %v2319_v3 }
 0x1fd   :  { %v2751_v49 = vrot.slane %v2750_v63, 2  ;;  %v2329_v45 = vrot.slane %v2328_v13, 4  ;;  %v3506_v17 = vsel %vm3357_vm1, %v2306_v61, -inf  ;;  %v2745_v59 = vmax.f32 %v2743_v52, %v2744_v46 }
 0x1fe   :  { %v6935_v29 = vsel %vm4089_vm10, %v4126_v2, %v4127_v33  ;;  %v695_v58 = vcombine.high %v693_v22, %v693_v22  ;;  %v2336_v57 = vrot.slane %v2335_v4, 4  ;;  %v6941_v34 = vsel %vm3357_vm1, %v2726_v41, -inf }
 0x1ff   :  { %4221 = vrot.lane.b32.xlu1 %v6935_v29, %s5932_s0  ;;  %9396 = vst [vmem:[#allocation2_spill] sm:$0xff] %v6941_v34  ;;  %v2758_v60 = vrot.slane %v2757_v7, 2  ;;  %v2323_v48 = vmax.f32 %v2321_v20, %v2322_v12  ;;  %v958_v42 = vrot.slane %v119_v24, %v5986_v10  ;;  %v6945_v27 = vsel %vm3357_vm1, %v2733_v62, -inf }
 0x200   :  { %9397 = vst [vmem:[#allocation6_spill] sm:$0xff] %v6945_v27  ;;  %v6948_v5 = vsel %vm3357_vm1, %v2313_v21, -inf  ;;  %v2765_v0 = vrot.slane %v2764_v25, 2  ;;  %v965_v28 = vrot.slane %v951_v35, %v5986_v10  ;;  %v3504_v52 = vmax.f32 %v6829_v43, %v6931_v9 }
 0x201   :  { %9398 = vst [vmem:[#allocation3_spill] sm:$0xff] %v6948_v5  ;;  %v3507_v22 = vmax.f32 %v6837_v50, %v3506_v17  ;;  %v2752_v41 = vmax.f32 %v2750_v63, %v2751_v49  ;;  %v2330_v61 = vmax.f32 %v2328_v13, %v2329_v45  ;;  %v6955_v20 = vsel %vm3357_vm1, %v2320_v39, -inf  ;;  %v85_v17 = vpop.trf.xlu1 }
 0x202   :  { %9399 = vst [vmem:[#allocation4_spill] sm:$0xff] %v6955_v20  ;;  %v2746_v3 = vrot.slane %v2745_v59, 1  ;;  %v2337_v24 = vmax.f32 %v2335_v4, %v2336_v57  ;;  %v2342_v62 = vsel %vm1564_vm0, %v695_v58, -inf  ;;  %v2759_v2 = vmax.f32 %v2757_v7, %v2758_v60 }
 0x203   :  { %v2324_v33 = vrot.slane %v2323_v48, 2  ;;  %v966_v12 = vcombine.high %v958_v42, %v958_v42  ;;  %v2766_v21 = vmax.f32 %v2764_v25, %v2765_v0  ;;  %v2769_v43 = vsel %vm1564_vm0, %v958_v42, -inf }
 0x204   :  { %v2783_v50 = vsel %vm1564_vm0, %v965_v28, -inf  ;;  %v4172_v63 = vrot.slane %v6922_v1, 2  ;;  %v2753_v9 = vrot.slane %v2752_v41, 1  ;;  %v2331_v4 = vrot.slane %v2330_v61, 2 }
 0x205   :  { %v2343_v35 = vrot.slane %v2342_v62, 4  ;;  %v2747_v39 = vmax.f32 %v2745_v59, %v2746_v3  ;;  %v2338_v49 = vrot.slane %v2337_v24, 2  ;;  %v967_v45 = vcombine.high %v965_v28, %v965_v28 }
 0x206   :  { %v4173_v7 = vrot.slane %v6925_v14, 2  ;;  %v2770_v58 = vrot.slane %v2769_v43, 4  ;;  %v2776_v25 = vsel %vm1564_vm0, %v966_v12, -inf  ;;  %v2784_v57 = vrot.slane %v2783_v50, 4 }
 0x207   :  { %v703_v60 = vrot.slane %v85_v17, %v5986_v10  ;;  %v2760_v42 = vrot.slane %v2759_v2, 1  ;;  %v2767_v0 = vrot.slane %v2766_v21, 1  ;;  %v2325_v46 = vmax.f32 %v2323_v48, %v2324_v33 }
 0x208   :  { %v6969_v13 = vsel %vm9261_vm11, %v4172_v63, %v4173_v7  ;;  %v6972_v20 = vsel %vm3357_vm1, %v2740_v32, -inf  ;;  %v2754_v59 = vmax.f32 %v2752_v41, %v2753_v9  ;;  %v2344_v28 = vmax.f32 %v2342_v62, %v2343_v35 }
 0x209   :  { %v696_v3 = vcombine.high %v85_v17, %v85_v17  ;;  %4266 = vrot.lane.b32.xlu1 %v6969_v13, %s5933_s22  ;;  %4407 = vrot.lane.b32.xlu0 %v6969_v13, %s5935_s24  ;;  %v2332_v14 = vmax.f32 %v2330_v61, %v2331_v4  ;;  %v2339_v12 = vmax.f32 %v2337_v24, %v2338_v49  ;;  %v2777_v56 = vrot.slane %v2776_v25, 4 }
 0x20a   :  { %v2790_v48 = vsel %vm1564_vm0, %v967_v45, -inf  ;;  %v3599_v33 = vsel %vm3357_vm1, %v2747_v39, -inf  ;;  %v2771_v63 = vmax.f32 %v2769_v43, %v2770_v58  ;;  %v2785_v7 = vmax.f32 %v2783_v50, %v2784_v57  ;;  %v120_v39 = vpop.trf.xlu0 }
 0x20b   :  { %v711_v32 = vcombine.high %v703_v60, %v703_v60  ;;  %v6981_v41 = vsel %vm9260_vm2, %v3507_v22, %v3504_v52  ;;  %v2761_v62 = vmax.f32 %v2759_v2, %v2760_v42  ;;  %v2768_v9 = vmax.f32 %v2766_v21, %v2767_v0 }
 0x20c   :  { %9400 = vst [vmem:[#allocation9_spill] sm:$0xff] %v6981_v41  ;;  %v2326_v35 = vrot.slane %v2325_v46, 1  ;;  %v3602_v17 = vsel %vm3357_vm1, %v2754_v59, -inf  ;;  %v2345_v5 = vrot.slane %v2344_v28, 2  ;;  %v2791_v47 = vrot.slane %v2790_v48, 4 }
 0x20d   :  { %v710_v61 = vrot.slane %v696_v3, %v5986_v10  ;;  %4313 = vrot.lane.b32.xlu1 %v6679_v26, %s5934_s23  ;;  %4455 = vrot.lane.b32.xlu0 %v6679_v26, %s5938_s26  ;;  %v3600_v24 = vmax.f32 %v6860_v11, %v3599_v33  ;;  %v2333_v43 = vrot.slane %v2332_v14, 1  ;;  %v2778_v52 = vmax.f32 %v2776_v25, %v2777_v56 }
 0x20e   :  { %v2349_v22 = vsel %vm1564_vm0, %v703_v60, -inf  ;;  %v2340_v2 = vrot.slane %v2339_v12, 1  ;;  %v2772_v21 = vrot.slane %v2771_v63, 2  ;;  %v2786_v50 = vrot.slane %v2785_v7, 2 }
 0x20f   :  { %v2356_v4 = vsel %vm1564_vm0, %v711_v32, -inf  ;;  %v3603_v49 = vmax.f32 %v6870_v51, %v3602_v17  ;;  %v3605_v45 = vsel %vm3357_vm1, %v2761_v62, -inf  ;;  %v6995_v58 = vsel %vm3357_vm1, %v2768_v9, -inf }
 0x210   :  { %v2327_v57 = vmax.f32 %v2325_v46, %v2326_v35  ;;  %v2792_v42 = vmax.f32 %v2790_v48, %v2791_v47  ;;  %v712_v11 = vcombine.high %v710_v61, %v710_v61  ;;  %v2350_v0 = vrot.slane %v2349_v22, 4 }
 0x211   :  { %v2363_v56 = vsel %vm1564_vm0, %v710_v61, -inf  ;;  %4361 = vrot.lane.b32.xlu1 %v6692_v55, %s5936_s25  ;;  %4500 = vrot.lane.b32.xlu0 %v6692_v55, %s5939_s27  ;;  %v2779_v25 = vrot.slane %v2778_v52, 2  ;;  %v2357_v60 = vrot.slane %v2356_v4, 4  ;;  %v968_v51 = vcombine.high %v120_v39, %v120_v39 }
 0x212   :  { %v975_v59 = vrot.slane %v120_v39, %v5986_v10  ;;  %v3606_v3 = vmax.f32 %v6864_v36, %v3605_v45  ;;  %v2346_v33 = vmax.f32 %v2344_v28, %v2345_v5  ;;  %v2773_v46 = vmax.f32 %v2771_v63, %v2772_v21 }
 0x213   :  { %v2787_v47 = vmax.f32 %v2785_v7, %v2786_v50  ;;  %v2334_v32 = vmax.f32 %v2332_v14, %v2333_v43  ;;  %v7007_v62 = vsel %vm3357_vm1, %v2327_v57, -inf  ;;  %v2364_v9 = vrot.slane %v2363_v56, 4 }
 0x214   :  { %9401 = vst [vmem:[#allocation7_spill] sm:$0xff] %v7007_v62  ;;  %v3947_v55 = vsel %vm9260_vm2, %v3603_v49, %v3600_v24  ;;  %v2793_v35 = vrot.slane %v2792_v42, 2  ;;  %v2351_v17 = vmax.f32 %v2349_v22, %v2350_v0  ;;  %v2370_v61 = vsel %vm1564_vm0, %v712_v11, -inf }
 0x215   :  { %4545 = vrot.lane.b32.xlu0 %v6741_v19, %s5940_s28  ;;  %v2780_v36 = vmax.f32 %v2778_v52, %v2779_v25  ;;  %v2358_v5 = vmax.f32 %v2356_v4, %v2357_v60  ;;  %v982_v28 = vrot.slane %v968_v51, %v5986_v10  ;;  %v983_v63 = vcombine.high %v975_v59, %v975_v59  ;;  %v86_v51 = vpop.trf.xlu1 }
 0x216   :  { %v2341_v7 = vmax.f32 %v2339_v12, %v2340_v2  ;;  %v2347_v14 = vrot.slane %v2346_v33, 1  ;;  %v2774_v43 = vrot.slane %v2773_v46, 1  ;;  %v2788_v21 = vrot.slane %v2787_v47, 1 }
 0x217   :  { %v7017_v24 = vsel %vm3357_vm1, %v2334_v32, -inf  ;;  %v2365_v22 = vmax.f32 %v2363_v56, %v2364_v9  ;;  %v2797_v39 = vsel %vm1564_vm0, %v975_v59, -inf  ;;  %v7021_v19 = vsel %vm3872_vm3, %v3606_v3, %v3947_v55 }
 0x218   :  { %9402 = vst [vmem:[#allocation10_spill] sm:$0xff] %v7017_v24  ;;  %v2794_v52 = vmax.f32 %v2792_v42, %v2793_v35  ;;  %v2352_v4 = vrot.slane %v2351_v17, 2  ;;  %v2371_v49 = vrot.slane %v2370_v61, 4  ;;  %v2781_v45 = vrot.slane %v2780_v36, 1 }
 0x219   :  { %v2359_v12 = vrot.slane %v2358_v5, 2  ;;  %v2804_v2 = vsel %vm1564_vm0, %v983_v63, -inf  ;;  %v2811_v57 = vsel %vm1564_vm0, %v982_v28, -inf  ;;  %v2775_v11 = vmax.f32 %v2773_v46, %v2774_v43 }
 0x21a   :  { %v2789_v0 = vmax.f32 %v2787_v47, %v2788_v21  ;;  %v984_v25 = vcombine.high %v982_v28, %v982_v28  ;;  %v2798_v60 = vrot.slane %v2797_v39, 4  ;;  %v7025_v56 = vmax.f32 %v2346_v33, %v2347_v14 }
 0x21b   :  { %v2366_v59 = vrot.slane %v2365_v22, 2  ;;  %v713_v32 = vcombine.high %v86_v51, %v86_v51  ;;  %v720_v3 = vrot.slane %v86_v51, %v5986_v10  ;;  %v2353_v42 = vmax.f32 %v2351_v17, %v2352_v4 }
 0x21c   :  { %9403 = vst [vmem:[#allocation5_spill] sm:$0xff] %v7025_v56  ;;  %v2372_v9 = vmax.f32 %v2370_v61, %v2371_v49  ;;  %v2805_v55 = vrot.slane %v2804_v2, 4  ;;  %v2812_v35 = vrot.slane %v2811_v57, 4  ;;  %v2782_v50 = vmax.f32 %v2780_v36, %v2781_v45  ;;  %v121_v45 = vpop.trf.xlu0 }
 0x21d   :  { %v2795_v48 = vrot.slane %v2794_v52, 1  ;;  %v2360_v46 = vmax.f32 %v2358_v5, %v2359_v12  ;;  %v7031_v47 = vsel %vm3357_vm1, %v2775_v11, -inf  ;;  %v7034_v33 = vsel %vm3357_vm1, %v2789_v0, -inf }
 0x21e   :  { %9404 = vst [vmem:[#allocation12_spill] sm:$0xff] %v7031_v47  ;;  %9405 = vst [vmem:[#allocation70_spill] sm:$0xff] %v7034_v33  ;;  %v2799_v28 = vmax.f32 %v2797_v39, %v2798_v60  ;;  %v2818_v14 = vsel %vm1564_vm0, %v984_v25, -inf  ;;  %v7038_v17 = vsel %vm3357_vm1, %v2341_v7, -inf  ;;  %v2367_v61 = vmax.f32 %v2365_v22, %v2366_v59 }
 0x21f   :  { %9406 = vst [vmem:[#allocation71_spill] sm:$0xff] %v7038_v17  ;;  %v727_v43 = vrot.slane %v713_v32, %v5986_v10  ;;  %v728_v21 = vcombine.high %v720_v3, %v720_v3  ;;  %v2354_v4 = vrot.slane %v2353_v42, 1  ;;  %v2373_v36 = vrot.slane %v2372_v9, 2 }
 0x220   :  { %v2806_v49 = vmax.f32 %v2804_v2, %v2805_v55  ;;  %v2813_v5 = vmax.f32 %v2811_v57, %v2812_v35  ;;  %v2796_v12 = vmax.f32 %v2794_v52, %v2795_v48  ;;  %v2819_v0 = vrot.slane %v2818_v14, 4 }
 0x221   :  { %v7046_v7 = vsel %vm3357_vm1, %v2782_v50, -inf  ;;  %v2361_v22 = vrot.slane %v2360_v46, 1  ;;  %v2800_v25 = vrot.slane %v2799_v28, 2  ;;  %v2377_v60 = vsel %vm1564_vm0, %v720_v3, -inf }
 0x222   :  { %9407 = vst [vmem:[#allocation72_spill] sm:$0xff] %v7046_v7  ;;  %v2368_v51 = vrot.slane %v2367_v61, 1  ;;  %v729_v59 = vcombine.high %v727_v43, %v727_v43  ;;  %v2384_v2 = vsel %vm1564_vm0, %v728_v21, -inf  ;;  %v985_v57 = vcombine.high %v121_v45, %v121_v45 }
 0x223   :  { %v2374_v48 = vmax.f32 %v2372_v9, %v2373_v36  ;;  %v2807_v52 = vrot.slane %v2806_v49, 2  ;;  %v2814_v32 = vrot.slane %v2813_v5, 2  ;;  %v992_v55 = vrot.slane %v121_v45, %v5986_v10 }
 0x224   :  { %v7052_v35 = vsel %vm3357_vm1, %v2796_v12, -inf  ;;  %v2355_v63 = vmax.f32 %v2353_v42, %v2354_v4  ;;  %v2820_v50 = vmax.f32 %v2818_v14, %v2819_v0  ;;  %v2378_v39 = vrot.slane %v2377_v60, 4 }
 0x225   :  { %v2801_v3 = vmax.f32 %v2799_v28, %v2800_v25  ;;  %v2385_v24 = vrot.slane %v2384_v2, 4  ;;  %v2391_v30 = vsel %vm1564_vm0, %v727_v43, -inf  ;;  %v2362_v21 = vmax.f32 %v2360_v46, %v2361_v22 }
 0x226   :  { %v2369_v56 = vmax.f32 %v2367_v61, %v2368_v51  ;;  %v2398_v9 = vsel %vm1564_vm0, %v729_v59, -inf  ;;  %v999_v36 = vrot.slane %v985_v57, %v5986_v10  ;;  %v2375_v45 = vrot.slane %v2374_v48, 1  ;;  %v87_v61 = vpop.trf.xlu1 }
 0x227   :  { %v2808_v17 = vmax.f32 %v2806_v49, %v2807_v52  ;;  %v2815_v12 = vmax.f32 %v2813_v5, %v2814_v32  ;;  %v2825_v42 = vsel %vm1564_vm0, %v992_v55, -inf  ;;  %v2821_v14 = vrot.slane %v2820_v50, 2 }
 0x228   :  { %v2379_v4 = vmax.f32 %v2377_v60, %v2378_v39  ;;  %v2392_v0 = vrot.slane %v2391_v30, 4  ;;  %v1000_v62 = vcombine.high %v992_v55, %v992_v55  ;;  %v7061_v28 = vsel %vm3357_vm1, %v2355_v63, -inf }
 0x229   :  { %v2802_v25 = vrot.slane %v2801_v3, 1  ;;  %v2386_v43 = vmax.f32 %v2384_v2, %v2385_v24  ;;  %v2399_v46 = vrot.slane %v2398_v9, 4  ;;  %v7064_v22 = vsel %vm3357_vm1, %v2362_v21, -inf }
 0x22a   :  { %v1001_v51 = vcombine.high %v999_v36, %v999_v36  ;;  %v2826_v59 = vrot.slane %v2825_v42, 4  ;;  %v730_v49 = vcombine.high %v87_v61, %v87_v61  ;;  %v2376_v5 = vmax.f32 %v2374_v48, %v2375_v45  ;;  %v88_v53 = vpop.trf.xlu1 }
 0x22b   :  { %v7067_v57 = vsel %vm3357_vm1, %v2369_v56, -inf  ;;  %v2809_v39 = vrot.slane %v2808_v17, 1  ;;  %v2816_v60 = vrot.slane %v2815_v12, 1  ;;  %v2822_v52 = vmax.f32 %v2820_v50, %v2821_v14 }
 0x22c   :  { %v2380_v32 = vrot.slane %v2379_v4, 2  ;;  %v2393_v63 = vmax.f32 %v2391_v30, %v2392_v0  ;;  %v2832_v55 = vsel %vm1564_vm0, %v1000_v62, -inf  ;;  %v2803_v24 = vmax.f32 %v2801_v3, %v2802_v25  ;;  %v122_v25 = vpop.trf.xlu0 }
 0x22d   :  { %v2387_v2 = vrot.slane %v2386_v43, 2  ;;  %v2400_v11 = vmax.f32 %v2398_v9, %v2399_v46  ;;  %v737_v21 = vrot.slane %v87_v61, %v5986_v10  ;;  %v2827_v15 = vmax.f32 %v2825_v42, %v2826_v59 }
 0x22e   :  { %v2839_v41 = vsel %vm1564_vm0, %v999_v36, -inf  ;;  %v2846_v48 = vsel %vm1564_vm0, %v1001_v51, -inf  ;;  %v744_v56 = vrot.slane %v730_v49, %v5986_v10  ;;  %v7075_v45 = vsel %vm3357_vm1, %v2376_v5, -inf }
 0x22f   :  { %v2810_v50 = vmax.f32 %v2808_v17, %v2809_v39  ;;  %v2817_v14 = vmax.f32 %v2815_v12, %v2816_v60  ;;  %v2833_v30 = vrot.slane %v2832_v55, 4  ;;  %v2823_v0 = vrot.slane %v2822_v52, 1 }
 0x230   :  { %v2381_v62 = vmax.f32 %v2379_v4, %v2380_v32  ;;  %v2394_v3 = vrot.slane %v2393_v63, 2  ;;  %v2405_v9 = vsel %vm1564_vm0, %v737_v21, -inf  ;;  %v7079_v42 = vsel %vm3357_vm1, %v2803_v24, -inf }
 0x231   :  { %v2840_v36 = vrot.slane %v2839_v41, 4  ;;  %v2847_v46 = vrot.slane %v2846_v48, 4  ;;  %v745_v61 = vcombine.high %v737_v21, %v737_v21  ;;  %v2388_v51 = vmax.f32 %v2386_v43, %v2387_v2 }
 0x232   :  { %v2401_v59 = vrot.slane %v2400_v11, 2  ;;  %v2828_v49 = vrot.slane %v2827_v15, 2  ;;  %v2419_v5 = vsel %vm1564_vm0, %v744_v56, -inf  ;;  %v2834_v17 = vmax.f32 %v2832_v55, %v2833_v30 }
 0x233   :  { %v746_v12 = vcombine.high %v744_v56, %v744_v56  ;;  %v2406_v39 = vrot.slane %v2405_v9, 4  ;;  %v1009_v4 = vrot.slane %v122_v25, %v5986_v10  ;;  %v2824_v60 = vmax.f32 %v2822_v52, %v2823_v0 }
 0x234   :  { %v7084_v32 = vsel %vm3357_vm1, %v2817_v14, -inf  ;;  %v2382_v26 = vrot.slane %v2381_v62, 1  ;;  %v2395_v24 = vmax.f32 %v2393_v63, %v2394_v3  ;;  %v2841_v8 = vmax.f32 %v2839_v41, %v2840_v36 }
 0x235   :  { %v2848_v16 = vmax.f32 %v2846_v48, %v2847_v46  ;;  %v2412_v21 = vsel %vm1564_vm0, %v745_v61, -inf  ;;  %v2420_v43 = vrot.slane %v2419_v5, 4  ;;  %v2389_v2 = vrot.slane %v2388_v51, 1 }
 0x236   :  { %v2402_v38 = vmax.f32 %v2400_v11, %v2401_v59  ;;  %v2829_v44 = vmax.f32 %v2827_v15, %v2828_v49  ;;  %v1002_v40 = vcombine.high %v122_v25, %v122_v25  ;;  %v2835_v55 = vrot.slane %v2834_v17, 2 }
 0x237   :  { %v2407_v56 = vmax.f32 %v2405_v9, %v2406_v39  ;;  %v2426_v30 = vsel %vm1564_vm0, %v746_v12, -inf  ;;  %v1017_v6 = vcombine.high %v1009_v4, %v1009_v4  ;;  %v7089_v52 = vsel %vm3357_vm1, %v2810_v50, -inf }
 0x238   :  { %v2383_v14 = vmax.f32 %v2381_v62, %v2382_v26  ;;  %v2396_v0 = vrot.slane %v2395_v24, 1  ;;  %v2413_v63 = vrot.slane %v2412_v21, 4  ;;  %v2842_v41 = vrot.slane %v2841_v8, 2 }
 0x239   :  { %v2849_v48 = vrot.slane %v2848_v16, 2  ;;  %v2421_v3 = vmax.f32 %v2419_v5, %v2420_v43  ;;  %v2853_v36 = vsel %vm1564_vm0, %v1009_v4, -inf  ;;  %v2390_v46 = vmax.f32 %v2388_v51, %v2389_v2 }
 0x23a   :  { %v2403_v11 = vrot.slane %v2402_v38, 1  ;;  %v2830_v15 = vrot.slane %v2829_v44, 1  ;;  %v2427_v25 = vrot.slane %v2426_v30, 4  ;;  %v2836_v61 = vmax.f32 %v2834_v17, %v2835_v55 }
 0x23b   :  { %v2408_v9 = vrot.slane %v2407_v56, 2  ;;  %v1016_v59 = vrot.slane %v1002_v40, %v5986_v10  ;;  %v2860_v49 = vsel %vm1564_vm0, %v1017_v6, -inf  ;;  %v7095_v50 = vsel %vm3357_vm1, %v2824_v60, -inf }
 0x23c   :  { %v2397_v26 = vmax.f32 %v2395_v24, %v2396_v0  ;;  %v2414_v62 = vmax.f32 %v2412_v21, %v2413_v63  ;;  %v2854_v12 = vrot.slane %v2853_v36, 4  ;;  %v7098_v5 = vsel %vm3357_vm1, %v2383_v14, -inf }
 0x23d   :  { %v2843_v39 = vmax.f32 %v2841_v8, %v2842_v41  ;;  %v2850_v51 = vmax.f32 %v2848_v16, %v2849_v48  ;;  %v2422_v4 = vrot.slane %v2421_v3, 2  ;;  %v2404_v43 = vmax.f32 %v2402_v38, %v2403_v11 }
 0x23e   :  { %v7101_v17 = vsel %vm3357_vm1, %v2390_v46, -inf  ;;  %v2428_v2 = vmax.f32 %v2426_v30, %v2427_v25  ;;  %v2861_v40 = vrot.slane %v2860_v49, 4  ;;  %v2831_v55 = vmax.f32 %v2829_v44, %v2830_v15 }
 0x23f   :  { %v2837_v6 = vrot.slane %v2836_v61, 1  ;;  %v2409_v23 = vmax.f32 %v2407_v56, %v2408_v9  ;;  %v1018_v60 = vcombine.high %v1016_v59, %v1016_v59  ;;  %v2415_v24 = vrot.slane %v2414_v62, 2 }
 0x240   :  { %v2855_v21 = vmax.f32 %v2853_v36, %v2854_v12  ;;  %v2867_v0 = vsel %vm1564_vm0, %v1016_v59, -inf  ;;  %v754_v14 = vrot.slane %v88_v53, %v5986_v10  ;;  %v2844_v8 = vrot.slane %v2843_v39, 1 }
 0x241   :  { %v2851_v16 = vrot.slane %v2850_v51, 1  ;;  %v2423_v63 = vmax.f32 %v2421_v3, %v2422_v4  ;;  %v747_v38 = vcombine.high %v88_v53, %v88_v53  ;;  %v7106_v41 = vsel %vm3357_vm1, %v2397_v26, -inf  ;;  %v123_v53 = vpop.trf.xlu0 }
 0x242   :  { %9408 = vst [vmem:[#allocation73_spill] sm:$0xff] %v7106_v41  ;;  %v7109_v30 = vsel %vm3357_vm1, %v2404_v43, -inf  ;;  %v2429_v44 = vrot.slane %v2428_v2, 2  ;;  %v2862_v56 = vmax.f32 %v2860_v49, %v2861_v40  ;;  %v2838_v48 = vmax.f32 %v2836_v61, %v2837_v6 }
 0x243   :  { %9409 = vst [vmem:[#allocation74_spill] sm:$0xff] %v7109_v30  ;;  %v2410_v46 = vrot.slane %v2409_v23, 1  ;;  %v2868_v11 = vrot.slane %v2867_v0, 4  ;;  %v2874_v36 = vsel %vm1564_vm0, %v1018_v60, -inf  ;;  %v7113_v15 = vsel %vm3357_vm1, %v2831_v55, -inf }
 0x244   :  { %v2416_v25 = vmax.f32 %v2414_v62, %v2415_v24  ;;  %v2856_v9 = vrot.slane %v2855_v21, 2  ;;  %v762_v3 = vcombine.high %v754_v14, %v754_v14  ;;  %v2845_v59 = vmax.f32 %v2843_v39, %v2844_v8 }
 0x245   :  { %v2852_v26 = vmax.f32 %v2850_v51, %v2851_v16  ;;  %v2424_v12 = vrot.slane %v2423_v63, 1  ;;  %v761_v4 = vrot.slane %v747_v38, %v5986_v10  ;;  %v2430_v43 = vmax.f32 %v2428_v2, %v2429_v44 }
 0x246   :  { %v2863_v30 = vrot.slane %v2862_v56, 2  ;;  %v2875_v49 = vrot.slane %v2874_v36, 4  ;;  %v2433_v61 = vsel %vm1564_vm0, %v754_v14, -inf  ;;  %v7118_v40 = vsel %vm3357_vm1, %v2838_v48, -inf }
 0x247   :  { %v2411_v6 = vmax.f32 %v2409_v23, %v2410_v46  ;;  %v2869_v55 = vmax.f32 %v2867_v0, %v2868_v11  ;;  %v1026_v62 = vrot.slane %v123_v53, %v5986_v10  ;;  %v2417_v60 = vrot.slane %v2416_v25, 1 }
 0x248   :  { %v2857_v24 = vmax.f32 %v2855_v21, %v2856_v9  ;;  %v2440_v39 = vsel %vm1564_vm0, %v762_v3, -inf  ;;  %v1019_v51 = vcombine.high %v123_v53, %v123_v53  ;;  %v7123_v8 = vsel %vm3357_vm1, %v2845_v59, -inf }
 0x249   :  { %v2425_v2 = vmax.f32 %v2423_v63, %v2424_v12  ;;  %v763_v16 = vcombine.high %v761_v4, %v761_v4  ;;  %v2434_v38 = vrot.slane %v2433_v61, 4  ;;  %v2431_v44 = vrot.slane %v2430_v43, 1 }
 0x24a   :  { %v2864_v14 = vmax.f32 %v2862_v56, %v2863_v30  ;;  %v2876_v54 = vmax.f32 %v2874_v36, %v2875_v49  ;;  %v2447_v48 = vsel %vm1564_vm0, %v761_v4, -inf  ;;  %v7127_v23 = vsel %vm3357_vm1, %v2852_v26, -inf }
 0x24b   :  { %v2870_v0 = vrot.slane %v2869_v55, 2  ;;  %v2441_v46 = vrot.slane %v2440_v39, 4  ;;  %v1034_v21 = vcombine.high %v1026_v62, %v1026_v62  ;;  %v2418_v11 = vmax.f32 %v2416_v25, %v2417_v60 }
 0x24c   :  { %v3527_v9 = vsel %vm3357_vm1, %v2411_v6, -inf  ;;  %v2858_v3 = vrot.slane %v2857_v24, 1  ;;  %v1033_v53 = vrot.slane %v1019_v51, %v5986_v10  ;;  %v7132_v63 = vsel %vm3357_vm1, %v2425_v2, -inf }
 0x24d   :  { %v2435_v59 = vmax.f32 %v2433_v61, %v2434_v38  ;;  %v2448_v30 = vrot.slane %v2447_v48, 4  ;;  %v2454_v56 = vsel %vm1564_vm0, %v763_v16, -inf  ;;  %v2432_v36 = vmax.f32 %v2430_v43, %v2431_v44 }
 0x24e   :  { %v2865_v12 = vrot.slane %v2864_v14, 1  ;;  %v2877_v26 = vrot.slane %v2876_v54, 2  ;;  %v2881_v4 = vsel %vm1564_vm0, %v1026_v62, -inf  ;;  %v3528_v49 = vmax.f32 %v7061_v28, %v3527_v9 }
 0x24f   :  { %v2871_v25 = vmax.f32 %v2869_v55, %v2870_v0  ;;  %v2442_v60 = vmax.f32 %v2440_v39, %v2441_v46  ;;  %v2888_v6 = vsel %vm1564_vm0, %v1034_v21, -inf  ;;  %v2859_v2 = vmax.f32 %v2857_v24, %v2858_v3  ;;  %v41_v0 = vpop.trf.xlu1 }
 0x250   :  { %v2455_v31 = vrot.slane %v2454_v56, 4  ;;  %v2895_v61 = vsel %vm1564_vm0, %v1033_v53, -inf  ;;  %v3530_v16 = vsel %vm3357_vm1, %v2418_v11, -inf  ;;  %v2436_v43 = vrot.slane %v2435_v59, 2 }
 0x251   :  { %v2449_v38 = vmax.f32 %v2447_v48, %v2448_v30  ;;  %v2882_v44 = vrot.slane %v2881_v4, 4  ;;  %v7143_v62 = vsel %vm3357_vm1, %v2432_v36, -inf  ;;  %v2866_v28 = vmax.f32 %v2864_v14, %v2865_v12 }
 0x252   :  { %v2878_v55 = vmax.f32 %v2876_v54, %v2877_v26  ;;  %v2889_v39 = vrot.slane %v2888_v6, 4  ;;  %v2872_v46 = vrot.slane %v2871_v25, 1  ;;  %v2443_v21 = vrot.slane %v2442_v60, 2 }
 0x253   :  { %v2896_v9 = vrot.slane %v2895_v61, 4  ;;  %v227_v24 = vrot.slane %v41_v0, %v5986_v10  ;;  %v3531_v3 = vmax.f32 %v7064_v22, %v3530_v16  ;;  %v3623_v51 = vsel %vm3357_vm1, %v2859_v2, -inf }
 0x254   :  { %v2456_v11 = vmax.f32 %v2454_v56, %v2455_v31  ;;  %v220_v33 = vcombine.high %v41_v0, %v41_v0  ;;  %v2437_v48 = vmax.f32 %v2435_v59, %v2436_v43  ;;  %v2450_v30 = vrot.slane %v2449_v38, 2 }
 0x255   :  { %v1035_v27 = vcombine.high %v1033_v53, %v1033_v53  ;;  %v2883_v36 = vmax.f32 %v2881_v4, %v2882_v44  ;;  %v2879_v14 = vrot.slane %v2878_v55, 1  ;;  %v3626_v12 = vsel %vm3357_vm1, %v2866_v28, -inf }
 0x256   :  { %v2890_v26 = vmax.f32 %v2888_v6, %v2889_v39  ;;  %v2873_v7 = vmax.f32 %v2871_v25, %v2872_v46  ;;  %v2444_v34 = vmax.f32 %v2442_v60, %v2443_v21  ;;  %v2897_v47 = vmax.f32 %v2895_v61, %v2896_v9 }
 0x257   :  { %v235_v18 = vcombine.high %v227_v24, %v227_v24  ;;  %v3926_v22 = vsel %vm9260_vm2, %v3531_v3, %v3528_v49  ;;  %v3624_v31 = vmax.f32 %v7079_v42, %v3623_v51  ;;  %v2457_v56 = vrot.slane %v2456_v11, 2  ;;  %v42_v51 = vpop.trf.xlu1 }
 0x258   :  { %v234_v59 = vrot.slane %v220_v33, %v5986_v10  ;;  %v2438_v53 = vrot.slane %v2437_v48, 1  ;;  %v2451_v4 = vmax.f32 %v2449_v38, %v2450_v30  ;;  %v2884_v2 = vrot.slane %v2883_v36, 2 }
 0x259   :  { %v2902_v16 = vsel %vm1564_vm0, %v1035_v27, -inf  ;;  %v2880_v43 = vmax.f32 %v2878_v55, %v2879_v14  ;;  %v3627_v44 = vmax.f32 %v7089_v52, %v3626_v12  ;;  %v2891_v6 = vrot.slane %v2890_v26, 2 }
 0x25a   :  { %v1565_v25 = vsel %vm1564_vm0, %v227_v24, -inf  ;;  %v3629_v60 = vsel %vm3357_vm1, %v2873_v7, -inf  ;;  %v2445_v61 = vrot.slane %v2444_v34, 1  ;;  %v2898_v49 = vrot.slane %v2897_v47, 2 }
 0x25b   :  { %v1572_v42 = vsel %vm1564_vm0, %v235_v18, -inf  ;;  %v2458_v28 = vmax.f32 %v2456_v11, %v2457_v56  ;;  %v2903_v33 = vrot.slane %v2902_v16, 4  ;;  %v236_v39 = vcombine.high %v234_v59, %v234_v59 }
 0x25c   :  { %v1579_v38 = vsel %vm1564_vm0, %v234_v59, -inf  ;;  %v2439_v0 = vmax.f32 %v2437_v48, %v2438_v53  ;;  %v2452_v27 = vrot.slane %v2451_v4, 1  ;;  %v2885_v55 = vmax.f32 %v2883_v36, %v2884_v2 }
 0x25d   :  { %v1566_v46 = vrot.slane %v1565_v25, 4  ;;  %v3630_v52 = vmax.f32 %v7084_v32, %v3629_v60  ;;  %v7162_v21 = vsel %vm3357_vm1, %v2880_v43, -inf  ;;  %v2892_v7 = vmax.f32 %v2890_v26, %v2891_v6 }
 0x25e   :  { %v1573_v9 = vrot.slane %v1572_v42, 4  ;;  %v3954_v24 = vsel %vm9260_vm2, %v3627_v44, %v3624_v31  ;;  %v2446_v18 = vmax.f32 %v2444_v34, %v2445_v61  ;;  %v2899_v3 = vmax.f32 %v2897_v47, %v2898_v49  ;;  %v43_v31 = vpop.trf.xlu1 }
 0x25f   :  { %v1580_v11 = vrot.slane %v1579_v38, 4  ;;  %v9410_v30 = vmax.f32 %v7067_v57, %v7132_v63  ;;  %v2459_v36 = vrot.slane %v2458_v28, 1  ;;  %v2904_v14 = vmax.f32 %v2902_v16, %v2903_v33 }
 0x260   :  { %v1586_v32 = vsel %vm1564_vm0, %v236_v39, -inf  ;;  %v2453_v12 = vmax.f32 %v2451_v4, %v2452_v27  ;;  %v7173_v56 = vsel %vm3357_vm1, %v2439_v0, -inf  ;;  %v2886_v26 = vrot.slane %v2885_v55, 1 }
 0x261   :  { %v7169_v48 = vsel %vm3872_vm3, %v9410_v30, %v3926_v22  ;;  %v1567_v59 = vmax.f32 %v1565_v25, %v1566_v46  ;;  %v7178_v47 = vsel %vm3872_vm3, %v3630_v52, %v3954_v24  ;;  %v2893_v57 = vrot.slane %v2892_v7, 1 }
 0x262   :  { %v1574_v63 = vmax.f32 %v1572_v42, %v1573_v9  ;;  %v7181_v22 = vsel %vm3357_vm1, %v2446_v18, -inf  ;;  %v2900_v53 = vrot.slane %v2899_v3, 1  ;;  %v1581_v2 = vmax.f32 %v1579_v38, %v1580_v11  ;;  %v7192_v52 = vpop.trf.xlu1 }
 0x263   :  { %v1587_v4 = vrot.slane %v1586_v32, 4  ;;  %v2460_v16 = vmax.f32 %v2458_v28, %v2459_v36  ;;  %v2905_v44 = vrot.slane %v2904_v14, 2  ;;  %v254_v6 = vcombine.high %v43_v31, %v43_v31 }
 0x264   :  { %v7186_v25 = vsel %vm3357_vm1, %v2453_v12, -inf  ;;  %v2887_v60 = vmax.f32 %v2885_v55, %v2886_v26  ;;  %v1568_v61 = vrot.slane %v1567_v59, 2  ;;  %v244_v49 = vrot.slane %v42_v51, %v5986_v10 }
 0x265   :  { %9411 = vst [vmem:[#allocation75_spill] sm:$0xff] %v7186_v25  ;;  %v2894_v33 = vmax.f32 %v2892_v7, %v2893_v57  ;;  %v1575_v39 = vrot.slane %v1574_v63, 2  ;;  %v237_v38 = vcombine.high %v42_v51, %v42_v51  ;;  %v2901_v0 = vmax.f32 %v2899_v3, %v2900_v53 }
 0x266   :  { %v1582_v28 = vrot.slane %v1581_v2, 2  ;;  %v1588_v27 = vmax.f32 %v1586_v32, %v1587_v4  ;;  %v261_v46 = vrot.slane %v43_v31, %v5986_v10  ;;  %v7197_v55 = vsel %vm3357_vm1, %v2460_v16, -inf }
 0x267   :  { %9412 = vst [vmem:[#allocation76_spill] sm:$0xff] %v7197_v55  ;;  %v2906_v24 = vmax.f32 %v2904_v14, %v2905_v44  ;;  %v268_v18 = vrot.slane %v254_v6, %v5986_v10  ;;  %v7201_v7 = vsel %vm3357_vm1, %v2887_v60, -inf  ;;  %v1569_v51 = vmax.f32 %v1567_v59, %v1568_v61  ;;  %v45_v61 = vpop.trf.xlu1 }
 0x268   :  { %v252_v3 = vcombine.high %v244_v49, %v244_v49  ;;  %v1621_v11 = vsel %vm1564_vm0, %v261_v46, -inf  ;;  %v7205_v30 = vsel %vm3357_vm1, %v2894_v33, -inf  ;;  %v1576_v36 = vmax.f32 %v1574_v63, %v1575_v39 }
 0x269   :  { %v251_v32 = vrot.slane %v237_v38, %v5986_v10  ;;  %v1593_v12 = vsel %vm1564_vm0, %v244_v49, -inf  ;;  %v7210_v26 = vsel %vm3357_vm1, %v2901_v0, -inf  ;;  %v1583_v14 = vmax.f32 %v1581_v2, %v1582_v28 }
 0x26a   :  { %v1589_v31 = vrot.slane %v1588_v27, 2  ;;  %v269_v57 = vcombine.high %v261_v46, %v261_v46  ;;  %v2907_v53 = vrot.slane %v2906_v24, 1  ;;  %v270_v4 = vcombine.high %v268_v18, %v268_v18 }
 0x26b   :  { %v1622_v16 = vrot.slane %v1621_v11, 4  ;;  %v1570_v63 = vrot.slane %v1569_v51, 1  ;;  %v1594_v6 = vrot.slane %v1593_v12, 4  ;;  %v1600_v60 = vsel %vm1564_vm0, %v252_v3, -inf }
 0x26c   :  { %v1577_v2 = vrot.slane %v1576_v36, 1  ;;  %v253_v33 = vcombine.high %v251_v32, %v251_v32  ;;  %v288_v39 = vcombine.high %v45_v61, %v45_v61  ;;  %v1584_v38 = vrot.slane %v1583_v14, 1 }
 0x26d   :  { %v1590_v0 = vmax.f32 %v1588_v27, %v1589_v31  ;;  %v1607_v28 = vsel %vm1564_vm0, %v251_v32, -inf  ;;  %v1628_v46 = vsel %vm1564_vm0, %v269_v57, -inf  ;;  %v1601_v9 = vrot.slane %v1600_v60, 4 }
 0x26e   :  { %v1623_v42 = vmax.f32 %v1621_v11, %v1622_v16  ;;  %v1635_v43 = vsel %vm1564_vm0, %v268_v18, -inf  ;;  %v1642_v54 = vsel %vm1564_vm0, %v270_v4, -inf  ;;  %v2908_v3 = vmax.f32 %v2906_v24, %v2907_v53 }
 0x26f   :  { %v1571_v44 = vmax.f32 %v1569_v51, %v1570_v63  ;;  %v1595_v59 = vmax.f32 %v1593_v12, %v1594_v6  ;;  %v295_v49 = vrot.slane %v45_v61, %v5986_v10  ;;  %v1578_v34 = vmax.f32 %v1576_v36, %v1577_v2 }
 0x270   :  { %v1608_v25 = vrot.slane %v1607_v28, 4  ;;  %v1629_v41 = vrot.slane %v1628_v46, 4  ;;  %v302_v27 = vrot.slane %v288_v39, %v5986_v10  ;;  %v1585_v31 = vmax.f32 %v1583_v14, %v1584_v38 }
 0x271   :  { %v1614_v32 = vsel %vm1564_vm0, %v253_v33, -inf  ;;  %v1636_v57 = vrot.slane %v1635_v43, 4  ;;  %v1643_v55 = vrot.slane %v1642_v54, 4  ;;  %v1591_v11 = vrot.slane %v1590_v0, 1 }
 0x272   :  { %v1602_v16 = vmax.f32 %v1600_v60, %v1601_v9  ;;  %v1624_v18 = vrot.slane %v1623_v42, 2  ;;  %v1677_v4 = vsel %vm1564_vm0, %v295_v49, -inf  ;;  %v7228_v24 = vsel %vm3357_vm1, %v2908_v3, -inf }
 0x273   :  { %v7231_v51 = vsel %vm3357_vm1, %v1571_v44, -inf  ;;  %v1596_v36 = vrot.slane %v1595_v59, 2  ;;  %v303_v12 = vcombine.high %v295_v49, %v295_v49  ;;  %v7234_v53 = vsel %vm3357_vm1, %v1578_v34, -inf }
 0x274   :  { %9413 = vst [vmem:[#allocation77_spill] sm:$0xff] %v7231_v51  ;;  %9414 = vst [vmem:[#allocation78_spill] sm:$0xff] %v7234_v53  ;;  %v1609_v14 = vmax.f32 %v1607_v28, %v1608_v25  ;;  %v1630_v63 = vmax.f32 %v1628_v46, %v1629_v41  ;;  %v304_v6 = vcombine.high %v302_v27, %v302_v27  ;;  %v1615_v61 = vrot.slane %v1614_v32, 4  ;;  %v46_v25 = vpop.trf.xlu1 }
 0x275   :  { %v1637_v2 = vmax.f32 %v1635_v43, %v1636_v57  ;;  %v1644_v9 = vmax.f32 %v1642_v54, %v1643_v55  ;;  %v1678_v60 = vrot.slane %v1677_v4, 4  ;;  %v1592_v33 = vmax.f32 %v1590_v0, %v1591_v11 }
 0x276   :  { %v7237_v39 = vsel %vm3357_vm1, %v1585_v31, -inf  ;;  %v1603_v38 = vrot.slane %v1602_v16, 2  ;;  %v1625_v3 = vmax.f32 %v1623_v42, %v1624_v18  ;;  %v7239_v44 = vmax.f32 %v1595_v59, %v1596_v36 }
 0x277   :  { %9415 = vst [vmem:[#allocation79_spill] sm:$0xff] %v7237_v39  ;;  %v271_v49 = vcombine.high %v7192_v52, %v7192_v52  ;;  %v278_v34 = vrot.slane %v7192_v52, %v5986_v10  ;;  %v1684_v41 = vsel %vm1564_vm0, %v303_v12, -inf  ;;  %v1610_v43 = vrot.slane %v1609_v14, 2 }
 0x278   :  { %9416 = vst [vmem:[#allocation80_spill] sm:$0xff] %v7239_v44  ;;  %v1631_v54 = vrot.slane %v1630_v63, 2  ;;  %v1691_v55 = vsel %vm1564_vm0, %v302_v27, -inf  ;;  %v1698_v0 = vsel %vm1564_vm0, %v304_v6, -inf  ;;  %v7248_v28 = vmax.f32 %v1614_v32, %v1615_v61 }
 0x279   :  { %v1638_v42 = vrot.slane %v1637_v2, 2  ;;  %v1645_v59 = vrot.slane %v1644_v9, 2  ;;  %v1679_v46 = vmax.f32 %v1677_v4, %v1678_v60  ;;  %v7251_v31 = vsel %vm3357_vm1, %v1592_v33, -inf }
 0x27a   :  { %9417 = vst [vmem:[#allocation81_spill] sm:$0xff] %v7248_v28  ;;  %9418 = vst [vmem:[#allocation82_spill] sm:$0xff] %v7251_v31  ;;  %v7253_v57 = vmax.f32 %v1602_v16, %v1603_v38  ;;  %v1626_v52 = vrot.slane %v1625_v3, 1  ;;  %v1685_v11 = vrot.slane %v1684_v41, 4  ;;  %v286_v36 = vcombine.high %v278_v34, %v278_v34  ;;  %v47_v16 = vpop.trf.xlu1 }
 0x27b   :  { %v1692_v12 = vrot.slane %v1691_v55, 4  ;;  %v1699_v39 = vrot.slane %v1698_v0, 4  ;;  %v7256_v27 = vmax.f32 %v1609_v14, %v1610_v43  ;;  %v1632_v6 = vmax.f32 %v1630_v63, %v1631_v54 }
 0x27c   :  { %9419 = vst [vmem:[#allocation83_spill] sm:$0xff] %v7253_v57  ;;  %v285_v32 = vrot.slane %v271_v49, %v5986_v10  ;;  %v1649_v61 = vsel %vm1564_vm0, %v278_v34, -inf  ;;  %v1639_v4 = vmax.f32 %v1637_v2, %v1638_v42  ;;  %v1646_v60 = vmax.f32 %v1644_v9, %v1645_v59 }
 0x27d   :  { %9420 = vst [vmem:[#allocation84_spill] sm:$0xff] %v7256_v27  ;;  %v1680_v33 = vrot.slane %v1679_v46, 2  ;;  %v305_v31 = vcombine.high %v46_v25, %v46_v25  ;;  %v1627_v53 = vmax.f32 %v1625_v3, %v1626_v52  ;;  %v1686_v51 = vmax.f32 %v1684_v41, %v1685_v11 }
 0x27e   :  { %v312_v18 = vrot.slane %v46_v25, %v5986_v10  ;;  %v1650_v44 = vrot.slane %v1649_v61, 4  ;;  %v7263_v14 = vsel %vm1564_vm0, %v286_v36, -inf  ;;  %v1693_v63 = vmax.f32 %v1691_v55, %v1692_v12  ;;  %v7277_v12 = vpop.trf.xlu1 }
 0x27f   :  { %v1700_v43 = vmax.f32 %v1698_v0, %v1699_v39  ;;  %v1633_v34 = vrot.slane %v1632_v6, 1  ;;  %v287_v2 = vcombine.high %v285_v32, %v285_v32  ;;  %v7267_v9 = vsel %vm1564_vm0, %v285_v32, -inf }
 0x280   :  { %v1640_v54 = vrot.slane %v1639_v4, 1  ;;  %v1647_v42 = vrot.slane %v1646_v60, 1  ;;  %v1681_v59 = vmax.f32 %v1679_v46, %v1680_v33  ;;  %v319_v3 = vrot.slane %v305_v31, %v5986_v10 }
 0x281   :  { %v1657_v41 = vrot.slane %v7263_v14, 4  ;;  %v1687_v25 = vrot.slane %v1686_v51, 2  ;;  %v320_v52 = vcombine.high %v312_v18, %v312_v18  ;;  %v1705_v11 = vsel %vm1564_vm0, %v312_v18, -inf }
 0x282   :  { %v7273_v39 = vsel %vm3357_vm1, %v1627_v53, -inf  ;;  %v7275_v55 = vmax.f32 %v1649_v61, %v1650_v44  ;;  %v1694_v0 = vrot.slane %v1693_v63, 2  ;;  %v1701_v36 = vrot.slane %v1700_v43, 2 }
 0x283   :  { %9421 = vst [vmem:[#allocation85_spill] sm:$0xff] %v7273_v39  ;;  %v7279_v32 = vmax.f32 %v1632_v6, %v1633_v34  ;;  %v1664_v46 = vrot.slane %v7267_v9, 4  ;;  %v7283_v31 = vsel %vm1564_vm0, %v287_v2, -inf  ;;  %v9425_v18 = vmax.f32 %v7095_v50, %v7162_v21 }
 0x284   :  { %9422 = vst [vmem:[#allocation86_spill] sm:$0xff] %v7275_v55  ;;  %9424 = vst [vmem:[#allocation88_spill] sm:$0xff] %v7283_v31  ;;  %v1682_v33 = vrot.slane %v1681_v59, 1  ;;  %v321_v44 = vcombine.high %v319_v3, %v319_v3  ;;  %v1706_v61 = vrot.slane %v1705_v11, 4  ;;  %v3645_v49 = vmax.f32 %v7127_v23, %v7228_v24 }
 0x285   :  { %9423 = vst [vmem:[#allocation87_spill] sm:$0xff] %v7279_v32  ;;  %v3956_v53 = vsel %vm3874_vm4, %v9425_v18, %v7178_v47  ;;  %v1688_v38 = vmax.f32 %v1686_v51, %v1687_v25  ;;  %v1712_v6 = vsel %vm1564_vm0, %v320_v52, -inf  ;;  %v1719_v34 = vsel %vm1564_vm0, %v319_v3, -inf }
 0x286   :  { %v9426_v2 = vmax.f32 %v7113_v15, %v7201_v7  ;;  %v1695_v28 = vmax.f32 %v1693_v63, %v1694_v0  ;;  %v1702_v50 = vmax.f32 %v1700_v43, %v1701_v36  ;;  %v322_v21 = vcombine.high %v47_v16, %v47_v16 }
 0x287   :  { %v9427_v47 = vmax.f32 %v7118_v40, %v7205_v30  ;;  %v7302_v27 = vmax.f32 %v1639_v4, %v1640_v54  ;;  %v7304_v23 = vmax.f32 %v1646_v60, %v1647_v42  ;;  %v329_v24 = vrot.slane %v47_v16, %v5986_v10  ;;  %v49_v40 = vpop.trf.xlu1 }
 0x288   :  { %v3957_v57 = vsel %vm3876_vm5, %v9426_v2, %v3956_v53  ;;  %v9430_v51 = vmax.f32 %v7123_v8, %v7210_v26  ;;  %v1707_v63 = vmax.f32 %v1705_v11, %v1706_v61  ;;  %v1713_v43 = vrot.slane %v1712_v6, 4 }
 0x289   :  { %v3958_v18 = vsel %vm3878_vm6, %v9427_v47, %v3957_v57  ;;  %9428 = vst [vmem:[#allocation89_spill] sm:$0xff] %v7302_v27  ;;  %9429 = vst [vmem:[#allocation90_spill] sm:$0xff] %v7304_v23  ;;  %v1683_v30 = vmax.f32 %v1681_v59, %v1682_v33  ;;  %v1689_v57 = vrot.slane %v1688_v38, 1  ;;  %v1720_v4 = vrot.slane %v1719_v34, 4 }
 0x28a   :  { %v3959_v15 = vsel %vm3880_vm7, %v9430_v51, %v3958_v18  ;;  %v1696_v60 = vrot.slane %v1695_v28, 1  ;;  %v1703_v42 = vrot.slane %v1702_v50, 1  ;;  %v1726_v16 = vsel %vm1564_vm0, %v321_v44, -inf }
 0x28b   :  { %v3960_v3 = vsel %vm9262_vm8, %v3645_v49, %v3959_v15  ;;  %v336_v25 = vrot.slane %v322_v21, %v5986_v10  ;;  %v337_v8 = vcombine.high %v329_v24, %v329_v24  ;;  %v356_v11 = vcombine.high %v49_v40, %v49_v40  ;;  %v7329_v51 = vpop.trf.xlu1 }
 0x28c   :  { %v4002_v54 = vrot.slane %v3960_v3, 7  ;;  %v1708_v53 = vrot.slane %v1707_v63, 2  ;;  %v1714_v33 = vmax.f32 %v1712_v6, %v1713_v43  ;;  %v1733_v61 = vsel %vm1564_vm0, %v329_v24, -inf }
 0x28d   :  { %v363_v44 = vrot.slane %v49_v40, %v5986_v10  ;;  %v1690_v2 = vmax.f32 %v1688_v38, %v1689_v57  ;;  %v1721_v21 = vmax.f32 %v1719_v34, %v1720_v4  ;;  %v7332_v15 = vmax.f32 %v7263_v14, %v1657_v41 }
 0x28e   :  { %v7316_v26 = vsel %vm9263_vm9, 0.0, %v4002_v54  ;;  %v4054_v52 = vsel %vm9263_vm9, %v4002_v54, 0.0  ;;  %v7335_v3 = vmax.f32 %v7267_v9, %v1664_v46  ;;  %v1727_v6 = vrot.slane %v1726_v16, 4 }
 0x28f   :  { %9431 = vst [vmem:[#allocation91_spill] sm:$0xff] %v7316_v26  ;;  %v4169_v49 = vrot.slane %v7316_v26, 2  ;;  %v4170_v0 = vrot.slane %v4054_v52, 2  ;;  %v4123_v59 = vrot.slane %v7316_v26, 1  ;;  %v4124_v36 = vrot.slane %v4054_v52, 1  ;;  %9432 = vst [vmem:[#allocation92_spill] sm:$0xff] %v7332_v15 }
 0x290   :  { %9433 = vst [vmem:[#allocation93_spill] sm:$0xff] %v7335_v3  ;;  %v338_v24 = vcombine.high %v336_v25, %v336_v25  ;;  %v1734_v38 = vrot.slane %v1733_v61, 4  ;;  %v1740_v34 = vsel %vm1564_vm0, %v337_v8, -inf  ;;  %v1747_v43 = vsel %vm1564_vm0, %v336_v25, -inf }
 0x291   :  { %v7324_v47 = vsel %vm9261_vm11, %v4169_v49, %v4170_v0  ;;  %v7327_v18 = vsel %vm4089_vm10, %v4123_v59, %v4124_v36  ;;  %v370_v40 = vrot.slane %v356_v11, %v5986_v10  ;;  %v1697_v14 = vmax.f32 %v1695_v28, %v1696_v60  ;;  %v7360_v60 = vpop.trf.xlu1 }
 0x292   :  { %4405 = vrot.lane.b32.xlu0 %v7324_v47, %s5935_s24  ;;  %4219 = vrot.lane.b32.xlu1 %v7327_v18, %s5932_s0  ;;  %v1704_v41 = vmax.f32 %v1702_v50, %v1703_v42  ;;  %v7345_v9 = vsel %vm3357_vm1, %v1683_v30, -inf  ;;  %v371_v46 = vcombine.high %v363_v44, %v363_v44  ;;  %v7348_v57 = vsel %vm3357_vm1, %v1690_v2, -inf }
 0x293   :  { %9434 = vst [vmem:[#allocation94_spill] sm:$0xff] %v7345_v9  ;;  %9435 = vst [vmem:[#allocation95_spill] sm:$0xff] %v7348_v57  ;;  %v1709_v4 = vmax.f32 %v1707_v63, %v1708_v53  ;;  %v1715_v54 = vrot.slane %v1714_v33, 2  ;;  %v1722_v52 = vrot.slane %v1721_v21, 2  ;;  %v1741_v49 = vrot.slane %v1740_v34, 4 }
 0x294   :  { %v1748_v0 = vrot.slane %v1747_v43, 4  ;;  %v1754_v8 = vsel %vm1564_vm0, %v338_v24, -inf  ;;  %v1789_v25 = vsel %vm1564_vm0, %v363_v44, -inf  ;;  %v7356_v28 = vmax.f32 %v1726_v16, %v1727_v6 }
 0x295   :  { %v1735_v50 = vmax.f32 %v1733_v61, %v1734_v38  ;;  %v346_v63 = vrot.slane %v7277_v12, %v5986_v10  ;;  %v372_v30 = vcombine.high %v370_v40, %v370_v40  ;;  %v7363_v42 = vsel %vm3357_vm1, %v1697_v14, -inf }
 0x296   :  { %4453 = vrot.lane.b32.xlu0 %v6922_v1, %s5938_s26  ;;  %4264 = vrot.lane.b32.xlu1 %v7324_v47, %s5933_s22  ;;  %9436 = vst [vmem:[#allocation96_spill] sm:$0xff] %v7356_v28  ;;  %9437 = vst [vmem:[#allocation97_spill] sm:$0xff] %v7363_v42  ;;  %v7366_v11 = vsel %vm3357_vm1, %v1704_v41, -inf  ;;  %v339_v59 = vcombine.high %v7277_v12, %v7277_v12  ;;  %v1796_v36 = vsel %vm1564_vm0, %v371_v46, -inf  ;;  %v1755_v53 = vrot.slane %v1754_v8, 4 }
 0x297   :  { %9438 = vst [vmem:[#allocation98_spill] sm:$0xff] %v7366_v11  ;;  %v7371_v16 = vmax.f32 %v1714_v33, %v1715_v54  ;;  %v1790_v61 = vrot.slane %v1789_v25, 4  ;;  %v1803_v44 = vsel %vm1564_vm0, %v370_v40, -inf  ;;  %v1710_v2 = vrot.slane %v1709_v4, 1 }
 0x298   :  { %v7374_v6 = vmax.f32 %v1721_v21, %v1722_v52  ;;  %v1742_v24 = vmax.f32 %v1740_v34, %v1741_v49  ;;  %v1749_v38 = vmax.f32 %v1747_v43, %v1748_v0  ;;  %v1736_v12 = vrot.slane %v1735_v50, 2  ;;  %v7388_v0 = vpop.trf.xlu1 }
 0x299   :  { %9439 = vst [vmem:[#allocation99_spill] sm:$0xff] %v7371_v16  ;;  %v1761_v14 = vsel %vm1564_vm0, %v346_v63, -inf  ;;  %v1797_v33 = vrot.slane %v1796_v36, 4  ;;  %v1810_v41 = vsel %vm1564_vm0, %v372_v30, -inf  ;;  %v353_v46 = vrot.slane %v339_v59, %v5986_v10 }
 0x29a   :  { %9440 = vst [vmem:[#allocation100_spill] sm:$0xff] %v7374_v6  ;;  %4498 = vrot.lane.b32.xlu0 %v6935_v29, %s5939_s27  ;;  %4311 = vrot.lane.b32.xlu1 %v6922_v1, %s5934_s23  ;;  %v354_v40 = vcombine.high %v346_v63, %v346_v63  ;;  %v1804_v54 = vrot.slane %v1803_v44, 4  ;;  %v373_v21 = vcombine.high %v7329_v51, %v7329_v51  ;;  %v1743_v7 = vrot.slane %v1742_v24, 2 }
 0x29b   :  { %v1756_v43 = vmax.f32 %v1754_v8, %v1755_v53  ;;  %v1791_v52 = vmax.f32 %v1789_v25, %v1790_v61  ;;  %v380_v49 = vrot.slane %v7329_v51, %v5986_v10  ;;  %v1750_v23 = vrot.slane %v1749_v38, 2 }
 0x29c   :  { %v1762_v27 = vrot.slane %v1761_v14, 4  ;;  %v1811_v30 = vrot.slane %v1810_v41, 4  ;;  %v7394_v63 = vmax.f32 %v1709_v4, %v1710_v2  ;;  %v1737_v25 = vmax.f32 %v1735_v50, %v1736_v12  ;;  %v7401_v12 = vpop.trf.xlu1 }
 0x29d   :  { %v1798_v59 = vmax.f32 %v1796_v36, %v1797_v33  ;;  %v355_v53 = vcombine.high %v353_v46, %v353_v46  ;;  %v1768_v51 = vsel %vm1564_vm0, %v354_v40, -inf  ;;  %v1805_v61 = vmax.f32 %v1803_v44, %v1804_v54 }
 0x29e   :  { %4543 = vrot.lane.b32.xlu0 %v6969_v13, %s5940_s28  ;;  %4359 = vrot.lane.b32.xlu1 %v6935_v29, %s5936_s25  ;;  %9441 = vst [vmem:[#allocation101_spill] sm:$0xff] %v7394_v63  ;;  %v387_v34 = vrot.slane %v373_v21, %v5986_v10  ;;  %v1757_v39 = vrot.slane %v1756_v43, 2  ;;  %v1775_v3 = vsel %vm1564_vm0, %v353_v46, -inf  ;;  %v1792_v55 = vrot.slane %v1791_v52, 2 }
 0x29f   :  { %v1817_v13 = vsel %vm1564_vm0, %v380_v49, -inf  ;;  %v1744_v32 = vmax.f32 %v1742_v24, %v1743_v7  ;;  %v1751_v29 = vmax.f32 %v1749_v38, %v1750_v23  ;;  %v1763_v4 = vmax.f32 %v1761_v14, %v1762_v27 }
 0x2a0   :  { %v1812_v2 = vmax.f32 %v1810_v41, %v1811_v30  ;;  %v1738_v15 = vrot.slane %v1737_v25, 1  ;;  %v1769_v8 = vrot.slane %v1768_v51, 4  ;;  %v1799_v50 = vrot.slane %v1798_v59, 2 }
 0x2a1   :  { %v388_v36 = vcombine.high %v380_v49, %v380_v49  ;;  %v1806_v33 = vrot.slane %v1805_v61, 2  ;;  %v389_v44 = vcombine.high %v387_v34, %v387_v34  ;;  %v1818_v40 = vrot.slane %v1817_v13, 4 }
 0x2a2   :  { %v1831_v54 = vsel %vm1564_vm0, %v387_v34, -inf  ;;  %v1758_v21 = vmax.f32 %v1756_v43, %v1757_v39  ;;  %v1776_v46 = vrot.slane %v1775_v3, 4  ;;  %v1782_v11 = vsel %vm1564_vm0, %v355_v53, -inf }
 0x2a3   :  { %v1793_v63 = vmax.f32 %v1791_v52, %v1792_v55  ;;  %v1745_v7 = vrot.slane %v1744_v32, 1  ;;  %v1752_v23 = vrot.slane %v1751_v29, 1  ;;  %v1764_v27 = vrot.slane %v1763_v4, 2  ;;  %v7409_v55 = vpop.trf.xlu1 }
 0x2a4   :  { %v1813_v24 = vrot.slane %v1812_v2, 2  ;;  %v1770_v38 = vmax.f32 %v1768_v51, %v1769_v8  ;;  %v1800_v14 = vmax.f32 %v1798_v59, %v1799_v50  ;;  %v1824_v41 = vsel %vm1564_vm0, %v388_v36, -inf }
 0x2a5   :  { %v1832_v49 = vrot.slane %v1831_v54, 4  ;;  %v1739_v30 = vmax.f32 %v1737_v25, %v1738_v15  ;;  %v1807_v31 = vmax.f32 %v1805_v61, %v1806_v33  ;;  %v1819_v42 = vmax.f32 %v1817_v13, %v1818_v40 }
 0x2a6   :  { %v1838_v16 = vsel %vm1564_vm0, %v389_v44, -inf  ;;  %v1759_v34 = vrot.slane %v1758_v21, 1  ;;  %v7407_v39 = vmax.f32 %v1775_v3, %v1776_v46  ;;  %v1783_v43 = vrot.slane %v1782_v11, 4 }
 0x2a7   :  { %v1794_v53 = vrot.slane %v1793_v63, 1  ;;  %v1746_v52 = vmax.f32 %v1744_v32, %v1745_v7  ;;  %v1814_v28 = vmax.f32 %v1812_v2, %v1813_v24  ;;  %v1825_v6 = vrot.slane %v1824_v41, 4 }
 0x2a8   :  { %9442 = vst [vmem:[#allocation102_spill] sm:$0xff] %v7407_v39  ;;  %v390_v8 = vcombine.high %v7360_v60, %v7360_v60  ;;  %v7413_v59 = vmax.f32 %v1751_v29, %v1752_v23  ;;  %v1801_v15 = vrot.slane %v1800_v14, 1  ;;  %v1833_v25 = vmax.f32 %v1831_v54, %v1832_v49 }
 0x2a9   :  { %v1839_v51 = vrot.slane %v1838_v16, 4  ;;  %v7415_v61 = vmax.f32 %v1763_v4, %v1764_v27  ;;  %v1771_v13 = vrot.slane %v1770_v38, 2  ;;  %v1808_v3 = vrot.slane %v1807_v31, 1 }
 0x2aa   :  { %9443 = vst [vmem:[#allocation103_spill] sm:$0xff] %v7413_v59  ;;  %v1820_v50 = vrot.slane %v1819_v42, 2  ;;  %v7417_v36 = vmax.f32 %v1758_v21, %v1759_v34  ;;  %v7420_v33 = vsel %vm3357_vm1, %v1739_v30, -inf  ;;  %v1795_v32 = vmax.f32 %v1793_v63, %v1794_v53  ;;  %v7428_v21 = vpop.trf.xlu1 }
 0x2ab   :  { %9444 = vst [vmem:[#allocation104_spill] sm:$0xff] %v7415_v61  ;;  %9446 = vst [vmem:[#allocation106_spill] sm:$0xff] %v7420_v33  ;;  %v397_v2 = vrot.slane %v7360_v60, %v5986_v10  ;;  %v1815_v44 = vrot.slane %v1814_v28, 1  ;;  %v1826_v40 = vmax.f32 %v1824_v41, %v1825_v6  ;;  %v404_v54 = vrot.slane %v390_v8, %v5986_v10 }
 0x2ac   :  { %9445 = vst [vmem:[#allocation105_spill] sm:$0xff] %v7417_v36  ;;  %v7426_v4 = vmax.f32 %v1782_v11, %v1783_v43  ;;  %v1802_v46 = vmax.f32 %v1800_v14, %v1801_v15  ;;  %v1834_v7 = vrot.slane %v1833_v25, 2  ;;  %v1840_v23 = vmax.f32 %v1838_v16, %v1839_v51  ;;  %v9454_v15 = vld [vmem:[#allocation11_spill] sm:$0xff]  ;;  %v9455_v51 = vld [vmem:[#allocation12_spill] sm:$0xff] }
 0x2ad   :  { %v7433_v63 = vsel %vm3357_vm1, %v1746_v52, -inf  ;;  %v1809_v60 = vmax.f32 %v1807_v31, %v1808_v3  ;;  %v7435_v24 = vmax.f32 %v1819_v42, %v1820_v50  ;;  %v7437_v49 = vmax.f32 %v1770_v38, %v1771_v13  ;;  %v9457_v3 = vld [vmem:[#allocation2_spill] sm:$0xff] }
 0x2ae   :  { %9447 = vst [vmem:[#allocation107_spill] sm:$0xff] %v7426_v4  ;;  %9448 = vst [vmem:[#allocation108_spill] sm:$0xff] %v7433_v63  ;;  %v7440_v6 = vsel %vm3357_vm1, %v1795_v32, -inf  ;;  %v405_v11 = vcombine.high %v397_v2, %v397_v2  ;;  %v1845_v14 = vsel %vm1564_vm0, %v397_v2, -inf  ;;  %v1816_v16 = vmax.f32 %v1814_v28, %v1815_v44  ;;  %v7469_v32 = vpop.trf.xlu1  ;;  %v7471_v2 = vpop.permute.xlu0 %4225 }
 0x2af   :  { %9449 = vst [vmem:[#allocation109_spill] sm:$0xff] %v7437_v49  ;;  %9450 = vst [vmem:[#allocation110_spill] sm:$0xff] %v7440_v6  ;;  %v1827_v41 = vrot.slane %v1826_v40, 2  ;;  %v406_v30 = vcombine.high %v404_v54, %v404_v54  ;;  %v9451_v34 = vmax.f32 %v6873_v37, %v6995_v58  ;;  %v7449_v31 = vsel %vm3357_vm1, %v1802_v46, -inf  ;;  %v9460_v46 = vld [vmem:[#allocation6_spill] sm:$0xff] }
 0x2b0   :  { %9452 = vst [vmem:[#allocation111_spill] sm:$0xff] %v7449_v31  ;;  %v1835_v42 = vmax.f32 %v1833_v25, %v1834_v7  ;;  %v1841_v38 = vrot.slane %v1840_v23, 2  ;;  %v3621_v53 = vmax.f32 %v6972_v20, %v7052_v35  ;;  %v7454_v52 = vsel %vm3357_vm1, %v1809_v60, -inf  ;;  %v9458_v20 = vld [vmem:[#allocation72_spill] sm:$0xff]  ;;  %v9461_v7 = vld [vmem:[#allocation70_spill] sm:$0xff] }
 0x2b1   :  { %v3949_v43 = vsel %vm3874_vm4, %v9451_v34, %v7021_v19  ;;  %9453 = vst [vmem:[#allocation112_spill] sm:$0xff] %v7454_v52  ;;  %v1822_v28 = vrot.slane %v7435_v24, 1  ;;  %v1846_v8 = vrot.slane %v1845_v14, 4  ;;  %v9456_v13 = vmax.f32 %v9454_v15, %v9455_v51 }
 0x2b2   :  { %v1852_v58 = vsel %vm1564_vm0, %v405_v11, -inf  ;;  %v1859_v19 = vsel %vm1564_vm0, %v404_v54, -inf  ;;  %v414_v25 = vrot.slane %v7388_v0, %v5986_v10  ;;  %v9459_v35 = vmax.f32 %v9457_v3, %v9458_v20 }
 0x2b3   :  { %v3950_v37 = vsel %vm3876_vm5, %v9456_v13, %v3949_v43  ;;  %v1866_v44 = vsel %vm1564_vm0, %v406_v30, -inf  ;;  %v9462_v60 = vmax.f32 %v9460_v46, %v9461_v7  ;;  %v424_v54 = vcombine.high %v7401_v12, %v7401_v12  ;;  %v7493_v7 = vpop.permute.xlu0 %4413 }
 0x2b4   :  { %v3951_v50 = vsel %vm3878_vm6, %v9459_v35, %v3950_v37  ;;  %v431_v34 = vrot.slane %v7401_v12, %v5986_v10  ;;  %v7483_v43 = vsel %vm3357_vm1, %v1816_v16, -inf  ;;  %v7485_v15 = vmax.f32 %v1826_v40, %v1827_v41 }
 0x2b5   :  { %v3952_v11 = vsel %vm3880_vm7, %v9462_v60, %v3951_v50  ;;  %9463 = vst [vmem:[#allocation11_spill] sm:$0xff] %v7483_v43  ;;  %v1836_v51 = vrot.slane %v1835_v42, 1  ;;  %v7488_v30 = vmax.f32 %v1840_v23, %v1841_v38  ;;  %v1847_v37 = vmax.f32 %v1845_v14, %v1846_v8  ;;  %v7502_v60 = vpop.permute.xlu1 %4270 }
 0x2b6   :  { %v3953_v13 = vsel %vm9262_vm8, %v3621_v53, %v3952_v11  ;;  %v1853_v3 = vrot.slane %v1852_v58, 4  ;;  %v1860_v35 = vrot.slane %v1859_v19, 4  ;;  %v1867_v50 = vrot.slane %v1866_v44, 4 }
 0x2b7   :  { %9464 = vst [vmem:[#allocation12_spill] sm:$0xff] %v7488_v30  ;;  %v4001_v20 = vrot.slane %v3953_v13, 7  ;;  %v407_v46 = vcombine.high %v7388_v0, %v7388_v0  ;;  %v1873_v12 = vsel %vm1564_vm0, %v414_v25, -inf  ;;  %v438_v23 = vrot.slane %v424_v54, %v5986_v10 }
 0x2b8   :  { %v439_v41 = vcombine.high %v431_v34, %v431_v34  ;;  %v1848_v0 = vrot.slane %v1847_v37, 2  ;;  %v1854_v11 = vmax.f32 %v1852_v58, %v1853_v3  ;;  %v422_v13 = vcombine.high %v414_v25, %v414_v25 }
 0x2b9   :  { %v7496_v40 = vsel %vm9263_vm9, 0.0, %v4001_v20  ;;  %v4053_v16 = vsel %vm9263_vm9, %v4001_v20, 0.0  ;;  %v1901_v27 = vsel %vm1564_vm0, %v431_v34, -inf  ;;  %v1861_v29 = vmax.f32 %v1859_v19, %v1860_v35 }
 0x2ba   :  { %v4166_v14 = vrot.slane %v7496_v40, 2  ;;  %v4167_v38 = vrot.slane %v4053_v16, 2  ;;  %v4120_v53 = vrot.slane %v7496_v40, 1  ;;  %v4121_v8 = vrot.slane %v4053_v16, 1 }
 0x2bb   :  { %v421_v33 = vrot.slane %v407_v46, %v5986_v10  ;;  %v1868_v9 = vmax.f32 %v1866_v44, %v1867_v50  ;;  %v1874_v36 = vrot.slane %v1873_v12, 4  ;;  %v440_v58 = vcombine.high %v438_v23, %v438_v23  ;;  %v7523_v46 = vpop.permute.xlu1 %4317  ;;  %v7525_v44 = vpop.permute.xlu0 %4445 }
 0x2bc   :  { %v7507_v20 = vsel %vm9261_vm11, %v4166_v14, %v4167_v38  ;;  %v7510_v54 = vsel %vm4089_vm10, %v4120_v53, %v4121_v8  ;;  %v1908_v25 = vsel %vm1564_vm0, %v439_v41, -inf  ;;  %v7518_v19 = vmax.f32 %v7435_v24, %v1822_v28 }
 0x2bd   :  { %9465 = vst [vmem:[#allocation2_spill] sm:$0xff] %v7507_v20  ;;  %4403 = vrot.lane.b32.xlu0 %v7507_v20, %s5935_s24  ;;  %4217 = vrot.lane.b32.xlu1 %v7510_v54, %s5932_s0  ;;  %v1829_v34 = vrot.slane %v7485_v15, 1  ;;  %v7521_v3 = vmax.f32 %v1835_v42, %v1836_v51  ;;  %v1902_v35 = vrot.slane %v1901_v27, 4  ;;  %v1849_v50 = vmax.f32 %v1847_v37, %v1848_v0 }
 0x2be   :  { %9466 = vst [vmem:[#allocation72_spill] sm:$0xff] %v7518_v19  ;;  %v1855_v16 = vrot.slane %v1854_v11, 2  ;;  %v1880_v14 = vsel %vm1564_vm0, %v422_v13, -inf  ;;  %v1915_v38 = vsel %vm1564_vm0, %v438_v23, -inf  ;;  %v1862_v53 = vrot.slane %v1861_v29, 2 }
 0x2bf   :  { %9467 = vst [vmem:[#allocation6_spill] sm:$0xff] %v7521_v3  ;;  %v423_v41 = vcombine.high %v421_v33, %v421_v33  ;;  %v1887_v24 = vsel %vm1564_vm0, %v421_v33, -inf  ;;  %v1909_v28 = vrot.slane %v1908_v25, 4  ;;  %v1869_v8 = vrot.slane %v1868_v9, 2  ;;  %v7544_v57 = vpop.permute.xlu1 %4365  ;;  %v7546_v63 = vpop.permute.xlu0 %4490 }
 0x2c0   :  { %v1875_v49 = vmax.f32 %v1873_v12, %v1874_v36  ;;  %v1922_v42 = vsel %vm1564_vm0, %v440_v58, -inf  ;;  %v448_v51 = vrot.slane %v7409_v55, %v5986_v10  ;;  %v1881_v37 = vrot.slane %v1880_v14, 4 }
 0x2c1   :  { %4451 = vrot.lane.b32.xlu0 %v7316_v26, %s5938_s26  ;;  %4262 = vrot.lane.b32.xlu1 %v7507_v20, %s5933_s22  ;;  %v1903_v23 = vmax.f32 %v1901_v27, %v1902_v35  ;;  %v1916_v0 = vrot.slane %v1915_v38, 4  ;;  %v441_v33 = vcombine.high %v7409_v55, %v7409_v55  ;;  %v1850_v36 = vrot.slane %v1849_v50, 1 }
 0x2c2   :  { %v1856_v12 = vmax.f32 %v1854_v11, %v1855_v16  ;;  %v1888_v58 = vrot.slane %v1887_v24, 4  ;;  %v7541_v4 = vmax.f32 %v7485_v15, %v1829_v34  ;;  %v1894_v39 = vsel %vm1564_vm0, %v423_v41, -inf }
 0x2c3   :  { %v1910_v61 = vmax.f32 %v1908_v25, %v1909_v28  ;;  %v1923_v59 = vrot.slane %v1922_v42, 4  ;;  %v1863_v27 = vmax.f32 %v1861_v29, %v1862_v53  ;;  %v1870_v35 = vmax.f32 %v1868_v9, %v1869_v8 }
 0x2c4   :  { %9468 = vst [vmem:[#allocation70_spill] sm:$0xff] %v7541_v4  ;;  %v1876_v3 = vrot.slane %v1875_v49, 2  ;;  %v456_v55 = vcombine.high %v448_v51, %v448_v51  ;;  %v7552_v15 = vmax.f32 %v1880_v14, %v1881_v37  ;;  %v1904_v11 = vrot.slane %v1903_v23, 2 }
 0x2c5   :  { %4496 = vrot.lane.b32.xlu0 %v7327_v18, %s5939_s27  ;;  %4309 = vrot.lane.b32.xlu1 %v7316_v26, %s5934_s23  ;;  %v1917_v34 = vmax.f32 %v1915_v38, %v1916_v0  ;;  %v455_v25 = vrot.slane %v441_v33, %v5986_v10  ;;  %v1851_v16 = vmax.f32 %v1849_v50, %v1850_v36  ;;  %v1857_v41 = vrot.slane %v1856_v12, 1 }
 0x2c6   :  { %v7555_v28 = vmax.f32 %v1887_v24, %v1888_v58  ;;  %v458_v9 = vcombine.high %v7428_v21, %v7428_v21  ;;  %v1895_v29 = vrot.slane %v1894_v39, 4  ;;  %v1911_v53 = vrot.slane %v1910_v61, 2 }
 0x2c7   :  { %v1924_v8 = vmax.f32 %v1922_v42, %v1923_v59  ;;  %v1929_v13 = vsel %vm1564_vm0, %v448_v51, -inf  ;;  %v1864_v30 = vrot.slane %v1863_v27, 1  ;;  %v1871_v43 = vrot.slane %v1870_v35, 1  ;;  %v7570_v42 = vpop.permute.xlu1 %4223  ;;  %v7572_v51 = vpop.permute.xlu0 %4535 }
 0x2c8   :  { %v7560_v14 = vmax.f32 %v1875_v49, %v1876_v3  ;;  %v1936_v38 = vsel %vm1564_vm0, %v456_v55, -inf  ;;  %v1905_v50 = vmax.f32 %v1903_v23, %v1904_v11  ;;  %v1918_v24 = vrot.slane %v1917_v34, 2 }
 0x2c9   :  { %4541 = vrot.lane.b32.xlu0 %v7324_v47, %s5940_s28  ;;  %4357 = vrot.lane.b32.xlu1 %v7327_v18, %s5936_s25  ;;  %v1943_v37 = vsel %vm1564_vm0, %v455_v25, -inf  ;;  %v465_v59 = vrot.slane %v7428_v21, %v5986_v10  ;;  %v1883_v49 = vrot.slane %v7552_v15, 2  ;;  %v457_v3 = vcombine.high %v455_v25, %v455_v25 }
 0x2ca   :  { %9469 = vst [vmem:[#allocation113_spill] sm:$0xff] %v7560_v14  ;;  %v1930_v0 = vrot.slane %v1929_v13, 4  ;;  %v472_v47 = vrot.slane %v458_v9, %v5986_v10  ;;  %v1912_v33 = vmax.f32 %v1910_v61, %v1911_v53  ;;  %v1925_v36 = vrot.slane %v1924_v8, 2 }
 0x2cb   :  { %v1937_v18 = vrot.slane %v1936_v38, 4  ;;  %v1957_v23 = vsel %vm1564_vm0, %v465_v59, -inf  ;;  %v1858_v58 = vmax.f32 %v1856_v12, %v1857_v41  ;;  %v7578_v55 = vsel %vm3357_vm1, %v1851_v16, -inf  ;;  %v7586_v16 = vpop.permute.xlu1 %4268  ;;  %v7588_v20 = vpop.permute.xlu0 %4411 }
 0x2cc   :  { %9470 = vst [vmem:[#allocation114_spill] sm:$0xff] %v7578_v55  ;;  %v1944_v11 = vrot.slane %v1943_v37, 4  ;;  %v7581_v26 = vmax.f32 %v1894_v39, %v1895_v29  ;;  %v1906_v52 = vrot.slane %v1905_v50, 1  ;;  %v1919_v4 = vmax.f32 %v1917_v34, %v1918_v24 }
 0x2cd   :  { %v473_v25 = vcombine.high %v465_v59, %v465_v59  ;;  %v1931_v19 = vmax.f32 %v1929_v13, %v1930_v0  ;;  %v1950_v9 = vsel %vm1564_vm0, %v457_v3, -inf  ;;  %v474_v61 = vcombine.high %v472_v47, %v472_v47 }
 0x2ce   :  { %v1958_v53 = vrot.slane %v1957_v23, 4  ;;  %v7584_v31 = vmax.f32 %v1863_v27, %v1864_v30  ;;  %v1913_v1 = vrot.slane %v1912_v33, 1  ;;  %v1926_v12 = vmax.f32 %v1924_v8, %v1925_v36 }
 0x2cf   :  { %v1938_v41 = vmax.f32 %v1936_v38, %v1937_v18  ;;  %v7590_v21 = vmax.f32 %v1870_v35, %v1871_v43  ;;  %v1945_v34 = vmax.f32 %v1943_v37, %v1944_v11  ;;  %v1920_v29 = vrot.slane %v1919_v4, 1 }
 0x2d0   :  { %9471 = vst [vmem:[#allocation115_spill] sm:$0xff] %v7584_v31  ;;  %v1951_v24 = vrot.slane %v1950_v9, 4  ;;  %v1964_v30 = vsel %vm1564_vm0, %v473_v25, -inf  ;;  %v1971_v27 = vsel %vm1564_vm0, %v472_v47, -inf  ;;  %v1907_v8 = vmax.f32 %v1905_v50, %v1906_v52  ;;  %v9475_v52 = vld [vmem:[#allocation56_spill] sm:$0xff]  ;;  %v9476_v50 = vld [vmem:[#allocation51_spill] sm:$0xff] }
 0x2d1   :  { %9472 = vst [vmem:[#allocation116_spill] sm:$0xff] %v7590_v21  ;;  %v1932_v38 = vrot.slane %v1931_v19, 2  ;;  %v1959_v59 = vmax.f32 %v1957_v23, %v1958_v53  ;;  %v1978_v3 = vsel %vm1564_vm0, %v474_v61, -inf  ;;  %v7599_v43 = vsel %vm3357_vm1, %v1858_v58, -inf  ;;  %v9477_v23 = vld [vmem:[#allocation23_spill] sm:$0xff]  ;;  %v7609_v58 = vpop.permute.xlu1 %4315 }
 0x2d2   :  { %9473 = vst [vmem:[#allocation117_spill] sm:$0xff] %v7599_v43  ;;  %v1914_v35 = vmax.f32 %v1912_v33, %v1913_v1  ;;  %v1927_v0 = vrot.slane %v1926_v12, 1  ;;  %v1939_v36 = vrot.slane %v1938_v41, 2  ;;  %v7602_v18 = vmax.f32 %v7552_v15, %v1883_v49  ;;  %v7611_v1 = vpop.permute.xlu0 %4459 }
 0x2d3   :  { %v1946_v37 = vrot.slane %v1945_v34, 2  ;;  %v1965_v11 = vrot.slane %v1964_v30, 4  ;;  %v1972_v39 = vrot.slane %v1971_v27, 4  ;;  %v1921_v25 = vmax.f32 %v1919_v4, %v1920_v29 }
 0x2d4   :  { %9474 = vst [vmem:[#allocation118_spill] sm:$0xff] %v7602_v18  ;;  %v1952_v13 = vmax.f32 %v1950_v9, %v1951_v24  ;;  %v1979_v47 = vrot.slane %v1978_v3, 4  ;;  %v9478_v53 = vmax.f32 %v9476_v50, %v9477_v23  ;;  %v7614_v15 = vsel %vm3357_vm1, %v1907_v8, -inf  ;;  %v9496_v18 = vld [vmem:[#allocation45_spill] sm:$0xff] }
 0x2d5   :  { %v7616_v49 = vmax.f32 %v1931_v19, %v1932_v38  ;;  %v1960_v33 = vrot.slane %v1959_v59, 2  ;;  %v475_v4 = vcombine.high %v7469_v32, %v7469_v32  ;;  %v1928_v9 = vmax.f32 %v1926_v12, %v1927_v0  ;;  %v9480_v19 = vld [vmem:[#allocation60_spill] sm:$0xff]  ;;  %v9482_v0 = vld [vmem:[#allocation27_spill] sm:$0xff] }
 0x2d6   :  { %v3942_v61 = vsel %vm3874_vm4, %v9478_v53, %v9475_v52  ;;  %v7621_v29 = vsel %vm3357_vm1, %v1914_v35, -inf  ;;  %v7623_v24 = vmax.f32 %v1938_v41, %v1939_v36  ;;  %v482_v52 = vrot.slane %v7469_v32, %v5986_v10  ;;  %v9479_v53 = vld [vmem:[#allocation20_spill] sm:$0xff]  ;;  %v9483_v41 = vld [vmem:[#allocation19_spill] sm:$0xff] }
 0x2d7   :  { %v7627_v50 = vmax.f32 %v1945_v34, %v1946_v37  ;;  %v1966_v23 = vmax.f32 %v1964_v30, %v1965_v11  ;;  %v1973_v8 = vmax.f32 %v1971_v27, %v1972_v39  ;;  %v9481_v38 = vmax.f32 %v9479_v53, %v9480_v19  ;;  %v9484_v30 = vld [vmem:[#allocation13_spill] sm:$0xff]  ;;  %v9485_v39 = vld [vmem:[#allocation62_spill] sm:$0xff] }
 0x2d8   :  { %v7634_v6 = vsel %vm3357_vm1, %v1921_v25, -inf  ;;  %v1953_v12 = vrot.slane %v1952_v13, 2  ;;  %v1980_v35 = vmax.f32 %v1978_v3, %v1979_v47  ;;  %v3597_v36 = vmax.f32 %v9483_v41, %v9482_v0  ;;  %v9487_v3 = vld [vmem:[#allocation18_spill] sm:$0xff]  ;;  %v9488_v47 = vld [vmem:[#allocation63_spill] sm:$0xff]  ;;  %v9490_v41 = vld [vmem:[#allocation25_spill] sm:$0xff] }
 0x2d9   :  { %v3943_v55 = vsel %vm3876_vm5, %v9481_v38, %v3942_v61  ;;  %v1961_v32 = vmax.f32 %v1959_v59, %v1960_v33  ;;  %v489_v34 = vrot.slane %v475_v4, %v5986_v10  ;;  %v9486_v27 = vmax.f32 %v9484_v30, %v9485_v39  ;;  %v7652_v38 = vpop.permute.xlu1 %4363  ;;  %v7654_v59 = vpop.permute.xlu0 %4504  ;;  %v9491_v33 = vld [vmem:[#allocation40_spill] sm:$0xff] }
 0x2da   :  { %v7645_v11 = vsel %vm3357_vm1, %v1928_v9, -inf  ;;  %v490_v25 = vcombine.high %v482_v52, %v482_v52  ;;  %v1985_v61 = vsel %vm1564_vm0, %v482_v52, -inf  ;;  %v9489_v53 = vmax.f32 %v9487_v3, %v9488_v47  ;;  %v9492_v10 = vld [vmem:[#allocation28_spill] sm:$0xff] }
 0x2db   :  { %v3944_v37 = vsel %vm3878_vm6, %v9486_v27, %v3943_v55  ;;  %v1967_v55 = vrot.slane %v1966_v23, 2  ;;  %v1974_v4 = vrot.slane %v1973_v8, 2  ;;  %v7658_v9 = vmax.f32 %v1952_v13, %v1953_v12  ;;  %v9493_v13 = vld [vmem:[#allocation38_spill] sm:$0xff] }
 0x2dc   :  { %v3945_v19 = vsel %vm3880_vm7, %v9489_v53, %v3944_v37  ;;  %v1981_v0 = vrot.slane %v1980_v35, 2  ;;  %v4580_v30 = vsel %vm3357_vm1, %v9490_v41, %v7471_v2  ;;  %v1962_v39 = vrot.slane %v1961_v32, 1  ;;  %v9495_v41 = vld [vmem:[#allocation33_spill] sm:$0xff] }
 0x2dd   :  { %v3946_v52 = vsel %vm9262_vm8, %v3597_v36, %v3945_v19  ;;  %v491_v27 = vcombine.high %v489_v34, %v489_v34  ;;  %v1986_v37 = vrot.slane %v1985_v61, 4  ;;  %v1992_v3 = vsel %vm1564_vm0, %v490_v25, -inf }
 0x2de   :  { %v1999_v47 = vsel %vm1564_vm0, %v489_v34, -inf  ;;  %v4000_v53 = vrot.slane %v3946_v52, 7  ;;  %v9494_v12 = vmax.f32 %v9492_v10, %v9493_v13  ;;  %v1968_v36 = vmax.f32 %v1966_v23, %v1967_v55  ;;  %v7685_v23 = vpop.permute.xlu1 %4221 }
 0x2df   :  { %v1975_v19 = vmax.f32 %v1973_v8, %v1974_v4  ;;  %v4596_v2 = vsel %vm4581_vm12, %v4580_v30, %v7502_v60  ;;  %v9497_v14 = vmax.f32 %v9495_v41, %v9496_v18  ;;  %v7677_v25 = vmax.f32 %v1980_v35, %v1981_v0  ;;  %v7687_v8 = vpop.permute.xlu0 %4549  ;;  %v9500_v4 = vld [vmem:[#allocation34_spill] sm:$0xff] }
 0x2e0   :  { %v3935_v21 = vsel %vm3874_vm4, %v9494_v12, %v9491_v33  ;;  %v7680_v34 = vsel %vm9263_vm9, 0.0, %v4000_v53  ;;  %v4052_v52 = vsel %vm9263_vm9, %v4000_v53, 0.0  ;;  %v4613_v10 = vsel %vm9266_vm13, %v4596_v2, %v7523_v46  ;;  %v9501_v0 = vld [vmem:[#allocation46_spill] sm:$0xff]  ;;  %v9503_v12 = vld [vmem:[#allocation35_spill] sm:$0xff] }
 0x2e1   :  { %v3936_v31 = vsel %vm3876_vm5, %v9497_v14, %v3935_v21  ;;  %v4163_v60 = vrot.slane %v7680_v34, 2  ;;  %v4164_v33 = vrot.slane %v4052_v52, 2  ;;  %v4117_v18 = vrot.slane %v7680_v34, 1  ;;  %v9498_v14 = vld [vmem:[#allocation48_spill] sm:$0xff]  ;;  %v9504_v2 = vld [vmem:[#allocation47_spill] sm:$0xff] }
 0x2e2   :  { %v9499_v21 = vld [vmem:[#allocation36_spill] sm:$0xff]  ;;  %v4118_v55 = vrot.slane %v4052_v52, 1  ;;  %v9502_v30 = vmax.f32 %v9500_v4, %v9501_v0  ;;  %v1993_v46 = vrot.slane %v1992_v3, 4  ;;  %v9505_v41 = vmax.f32 %v9503_v12, %v9504_v2 }
 0x2e3   :  { %v3573_v35 = vmax.f32 %v9499_v21, %v9498_v14  ;;  %v7698_v13 = vsel %vm9261_vm11, %v4163_v60, %v4164_v33  ;;  %v4630_v14 = vsel %vm9267_vm14, %v4613_v10, %v7544_v57  ;;  %v1987_v52 = vmax.f32 %v1985_v61, %v1986_v37  ;;  %v9506_v10 = vld [vmem:[#allocation22_spill] sm:$0xff] }
 0x2e4   :  { %v3937_v53 = vsel %vm3878_vm6, %v9502_v30, %v3936_v31  ;;  %4401 = vrot.lane.b32.xlu0 %v7698_v13, %s5935_s24  ;;  %v7709_v31 = vsel %vm4089_vm10, %v4117_v18, %v4118_v55  ;;  %v4647_v21 = vsel %vm9265_vm15, %v4630_v14, %v7493_v7  ;;  %vm9264_vm2 = vcmask 195584   ;;  %v7720_v55 = vpop.permute.xlu1 %4266  ;;  %v7722_v7 = vpop.permute.xlu0 %4409 }
 0x2e5   :  { %v3938_v43 = vsel %vm3880_vm7, %v9505_v41, %v3937_v53  ;;  %v1963_v60 = vmax.f32 %v1961_v32, %v1962_v39  ;;  %v2000_v33 = vrot.slane %v1999_v47, 4  ;;  %4215 = vrot.lane.b32.xlu1 %v7709_v31, %s5932_s0  ;;  %vm4665_vm11 = vcmask 228352  }
 0x2e6   :  { %v3939_v4 = vsel %vm9262_vm8, %v3573_v35, %v3938_v43  ;;  %v1969_v57 = vrot.slane %v1968_v36, 1  ;;  %v1976_v61 = vrot.slane %v1975_v19, 1  ;;  %v2006_v37 = vsel %vm1564_vm0, %v491_v27, -inf }
 0x2e7   :  { %v4579_v18 = vsel %vm3357_vm1, %v9506_v10, %v7570_v42  ;;  %v1983_v32 = vrot.slane %v7677_v25, 1  ;;  %v4664_v39 = vsel %vm9264_vm2, %v4647_v21, %v7525_v44  ;;  %vm4682_vm8 = vcmask 261120  }
 0x2e8   :  { %v4595_v43 = vsel %vm4581_vm12, %v4579_v18, %v7586_v16  ;;  %v1988_v35 = vrot.slane %v1987_v52, 2  ;;  %4449 = vrot.lane.b32.xlu0 %v7496_v40, %s5938_s26  ;;  %v3999_v27 = vrot.slane %v3939_v4, 7  ;;  %v4681_v42 = vsel %vm4665_vm11, %v4664_v39, %v7546_v63 }
 0x2e9   :  { %v4612_v0 = vsel %vm9266_vm13, %v4595_v43, %v7609_v58  ;;  %4260 = vrot.lane.b32.xlu1 %v7698_v13, %s5933_s22  ;;  %v9507_v30 = vmax.f32 %v7075_v45, %v7143_v62  ;;  %v4698_v53 = vsel %vm4682_vm8, %v4681_v42, %v7572_v51  ;;  %vm4706_vm0 = vcmask 293888  }
 0x2ea   :  { %v4629_v12 = vsel %vm9267_vm14, %v4612_v0, %v7652_v38  ;;  %v1970_v2 = vmax.f32 %v1968_v36, %v1969_v57  ;;  %v1994_v41 = vmax.f32 %v1992_v3, %v1993_v46  ;;  %v2001_v14 = vmax.f32 %v1999_v47, %v2000_v33  ;;  %5831 = vmatpush3.xpose.msk.msra.mxu0 %vm4706_vm0, %v4698_v53  ;;  %v4314_v46 = vpop.permute.xlu1 %4313  ;;  %v9519_v53 = vld [vmem:[#allocation3_spill] sm:$0xff] }
 0x2eb   :  { %v3928_v16 = vsel %vm3874_vm4, %v9507_v30, %v7169_v48  ;;  %v2007_v58 = vrot.slane %v2006_v37, 4  ;;  %v9508_v21 = vrot.slane %v7616_v49, 1  ;;  %v9509_v45 = vrot.slane %v7623_v24, 1 }
 0x2ec   :  { %v9510_v48 = vrot.slane %v7627_v50, 1  ;;  %v1977_v38 = vmax.f32 %v1975_v19, %v1976_v61  ;;  %v9511_v3 = vmov 0.0   ;;  %4494 = vrot.lane.b32.xlu0 %v7510_v54, %s5939_s27  ;;  %v7764_v47 = vsel %vm9263_vm9, 0.0, %v3999_v27  ;;  %v7773_v19 = vpop.permute.xlu0 %4457 }
 0x2ed   :  { %v1935_v4 = vmax.f32 %v7616_v49, %v9508_v21  ;;  %v7753_v62 = vmax.f32 %v7623_v24, %v9509_v45  ;;  %5832 = vmatprep.subr.mxu0 %v9511_v3  ;;  %v4051_v49 = vsel %vm9263_vm9, %v3999_v27, 0.0  ;;  %v9512_v24 = vmax.f32 %v7098_v5, %v7173_v56  ;;  %4307 = vrot.lane.b32.xlu1 %v7496_v40, %s5934_s23  ;;  %v9522_v21 = vld [vmem:[#allocation24_spill] sm:$0xff]  ;;  %v9523_v45 = vld [vmem:[#allocation37_spill] sm:$0xff] }
 0x2ee   :  { %v7758_v10 = vmax.f32 %v7627_v50, %v9510_v48  ;;  %v4646_v50 = vsel %vm9265_vm15, %v4629_v12, %v7588_v20  ;;  %v1955_v33 = vrot.slane %v7658_v9, 1  ;;  %v1984_v57 = vmax.f32 %v7677_v25, %v1983_v32  ;;  %v9514_v32 = vld [vmem:[#allocation2_spill] sm:$0xff] }
 0x2ef   :  { %v3929_v36 = vsel %vm3876_vm5, %v9512_v24, %v3928_v16  ;;  %v7778_v61 = vsel %vm3357_vm1, %v1963_v60, -inf  ;;  %v1989_v18 = vmax.f32 %v1987_v52, %v1988_v35  ;;  %v7783_v5 = vsel %vm3357_vm1, %v1970_v2, -inf  ;;  %v9517_v16 = vld [vmem:[#allocation9_spill] sm:$0xff] }
 0x2f0   :  { %v1995_v56 = vrot.slane %v1994_v41, 2  ;;  %v2002_v39 = vrot.slane %v2001_v14, 2  ;;  %v2008_v20 = vmax.f32 %v2006_v37, %v2007_v58  ;;  %v4160_v43 = vrot.slane %v7764_v47, 2  ;;  %4539 = vrot.lane.b32.xlu0 %v9514_v32, %s5940_s28  ;;  %v9521_v58 = vld [vmem:[#allocation39_spill] sm:$0xff]  ;;  %v9525_v24 = vld [vmem:[#allocation73_spill] sm:$0xff] }
 0x2f1   :  { %v4161_v27 = vrot.slane %v4051_v49, 2  ;;  %v9513_v42 = vmax.f32 %v7101_v17, %v7181_v22  ;;  %v4663_v52 = vsel %vm9264_vm2, %v4646_v50, %v7611_v1  ;;  %v7793_v60 = vsel %vm3357_vm1, %v1977_v38, -inf  ;;  %4355 = vrot.lane.b32.xlu1 %v7510_v54, %s5936_s25  ;;  %v9515_v17 = vld [vmem:[#allocation76_spill] sm:$0xff]  ;;  %v9516_v22 = vld [vmem:[#allocation74_spill] sm:$0xff] }
 0x2f2   :  { %v4114_v35 = vrot.slane %v7764_v47, 1  ;;  %v4115_v37 = vrot.slane %v4051_v49, 1  ;;  %v4680_v0 = vsel %vm4665_vm11, %v4663_v52, %v7654_v59  ;;  %v3549_v30 = vmax.f32 %v9516_v22, %v9515_v17  ;;  %v9518_v1 = vld [vmem:[#allocation64_spill] sm:$0xff]  ;;  %v4362_v17 = vpop.permute.xlu1 %4361  ;;  %v4503_v22 = vpop.permute.xlu0 %4502 }
 0x2f3   :  { %v3930_v25 = vsel %vm3878_vm6, %v9513_v42, %v3929_v36  ;;  %v9520_v12 = vmax.f32 %v9518_v1, %v9519_v53  ;;  %v9524_v48 = vmax.f32 %v9522_v21, %v9523_v45  ;;  %v4697_v59 = vsel %vm4682_vm8, %v4680_v0, %v7687_v8  ;;  %v9526_v36 = vld [vmem:[#allocation75_spill] sm:$0xff]  ;;  %v9528_v52 = vld [vmem:[#allocation8_spill] sm:$0xff] }
 0x2f4   :  { %v1990_v49 = vrot.slane %v1989_v18, 1  ;;  %v1996_v54 = vmax.f32 %v1994_v41, %v1995_v56  ;;  %v9527_v50 = vmax.f32 %v9525_v24, %v9526_v36  ;;  %v4578_v32 = vsel %vm3357_vm1, %v9528_v52, %v7685_v23  ;;  %5833 = vmatpush3.xpose.msk.msra.mxu0 %vm4706_vm0, %v4697_v59  ;;  %v9530_v56 = vld [vmem:[#allocation65_spill] sm:$0xff]  ;;  %v9531_v23 = vld [vmem:[#allocation4_spill] sm:$0xff]  ;;  %v9540_v24 = vld [vmem:[#allocation30_spill] sm:$0xff] }
 0x2f5   :  { %v3920_v2 = vsel %vm3872_vm3, %v9520_v12, %v9517_v16  ;;  %v3907_v38 = vsel %vm3874_vm4, %v9524_v48, %v9521_v58  ;;  %v2003_v16 = vmax.f32 %v2001_v14, %v2002_v39  ;;  %v2009_v1 = vrot.slane %v2008_v20, 2  ;;  %5834 = vmatprep.subr.mxu0 %v9511_v3  ;;  %v9533_v12 = vld [vmem:[#allocation29_spill] sm:$0xff] }
 0x2f6   :  { %v3931_v42 = vsel %vm3880_vm7, %v9527_v50, %v3930_v25  ;;  %vm9529_vm9 = vcmask 1045504   ;;  %v4594_v8 = vsel %vm4581_vm12, %v4578_v32, %v7720_v55  ;;  %v7830_v41 = vsel %vm4089_vm10, %v4114_v35, %v4115_v37  ;;  %v9534_v14 = vld [vmem:[#allocation41_spill] sm:$0xff] }
 0x2f7   :  { %v4162_v53 = vsel %vm9529_vm9, %v4160_v43, %v4161_v27  ;;  %v9532_v25 = vmax.f32 %v9530_v56, %v9531_v23  ;;  %v9535_v39 = vmax.f32 %v9533_v12, %v9534_v14  ;;  %v4611_v27 = vsel %vm9266_vm13, %v4594_v8, %v4314_v46  ;;  %4213 = vrot.lane.b32.xlu1 %v7830_v41, %s5932_s0  ;;  %v9546_v32 = vld [vmem:[#allocation5_spill] sm:$0xff]  ;;  %v9549_v23 = vld [vmem:[#allocation67_spill] sm:$0xff] }
 0x2f8   :  { %4399 = vrot.lane.b32.xlu0 %v4162_v53, %s5935_s24  ;;  %v7842_v55 = vsel %vm3357_vm1, %v1935_v4, -inf  ;;  %v3432_v58 = vmax.f32 %v7614_v15, %v7778_v61  ;;  %vm9536_vm9 = vcmask 1047559   ;;  %v4628_v37 = vsel %vm9267_vm14, %v4611_v27, %v4362_v17  ;;  %v9538_v15 = vld [vmem:[#allocation7_spill] sm:$0xff]  ;;  %v9556_v27 = vld [vmem:[#allocation49_spill] sm:$0xff] }
 0x2f9   :  { %v3921_v0 = vsel %vm3874_vm4, %v9532_v25, %v3920_v2  ;;  %v3908_v43 = vsel %vm3876_vm5, %v9535_v39, %v3907_v38  ;;  %v3932_v35 = vsel %vm9536_vm9, %v3549_v30, %v3931_v42  ;;  %v3435_v2 = vmax.f32 %v7621_v29, %v7783_v5  ;;  %v9537_v38 = vld [vmem:[#allocation66_spill] sm:$0xff]  ;;  %v9543_v29 = vld [vmem:[#allocation71_spill] sm:$0xff] }
 0x2fa   :  { %v3438_v21 = vmax.f32 %v7634_v6, %v7793_v60  ;;  %v3440_v46 = vsel %vm3357_vm1, %v1984_v57, -inf  ;;  %v1991_v4 = vmax.f32 %v1989_v18, %v1990_v49  ;;  %v1997_v45 = vrot.slane %v1996_v54, 1  ;;  %v9541_v30 = vld [vmem:[#allocation42_spill] sm:$0xff]  ;;  %v9544_v57 = vld [vmem:[#allocation69_spill] sm:$0xff]  ;;  %v4548_v60 = vpop.permute.xlu0 %4547  ;;  %v9545_v49 = vld [vmem:[#allocation68_spill] sm:$0xff] }
 0x2fb   :  { %v2004_v48 = vrot.slane %v2003_v16, 1  ;;  %v9539_v61 = vmax.f32 %v9537_v38, %v9538_v15  ;;  %v9542_v36 = vmax.f32 %v9540_v24, %v9541_v30  ;;  %v2010_v42 = vmax.f32 %v2008_v20, %v2009_v1  ;;  %4258 = vrot.lane.b32.xlu1 %v4162_v53, %s5933_s22  ;;  %v9547_v20 = vld [vmem:[#allocation44_spill] sm:$0xff]  ;;  %v9550_v25 = vld [vmem:[#allocation10_spill] sm:$0xff]  ;;  %v9552_v12 = vld [vmem:[#allocation31_spill] sm:$0xff] }
 0x2fc   :  { %4447 = vrot.lane.b32.xlu0 %v7680_v34, %s5938_s26  ;;  %v3998_v6 = vrot.slane %v3932_v35, 7  ;;  %v3522_v18 = vmax.f32 %v9544_v57, %v9543_v29  ;;  %v4645_v5 = vsel %vm9265_vm15, %v4628_v37, %v7722_v7  ;;  %v3523_v52 = vsel %vm3357_vm1, %v9545_v49, -inf  ;;  %v9548_v1 = vld [vmem:[#allocation32_spill] sm:$0xff]  ;;  %v9553_v14 = vld [vmem:[#allocation43_spill] sm:$0xff] }
 0x2fd   :  { %v3922_v59 = vsel %vm3876_vm5, %v9539_v61, %v3921_v0  ;;  %v3909_v50 = vsel %vm3878_vm6, %v9542_v36, %v3908_v43  ;;  %v3524_v17 = vsel %vm3357_vm1, %v9546_v32, -inf  ;;  %v3477_v8 = vmax.f32 %v9548_v1, %v9547_v20  ;;  %v9555_v43 = vld [vmem:[#allocation21_spill] sm:$0xff]  ;;  %v9557_v35 = vld [vmem:[#allocation15_spill] sm:$0xff] }
 0x2fe   :  { %v4662_v56 = vsel %vm9264_vm2, %v4645_v5, %v7773_v19  ;;  %v9551_v0 = vmax.f32 %v9549_v23, %v9550_v25  ;;  %v9554_v53 = vmax.f32 %v9552_v12, %v9553_v14  ;;  %v9558_v37 = vmax.f32 %v9556_v27, %v9557_v35  ;;  %v9573_v14 = vld [vmem:[#allocation52_spill] sm:$0xff] }
 0x2ff   :  { %v4679_v15 = vsel %vm4665_vm11, %v4662_v56, %v4503_v22  ;;  %v3441_v19 = vmax.f32 %v7645_v11, %v3440_v46  ;;  %vm9559_vm9 = vcmask 1041409   ;;  %v3443_v24 = vsel %vm3357_vm1, %v1991_v4, -inf  ;;  %4305 = vrot.lane.b32.xlu1 %v7680_v34, %s5934_s23 }
 0x300   :  { %v3923_v7 = vsel %vm3878_vm6, %v9551_v0, %v3922_v59  ;;  %v3910_v39 = vsel %vm3880_vm7, %v9554_v53, %v3909_v50  ;;  %v3913_v38 = vsel %vm3872_vm3, %v9558_v37, %v9555_v43  ;;  %v3898_v61 = vsel %vm9559_vm9, %v3435_v2, %v3432_v58  ;;  %4492 = vrot.lane.b32.xlu0 %v7709_v31, %s5939_s27  ;;  %v9563_v58 = vld [vmem:[#allocation50_spill] sm:$0xff]  ;;  %v9564_v2 = vld [vmem:[#allocation16_spill] sm:$0xff]  ;;  %v9571_v0 = vld [vmem:[#allocation61_spill] sm:$0xff] }
 0x301   :  { %v4696_v59 = vsel %vm4682_vm8, %v4679_v15, %v4548_v60  ;;  %v1998_v30 = vmax.f32 %v1996_v54, %v1997_v45  ;;  %vm9560_vm2 = vcmask 1040384   ;;  %v3525_v29 = vmax.f32 %v3523_v52, %v3524_v17  ;;  %v7926_v17 = vpop.permute.xlu0 %4407  ;;  %v9577_v43 = vld [vmem:[#allocation57_spill] sm:$0xff] }
 0x302   :  { %v7899_v36 = vsel %vm9560_vm2, 0.0, %v3998_v6  ;;  %vm9561_vm15 = vmmov %vm9560_vm2  ;;  %5835 = vmatpush3.xpose.msk.msra.mxu0 %vm4706_vm0, %v4696_v59  ;;  %v2011_v11 = vrot.slane %v2010_v42, 1  ;;  %v3924_v22 = vsel %vm3880_vm7, %v3522_v18, %v3923_v7  ;;  %vm9562_vm9 = vcmask 1047559   ;;  %v9572_v7 = vld [vmem:[#allocation55_spill] sm:$0xff]  ;;  %v9579_v37 = vld [vmem:[#allocation117_spill] sm:$0xff] }
 0x303   :  { %v7902_v50 = vsel %vm9561_vm15, %v3998_v6, 0.0  ;;  %v3911_v54 = vsel %vm9562_vm9, %v3477_v8, %v3910_v39  ;;  %v9565_v46 = vmax.f32 %v9563_v58, %v9564_v2  ;;  %5836 = vmatprep.subr.mxu0 %v9511_v3  ;;  %v9566_v45 = vrot.slane %v7555_v28, 2  ;;  %vm9567_vm2 = vmmov %vm9562_vm9  ;;  %4353 = vrot.lane.b32.xlu1 %v7709_v31, %s5936_s25  ;;  %v9574_v39 = vld [vmem:[#allocation58_spill] sm:$0xff]  ;;  %v9583_v59 = vld [vmem:[#allocation115_spill] sm:$0xff] }
 0x304   :  { %v1897_v57 = vrot.slane %v7581_v26, 2  ;;  %v3899_v5 = vsel %vm3872_vm3, %v3438_v21, %v3898_v61  ;;  %v2005_v60 = vmax.f32 %v2003_v16, %v2004_v48  ;;  %v3445_v18 = vsel %vm3357_vm1, %v7753_v62, -inf  ;;  %4537 = vrot.lane.b32.xlu0 %v7698_v13, %s5940_s28  ;;  %v9568_v16 = vld [vmem:[#allocation53_spill] sm:$0xff]  ;;  %v9569_v48 = vld [vmem:[#allocation26_spill] sm:$0xff]  ;;  %v4220_v23 = vpop.permute.xlu1 %4219 }
 0x305   :  { %v3914_v4 = vsel %vm3874_vm4, %v9565_v46, %v3913_v38  ;;  %v7917_v6 = vmax.f32 %v7555_v28, %v9566_v45  ;;  %v3444_v49 = vmax.f32 %v7842_v55, %v3443_v24  ;;  %v4191_v52 = vrot.slane %v7899_v36, 2  ;;  %v9576_v31 = vld [vmem:[#allocation54_spill] sm:$0xff]  ;;  %v9580_v38 = vld [vmem:[#allocation111_spill] sm:$0xff]  ;;  %v9587_v2 = vld [vmem:[#allocation17_spill] sm:$0xff] }
 0x306   :  { %v4192_v32 = vrot.slane %v7902_v50, 2  ;;  %v3446_v20 = vsel %vm3357_vm1, %v1998_v30, -inf  ;;  %v3925_v28 = vsel %vm9567_vm2, %v3525_v29, %v3924_v22  ;;  %v3995_v21 = vrot.slane %v3911_v54, 7  ;;  %v9584_v29 = vld [vmem:[#allocation113_spill] sm:$0xff]  ;;  %v9586_v54 = vld [vmem:[#allocation118_spill] sm:$0xff] }
 0x307   :  { %v9570_v1 = vmax.f32 %v9568_v16, %v9569_v48  ;;  %v1956_v55 = vmax.f32 %v7658_v9, %v1955_v33  ;;  %v3448_v8 = vsel %vm3357_vm1, %v7758_v10, -inf  ;;  %v2012_v56 = vmax.f32 %v2010_v42, %v2011_v11  ;;  %4197 = vrot.lane.b32.xlu1 %v9587_v2, %s5932_s0  ;;  %v9590_v48 = vld [vmem:[#allocation70_spill] sm:$0xff] }
 0x308   :  { %v3900_v13 = vsel %vm3874_vm4, %v3441_v19, %v3899_v5  ;;  %v3449_v25 = vsel %vm3357_vm1, %v2005_v60, -inf  ;;  %v3498_v12 = vmax.f32 %v9572_v7, %v9571_v0  ;;  %v3499_v53 = vsel %vm3357_vm1, %v9573_v14, -inf  ;;  %v4265_v45 = vpop.permute.xlu1 %4264  ;;  %v9597_v14 = vld [vmem:[#allocation59_spill] sm:$0xff] }
 0x309   :  { %v3915_v62 = vsel %vm3876_vm5, %v9570_v1, %v3914_v4  ;;  %v3500_v9 = vsel %vm3357_vm1, %v9574_v39, -inf  ;;  %v3447_v33 = vmax.f32 %v3445_v18, %v3446_v20  ;;  %vm9575_vm15 = vcmask 1045504   ;;  %v4456_v4 = vpop.permute.xlu0 %4455 }
 0x30a   :  { %v7952_v10 = vsel %vm9575_vm15, %v4191_v52, %v4192_v32  ;;  %v3997_v42 = vrot.slane %v3925_v28, 7  ;;  %v9578_v27 = vmax.f32 %v9576_v31, %v9577_v43  ;;  %v3411_v15 = vmax.f32 %v9580_v38, %v9579_v37 }
 0x30b   :  { %4397 = vrot.lane.b32.xlu0 %v7952_v10, %s5935_s24  ;;  %vm9581_vm9 = vcmask 1040384   ;;  %v3901_v24 = vsel %vm3876_vm5, %v3444_v49, %v3900_v13  ;;  %v3413_v30 = vsel %vm3357_vm1, %v9583_v59, -inf  ;;  %v9585_v11 = vrot.slane %v9584_v29, 1  ;;  %v9593_v13 = vld [vmem:[#allocation110_spill] sm:$0xff]  ;;  %4242 = vrot.lane.b32.xlu1 %v9597_v14, %s5933_s22 }
 0x30c   :  { %v3916_v35 = vsel %vm3878_vm6, %v9578_v27, %v3915_v62  ;;  %v7963_v19 = vsel %vm9581_vm9, 0.0, %v3995_v21  ;;  %vm9582_vm2 = vmmov %vm9581_vm9  ;;  %v1885_v58 = vrot.slane %v9586_v54, 1  ;;  %v3501_v46 = vmax.f32 %v3499_v53, %v3500_v9  ;;  %v9591_v62 = vld [vmem:[#allocation112_spill] sm:$0xff]  ;;  %v4312_v9 = vpop.permute.xlu1 %4311 }
 0x30d   :  { %v4047_v61 = vsel %vm9582_vm2, %v3995_v21, 0.0  ;;  %v1879_v22 = vmax.f32 %v9584_v29, %v9585_v11  ;;  %v3451_v5 = vsel %vm3357_vm1, %v1956_v55, -inf  ;;  %v3450_v60 = vmax.f32 %v3448_v8, %v3449_v25  ;;  %vm9588_vm15 = vmmov %vm9582_vm2  ;;  %v9589_v21 = vld [vmem:[#allocation72_spill] sm:$0xff]  ;;  %v9594_v25 = vld [vmem:[#allocation114_spill] sm:$0xff] }
 0x30e   :  { %v3452_v18 = vsel %vm3357_vm1, %v2012_v56, -inf  ;;  %v3917_v49 = vsel %vm3880_vm7, %v3498_v12, %v3916_v35  ;;  %v7979_v52 = vsel %vm9588_vm15, 0.0, %v3997_v42  ;;  %v4105_v32 = vrot.slane %v7963_v19, 1  ;;  %v9592_v8 = vld [vmem:[#allocation116_spill] sm:$0xff] }
 0x30f   :  { %v4106_v20 = vrot.slane %v4047_v61, 1  ;;  %v3902_v28 = vsel %vm3878_vm6, %v3447_v33, %v3901_v24  ;;  %v7985_v16 = vsel %vm3357_vm1, %v9589_v21, -inf  ;;  %v7989_v1 = vsel %vm3357_vm1, %v9590_v48, -inf  ;;  %4299 = vrot.lane.b32.xlu0 %v7979_v52, %s5934_s23  ;;  %v9599_v24 = vld [vmem:[#allocation91_spill] sm:$0xff]  ;;  %4303 = vrot.lane.b32.xlu1 %v7764_v47, %s5934_s23 }
 0x310   :  { %v3414_v55 = vmax.f32 %v9591_v62, %v3413_v30  ;;  %v3416_v56 = vsel %vm3357_vm1, %v9592_v8, -inf  ;;  %v9595_v0 = vmax.f32 %v9593_v13, %v9594_v25  ;;  %vm9596_vm9 = vcmask 1041409   ;;  %v9600_v30 = vld [vmem:[#allocation11_spill] sm:$0xff] }
 0x311   :  { %v1892_v12 = vrot.slane %v7917_v6, 1  ;;  %vm9598_vm2 = vcmask 1047559   ;;  %v3453_v39 = vmax.f32 %v3451_v5, %v3452_v18  ;;  %v1886_v33 = vmax.f32 %v9586_v54, %v1885_v58  ;;  %v4360_v58 = vpop.permute.xlu1 %4359 }
 0x312   :  { %v3891_v7 = vsel %vm9596_vm9, %v3411_v15, %v9595_v0  ;;  %v3918_v53 = vsel %vm9598_vm2, %v3501_v46, %v3917_v49  ;;  %v1898_v31 = vmax.f32 %v7581_v26, %v1897_v57  ;;  %v3419_v43 = vsel %vm3357_vm1, %v1879_v22, -inf  ;;  %v4501_v15 = vpop.permute.xlu0 %4500  ;;  %vm9601_vm9 = vmmov %vm9598_vm2 }
 0x313   :  { %v3903_v27 = vsel %vm3880_vm7, %v3450_v60, %v3902_v28  ;;  %v8009_v35 = vsel %vm4089_vm10, %v4105_v32, %v4106_v20  ;;  %v4151_v37 = vrot.slane %v7963_v19, 2  ;;  %v4152_v38 = vrot.slane %v4047_v61, 2  ;;  %4351 = vrot.lane.b32.xlu1 %v7830_v41, %s5936_s25 }
 0x314   :  { %v4577_v59 = vsel %vm3357_vm1, %v9599_v24, %v4220_v23  ;;  %v3417_v29 = vmax.f32 %v9600_v30, %v3416_v56  ;;  %4207 = vrot.lane.b32.xlu0 %v8009_v35, %s5932_s0  ;;  %v4049_v26 = vsel %vm9588_vm15, %v3997_v42, 0.0  ;;  %v3996_v57 = vrot.slane %v3918_v53, 7  ;;  %v9615_v24 = vld [vmem:[#allocation104_spill] sm:$0xff]  ;;  %v9616_v30 = vld [vmem:[#allocation102_spill] sm:$0xff] }
 0x315   :  { %v4593_v11 = vsel %vm4581_vm12, %v4577_v59, %v4265_v45  ;;  %v3892_v22 = vsel %vm3872_vm3, %v3414_v55, %v3891_v7  ;;  %v1893_v54 = vmax.f32 %v7917_v6, %v1892_v12  ;;  %v3904_v61 = vsel %vm9601_vm9, %v3453_v39, %v3903_v27  ;;  %v9609_v55 = vld [vmem:[#allocation6_spill] sm:$0xff]  ;;  %v9613_v27 = vld [vmem:[#allocation95_spill] sm:$0xff] }
 0x316   :  { %v4610_v23 = vsel %vm9266_vm13, %v4593_v11, %v4312_v9  ;;  %v1899_v46 = vrot.slane %v1898_v31, 1  ;;  %v3420_v5 = vmax.f32 %v7985_v16, %v3419_v43  ;;  %v3422_v42 = vsel %vm3357_vm1, %v1886_v33, -inf  ;;  %v9607_v16 = vld [vmem:[#allocation12_spill] sm:$0xff]  ;;  %v4546_v56 = vpop.permute.xlu0 %4545 }
 0x317   :  { %v4627_v60 = vsel %vm9267_vm14, %v4610_v23, %v4360_v58  ;;  %vm9602_vm2 = vcmask 1045504   ;;  %v4111_v6 = vrot.slane %v7979_v52, 1  ;;  %v4112_v18 = vrot.slane %v4049_v26, 1  ;;  %v9612_v43 = vld [vmem:[#allocation108_spill] sm:$0xff] }
 0x318   :  { %v8029_v45 = vsel %vm9602_vm2, %v4151_v37, %v4152_v38  ;;  %vm9603_vm15 = vcmask 162816   ;;  %vm9604_vm9 = vcmask 1040384   ;;  %v3994_v28 = vrot.slane %v3904_v61, 7  ;;  %v9614_v38 = vld [vmem:[#allocation103_spill] sm:$0xff] }
 0x319   :  { %v4644_v49 = vsel %vm9603_vm15, %v4627_v60, %v7926_v17  ;;  %4252 = vrot.lane.b32.xlu0 %v8029_v45, %s5933_s22  ;;  %v8037_v32 = vsel %vm9604_vm9, 0.0, %v3996_v57  ;;  %vm9605_vm13 = vmmov %vm9604_vm9  ;;  %vm9606_vm14 = vcmask 195584   ;;  %v9608_v48 = vrot.slane %v9607_v16, 1 }
 0x31a   :  { %v8040_v20 = vsel %vm9605_vm13, %v3996_v57, 0.0  ;;  %v4661_v21 = vsel %vm9606_vm14, %v4644_v49, %v4456_v4  ;;  %v3424_v8 = vsel %vm3357_vm1, %v9609_v55, -inf  ;;  %v3893_v17 = vsel %vm3874_vm4, %v3417_v29, %v3892_v22  ;;  %vm9610_vm13 = vmmov %vm9604_vm9  ;;  %v9618_v57 = vld [vmem:[#allocation107_spill] sm:$0xff] }
 0x31b   :  { %v1844_v62 = vmax.f32 %v9607_v16, %v9608_v48  ;;  %v4678_v13 = vsel %vm4665_vm11, %v4661_v21, %v4501_v15  ;;  %v1900_v25 = vmax.f32 %v1898_v31, %v1899_v46  ;;  %v3423_v0 = vmax.f32 %v7989_v1, %v3422_v42  ;;  %vm9611_vm14 = vmmov %vm9604_vm9  ;;  %v9619_v42 = vld [vmem:[#allocation100_spill] sm:$0xff]  ;;  %v9623_v48 = vld [vmem:[#allocation99_spill] sm:$0xff] }
 0x31c   :  { %v3425_v4 = vsel %vm3357_vm1, %v1893_v54, -inf  ;;  %v4695_v7 = vsel %vm4682_vm8, %v4678_v13, %v4546_v56  ;;  %v8056_v12 = vsel %vm4089_vm10, %v4111_v6, %v4112_v18  ;;  %v4108_v53 = vrot.slane %v8037_v32, 1  ;;  %v9620_v6 = vld [vmem:[#allocation96_spill] sm:$0xff] }
 0x31d   :  { %v4109_v39 = vrot.slane %v8040_v20, 1  ;;  %v4157_v41 = vrot.slane %v7979_v52, 2  ;;  %5837 = vmatpush3.xpose.msk.msra.mxu0 %vm4706_vm0, %v4695_v7  ;;  %4297 = vrot.lane.b32.xlu0 %v8037_v32, %s5934_s23  ;;  %v4158_v9 = vrot.slane %v4049_v26, 2  ;;  %v8065_v1 = vsel %vm9610_vm13, 0.0, %v3994_v28  ;;  %v9628_v7 = vld [vmem:[#allocation106_spill] sm:$0xff]  ;;  %vm9636_vm13 = vmmov %vm9602_vm2 }
 0x31e   :  { %v4046_v33 = vsel %vm9611_vm14, %v3994_v28, 0.0  ;;  %v3894_v31 = vsel %vm3876_vm5, %v3420_v5, %v3893_v17  ;;  %5838 = vmatprep.subr.mxu0 %v9511_v3  ;;  %v3387_v37 = vmax.f32 %v9613_v27, %v9612_v43  ;;  %v3389_v15 = vsel %vm3357_vm1, %v9614_v38, -inf  ;;  %4211 = vrot.lane.b32.xlu1 %v8056_v12, %s5932_s0  ;;  %v9622_v28 = vld [vmem:[#allocation109_spill] sm:$0xff] }
 0x31f   :  { %v1766_v59 = vrot.slane %v9615_v24, 1  ;;  %v9617_v29 = vrot.slane %v9616_v30, 2  ;;  %v1785_v11 = vrot.slane %v9618_v57, 2  ;;  %v3427_v22 = vsel %vm3357_vm1, %v1844_v62, -inf }
 0x320   :  { %v3426_v54 = vmax.f32 %v3424_v8, %v3425_v4  ;;  %v3428_v61 = vsel %vm3357_vm1, %v1900_v25, -inf  ;;  %v8084_v23 = vsel %vm4089_vm10, %v4108_v53, %v4109_v39  ;;  %v4102_v58 = vrot.slane %v8065_v1, 1  ;;  %v9625_v8 = vld [vmem:[#allocation97_spill] sm:$0xff]  ;;  %v9627_v4 = vld [vmem:[#allocation94_spill] sm:$0xff] }
 0x321   :  { %v1779_v26 = vmax.f32 %v9616_v30, %v9617_v29  ;;  %v4103_v46 = vrot.slane %v4046_v33, 1  ;;  %v3895_v5 = vsel %vm3878_vm6, %v3423_v0, %v3894_v31  ;;  %v1724_v60 = vrot.slane %v9619_v42, 1  ;;  %4345 = vrot.lane.b32.xlu0 %v8084_v23, %s5936_s25  ;;  %v9626_v25 = vld [vmem:[#allocation105_spill] sm:$0xff] }
 0x322   :  { %v9621_v18 = vrot.slane %v9620_v6, 2  ;;  %v1773_v21 = vrot.slane %v9622_v28, 1  ;;  %v8096_v16 = vsel %vm9602_vm2, %v4157_v41, %v4158_v9  ;;  %v9624_v62 = vrot.slane %v9623_v48, 1  ;;  %v9632_v29 = vld [vmem:[#allocation101_spill] sm:$0xff]  ;;  %vm9641_vm2 = vmmov %vm9611_vm14 }
 0x323   :  { %v3390_v17 = vmax.f32 %v9625_v8, %v3389_v15  ;;  %v1767_v56 = vmax.f32 %v9615_v24, %v1766_v59  ;;  %4256 = vrot.lane.b32.xlu1 %v8096_v16, %s5933_s22  ;;  %v3429_v13 = vmax.f32 %v3427_v22, %v3428_v61  ;;  %v3392_v0 = vsel %vm3357_vm1, %v9626_v25, -inf  ;;  %v9631_v15 = vld [vmem:[#allocation88_spill] sm:$0xff] }
 0x324   :  { %v1730_v49 = vmax.f32 %v9620_v6, %v9621_v18  ;;  %v1718_v55 = vmax.f32 %v9623_v48, %v9624_v62  ;;  %v9629_v53 = vmax.f32 %v9627_v4, %v9628_v7  ;;  %vm9630_vm15 = vcmask 1041409   ;;  %v9635_v61 = vld [vmem:[#allocation92_spill] sm:$0xff] }
 0x325   :  { %v1786_v41 = vmax.f32 %v9618_v57, %v1785_v11  ;;  %v3896_v9 = vsel %vm3880_vm7, %v3426_v54, %v3895_v5  ;;  %v1780_v31 = vrot.slane %v1779_v26, 1  ;;  %v8114_v43 = vsel %vm4089_vm10, %v4102_v58, %v4103_v46  ;;  %v9633_v11 = vld [vmem:[#allocation98_spill] sm:$0xff] }
 0x326   :  { %v3884_v39 = vsel %vm9630_vm15, %v3387_v37, %v9629_v53  ;;  %v4148_v27 = vrot.slane %v8065_v1, 2  ;;  %v4149_v38 = vrot.slane %v4046_v33, 2  ;;  %v1671_v24 = vrot.slane %v9631_v15, 4  ;;  %4205 = vrot.lane.b32.xlu0 %v8114_v43, %s5932_s0  ;;  %vm9649_vm15 = vmmov %vm9636_vm13 }
 0x327   :  { %v1774_v59 = vmax.f32 %v9622_v28, %v1773_v21  ;;  %v4185_v37 = vrot.slane %v7899_v36, 1  ;;  %v4186_v30 = vrot.slane %v7902_v50, 1  ;;  %v3394_v57 = vsel %vm3357_vm1, %v9632_v29, -inf  ;;  %4301 = vrot.lane.b32.xlu1 %v7899_v36, %s5934_s23  ;;  %v9644_v29 = vld [vmem:[#allocation78_spill] sm:$0xff] }
 0x328   :  { %v3393_v22 = vmax.f32 %v9633_v11, %v3392_v0  ;;  %v3395_v54 = vsel %vm3357_vm1, %v1767_v56, -inf  ;;  %vm9634_vm9 = vcmask 1047559   ;;  %v1659_v58 = vrot.slane %v9635_v61, 2  ;;  %v9645_v11 = vld [vmem:[#allocation89_spill] sm:$0xff] }
 0x329   :  { %v3897_v33 = vsel %vm9634_vm9, %v3429_v13, %v3896_v9  ;;  %v1731_v46 = vrot.slane %v1730_v49, 1  ;;  %v3885_v5 = vsel %vm3872_vm3, %v3390_v17, %v3884_v39  ;;  %v1787_v6 = vrot.slane %v1786_v41, 1  ;;  %v9637_v17 = vld [vmem:[#allocation87_spill] sm:$0xff] }
 0x32a   :  { %v1725_v50 = vmax.f32 %v9619_v42, %v1724_v60  ;;  %v3397_v18 = vsel %vm3357_vm1, %v1718_v55, -inf  ;;  %v1781_v28 = vmax.f32 %v1779_v26, %v1780_v31  ;;  %v8135_v21 = vsel %vm9636_vm13, %v4148_v27, %v4149_v38  ;;  %v9638_v42 = vld [vmem:[#allocation86_spill] sm:$0xff]  ;;  %v9640_v55 = vld [vmem:[#allocation93_spill] sm:$0xff] }
 0x32b   :  { %v3396_v48 = vmax.f32 %v3394_v57, %v3395_v54  ;;  %v3398_v62 = vsel %vm3357_vm1, %v1774_v59, -inf  ;;  %v8139_v8 = vsel %vm4089_vm10, %v4185_v37, %v4186_v30  ;;  %4250 = vrot.lane.b32.xlu0 %v8135_v21, %s5933_s22  ;;  %v3993_v56 = vrot.slane %v3897_v33, 7 }
 0x32c   :  { %v3362_v13 = vsel %vm3357_vm1, %v9637_v17, -inf  ;;  %v9639_v60 = vrot.slane %v9638_v42, 2  ;;  %v1666_v25 = vrot.slane %v9640_v55, 2  ;;  %4349 = vrot.lane.b32.xlu1 %v8139_v8, %s5936_s25  ;;  %v3886_v0 = vsel %vm3874_vm4, %v3393_v22, %v3885_v5 }
 0x32d   :  { %v1660_v4 = vmax.f32 %v9635_v61, %v1659_v58  ;;  %v1672_v7 = vmax.f32 %v9631_v15, %v1671_v24  ;;  %v1732_v53 = vmax.f32 %v1730_v49, %v1731_v46  ;;  %v1788_v39 = vmax.f32 %v1786_v41, %v1787_v6  ;;  %v9642_v41 = vld [vmem:[#allocation85_spill] sm:$0xff]  ;;  %v8174_v46 = vpop.permute.xlu0 %4405 }
 0x32e   :  { %v1653_v26 = vmax.f32 %v9638_v42, %v9639_v60  ;;  %v3400_v9 = vsel %vm3357_vm1, %v1725_v50, -inf  ;;  %v3399_v31 = vmax.f32 %v3397_v18, %v3398_v62  ;;  %v3401_v27 = vsel %vm3357_vm1, %v1781_v28, -inf  ;;  %v9643_v15 = vld [vmem:[#allocation77_spill] sm:$0xff]  ;;  %v9646_v28 = vld [vmem:[#allocation80_spill] sm:$0xff] }
 0x32f   :  { %v4154_v38 = vrot.slane %v8037_v32, 2  ;;  %4295 = vrot.lane.b32.xlu0 %v7963_v19, %s5934_s23  ;;  %v4155_v59 = vrot.slane %v8040_v20, 2  ;;  %v8161_v37 = vsel %vm9611_vm14, 0.0, %v3993_v56  ;;  %v4045_v30 = vsel %vm9641_vm2, %v3993_v56, 0.0  ;;  %v9648_v56 = vld [vmem:[#allocation84_spill] sm:$0xff]  ;;  %v9650_v60 = vld [vmem:[#allocation81_spill] sm:$0xff]  ;;  %vm9659_vm14 = vmmov %vm9649_vm15 }
 0x330   :  { %v3887_v49 = vsel %vm3876_vm5, %v3396_v48, %v3886_v0  ;;  %v3360_v24 = vmax.f32 %v9643_v15, %v9642_v41  ;;  %v3363_v57 = vmax.f32 %v9644_v29, %v3362_v13  ;;  %v3365_v22 = vsel %vm3357_vm1, %v9645_v11, -inf  ;;  %4209 = vrot.lane.b32.xlu1 %v8084_v23, %s5932_s0  ;;  %v9652_v0 = vld [vmem:[#allocation90_spill] sm:$0xff] }
 0x331   :  { %v1654_v54 = vrot.slane %v1653_v26, 1  ;;  %v1673_v20 = vrot.slane %v1672_v7, 2  ;;  %v3403_v33 = vsel %vm3357_vm1, %v1732_v53, -inf  ;;  %v3402_v61 = vmax.f32 %v3400_v9, %v3401_v27 }
 0x332   :  { %v3404_v58 = vsel %vm3357_vm1, %v1788_v39, -inf  ;;  %v1667_v5 = vmax.f32 %v9640_v55, %v1666_v25  ;;  %v4099_v6 = vrot.slane %v8161_v37, 1  ;;  %v4100_v50 = vrot.slane %v4045_v30, 1 }
 0x333   :  { %v3888_v18 = vsel %vm3878_vm6, %v3399_v31, %v3887_v49  ;;  %v9647_v48 = vrot.slane %v9646_v28, 1  ;;  %v1612_v17 = vrot.slane %v9648_v56, 1  ;;  %v1661_v13 = vrot.slane %v1660_v4, 1  ;;  %4343 = vrot.lane.b32.xlu0 %v8009_v35, %s5936_s25  ;;  %v9653_v31 = vld [vmem:[#allocation79_spill] sm:$0xff] }
 0x334   :  { %v8184_v42 = vsel %vm9649_vm15, %v4154_v38, %v4155_v59  ;;  %v9651_v55 = vrot.slane %v9650_v60, 2  ;;  %v3368_v53 = vsel %vm3357_vm1, %v9652_v0, -inf  ;;  %v1655_v39 = vmax.f32 %v1653_v26, %v1654_v54 }
 0x335   :  { %v1599_v62 = vmax.f32 %v9646_v28, %v9647_v48  ;;  %4254 = vrot.lane.b32.xlu1 %v8184_v42, %s5933_s22  ;;  %v3405_v9 = vmax.f32 %v3403_v33, %v3404_v58  ;;  %v3366_v27 = vmax.f32 %v9653_v31, %v3365_v22  ;;  %vm9654_vm9 = vcmask 1041409   ;;  %v9655_v28 = vld [vmem:[#allocation83_spill] sm:$0xff]  ;;  %v4454_v22 = vpop.permute.xlu0 %4453  ;;  %v4218_v33 = vpop.permute.xlu1 %4217 }
 0x336   :  { %v1618_v25 = vmax.f32 %v9650_v60, %v9651_v55  ;;  %v3871_v38 = vsel %vm9654_vm9, %v3363_v57, %v3360_v24  ;;  %v1674_v59 = vmax.f32 %v1672_v7, %v1673_v20  ;;  %v3889_v49 = vsel %vm3880_vm7, %v3402_v61, %v3888_v18  ;;  %v9657_v24 = vld [vmem:[#allocation82_spill] sm:$0xff]  ;;  %vm9666_vm9 = vmmov %vm9659_vm14 }
 0x337   :  { %v1668_v41 = vrot.slane %v1667_v5, 1  ;;  %v8199_v15 = vsel %vm4089_vm10, %v4099_v6, %v4100_v50  ;;  %v4145_v29 = vrot.slane %v8161_v37, 2  ;;  %v4146_v11 = vrot.slane %v4045_v30, 2 }
 0x338   :  { %v9656_v26 = vrot.slane %v9655_v28, 1  ;;  %v1662_v48 = vmax.f32 %v1660_v4, %v1661_v13  ;;  %4203 = vrot.lane.b32.xlu0 %v8199_v15, %s5932_s0  ;;  %v3370_v7 = vsel %vm3357_vm1, %v1599_v62, -inf  ;;  %v3369_v57 = vmax.f32 %v9657_v24, %v3368_v53 }
 0x339   :  { %v3371_v20 = vsel %vm3357_vm1, %v1655_v39, -inf  ;;  %4347 = vrot.lane.b32.xlu1 %v8056_v12, %s5936_s25  ;;  %vm9658_vm13 = vcmask 1047559   ;;  %v1619_v61 = vrot.slane %v1618_v25, 1  ;;  %v3873_v58 = vsel %vm3872_vm3, %v3366_v27, %v3871_v38  ;;  %v4263_v0 = vpop.permute.xlu1 %4262  ;;  %vm9660_vm3 = vmmov %vm9641_vm2 }
 0x33a   :  { %v1606_v54 = vmax.f32 %v9655_v28, %v9656_v26  ;;  %v3890_v30 = vsel %vm9658_vm13, %v3405_v9, %v3889_v49  ;;  %v1675_v4 = vrot.slane %v1674_v59, 1  ;;  %v1613_v6 = vmax.f32 %v9648_v56, %v1612_v17  ;;  %v4499_v17 = vpop.permute.xlu0 %4498 }
 0x33b   :  { %v1669_v50 = vmax.f32 %v1667_v5, %v1668_v41  ;;  %v8216_v18 = vsel %vm9659_vm14, %v4145_v29, %v4146_v11  ;;  %v3372_v13 = vmax.f32 %v3370_v7, %v3371_v20  ;;  %v3374_v60 = vsel %vm3357_vm1, %v1662_v48, -inf  ;;  %vm9668_vm14 = vmmov %vm9641_vm2 }
 0x33c   :  { %v3373_v62 = vsel %vm3357_vm1, %v1606_v54, -inf  ;;  %4248 = vrot.lane.b32.xlu0 %v8216_v18, %s5933_s22  ;;  %v3992_v55 = vrot.slane %v3890_v30, 7  ;;  %v3875_v53 = vsel %vm3874_vm4, %v3369_v57, %v3873_v58  ;;  %v1620_v56 = vmax.f32 %v1618_v25, %v1619_v61 }
 0x33d   :  { %4395 = vrot.lane.b32.xlu1 %v8096_v16, %s5935_s24  ;;  %v1676_v5 = vmax.f32 %v1674_v59, %v1675_v4  ;;  %v3376_v39 = vsel %vm3357_vm1, %v1613_v6, -inf  ;;  %v3375_v9 = vmax.f32 %v3373_v62, %v3374_v60  ;;  %v3377_v31 = vsel %vm3357_vm1, %v1669_v50, -inf  ;;  %v4310_v25 = vpop.permute.xlu1 %4309 }
 0x33e   :  { %v8230_v27 = vsel %vm9660_vm3, 0.0, %v3992_v55  ;;  %v4044_v38 = vsel %vm9641_vm2, %v3992_v55, 0.0  ;;  %v3877_v49 = vsel %vm3876_vm5, %v3372_v13, %v3875_v53  ;;  %v3379_v59 = vsel %vm3357_vm1, %v1620_v56, -inf  ;;  %v4544_v48 = vpop.permute.xlu0 %4543  ;;  %vm9669_vm3 = vmmov %vm9666_vm9 }
 0x33f   :  { %v3378_v41 = vmax.f32 %v3376_v39, %v3377_v31  ;;  %v3380_v29 = vsel %vm3357_vm1, %v1676_v5, -inf  ;;  %v4096_v11 = vrot.slane %v8230_v27, 1  ;;  %v4097_v28 = vrot.slane %v4044_v38, 1 }
 0x340   :  { %4293 = vrot.lane.b32.xlu0 %v8065_v1, %s5934_s23  ;;  %v4576_v26 = vsel %vm3357_vm1, %v7496_v40, %v4218_v33  ;;  %v3879_v54 = vsel %vm3878_vm6, %v3375_v9, %v3877_v49  ;;  %v3381_v7 = vmax.f32 %v3379_v59, %v3380_v29  ;;  %vm9661_vm4 = vcmask 97280  }
 0x341   :  { %4443 = vrot.lane.b32.xlu1 %v7899_v36, %s5938_s26  ;;  %v4592_v36 = vsel %vm4581_vm12, %v4576_v26, %v4263_v0  ;;  %v4358_v57 = vpop.permute.xlu1 %4357  ;;  %v3881_v20 = vsel %vm3880_vm7, %v3378_v41, %v3879_v54  ;;  %vm9662_vm5 = vcmask 130048   ;;  %v8251_v40 = vsel %vm4089_vm10, %v4096_v11, %v4097_v28  ;;  %vm9665_vm7 = vmmov %vm9658_vm13 }
 0x342   :  { %v4609_v24 = vsel %vm9661_vm4, %v4592_v36, %v4310_v25  ;;  %v4142_v33 = vrot.slane %v8230_v27, 2  ;;  %v4143_v61 = vrot.slane %v4044_v38, 2  ;;  %vm9663_vm6 = vcmask 162816   ;;  %v4404_v50 = vpop.permute.xlu0 %4403  ;;  %vm9667_vm13 = vmmov %vm9641_vm2 }
 0x343   :  { %v4626_v30 = vsel %vm9662_vm5, %v4609_v24, %v4358_v57  ;;  %vm9664_vm15 = vcmask 195584   ;;  %v3883_v4 = vsel %vm9665_vm7, %v3381_v7, %v3881_v20  ;;  %vm9670_vm2 = vmmov %vm9661_vm4 }
 0x344   :  { %4341 = vrot.lane.b32.xlu0 %v8114_v43, %s5936_s25  ;;  %v4643_v58 = vsel %vm9663_vm6, %v4626_v30, %v8174_v46  ;;  %v8265_v13 = vsel %vm9666_vm9, %v4142_v33, %v4143_v61  ;;  %v3991_v46 = vrot.slane %v3883_v4, 7  ;;  %vm9671_vm4 = vmmov %vm9662_vm5 }
 0x345   :  { %4488 = vrot.lane.b32.xlu1 %v8139_v8, %s5939_s27  ;;  %v4660_v8 = vsel %vm9664_vm15, %v4643_v58, %v4454_v22  ;;  %vm9672_vm5 = vmmov %vm9663_vm6 }
 0x346   :  { %v4677_v6 = vsel %vm4665_vm11, %v4660_v8, %v4499_v17  ;;  %v8276_v22 = vsel %vm9667_vm13, 0.0, %v3991_v46  ;;  %v4043_v60 = vsel %vm9668_vm14, %v3991_v46, 0.0  ;;  %vm9673_vm6 = vmmov %vm9664_vm15 }
 0x347   :  { %v4694_v62 = vsel %vm4682_vm8, %v4677_v6, %v4544_v48  ;;  %v4093_v55 = vrot.slane %v8276_v22, 1  ;;  %v4094_v0 = vrot.slane %v4043_v60, 1  ;;  %v4139_v5 = vrot.slane %v8276_v22, 2  ;;  %vm9674_vm15 = vmmov %vm9670_vm2 }
 0x348   :  { %4201 = vrot.lane.b32.xlu0 %v8251_v40, %s5932_s0  ;;  %5839 = vmatpush3.xpose.msk.msra.mxu0 %vm4706_vm0, %v4694_v62  ;;  %v4140_v17 = vrot.slane %v4043_v60, 2  ;;  %vm9675_vm7 = vmmov %vm9671_vm4 }
 0x349   :  { %4533 = vrot.lane.b32.xlu1 %v7952_v10, %s5940_s28  ;;  %5840 = vmatprep.subr.mxu0 %v9511_v3  ;;  %v4452_v10 = vpop.permute.xlu0 %4451  ;;  %v4095_v56 = vsel %vm4089_vm10, %v4093_v55, %v4094_v0  ;;  %vm9676_vm9 = vmmov %vm9672_vm5  ;;  %v9678_v55 = vld [vmem:[#allocation14_spill] sm:$0xff] }
 0x34a   :  { %v4141_v39 = vsel %vm9669_vm3, %v4139_v5, %v4140_v17  ;;  %vm9677_vm13 = vmmov %vm9673_vm6 }
 0x34b   :  { %vm9679_vm14 = vmmov %vm9670_vm2 }
 0x34c   :  { %4246 = vrot.lane.b32.xlu0 %v8265_v13, %s5933_s22  ;;  %vm9680_vm3 = vmmov %vm9671_vm4 }
 0x34d   :  { %4393 = vrot.lane.b32.xlu1 %v8184_v42, %s5935_s24  ;;  %v4497_v53 = vpop.permute.xlu0 %4496 }
 0x350   :  { %4291 = vrot.lane.b32.xlu0 %v8161_v37, %s5934_s23 }
 0x351   :  { %4441 = vrot.lane.b32.xlu1 %v7979_v52, %s5938_s26  ;;  %v4542_v9 = vpop.permute.xlu0 %4541 }
 0x354   :  { %4339 = vrot.lane.b32.xlu0 %v8199_v15, %s5936_s25 }
 0x355   :  { %4486 = vrot.lane.b32.xlu1 %v8056_v12, %s5939_s27 }
 0x356   :  { %v4402_v12 = vpop.permute.xlu0 %4401 }
 0x357   :  { %v4216_v31 = vpop.permute.xlu1 %4215 }
 0x358   :  { %4199 = vrot.lane.b32.xlu0 %v4095_v56, %s5932_s0  ;;  %v4575_v59 = vsel %vm3357_vm1, %v7680_v34, %v4216_v31 }
 0x359   :  { %4531 = vrot.lane.b32.xlu1 %v8096_v16, %s5940_s28 }
 0x35a   :  { %v4450_v16 = vpop.permute.xlu0 %4449 }
 0x35b   :  { %v4261_v38 = vpop.permute.xlu1 %4260 }
 0x35c   :  { %4244 = vrot.lane.b32.xlu0 %v4141_v39, %s5933_s22 }
 0x35d   :  { %4391 = vrot.lane.b32.xlu1 %v8029_v45, %s5935_s24 }
 0x35e   :  { %v4495_v49 = vpop.permute.xlu0 %4494 }
 0x35f   :  { %v4308_v25 = vpop.permute.xlu1 %4307 }
 0x360   :  { %4289 = vrot.lane.b32.xlu0 %v8230_v27, %s5934_s23 }
 0x361   :  { %4439 = vrot.lane.b32.xlu1 %v8037_v32, %s5938_s26 }
 0x362   :  { %v4540_v41 = vpop.permute.xlu0 %4539 }
 0x363   :  { %v4356_v11 = vpop.permute.xlu1 %4355 }
 0x364   :  { %4337 = vrot.lane.b32.xlu0 %v8251_v40, %s5936_s25 }
 0x365   :  { %4484 = vrot.lane.b32.xlu1 %v8084_v23, %s5939_s27  ;;  %v4591_v23 = vsel %vm4581_vm12, %v4575_v59, %v4261_v38 }
 0x366   :  { %v4608_v29 = vsel %vm9670_vm2, %v4591_v23, %v4308_v25  ;;  %vm9681_vm2 = vmmov %vm9672_vm5 }
 0x367   :  { %v4625_v28 = vsel %vm9671_vm4, %v4608_v29, %v4356_v11  ;;  %vm9682_vm4 = vmmov %vm9673_vm6 }
 0x368   :  { %4385 = vrot.lane.b32.xlu0 %v8265_v13, %s5935_s24 }
 0x369   :  { %4529 = vrot.lane.b32.xlu1 %v8184_v42, %s5940_s28  ;;  %v4642_v42 = vsel %vm9672_vm5, %v4625_v28, %v4404_v50  ;;  %v4214_v54 = vpop.permute.xlu1 %4213  ;;  %vm5941_vm5 = vmmov 0  }
 0x36a   :  { %v4659_v34 = vsel %vm9673_vm6, %v4642_v42, %v4452_v10  ;;  %v4400_v26 = vpop.permute.xlu0 %4399  ;;  %v4574_v30 = vsel %vm3357_vm1, %v7764_v47, %v4214_v54  ;;  %5862 = vmatprep.mubr.msk.f32.mxu0 %vm5941_vm5, %v9511_v3  ;;  %5897 = vmatprep.mubr.msk.f32.mxu1 %vm5941_vm5, %v9511_v3  ;;  %vm9683_vm6 = vmmov %vm9679_vm14 }
 0x36b   :  { %v4676_v48 = vsel %vm4665_vm11, %v4659_v34, %v4497_v53 }
 0x36c   :  { %4287 = vrot.lane.b32.xlu0 %v8276_v22, %s5934_s23  ;;  %v4693_v36 = vsel %vm4682_vm8, %v4676_v48, %v4542_v9 }
 0x36d   :  { %4389 = vrot.lane.b32.xlu1 %v8135_v21, %s5935_s24  ;;  %5841 = vmatpush3.xpose.msk.msra.mxu0 %vm4706_vm0, %v4693_v36  ;;  %v4259_v24 = vpop.permute.xlu1 %4258 }
 0x36e   :  { %v4448_v7 = vpop.permute.xlu0 %4447  ;;  %5842 = vmatprep.subr.mxu0 %v9511_v3 }
 0x370   :  { %4335 = vrot.lane.b32.xlu0 %v4095_v56, %s5936_s25 }
 0x371   :  { %4437 = vrot.lane.b32.xlu1 %v7963_v19, %s5938_s26  ;;  %v4306_v20 = vpop.permute.xlu1 %4305 }
 0x372   :  { %v4493_v57 = vpop.permute.xlu0 %4492 }
 0x374   :  { %4383 = vrot.lane.b32.xlu0 %v4141_v39, %s5935_s24 }
 0x375   :  { %4482 = vrot.lane.b32.xlu1 %v8009_v35, %s5939_s27  ;;  %v4590_v35 = vsel %vm4581_vm12, %v4574_v30, %v4259_v24  ;;  %v4354_v58 = vpop.permute.xlu1 %4353 }
 0x376   :  { %v4538_v33 = vpop.permute.xlu0 %4537  ;;  %v4607_v61 = vsel %vm9674_vm15, %v4590_v35, %v4306_v20  ;;  %vm9684_vm15 = vmmov %vm9680_vm3 }
 0x377   :  { %v4624_v8 = vsel %vm9675_vm7, %v4607_v61, %v4354_v58  ;;  %vm9685_vm7 = vmmov %vm9681_vm2 }
 0x378   :  { %4476 = vrot.lane.b32.xlu0 %v8251_v40, %s5939_s27  ;;  %v4641_v40 = vsel %vm9676_vm9, %v4624_v8, %v4402_v12  ;;  %vm9686_vm9 = vmmov %vm9682_vm4 }
 0x379   :  { %4527 = vrot.lane.b32.xlu1 %v8029_v45, %s5940_s28  ;;  %v4658_v45 = vsel %vm9677_vm13, %v4641_v40, %v4450_v16  ;;  %v4198_v47 = vpop.permute.xlu1 %4197  ;;  %vm9687_vm13 = vmmov %vm9683_vm6 }
 0x37a   :  { %v4675_v6 = vsel %vm4665_vm11, %v4658_v45, %v4495_v49  ;;  %v4566_v0 = vsel %vm3357_vm1, %v9678_v55, %v4198_v47  ;;  %v5942_v49 = vmov 0  }
 0x37b   :  { %v4692_v50 = vsel %vm4682_vm8, %v4675_v6, %v4540_v41  ;;  %5919 = vset.pattern.permute.xlu0 %v5942_v49 }
 0x37c   :  { %5843 = vmatpush3.xpose.msk.msra.mxu0 %vm4706_vm0, %v4692_v50 }
 0x37d   :  { %4387 = vrot.lane.b32.xlu1 %v8216_v18, %s5935_s24  ;;  %v4398_v4 = vpop.permute.xlu0 %4397  ;;  %5844 = vmatprep.subr.mxu0 %v9511_v3  ;;  %v4243_v46 = vpop.permute.xlu1 %4242 }
 0x381   :  { %4435 = vrot.lane.b32.xlu1 %v8065_v1, %s5938_s26  ;;  %v4300_v62 = vpop.permute.xlu0 %4299  ;;  %v4304_v60 = vpop.permute.xlu1 %4303 }
 0x385   :  { %4480 = vrot.lane.b32.xlu1 %v8114_v43, %s5939_s27  ;;  %v8358_v43 = vsel %vm4581_vm12, %v4566_v0, %v4243_v46  ;;  %v4352_v5 = vpop.permute.xlu1 %4351 }
 0x386   :  { %v8351_v10 = vpop.permute.xlu0 %4207  ;;  %v4606_v56 = vsel %vm9679_vm14, %v8358_v43, %v4304_v60  ;;  %vm9688_vm14 = vmmov %vm9680_vm3 }
 0x387   :  { %vm9692_vm5 = vmmov %vm9688_vm14 }
 0x389   :  { %4525 = vrot.lane.b32.xlu1 %v8135_v21, %s5940_s28  ;;  %v4623_v21 = vsel %vm9680_vm3, %v4606_v56, %v4352_v5  ;;  %vm9689_vm3 = vmmov %vm9681_vm2 }
 0x38a   :  { %v4640_v17 = vsel %vm9681_vm2, %v4623_v21, %v4400_v26  ;;  %vm9690_vm2 = vmmov %vm9682_vm4 }
 0x38b   :  { %v8360_v53 = vpop.permute.xlu0 %4252  ;;  %v4657_v39 = vsel %vm9682_vm4, %v4640_v17, %v4448_v7  ;;  %vm9691_vm4 = vmmov %vm9683_vm6 }
 0x38c   :  { %v4674_v31 = vsel %vm4665_vm11, %v4657_v39, %v4493_v57 }
 0x38d   :  { %4433 = vrot.lane.b32.xlu1 %v8161_v37, %s5938_s26  ;;  %v4691_v16 = vsel %vm4682_vm8, %v4674_v31, %v4538_v33 }
 0x38e   :  { %5845 = vmatpush3.xpose.msk.msra.mxu0 %vm4706_vm0, %v4691_v16 }
 0x38f   :  { %v4298_v9 = vpop.permute.xlu0 %4297  ;;  %5846 = vmatprep.subr.mxu0 %v9511_v3 }
 0x390   :  { %v4212_v12 = vpop.permute.xlu1 %4211 }
 0x391   :  { %4478 = vrot.lane.b32.xlu1 %v8199_v15, %s5939_s27  ;;  %v8379_v15 = vld [vmem:[%s9141_s2] sm:$0xff]  ;;  %v4573_v23 = vsel %vm3357_vm1, %v7979_v52, %v4212_v12 }
 0x392   :  { %4703 = vperm.xlu0 %5919, %v8379_v15  }
 0x393   :  { %v4346_v38 = vpop.permute.xlu0 %4345 }
 0x395   :  { %4523 = vrot.lane.b32.xlu1 %v8216_v18, %s5940_s28  ;;  %v4257_v25 = vpop.permute.xlu1 %4256 }
 0x396   :  { %v4589_v41 = vsel %vm4581_vm12, %v4573_v23, %v4257_v25 }
 0x398   :  { %v4206_v18 = vpop.permute.xlu0 %4205 }
 0x399   :  { %4431 = vrot.lane.b32.xlu1 %v8230_v27, %s5938_s26  ;;  %v4302_v59 = vpop.permute.xlu1 %4301 }
 0x39a   :  { %v4605_v11 = vsel %vm9683_vm6, %v4589_v41, %v4302_v59  ;;  %vm9693_vm6 = vmmov %vm9689_vm3 }
 0x39d   :  { %4521 = vrot.lane.b32.xlu1 %v8265_v13, %s5940_s28  ;;  %v4251_v29 = vpop.permute.xlu0 %4250 }
 0x39e   :  { %v4350_v28 = vpop.permute.xlu1 %4349 }
 0x39f   :  { %v4622_v42 = vsel %vm9684_vm15, %v4605_v11, %v4350_v28  ;;  %vm9694_vm15 = vmmov %vm9690_vm2 }
 0x3a0   :  { %v4639_v34 = vsel %vm9685_vm7, %v4622_v42, %v4398_v4  ;;  %vm9695_vm7 = vmmov %vm9691_vm4 }
 0x3a1   :  { %v4656_v26 = vsel %vm9686_vm9, %v4639_v34, %v7525_v44  ;;  %v4296_v54 = vpop.permute.xlu0 %4295  ;;  %vm9696_vm9 = vmmov %vm9692_vm5 }
 0x3a2   :  { %v4210_v48 = vpop.permute.xlu1 %4209  ;;  %v4673_v52 = vsel %vm4665_vm11, %v4656_v26, %v7546_v63 }
 0x3a3   :  { %v4690_v13 = vsel %vm4682_vm8, %v4673_v52, %v7572_v51  ;;  %v4572_v44 = vsel %vm3357_vm1, %v8037_v32, %v4210_v48 }
 0x3a4   :  { %5847 = vmatpush3.xpose.msk.msra.mxu0 %vm4706_vm0, %v4690_v13 }
 0x3a5   :  { %5848 = vmatprep.subr.mxu0 %v9511_v3  ;;  %v4344_v7 = vpop.permute.xlu0 %4343 }
 0x3a7   :  { %v4255_v36 = vpop.permute.xlu1 %4254 }
 0x3a8   :  { %v4588_v35 = vsel %vm4581_vm12, %v4572_v44, %v4255_v36 }
 0x3a9   :  { %v4604_v63 = vsel %vm9687_vm13, %v4588_v35, %v4300_v62  ;;  %v4571_v62 = vsel %vm3357_vm1, %v7963_v19, %v8351_v10  ;;  %vm9697_vm13 = vmmov %vm9689_vm3 }
 0x3aa   :  { %v4204_v57 = vpop.permute.xlu0 %4203  ;;  %v4587_v46 = vsel %vm4581_vm12, %v4571_v62, %v8360_v53 }
 0x3ab   :  { %v4348_v24 = vpop.permute.xlu1 %4347  ;;  %v4603_v0 = vsel %vm9691_vm4, %v4587_v46, %v4298_v9  ;;  %v4570_v9 = vsel %vm3357_vm1, %v8065_v1, %v4206_v18  ;;  %v4569_v48 = vsel %vm3357_vm1, %v8161_v37, %v4204_v57 }
 0x3ac   :  { %v4621_v51 = vsel %vm9688_vm14, %v4604_v63, %v4348_v24  ;;  %v4620_v5 = vsel %vm9692_vm5, %v4603_v0, %v4346_v38  ;;  %v4586_v38 = vsel %vm4581_vm12, %v4570_v9, %v4251_v29  ;;  %vm9698_vm14 = vmmov %vm9690_vm2 }
 0x3ad   :  { %v4602_v25 = vsel %vm9695_vm7, %v4586_v38, %v4296_v54 }
 0x3ae   :  { %v4249_v33 = vpop.permute.xlu0 %4248  ;;  %v4619_v23 = vsel %vm9696_vm9, %v4602_v25, %v4344_v7 }
 0x3af   :  { %v4396_v20 = vpop.permute.xlu1 %4395  ;;  %v4585_v52 = vsel %vm4581_vm12, %v4569_v48, %v4249_v33 }
 0x3b0   :  { %v4638_v58 = vsel %vm9689_vm3, %v4621_v51, %v4396_v20  ;;  %vm9699_vm3 = vmmov %vm9691_vm4 }
 0x3b1   :  { %vm9701_vm4 = vmmov %vm9693_vm6 }
 0x3b2   :  { %v4294_v8 = vpop.permute.xlu0 %4293  ;;  %vm9705_vm7 = vmmov %vm9701_vm4 }
 0x3b3   :  { %v4444_v30 = vpop.permute.xlu1 %4443  ;;  %v4601_v13 = vsel %vm9699_vm3, %v4585_v52, %v4294_v8 }
 0x3b4   :  { %v4655_v40 = vsel %vm9690_vm2, %v4638_v58, %v4444_v30  ;;  %vm9700_vm2 = vmmov %vm9692_vm5 }
 0x3b5   :  { %vm9702_vm5 = vmmov %vm9698_vm14 }
 0x3b6   :  { %v4342_v6 = vpop.permute.xlu0 %4341  ;;  %vm9706_vm9 = vmmov %vm9702_vm5 }
 0x3b7   :  { %v4489_v61 = vpop.permute.xlu1 %4488  ;;  %v4618_v7 = vsel %vm9700_vm2, %v4601_v13, %v4342_v6 }
 0x3b8   :  { %v4672_v45 = vsel %vm4665_vm11, %v4655_v40, %v4489_v61 }
 0x3ba   :  { %v4202_v60 = vpop.permute.xlu0 %4201 }
 0x3bb   :  { %v4534_v4 = vpop.permute.xlu1 %4533  ;;  %v4568_v61 = vsel %vm3357_vm1, %v8230_v27, %v4202_v60 }
 0x3bc   :  { %v4689_v47 = vsel %vm4682_vm8, %v4672_v45, %v4534_v4 }
 0x3bd   :  { %5849 = vmatpush3.xpose.msk.msra.mxu0 %vm4706_vm0, %v4689_v47 }
 0x3be   :  { %5850 = vmatprep.subr.mxu0 %v9511_v3  ;;  %v4247_v31 = vpop.permute.xlu0 %4246 }
 0x3bf   :  { %v4394_v32 = vpop.permute.xlu1 %4393  ;;  %v4584_v51 = vsel %vm4581_vm12, %v4568_v61, %v4247_v31 }
 0x3c0   :  { %v4637_v21 = vsel %vm9693_vm6, %v4620_v5, %v4394_v32  ;;  %vm9703_vm6 = vmmov %vm9699_vm3 }
 0x3c2   :  { %v4292_v10 = vpop.permute.xlu0 %4291 }
 0x3c3   :  { %v4442_v50 = vpop.permute.xlu1 %4441  ;;  %v4600_v8 = vsel %vm9703_vm6, %v4584_v51, %v4292_v10 }
 0x3c4   :  { %v4654_v17 = vsel %vm9694_vm15, %v4637_v21, %v4442_v50  ;;  %vm9704_vm15 = vmmov %vm9700_vm2 }
 0x3c6   :  { %v4340_v41 = vpop.permute.xlu0 %4339 }
 0x3c7   :  { %v4487_v56 = vpop.permute.xlu1 %4486  ;;  %v4617_v45 = vsel %vm9704_vm15, %v4600_v8, %v4340_v41 }
 0x3c8   :  { %v4671_v39 = vsel %vm4665_vm11, %v4654_v17, %v4487_v56 }
 0x3ca   :  { %v4200_v1 = vpop.permute.xlu0 %4199 }
 0x3cb   :  { %v4532_v12 = vpop.permute.xlu1 %4531  ;;  %v4567_v46 = vsel %vm3357_vm1, %v8276_v22, %v4200_v1  ;;  %vm9711_vm1 = vmmov %vm9703_vm6 }
 0x3cc   :  { %v4688_v16 = vsel %vm4682_vm8, %v4671_v39, %v4532_v12 }
 0x3cd   :  { %5851 = vmatpush3.xpose.msk.msra.mxu0 %vm4706_vm0, %v4688_v16 }
 0x3ce   :  { %5852 = vmatprep.subr.mxu0 %v9511_v3  ;;  %v4245_v54 = vpop.permute.xlu0 %4244 }
 0x3cf   :  { %v4392_v19 = vpop.permute.xlu1 %4391  ;;  %v4583_v60 = vsel %vm4581_vm12, %v4567_v46, %v4245_v54  ;;  %v9269_v54 = vmov 1  }
 0x3d0   :  { %v4636_v11 = vsel %vm9697_vm13, %v4619_v23, %v4392_v19  ;;  %vm9707_vm13 = vmmov %vm9699_vm3  ;;  %5920 = vset.pattern.permute.xlu0 %v9269_v54 }
 0x3d1   :  { %vm9709_vm3 = vmmov %vm9701_vm4 }
 0x3d2   :  { %v4290_v20 = vpop.permute.xlu0 %4289 }
 0x3d3   :  { %v4440_v53 = vpop.permute.xlu1 %4439  ;;  %v4599_v56 = vsel %vm9707_vm13, %v4583_v60, %v4290_v20 }
 0x3d4   :  { %v4653_v28 = vsel %vm9698_vm14, %v4636_v11, %v4440_v53  ;;  %vm9708_vm14 = vmmov %vm9700_vm2 }
 0x3d5   :  { %vm9710_vm2 = vmmov %vm9702_vm5 }
 0x3d6   :  { %v4338_v57 = vpop.permute.xlu0 %4337  ;;  %vm9714_vm6 = vmmov %vm9710_vm2 }
 0x3d7   :  { %v4485_v59 = vpop.permute.xlu1 %4484  ;;  %v4616_v21 = vsel %vm9708_vm14, %v4599_v56, %v4338_v57 }
 0x3d8   :  { %v4670_v42 = vsel %vm4665_vm11, %v4653_v28, %v4485_v59 }
 0x3da   :  { %v4386_v58 = vpop.permute.xlu0 %4385 }
 0x3db   :  { %v4530_v34 = vpop.permute.xlu1 %4529  ;;  %v4633_v17 = vsel %vm9709_vm3, %v4616_v21, %v4386_v58 }
 0x3dc   :  { %v4687_v26 = vsel %vm4682_vm8, %v4670_v42, %v4530_v34 }
 0x3dd   :  { %5853 = vmatpush3.xpose.msk.msra.mxu0 %vm4706_vm0, %v4687_v26 }
 0x3de   :  { %5854 = vmatprep.subr.mxu0 %v9511_v3  ;;  %v4288_v50 = vpop.permute.xlu0 %4287 }
 0x3df   :  { %v4390_v18 = vpop.permute.xlu1 %4389  ;;  %v4598_v22 = vsel %vm9711_vm1, %v8358_v43, %v4288_v50  ;;  %v4699_v43 = vld [vmem:[%s9142_s1] sm:$0xff]  ;;  %s5944_s1 = smov 48  }
 0x3e0   :  { %v4635_v24 = vsel %vm9701_vm4, %v4618_v7, %v4390_v18  ;;  %vm9712_vm4 = vmmov %vm9708_vm14 }
 0x3e2   :  { %v4336_v0 = vpop.permute.xlu0 %4335 }
 0x3e3   :  { %v4438_v29 = vpop.permute.xlu1 %4437  ;;  %v4615_v10 = vsel %vm9712_vm4, %v4598_v22, %v4336_v0 }
 0x3e4   :  { %v4652_v44 = vsel %vm9702_vm5, %v4635_v24, %v4438_v29  ;;  %vm9713_vm5 = vmmov %vm9709_vm3 }
 0x3e6   :  { %v4384_v16 = vpop.permute.xlu0 %4383 }
 0x3e7   :  { %v4483_v36 = vpop.permute.xlu1 %4482  ;;  %v4632_v53 = vsel %vm9713_vm5, %v4615_v10, %v4384_v16 }
 0x3e8   :  { %v4669_v30 = vsel %vm4665_vm11, %v4652_v44, %v4483_v36  ;;  %v9268_v36 = vmov 2  }
 0x3e9   :  { %5921 = vset.pattern.permute.xlu1 %v9268_v36 }
 0x3ea   :  { %v4477_v25 = vpop.permute.xlu0 %4476 }
 0x3eb   :  { %v4528_v35 = vpop.permute.xlu1 %4527 }
 0x3ec   :  { %v4686_v63 = vsel %vm4682_vm8, %v4669_v30, %v4528_v35 }
 0x3ed   :  { %5855 = vmatpush3.xpose.msk.msra.mxu0 %vm4706_vm0, %v4686_v63 }
 0x3ee   :  { %5856 = vmatprep.subr.mxu0 %v9511_v3 }
 0x3ef   :  { %v4388_v37 = vpop.permute.xlu1 %4387 }
 0x3f0   :  { %v4634_v4 = vsel %vm9705_vm7, %v4617_v45, %v4388_v37 }
 0x3f3   :  { %v4436_v33 = vpop.permute.xlu1 %4435 }
 0x3f4   :  { %v4651_v47 = vsel %vm9706_vm9, %v4634_v4, %v4436_v33  ;;  %vm9719_vm9 = vcmask 1045504  }
 0x3f5   :  { %vm9722_vm3 = vmmov %vm9719_vm9 }
 0x3f6   :  { %vm9725_vm4 = vmmov %vm9722_vm3 }
 0x3f7   :  { %v4481_v40 = vpop.permute.xlu1 %4480  ;;  %vm9726_vm5 = vmmov %vm9722_vm3 }
 0x3f8   :  { %v4668_v32 = vsel %vm4665_vm11, %v4651_v47, %v4481_v40 }
 0x3fb   :  { %v4526_v6 = vpop.permute.xlu1 %4525 }
 0x3fc   :  { %v4685_v62 = vsel %vm4682_vm8, %v4668_v32, %v4526_v6 }
 0x3fd   :  { %5857 = vmatpush3.xpose.msk.msra.mxu0 %vm4706_vm0, %v4685_v62 }
 0x3fe   :  { %5858 = vmatprep.subr.mxu0 %v9511_v3 }
 0x3ff   :  { %v4434_v27 = vpop.permute.xlu1 %4433 }
 0x400   :  { %v4650_v39 = vsel %vm9710_vm2, %v4633_v17, %v4434_v27 }
 0x403   :  { %v4479_v5 = vpop.permute.xlu1 %4478 }
 0x404   :  { %v4667_v12 = vsel %vm4665_vm11, %v4650_v39, %v4479_v5 }
 0x407   :  { %v4524_v31 = vpop.permute.xlu1 %4523 }
 0x408   :  { %v4684_v19 = vsel %vm4682_vm8, %v4667_v12, %v4524_v31 }
 0x409   :  { %5859 = vmatpush3.xpose.msk.msra.mxu0 %vm4706_vm0, %v4684_v19 }
 0x40a   :  { %5860 = vmatprep.subr.mxu0 %v9511_v3 }
 0x40b   :  { %v4432_v9 = vpop.permute.xlu1 %4431 }
 0x40c   :  { %v4649_v38 = vsel %vm9714_vm6, %v4632_v53, %v4432_v9 }
 0x40d   :  { %v4666_v59 = vsel %vm4665_vm11, %v4649_v38, %v4477_v25  ;;  %v4704_v11 = vpop.permute.xlu0 %4703  ;;  %vm9715_vm11 = vcmask 1040384  }
 0x40f   :  { %v4522_v23 = vpop.permute.xlu1 %4521 }
 0x410   :  { %v4683_v41 = vsel %vm4682_vm8, %v4666_v59, %v4522_v23 }
 0x411   :  { %5861 = vmatpush3.xpose.msk.msra.mxu0 %vm4706_vm0, %v4683_v41 }
 0x414   :  { %5863 = vmatmul.mubr.msk.f32.vlgmr.msra.gmra.mxu0 %vm4706_vm0, %v4699_v43  ;;  %vm9716_vm0 = vmmov %vm9715_vm11 }
 0x415   :  { %vm9717_vm15 = vmmov %vm9716_vm0 }
 0x416   :  { %vm9718_vm7 = vmmov %vm9716_vm0 }
 0x417   :  { %vm9720_vm13 = vmmov %vm9716_vm0 }
 0x418   :  { %vm9721_vm14 = vmmov %vm9716_vm0 }
 0x419   :  { %vm9723_vm2 = vmmov %vm9716_vm0 }
 0x41a   :  { %vm9724_vm1 = vmmov %vm9716_vm0 }
 0x41b   :  { %vm9727_vm6 = vmmov %vm9716_vm0 }
 0x4d4   :  { %v4824_v28 = vpop.f32.mrf.mxu0 }
 0x4d5   :  { %v4825_v42 = vadd.f32 %v4824_v28, %v4704_v11 }
 0x4d6   :  { %v5864_v34 = vpop.f32.mrf.mxu0 }
 0x4d7   :  { %4828 = vadd.xlane.f32.xlu1 %v4825_v42 }
 0x4e8   :  { %5099 = vrot.lane.b32.xlu1 %v9587_v2, %s5933_s22 }
 0x4ec   :  { %5144 = vrot.lane.b32.xlu1 %v9597_v14, %s5936_s25 }
 0x560   :  { %v4829_v26 = vpop.xlane.xlu1 %4828 }
 0x561   :  { %v4831_v1 = vmul.f32 0.0078125, %v4829_v26 }
 0x563   :  { %v4832_v18 = vsub.f32 %v4825_v42, %v4831_v1 }
 0x565   :  { %v4833_v29 = vmul.f32 %v4832_v18, %v4832_v18 }
 0x567   :  { %4834 = vadd.xlane.f32.xlu0 %v4833_v29 }
 0x57d   :  { %5347 = vrot.lane.b32.xlu0 %v9678_v55, %s5944_s1 }
 0x581   :  { %5392 = vrot.lane.b32.xlu0 %v9587_v2, %s5945_s7  ;;  %v8497_v2 = vpop.permute.xlu1 %5099 }
 0x585   :  { %5437 = vrot.lane.b32.xlu0 %v9597_v14, %s5946_s8  ;;  %v8499_v14 = vpop.permute.xlu1 %5144 }
 0x5f0   :  { %v4835_v48 = vpop.xlane.xlu0 %4834 }
 0x5f1   :  { %v4836_v52 = vmul.f32 0.0078125, %v4835_v48 }
 0x5f3   :  { %v4837_v13 = vadd.f32 1e-05, %v4836_v52 }
 0x5f4   :  { %v8502_v35 = vpop.permute.xlu0 %5347 }
 0x5f5   :  { %5927 = vrsqrt.f32 %v4837_v13 }
 0x5f8   :  { %v8504_v63 = vpop.permute.xlu0 %5392 }
 0x5fc   :  { %v8506_v37 = vpop.permute.xlu0 %5437 }
 0x602   :  { %v5928_v7 = vpop.eup %5927 }
 0x603   :  { %v4839_v24 = vmul.f32 %v5928_v7, %v8379_v15 }
 0x605   :  { %4848 = vperm.xlu0 %5920, %v4839_v24   ;;  %v4840_v20 = vmul.f32 %v4839_v24, %v4831_v1 }
 0x607   :  { %4842 = vrot.lane.b32.xlu1 %v4840_v20, %s5948_s9 }
 0x609   :  { %5922 = vset.pattern.permute.xlu0 %v5942_v49 }
 0x679   :  { %v4843_v44 = vpop.permute.xlu1 %4842 }
 0x67a   :  { %v4845_v30 = vsub.f32 %v8379_v15, %v4843_v44 }
 0x67c   :  { %4854 = vperm.xlu1 %5921, %v4845_v30  }
 0x680   :  { %v4849_v57 = vpop.permute.xlu0 %4848 }
 0x681   :  { %v4851_v33 = vmul.f32 %v4849_v57, %v4825_v42 }
 0x6f7   :  { %v4855_v61 = vpop.permute.xlu1 %4854 }
 0x6f8   :  { %v4857_v51 = vadd.f32 %v4855_v61, %v4851_v33 }
 0x6fa   :  { %v4858_v58 = vmax.f32 %v4857_v51, 0.0 }
 0x6fc   :  { %4859 = vxpose.xlu1.b32.start.end [1/1] (short) %v4858_v58, 128 }
 0x778   :  { %v8508_v49 = vpop.trf.xlu1 }
 0x77c   :  { %v8510_v8 = vpop.trf.xlu1 }
 0x780   :  { %v4877_v40 = vpop.trf.xlu1 }
 0x781   :  { %v4909_v45 = vrot.slane %v4877_v40, 7 }
 0x783   :  { %v8513_v15 = vsel %vm9715_vm11, 0.0, %v4909_v45  ;;  %v4957_v4 = vsel %vm9716_vm0, %v4909_v45, 0.0  ;;  %vm9728_vm11 = vmmov %vm9716_vm0 }
 0x784   :  { %v5006_v47 = vrot.slane %v4957_v4, 1  ;;  %v4878_v32 = vpop.trf.xlu1  ;;  %v5005_v6 = vrot.slane %v8513_v15, 1  ;;  %v5048_v62 = vrot.slane %v4957_v4, 2  ;;  %v5047_v46 = vrot.slane %v8513_v15, 2  ;;  %vm9729_vm0 = vmmov %vm9722_vm3 }
 0x785   :  { %v4910_v50 = vrot.slane %v4878_v32, 7 }
 0x786   :  { %v8518_v27 = vsel %vm4089_vm10, %v5005_v6, %v5006_v47  ;;  %v8529_v39 = vsel %vm9719_vm9, %v5047_v46, %v5048_v62  ;;  %vm9732_vm9 = vmmov %vm9724_vm1 }
 0x787   :  { %v8522_v60 = vsel %vm9717_vm15, 0.0, %v4910_v50  ;;  %v4958_v0 = vsel %vm9718_vm7, %v4910_v50, 0.0  ;;  %5105 = vrot.lane.b32.xlu0 %v8518_v27, %s5933_s22  ;;  %vm9730_vm15 = vmmov %vm9724_vm1 }
 0x788   :  { %v5009_v56 = vrot.slane %v4958_v0, 1  ;;  %v4879_v5 = vpop.trf.xlu1  ;;  %v5008_v21 = vrot.slane %v8522_v60, 1  ;;  %v5051_v9 = vrot.slane %v4958_v0, 2  ;;  %v5050_v25 = vrot.slane %v8522_v60, 2  ;;  %vm9731_vm7 = vmmov %vm9724_vm1 }
 0x789   :  { %v4911_v17 = vrot.slane %v4879_v5, 7 }
 0x78a   :  { %v8538_v22 = vsel %vm4089_vm10, %v5008_v21, %v5009_v56  ;;  %v8556_v42 = vsel %vm9725_vm4, %v5050_v25, %v5051_v9  ;;  %vm9737_vm4 = vmmov %vm9729_vm0 }
 0x78b   :  { %v8532_v12 = vsel %vm9720_vm13, 0.0, %v4911_v17  ;;  %v4959_v31 = vsel %vm9721_vm14, %v4911_v17, 0.0  ;;  %5150 = vrot.lane.b32.xlu0 %v8529_v39, %s5936_s25  ;;  %vm9733_vm13 = vmmov %vm9724_vm1 }
 0x78c   :  { %v5054_v16 = vrot.slane %v4959_v31, 2  ;;  %v4880_v19 = vpop.trf.xlu1  ;;  %v5053_v10 = vrot.slane %v8532_v12, 2  ;;  %v5012_v1 = vrot.slane %v4959_v31, 1  ;;  %v5011_v29 = vrot.slane %v8532_v12, 1  ;;  %vm9734_vm14 = vmmov %vm9729_vm0 }
 0x78d   :  { %v4912_v53 = vrot.slane %v4880_v19, 7 }
 0x78e   :  { %v8542_v38 = vsel %vm9722_vm3, %v5053_v10, %v5054_v16  ;;  %v8574_v52 = vsel %vm4089_vm10, %v5011_v29, %v5012_v1  ;;  %vm9735_vm3 = vmmov %vm9729_vm0 }
 0x78f   :  { %v8546_v59 = vsel %vm9723_vm2, 0.0, %v4912_v53  ;;  %v4960_v23 = vsel %vm9724_vm1, %v4912_v53, 0.0  ;;  %5107 = vrot.lane.b32.xlu0 %v8538_v22, %s5933_s22  ;;  %5293 = vrot.lane.b32.xlu1 %v8542_v38, %s5949_s10  ;;  %vm9736_vm2 = vmmov %vm9724_vm1 }
 0x790   :  { %v5015_v41 = vrot.slane %v4960_v23, 1  ;;  %v5057_v43 = vrot.slane %v4960_v23, 2  ;;  %v5014_v11 = vrot.slane %v8546_v59, 1  ;;  %v5056_v28 = vrot.slane %v8546_v59, 2  ;;  %v4881_v26 = vpop.trf.xlu1 }
 0x791   :  { %v4913_v48 = vrot.slane %v4881_v26, 7 }
 0x792   :  { %v8559_v34 = vsel %vm4089_vm10, %v5014_v11, %v5015_v41  ;;  %v8566_v18 = vsel %vm9726_vm5, %v5056_v28, %v5057_v43  ;;  %vm9738_vm5 = vmmov %vm9724_vm1 }
 0x793   :  { %5152 = vrot.lane.b32.xlu0 %v8556_v42, %s5936_s25  ;;  %5111 = vrot.lane.b32.xlu1 %v8559_v34, %s5933_s22  ;;  %v8577_v13 = vsel %vm9727_vm6, 0.0, %v4913_v48  ;;  %v4961_v7 = vsel %vm9728_vm11, %v4913_v48, 0.0  ;;  %vm9739_vm6 = vmmov %vm9724_vm1 }
 0x794   :  { %v5018_v24 = vrot.slane %v4961_v7, 1  ;;  %v5017_v20 = vrot.slane %v8577_v13, 1  ;;  %v5060_v44 = vrot.slane %v4961_v7, 2  ;;  %v5059_v57 = vrot.slane %v8577_v13, 2  ;;  %v4882_v33 = vpop.trf.xlu1  ;;  %vm9740_vm11 = vmmov %vm9729_vm0 }
 0x795   :  { %v4914_v51 = vrot.slane %v4882_v33, 7 }
 0x796   :  { %v5019_v30 = vsel %vm4089_vm10, %v5017_v20, %v5018_v24  ;;  %v5061_v61 = vsel %vm9729_vm0, %v5059_v57, %v5060_v44  ;;  %vm9741_vm0 = vmmov %vm9724_vm1 }
 0x797   :  { %5197 = vrot.lane.b32.xlu0 %v8532_v12, %s5938_s26  ;;  %5156 = vrot.lane.b32.xlu1 %v8566_v18, %s5936_s25  ;;  %v4946_v40 = vsel %vm9730_vm15, 0.0, %v4914_v51  ;;  %v4962_v45 = vsel %vm9731_vm7, %v4914_v51, 0.0  ;;  %vm9742_vm15 = vmmov %vm9741_vm0 }
 0x798   :  { %v4883_v58 = vpop.trf.xlu1  ;;  %v5093_v47 = vrot.slane %v4946_v40, 2  ;;  %v5094_v32 = vrot.slane %v4962_v45, 2  ;;  %v5087_v53 = vrot.slane %v4946_v40, 1  ;;  %v5088_v9 = vrot.slane %v4962_v45, 1  ;;  %vm9743_vm7 = vmmov %vm9735_vm3 }
 0x799   :  { %v4915_v4 = vrot.slane %v4883_v58, 7 }
 0x79a   :  { %v5095_v56 = vsel %vm9734_vm14, %v5093_v47, %v5094_v32  ;;  %v5089_v11 = vsel %vm4089_vm10, %v5087_v53, %v5088_v9  ;;  %vm9746_vm14 = vmmov %vm9741_vm0 }
 0x79b   :  { %5109 = vrot.lane.b32.xlu0 %v8574_v52, %s5933_s22  ;;  %5295 = vrot.lane.b32.xlu1 %v8566_v18, %s5949_s10  ;;  %v8604_v6 = vsel %vm9732_vm9, 0.0, %v4915_v4  ;;  %v4963_v50 = vsel %vm9733_vm13, %v4915_v4, 0.0  ;;  %vm9744_vm9 = vmmov %vm9741_vm0 }
 0x79c   :  { %v4884_v62 = vpop.trf.xlu1  ;;  %v5062_v46 = vrot.slane %v8604_v6, 2  ;;  %v5063_v0 = vrot.slane %v4963_v50, 2  ;;  %v5020_v24 = vrot.slane %v8604_v6, 1  ;;  %v5021_v20 = vrot.slane %v4963_v50, 1  ;;  %vm9745_vm13 = vmmov %vm9741_vm0 }
 0x79d   :  { %v4916_v5 = vrot.slane %v4884_v62, 7 }
 0x79e   :  { %v5064_v21 = vsel %vm9735_vm3, %v5062_v46, %v5063_v0  ;;  %vm9747_vm3 = vmmov %vm9741_vm0 }
 0x79f   :  { %5154 = vrot.lane.b32.xlu0 %v8542_v38, %s5936_s25  ;;  %5343 = vrot.lane.b32.xlu1 %v8577_v13, %s5944_s1  ;;  %v8616_v17 = vsel %vm9736_vm2, 0.0, %v4916_v5  ;;  %v4964_v31 = vsel %vm9724_vm1, %v4916_v5, 0.0  ;;  %vm9748_vm2 = vmmov %vm9737_vm4 }
 0x7a0   :  { %v5066_v16 = vrot.slane %v4964_v31, 2  ;;  %v5065_v19 = vrot.slane %v8616_v17, 2  ;;  %v5024_v25 = vrot.slane %v4964_v31, 1  ;;  %v5023_v23 = vrot.slane %v8616_v17, 1  ;;  %v4885_v41 = vpop.trf.xlu1  ;;  %vm9749_vm1 = vmmov %vm9748_vm2 }
 0x7a1   :  { %v4917_v43 = vrot.slane %v4885_v41, 7 }
 0x7a2   :  { %v5067_v10 = vsel %vm9737_vm4, %v5065_v19, %v5066_v16  ;;  %v5025_v28 = vsel %vm4089_vm10, %v5023_v23, %v5024_v25  ;;  %vm9750_vm4 = vcmask 130048  }
 0x7a3   :  { %5245 = vrot.lane.b32.xlu0 %v8574_v52, %s5940_s28  ;;  %5113 = vrot.lane.b32.xlu1 %v5019_v30, %s5933_s22  ;;  %v8634_v26 = vsel %vm9738_vm5, 0.0, %v4917_v43  ;;  %v4965_v1 = vsel %vm9739_vm6, %v4917_v43, 0.0  ;;  %vm9751_vm5 = vmmov %vm9741_vm0 }
 0x7a4   :  { %v5069_v29 = vrot.slane %v4965_v1, 2  ;;  %v5068_v48 = vrot.slane %v8634_v26, 2  ;;  %v5027_v44 = vrot.slane %v4965_v1, 1  ;;  %v4886_v57 = vpop.trf.xlu1  ;;  %vm9752_vm6 = vmmov %vm9741_vm0 }
 0x7a5   :  { %v4918_v33 = vrot.slane %v4886_v57, 7 }
 0x7a6   :  { %v5070_v7 = vsel %vm9740_vm11, %v5068_v48, %v5069_v29  ;;  %vm9753_vm11 = vmmov %vm9750_vm4 }
 0x7a7   :  { %5199 = vrot.lane.b32.xlu0 %v8546_v59, %s5938_s26  ;;  %5158 = vrot.lane.b32.xlu1 %v5061_v61, %s5936_s25  ;;  %v8654_v58 = vsel %vm9741_vm0, 0.0, %v4918_v33  ;;  %vm9754_vm0 = vmmov %vm9750_vm4 }
 0x7a8   :  { %v5029_v4 = vrot.slane %v8654_v58, 1  ;;  %v5071_v50 = vrot.slane %v8654_v58, 2  ;;  %v4887_v46 = vpop.trf.xlu1 }
 0x7a9   :  { %v4919_v0 = vrot.slane %v4887_v46, 7 }
 0x7ab   :  { %5247 = vrot.lane.b32.xlu0 %v8559_v34, %s5940_s28  ;;  %5249 = vrot.lane.b32.xlu1 %v5019_v30, %s5940_s28  ;;  %v8679_v5 = vsel %vm9744_vm9, 0.0, %v4919_v0  ;;  %v4967_v31 = vsel %vm9745_vm13, %v4919_v0, 0.0  ;;  %vm5530_vm9 = vcmask 326656   ;;  %vm9756_vm13 = vmmov %vm9749_vm1 }
 0x7ac   :  { %v5033_v16 = vrot.slane %v4967_v31, 1  ;;  %v5032_v19 = vrot.slane %v8679_v5, 1  ;;  %v5075_v25 = vrot.slane %v4967_v31, 2  ;;  %v5074_v41 = vrot.slane %v8679_v5, 2 }
 0x7ae   :  { %v5034_v23 = vsel %vm4089_vm10, %v5032_v19, %v5033_v16  ;;  %v5076_v1 = vsel %vm9748_vm2, %v5074_v41, %v5075_v25  ;;  %vm5581_vm2 = vcmask 523264  }
 0x7af   :  { %5201 = vrot.lane.b32.xlu0 %v8577_v13, %s5938_s26  ;;  %5297 = vrot.lane.b32.xlu1 %v5061_v61, %s5949_s10 }
 0x7b3   :  { %5388 = vrot.lane.b32.xlu1 %v5019_v30, %s5945_s7  ;;  %5299 = vrot.lane.b32.xlu0 %v5095_v56, %s5949_s10  ;;  %v5026_v30 = vrot.slane %v8634_v26, 1 }
 0x7b5   :  { %v5028_v51 = vsel %vm4089_vm10, %v5026_v30, %v5027_v44 }
 0x7b7   :  { %5433 = vrot.lane.b32.xlu1 %v5061_v61, %s5946_s8  ;;  %5301 = vrot.lane.b32.xlu0 %v5064_v21, %s5949_s10  ;;  %v5022_v61 = vsel %vm4089_vm10, %v5020_v24, %v5021_v20 }
 0x7bb   :  { %5203 = vrot.lane.b32.xlu1 %v4946_v40, %s5938_s26  ;;  %5349 = vrot.lane.b32.xlu0 %v8616_v17, %s5944_s1 }
 0x7bf   :  { %5345 = vrot.lane.b32.xlu1 %v4946_v40, %s5944_s1  ;;  %5303 = vrot.lane.b32.xlu0 %v5067_v10, %s5949_s10  ;;  %v4966_v40 = vsel %vm9742_vm15, %v4918_v33, 0.0  ;;  %vm9755_vm15 = vcmask 195584  }
 0x7c0   :  { %v5030_v45 = vrot.slane %v4966_v40, 1  ;;  %v5072_v32 = vrot.slane %v4966_v40, 2 }
 0x7c2   :  { %v5031_v47 = vsel %vm4089_vm10, %v5029_v4, %v5030_v45  ;;  %v5073_v62 = vsel %vm9743_vm7, %v5071_v50, %v5072_v32  ;;  %vm5547_vm7 = vcmask 392192  }
 0x7c3   :  { %5251 = vrot.lane.b32.xlu1 %v5089_v11, %s5940_s28  ;;  %5394 = vrot.lane.b32.xlu0 %v5025_v28, %s5945_s7 }
 0x7c7   :  { %5390 = vrot.lane.b32.xlu1 %v5089_v11, %s5945_s7  ;;  %5439 = vrot.lane.b32.xlu0 %v5067_v10, %s5946_s8 }
 0x7cb   :  { %5435 = vrot.lane.b32.xlu1 %v5095_v56, %s5946_s8  ;;  %5351 = vrot.lane.b32.xlu0 %v8634_v26, %s5944_s1  ;;  %v4888_v56 = vpop.trf.xlu1 }
 0x7cc   :  { %v4920_v40 = vrot.slane %v4888_v56, 7 }
 0x7cf   :  { %5205 = vrot.lane.b32.xlu1 %v8604_v6, %s5938_s26  ;;  %5305 = vrot.lane.b32.xlu0 %v5070_v7, %s5949_s10 }
 0x7d3   :  { %5115 = vrot.lane.b32.xlu1 %v5022_v61, %s5933_s22  ;;  %5396 = vrot.lane.b32.xlu0 %v5028_v51, %s5945_s7 }
 0x7d7   :  { %5160 = vrot.lane.b32.xlu1 %v5064_v21, %s5936_s25  ;;  %5441 = vrot.lane.b32.xlu0 %v5070_v7, %s5946_s8  ;;  %v8681_v21 = vpop.trf.xlu1 }
 0x7db   :  { %5253 = vrot.lane.b32.xlu1 %v5022_v61, %s5940_s28  ;;  %5353 = vrot.lane.b32.xlu0 %v8654_v58, %s5944_s1 }
 0x7df   :  { %5207 = vrot.lane.b32.xlu1 %v8616_v17, %s5938_s26  ;;  %5121 = vrot.lane.b32.xlu0 %v5031_v47, %s5933_s22 }
 0x7e3   :  { %5117 = vrot.lane.b32.xlu1 %v5025_v28, %s5933_s22  ;;  %5166 = vrot.lane.b32.xlu0 %v5073_v62, %s5936_s25 }
 0x7e7   :  { %5162 = vrot.lane.b32.xlu1 %v5067_v10, %s5936_s25  ;;  %5307 = vrot.lane.b32.xlu0 %v5073_v62, %s5949_s10  ;;  %v4890_v10 = vpop.trf.xlu1 }
 0x7e8   :  { %v4922_v9 = vrot.slane %v4890_v10, 7 }
 0x7ea   :  { %v8700_v11 = vsel %vm9746_vm14, 0.0, %v4922_v9  ;;  %vm9757_vm14 = vmmov %vm9755_vm15 }
 0x7eb   :  { %5255 = vrot.lane.b32.xlu1 %v5025_v28, %s5940_s28  ;;  %5398 = vrot.lane.b32.xlu0 %v5031_v47, %s5945_s7  ;;  %v8703_v28 = vsel %vm9747_vm3, %v4922_v9, 0.0  ;;  %v5096_v29 = vrot.slane %v8700_v11, 2  ;;  %vm5564_vm3 = vcmask 457728  }
 0x7ec   :  { %v5097_v48 = vrot.slane %v8703_v28, 2 }
 0x7ee   :  { %v8718_v20 = vsel %vm9749_vm1, %v5096_v29, %v5097_v48  ;;  %vm9758_vm1 = vmmov %vm9757_vm14 }
 0x7ef   :  { %5209 = vrot.lane.b32.xlu1 %v8634_v26, %s5938_s26  ;;  %5443 = vrot.lane.b32.xlu0 %v5073_v62, %s5946_s8  ;;  %v4968_v62 = vsel %vm9752_vm6, %v4920_v40, 0.0  ;;  %vm9761_vm6 = vmmov %vm9756_vm13 }
 0x7f0   :  { %v5036_v0 = vrot.slane %v4968_v62, 1  ;;  %v5078_v19 = vrot.slane %v4968_v62, 2 }
 0x7f3   :  { %5119 = vrot.lane.b32.xlu1 %v5028_v51, %s5933_s22  ;;  %5213 = vrot.lane.b32.xlu0 %v8679_v5, %s5938_s26 }
 0x7f7   :  { %5164 = vrot.lane.b32.xlu1 %v5070_v7, %s5936_s25  ;;  %5355 = vrot.lane.b32.xlu0 %v8679_v5, %s5944_s1 }
 0x7f9   :  { %v8691_v53 = vpop.permute.xlu0 %5105 }
 0x7fb   :  { %5257 = vrot.lane.b32.xlu1 %v5028_v51, %s5940_s28  ;;  %5123 = vrot.lane.b32.xlu0 %v5034_v23, %s5933_s22 }
 0x7fd   :  { %v8697_v43 = vpop.permute.xlu0 %5150 }
 0x7ff   :  { %5211 = vrot.lane.b32.xlu1 %v8654_v58, %s5938_s26  ;;  %5168 = vrot.lane.b32.xlu0 %v5076_v1, %s5936_s25 }
 0x801   :  { %v8711_v7 = vpop.permute.xlu0 %5107  ;;  %v8713_v24 = vpop.permute.xlu1 %5293 }
 0x803   :  { %5259 = vrot.lane.b32.xlu1 %v5031_v47, %s5940_s28  ;;  %5261 = vrot.lane.b32.xlu0 %v5034_v23, %s5940_s28  ;;  %v8737_v47 = vsel %vm9751_vm5, 0.0, %v4920_v40 }
 0x804   :  { %v5035_v56 = vrot.slane %v8737_v47, 1  ;;  %v5077_v9 = vrot.slane %v8737_v47, 2 }
 0x805   :  { %v8720_v44 = vpop.permute.xlu0 %5152  ;;  %v5112_v30 = vpop.permute.xlu1 %5111 }
 0x806   :  { %v5474_v57 = vsel %vm4581_vm12, %v8546_v59, %v5112_v30  ;;  %v5037_v10 = vsel %vm4089_vm10, %v5035_v56, %v5036_v0  ;;  %v5079_v48 = vsel %vm9756_vm13, %v5077_v9, %v5078_v19  ;;  %vm9765_vm13 = vcmask 130048  }
 0x807   :  { %5309 = vrot.lane.b32.xlu0 %v5076_v1, %s5949_s10  ;;  %5315 = vrot.lane.b32.xlu1 %v8718_v20, %s5949_s10 }
 0x809   :  { %v8727_v33 = vpop.permute.xlu0 %5197  ;;  %v5157_v61 = vpop.permute.xlu1 %5156 }
 0x80a   :  { %v5489_v51 = vsel %vm9750_vm4, %v5474_v57, %v5157_v61  ;;  %vm9759_vm4 = vmmov %vm9751_vm5 }
 0x80b   :  { %5400 = vrot.lane.b32.xlu0 %v5034_v23, %s5945_s7  ;;  %5341 = vrot.lane.b32.xlu1 %v8546_v59, %s5944_s1  ;;  %vm9760_vm5 = vmmov %vm9759_vm4 }
 0x80d   :  { %v5110_v45 = vpop.permute.xlu0 %5109  ;;  %v5296_v4 = vpop.permute.xlu1 %5295 }
 0x80e   :  { %v5473_v25 = vsel %vm4581_vm12, %v8532_v12, %v5110_v45 }
 0x80f   :  { %5445 = vrot.lane.b32.xlu0 %v5076_v1, %s5946_s8  ;;  %5386 = vrot.lane.b32.xlu1 %v8559_v34, %s5945_s7 }
 0x811   :  { %v5155_v32 = vpop.permute.xlu0 %5154  ;;  %v5344_v50 = vpop.permute.xlu1 %5343 }
 0x812   :  { %v5488_v23 = vsel %vm9754_vm0, %v5473_v25, %v5155_v32  ;;  %vm9763_vm0 = vmmov %vm9759_vm4 }
 0x813   :  { %5215 = vrot.lane.b32.xlu0 %v8737_v47, %s5938_s26  ;;  %5431 = vrot.lane.b32.xlu1 %v8566_v18, %s5946_s8 }
 0x815   :  { %v8744_v59 = vpop.permute.xlu0 %5245  ;;  %v5114_v46 = vpop.permute.xlu1 %5113 }
 0x816   :  { %v5475_v34 = vsel %vm4581_vm12, %v8577_v13, %v5114_v46 }
 0x817   :  { %5357 = vrot.lane.b32.xlu0 %v8737_v47, %s5944_s1  ;;  %5291 = vrot.lane.b32.xlu1 %v8556_v42, %s5949_s10 }
 0x819   :  { %v5200_v31 = vpop.permute.xlu0 %5199  ;;  %v5159_v16 = vpop.permute.xlu1 %5158 }
 0x81a   :  { %v5490_v18 = vsel %vm9753_vm11, %v5475_v34, %v5159_v16  ;;  %v5503_v13 = vsel %vm9755_vm15, %v5488_v23, %v5200_v31  ;;  %vm9762_vm11 = vmmov %vm9759_vm4 }
 0x81b   :  { %5125 = vrot.lane.b32.xlu0 %v5037_v10, %s5933_s22  ;;  %5339 = vrot.lane.b32.xlu1 %v8532_v12, %s5944_s1  ;;  %vm9764_vm15 = vmmov %vm9761_vm6 }
 0x81d   :  { %v5248_v41 = vpop.permute.xlu0 %5247  ;;  %v5250_v1 = vpop.permute.xlu1 %5249 }
 0x81e   :  { %v5519_v29 = vsel %vm4682_vm8, %v5503_v13, %v5248_v41 }
 0x81f   :  { %v5536_v30 = vsel %vm5530_vm9, %v5519_v29, %v5296_v4  ;;  %5170 = vrot.lane.b32.xlu0 %v5079_v48, %s5936_s25  ;;  %5384 = vrot.lane.b32.xlu1 %v8574_v52, %s5945_s7 }
 0x820   :  { %v5553_v12 = vsel %vm5547_vm7, %v5536_v30, %v5344_v50 }
 0x821   :  { %v5202_v57 = vpop.permute.xlu0 %5201  ;;  %v5298_v61 = vpop.permute.xlu1 %5297 }
 0x822   :  { %v5504_v40 = vsel %vm9757_vm14, %v5489_v51, %v5202_v57  ;;  %vm9766_vm14 = vmmov %vm9765_vm13 }
 0x823   :  { %v5520_v45 = vsel %vm4682_vm8, %v5504_v40, %v5250_v1  ;;  %5263 = vrot.lane.b32.xlu0 %v5037_v10, %s5940_s28  ;;  %5429 = vrot.lane.b32.xlu1 %v8542_v38, %s5946_s8  ;;  %v4921_v38 = vrot.slane %v8681_v21, 7 }
 0x824   :  { %v5537_v4 = vsel %vm5530_vm9, %v5520_v45, %v5298_v61 }
 0x825   :  { %v8776_v32 = vpop.permute.xlu0 %5299  ;;  %v5389_v62 = vpop.permute.xlu1 %5388  ;;  %v8798_v31 = vsel %vm9759_vm4, 0.0, %v4921_v38  ;;  %v4969_v21 = vsel %vm9760_vm5, %v4921_v38, 0.0  ;;  %vm9767_vm4 = vmmov %vm9758_vm1 }
 0x826   :  { %v5570_v52 = vsel %vm5564_vm3, %v5553_v12, %v5389_v62  ;;  %v5039_v25 = vrot.slane %v4969_v21, 1  ;;  %v5038_v13 = vrot.slane %v8798_v31, 1  ;;  %v5081_v29 = vrot.slane %v4969_v21, 2  ;;  %vm9768_vm5 = vmmov %vm9765_vm13 }
 0x827   :  { %5311 = vrot.lane.b32.xlu0 %v5079_v48, %s5949_s10  ;;  %5289 = vrot.lane.b32.xlu1 %v8529_v39, %s5949_s10  ;;  %v5080_v30 = vrot.slane %v8798_v31, 2  ;;  %v4908_v12 = vrot.slane %v8510_v8, 7 }
 0x829   :  { %v8782_v51 = vpop.permute.xlu0 %5301  ;;  %v5434_v50 = vpop.permute.xlu1 %5433  ;;  %v5082_v45 = vsel %vm9761_vm6, %v5080_v30, %v5081_v29  ;;  %v4956_v62 = vsel %vm9763_vm0, %v4908_v12, 0.0  ;;  %vm9769_vm6 = vmmov %vm9758_vm1 }
 0x82a   :  { %v8785_v46 = vsel %vm5581_vm2, %v5570_v52, %v5434_v50  ;;  %v5045_v50 = vrot.slane %v4956_v62, 2  ;;  %vm9771_vm0 = vmmov %vm9768_vm5 }
 0x82b   :  { %5402 = vrot.lane.b32.xlu0 %v5037_v10, %s5945_s7  ;;  %5337 = vrot.lane.b32.xlu1 %v8522_v60, %s5944_s1 }
 0x82d   :  { %v8791_v0 = vpop.permute.xlu0 %5349  ;;  %v5204_v56 = vpop.permute.xlu1 %5203 }
 0x82e   :  { %v5505_v34 = vsel %vm9758_vm1, %v5490_v18, %v5204_v56 }
 0x82f   :  { %5447 = vrot.lane.b32.xlu0 %v5079_v48, %s5946_s8  ;;  %5382 = vrot.lane.b32.xlu1 %v8538_v22, %s5945_s7  ;;  %v5040_v48 = vsel %vm4089_vm10, %v5038_v13, %v5039_v25 }
 0x831   :  { %v8800_v16 = vpop.permute.xlu0 %5303  ;;  %v5346_v19 = vpop.permute.xlu1 %5345 }
 0x832   :  { %v5554_v10 = vsel %vm5547_vm7, %v5537_v4, %v5346_v19  ;;  %v8834_v4 = vsel %vm9762_vm11, 0.0, %v4908_v12  ;;  %v5090_v12 = vrot.slane %v8700_v11, 1  ;;  %vm9770_vm11 = vmmov %vm9768_vm5 }
 0x833   :  { %5217 = vrot.lane.b32.xlu0 %v8798_v31, %s5938_s26  ;;  %5427 = vrot.lane.b32.xlu1 %v8556_v42, %s5946_s8  ;;  %v5044_v38 = vrot.slane %v8834_v4, 2 }
 0x835   :  { %v8808_v18 = vpop.permute.xlu0 %5394  ;;  %v5252_v9 = vpop.permute.xlu1 %5251  ;;  %v8847_v19 = vsel %vm9764_vm15, %v5044_v38, %v5045_v50  ;;  %vm9772_vm15 = vmmov %vm9758_vm1 }
 0x836   :  { %v8811_v23 = vsel %vm4682_vm8, %v5505_v34, %v5252_v9 }
 0x837   :  { %5359 = vrot.lane.b32.xlu0 %v8798_v31, %s5944_s1  ;;  %5335 = vrot.lane.b32.xlu1 %v8513_v15, %s5944_s1 }
 0x839   :  { %v8818_v41 = vpop.permute.xlu0 %5439  ;;  %v5391_v1 = vpop.permute.xlu1 %5390 }
 0x83a   :  { %v5571_v42 = vsel %vm5564_vm3, %v5554_v10, %v5391_v1 }
 0x83b   :  { %5127 = vrot.lane.b32.xlu0 %v5040_v48, %s5933_s22  ;;  %5380 = vrot.lane.b32.xlu1 %v8518_v27, %s5945_s7 }
 0x83d   :  { %v8827_v57 = vpop.permute.xlu0 %5351  ;;  %v5436_v61 = vpop.permute.xlu1 %5435 }
 0x83e   :  { %v8830_v40 = vsel %vm5581_vm2, %v5571_v42, %v5436_v61  ;;  %v5091_v61 = vrot.slane %v8703_v28, 1 }
 0x83f   :  { %5172 = vrot.lane.b32.xlu0 %v5082_v45, %s5936_s25  ;;  %5425 = vrot.lane.b32.xlu1 %v8529_v39, %s5946_s8  ;;  %v5468_v39 = vsel %vm4581_vm12, %v9678_v55, %v8497_v2 }
 0x840   :  { %v8863_v13 = vsel %vm9766_vm14, %v5468_v39, %v8499_v14  ;;  %vm9774_vm14 = vmmov %vm9758_vm1 }
 0x841   :  { %v5306_v8 = vpop.permute.xlu0 %5305  ;;  %v5206_v52 = vpop.permute.xlu1 %5205 }
 0x842   :  { %v5506_v1 = vsel %vm9758_vm1, %v8863_v13, %v5206_v52  ;;  %vm9775_vm1 = vcmask 1040384  }
 0x843   :  { %5265 = vrot.lane.b32.xlu0 %v5040_v48, %s5940_s28  ;;  %5333 = vrot.lane.b32.xlu1 %v8834_v4, %s5944_s1 }
 0x845   :  { %v8844_v56 = vpop.permute.xlu0 %5396  ;;  %v5116_v34 = vpop.permute.xlu1 %5115 }
 0x846   :  { %v5476_v10 = vsel %vm4581_vm12, %v8604_v6, %v5116_v34 }
 0x847   :  { %5313 = vrot.lane.b32.xlu0 %v5082_v45, %s5949_s10  ;;  %5423 = vrot.lane.b32.xlu1 %v8847_v19, %s5946_s8 }
 0x849   :  { %v8857_v21 = vpop.permute.xlu0 %5441  ;;  %v5161_v9 = vpop.permute.xlu1 %5160 }
 0x84a   :  { %v5491_v25 = vsel %vm9765_vm13, %v5476_v10, %v5161_v9  ;;  %vm9773_vm13 = vmmov %vm9771_vm0 }
 0x84b   :  { %5404 = vrot.lane.b32.xlu0 %v5040_v48, %s5945_s7 }
 0x84d   :  { %v5354_v29 = vpop.permute.xlu0 %5353  ;;  %v5254_v42 = vpop.permute.xlu1 %5253 }
 0x84e   :  { %v8868_v55 = vsel %vm4682_vm8, %v5506_v1, %v5254_v42  ;;  %v5003_v1 = vrot.slane %v4956_v62, 1  ;;  %v5002_v42 = vrot.slane %v8834_v4, 1 }
 0x84f   :  { %5449 = vrot.lane.b32.xlu0 %v5082_v45, %s5946_s8  ;;  %v5092_v45 = vsel %vm4089_vm10, %v5090_v12, %v5091_v61 }
 0x851   :  { %v5122_v2 = vpop.permute.xlu0 %5121  ;;  %v5208_v6 = vpop.permute.xlu1 %5207 }
 0x852   :  { %v8872_v30 = vsel %vm9767_vm4, %v5491_v25, %v5208_v6  ;;  %vm9776_vm4 = vmmov %vm9775_vm1 }
 0x853   :  { %5219 = vrot.lane.b32.xlu0 %v8700_v11, %s5938_s26 }
 0x855   :  { %v5167_v14 = vpop.permute.xlu0 %5166  ;;  %v5118_v48 = vpop.permute.xlu1 %5117 }
 0x856   :  { %v5477_v6 = vsel %vm4581_vm12, %v8616_v17, %v5118_v48 }
 0x857   :  { %5361 = vrot.lane.b32.xlu0 %v8700_v11, %s5944_s1 }
 0x859   :  { %v5308_v52 = vpop.permute.xlu0 %5307  ;;  %v5163_v50 = vpop.permute.xlu1 %5162 }
 0x85a   :  { %v5492_v12 = vsel %vm9768_vm5, %v5477_v6, %v5163_v50  ;;  %vm9777_vm5 = vcmask 1045504  }
 0x85b   :  { %5267 = vrot.lane.b32.xlu0 %v5092_v45, %s5940_s28 }
 0x85d   :  { %v5399_v38 = vpop.permute.xlu0 %5398  ;;  %v8882_v34 = vpop.permute.xlu1 %5255 }
 0x85f   :  { %5195 = vrot.lane.b32.xlu0 %v8522_v60, %s5938_s26 }
 0x861   :  { %v5444_v39 = vpop.permute.xlu0 %5443  ;;  %v5210_v10 = vpop.permute.xlu1 %5209 }
 0x862   :  { %v5508_v61 = vsel %vm9769_vm6, %v5492_v12, %v5210_v10 }
 0x863   :  { %5406 = vrot.lane.b32.xlu0 %v5092_v45, %s5945_s7 }
 0x865   :  { %v5214_v28 = vpop.permute.xlu0 %5213  ;;  %v5120_v9 = vpop.permute.xlu1 %5119 }
 0x867   :  { %5451 = vrot.lane.b32.xlu0 %v8718_v20, %s5946_s8  ;;  %v8898_v20 = vsel %vm4089_vm10, %v5002_v42, %v5003_v1  ;;  %v4907_v1 = vrot.slane %v8508_v49, 7 }
 0x869   :  { %v5356_v11 = vpop.permute.xlu0 %5355  ;;  %v5165_v25 = vpop.permute.xlu1 %5164 }
 0x86b   :  { %5243 = vrot.lane.b32.xlu0 %v8538_v22, %s5940_s28 }
 0x86d   :  { %v5124_v45 = vpop.permute.xlu0 %5123  ;;  %v5258_v36 = vpop.permute.xlu1 %5257 }
 0x86e   :  { %v5524_v54 = vsel %vm4682_vm8, %v5508_v61, %v5258_v36  ;;  %v5480_v22 = vsel %vm4581_vm12, %v8679_v5, %v5124_v45  ;;  %v5478_v5 = vsel %vm4581_vm12, %v8634_v26, %v5120_v9 }
 0x86f   :  { %v5541_v62 = vsel %vm5530_vm9, %v5524_v54, %v5306_v8  ;;  %5103 = vrot.lane.b32.xlu0 %v8898_v20, %s5933_s22  ;;  %v5479_v54 = vsel %vm4581_vm12, %v8654_v58, %v5122_v2  ;;  %v8924_v58 = vsel %vm9775_vm1, 0.0, %v4907_v1  ;;  %v4955_v2 = vsel %vm9776_vm4, %v4907_v1, 0.0 }
 0x870   :  { %v5558_v17 = vsel %vm5547_vm7, %v5541_v62, %v5354_v29  ;;  %v5494_v8 = vsel %vm9771_vm0, %v5479_v54, %v5167_v14  ;;  %v5000_v9 = vrot.slane %v4955_v2, 1 }
 0x871   :  { %v5169_v48 = vpop.permute.xlu0 %5168  ;;  %v5212_v50 = vpop.permute.xlu1 %5211  ;;  %v5575_v10 = vsel %vm5564_vm3, %v5558_v17, %v5399_v38  ;;  %v5510_v29 = vsel %vm9772_vm15, %v5494_v8, %v5214_v28  ;;  %v5493_v38 = vsel %vm9773_vm13, %v5478_v5, %v5165_v25  ;;  %v4999_v28 = vrot.slane %v8924_v58, 1 }
 0x872   :  { %v5495_v6 = vsel %vm9770_vm11, %v5480_v22, %v5169_v48  ;;  %v8909_v36 = vsel %vm5581_vm2, %v5575_v10, %v5444_v39  ;;  %v5509_v12 = vsel %vm9774_vm14, %v5493_v38, %v5212_v50  ;;  %v5041_v17 = vrot.slane %v8924_v58, 2  ;;  %vm9780_vm11 = vmmov %vm9771_vm0 }
 0x873   :  { %5148 = vrot.lane.b32.xlu0 %v8847_v19, %s5936_s25  ;;  %v5042_v22 = vrot.slane %v4955_v2, 2  ;;  %v5001_v50 = vsel %vm4089_vm10, %v4999_v28, %v5000_v9  ;;  %vm9778_vm10 = vmmov %vm9771_vm0  ;;  %v9779_v9 = vmov 1   ;;  %vm5605_vm15 = vcmask 588800  }
 0x874   :  { %vm9781_vm0 = vmmov %vm9769_vm6 }
 0x875   :  { %v5262_v42 = vpop.permute.xlu0 %5261  ;;  %v5260_v39 = vpop.permute.xlu1 %5259  ;;  %v5043_v1 = vsel %vm9777_vm5, %v5041_v17, %v5042_v22  ;;  %vm9782_vm13 = vmmov %vm9781_vm0 }
 0x876   :  { %v5526_v49 = vsel %vm4682_vm8, %v5510_v29, %v5262_v42  ;;  %v5525_v14 = vsel %vm4682_vm8, %v5509_v12, %v5260_v39  ;;  %vm9783_vm14 = vmmov %vm9778_vm10 }
 0x877   :  { %5193 = vrot.lane.b32.xlu0 %v8513_v15, %s5938_s26  ;;  %v5542_v25 = vsel %vm5530_vm9, %v5525_v14, %v5308_v52  ;;  %vm9784_vm1 = vmmov %vm9781_vm0 }
 0x878   :  { %v5559_v62 = vsel %vm5547_vm7, %v5542_v25, %v5356_v11  ;;  %vm9785_vm4 = vmmov %vm9778_vm10 }
 0x879   :  { %v5310_v26 = vpop.permute.xlu0 %5309  ;;  %vm9786_vm5 = vmmov %vm9781_vm0 }
 0x87a   :  { %v5543_v61 = vsel %vm5530_vm9, %v5526_v49, %v5310_v26 }
 0x87b   :  { %5241 = vrot.lane.b32.xlu0 %v8518_v27, %s5940_s28 }
 0x87d   :  { %v5401_v45 = vpop.permute.xlu0 %5400 }
 0x87e   :  { %v5576_v48 = vsel %vm5564_vm3, %v5559_v62, %v5401_v45  ;;  %v5316_v62 = vpop.permute.xlu1 %5315 }
 0x87f   :  { %5101 = vrot.lane.b32.xlu0 %v5001_v50, %s5933_s22 }
 0x881   :  { %v5446_v10 = vpop.permute.xlu0 %5445 }
 0x882   :  { %v8941_v52 = vsel %vm5581_vm2, %v5576_v48, %v5446_v10  ;;  %v8973_v22 = vpop.permute.xlu1 %5341 }
 0x883   :  { %5146 = vrot.lane.b32.xlu0 %v5043_v1, %s5936_s25 }
 0x885   :  { %v5216_v27 = vpop.permute.xlu0 %5215 }
 0x886   :  { %v5511_v11 = vsel %vm9769_vm6, %v5495_v6, %v5216_v27  ;;  %vm9787_vm6 = vmmov %vm9785_vm4 }
 0x887   :  { %5191 = vrot.lane.b32.xlu0 %v8834_v4, %s5938_s26 }
 0x889   :  { %v5358_v54 = vpop.permute.xlu0 %5357 }
 0x88a   :  { %v5560_v8 = vsel %vm5547_vm7, %v5543_v61, %v5358_v54 }
 0x88b   :  { %5239 = vrot.lane.b32.xlu0 %v8898_v20, %s5940_s28 }
 0x88d   :  { %v5126_v5 = vpop.permute.xlu0 %5125 }
 0x88e   :  { %v5481_v29 = vsel %vm4581_vm12, %v8737_v47, %v5126_v5  ;;  %v8968_v47 = vld [vmem:[%s9143_s4] sm:$0xff] }
 0x88f   :  { %5287 = vrot.lane.b32.xlu0 %v8847_v19, %s5949_s10 }
 0x891   :  { %v5171_v38 = vpop.permute.xlu0 %5170 }
 0x892   :  { %v5496_v42 = vsel %vm9778_vm10, %v5481_v29, %v5171_v38  ;;  %vm9788_vm10 = vmmov %vm9781_vm0 }
 0x893   :  { %5189 = vrot.lane.b32.xlu0 %v8924_v58, %s5938_s26 }
 0x895   :  { %v5264_v6 = vpop.permute.xlu0 %5263 }
 0x896   :  { %v5527_v39 = vsel %vm4682_vm8, %v5511_v11, %v5264_v6 }
 0x897   :  { %5237 = vrot.lane.b32.xlu0 %v5001_v50, %s5940_s28  ;;  %v8975_v50 = vpop.permute.xlu1 %5386 }
 0x899   :  { %v5312_v12 = vpop.permute.xlu0 %5311 }
 0x89a   :  { %v5544_v49 = vsel %vm5530_vm9, %v5527_v39, %v5312_v12 }
 0x89b   :  { %5285 = vrot.lane.b32.xlu0 %v5043_v1, %s5949_s10  ;;  %v8977_v1 = vpop.permute.xlu1 %5431 }
 0x89d   :  { %v5403_v19 = vpop.permute.xlu0 %5402 }
 0x89e   :  { %v5577_v2 = vsel %vm5564_vm3, %v5560_v8, %v5403_v19 }
 0x89f   :  { %5378 = vrot.lane.b32.xlu0 %v8898_v20, %s5945_s7  ;;  %v8979_v54 = vpop.permute.xlu1 %5291 }
 0x8a1   :  { %v5448_v14 = vpop.permute.xlu0 %5447 }
 0x8a2   :  { %v5594_v26 = vsel %vm5581_vm2, %v5577_v2, %v5448_v14 }
 0x8a3   :  { %5602 = vperm.xlu0 %5922, %v8968_v47   ;;  %v8987_v12 = vpop.permute.xlu1 %5339 }
 0x8a5   :  { %v5218_v28 = vpop.permute.xlu0 %5217 }
 0x8a7   :  { %5923 = vset.pattern.permute.xlu0 %v9779_v9  ;;  %v5512_v9 = vsel %vm9782_vm13, %v5496_v42, %v5218_v28 }
 0x8a9   :  { %v5360_v25 = vpop.permute.xlu0 %5359 }
 0x8aa   :  { %v5561_v42 = vsel %vm5547_vm7, %v5544_v49, %v5360_v25 }
 0x8ad   :  { %v5128_v61 = vpop.permute.xlu0 %5127 }
 0x8ae   :  { %v5482_v8 = vsel %vm4581_vm12, %v8798_v31, %v5128_v61 }
 0x8b1   :  { %v5173_v45 = vpop.permute.xlu0 %5172 }
 0x8b2   :  { %v5497_v5 = vsel %vm9780_vm11, %v5482_v8, %v5173_v45  ;;  %v8998_v45 = vpop.permute.xlu1 %5384  ;;  %vm9789_vm11 = vmmov %vm9785_vm4 }
 0x8b5   :  { %v5266_v17 = vpop.permute.xlu0 %5265 }
 0x8b9   :  { %v5314_v20 = vpop.permute.xlu0 %5313 }
 0x8bd   :  { %v5405_v48 = vpop.permute.xlu0 %5404 }
 0x8be   :  { %v5578_v28 = vsel %vm5564_vm3, %v5561_v42, %v5405_v48 }
 0x8c1   :  { %v5450_v10 = vpop.permute.xlu0 %5449 }
 0x8c5   :  { %v5220_v27 = vpop.permute.xlu0 %5219 }
 0x8c6   :  { %v5513_v29 = vsel %vm9781_vm0, %v5497_v5, %v5220_v27 }
 0x8c9   :  { %v5362_v11 = vpop.permute.xlu0 %5361 }
 0x8cd   :  { %v5268_v38 = vpop.permute.xlu0 %5267 }
 0x8ce   :  { %v5529_v6 = vsel %vm4682_vm8, %v5513_v29, %v5268_v38 }
 0x8cf   :  { %v5546_v39 = vsel %vm5530_vm9, %v5529_v6, %v5316_v62  ;;  %v5528_v62 = vsel %vm4682_vm8, %v5512_v9, %v5266_v17  ;;  %v9006_v6 = vpop.permute.xlu1 %5429 }
 0x8d0   :  { %v5563_v19 = vsel %vm5547_vm7, %v5546_v39, %v8502_v35  ;;  %v5545_v27 = vsel %vm5530_vm9, %v5528_v62, %v5314_v20  ;;  %v5595_v20 = vsel %vm5581_vm2, %v5578_v28, %v5450_v10  ;;  %v5523_v39 = vsel %vm4682_vm8, %v8872_v30, %v8882_v34 }
 0x8d1   :  { %v5196_v2 = vpop.permute.xlu0 %5195  ;;  %v5580_v14 = vsel %vm5564_vm3, %v5563_v19, %v8504_v63  ;;  %v5562_v8 = vsel %vm5547_vm7, %v5545_v27, %v5362_v11  ;;  %v5540_v49 = vsel %vm5530_vm9, %v5523_v39, %v8800_v16  ;;  %v5539_v30 = vsel %vm5530_vm9, %v8868_v55, %v8782_v51 }
 0x8d2   :  { %v5597_v31 = vsel %vm5581_vm2, %v5580_v14, %v8506_v37  ;;  %v5557_v48 = vsel %vm5547_vm7, %v5540_v49, %v8827_v57  ;;  %v5538_v57 = vsel %vm5530_vm9, %v8811_v23, %v8776_v32 }
 0x8d3   :  { %5866 = vmatpush3.xpose.msk.msra.mxu1 %vm5605_vm15, %v5597_v31  ;;  %v5290_v19 = vpop.permute.xlu1 %5289  ;;  %v5574_v16 = vsel %vm5564_vm3, %v5557_v48, %v8844_v56  ;;  %v5555_v56 = vsel %vm5547_vm7, %v5538_v57, %v8502_v35  ;;  %v5471_v35 = vsel %vm4581_vm12, %v8513_v15, %v8691_v53  ;;  %v5598_v57 = vld [vmem:[%s9144_s3] sm:$0xff] }
 0x8d4   :  { %5867 = vmatprep.subr.mxu1 %v9511_v3  ;;  %v5591_v51 = vsel %vm5581_vm2, %v5574_v16, %v8857_v21  ;;  %v5572_v32 = vsel %vm5564_vm3, %v5555_v56, %v8504_v63  ;;  %v5472_v63 = vsel %vm4581_vm12, %v8522_v60, %v8711_v7 }
 0x8d5   :  { %v5407_v61 = vpop.permute.xlu0 %5406 }
 0x8d6   :  { %v5579_v5 = vsel %vm5564_vm3, %v5562_v8, %v5407_v61 }
 0x8d7   :  { %v5338_v10 = vpop.permute.xlu1 %5337 }
 0x8d9   :  { %v5452_v29 = vpop.permute.xlu0 %5451 }
 0x8da   :  { %v5596_v38 = vsel %vm5581_vm2, %v5579_v5, %v5452_v29 }
 0x8db   :  { %5868 = vmatpush3.xpose.msk.msra.mxu1 %vm5605_vm15, %v5596_v38  ;;  %v5383_v14 = vpop.permute.xlu1 %5382 }
 0x8dc   :  { %5869 = vmatprep.subr.mxu1 %v9511_v3 }
 0x8dd   :  { %v5244_v17 = vpop.permute.xlu0 %5243 }
 0x8df   :  { %5870 = vmatpush3.xpose.msk.msra.mxu1 %vm5605_vm15, %v5595_v20  ;;  %v5428_v23 = vpop.permute.xlu1 %5427 }
 0x8e0   :  { %5871 = vmatprep.subr.mxu1 %v9511_v3 }
 0x8e1   :  { %v5104_v11 = vpop.permute.xlu0 %5103 }
 0x8e3   :  { %5872 = vmatpush3.xpose.msk.msra.mxu1 %vm5605_vm15, %v5594_v26  ;;  %v5336_v61 = vpop.permute.xlu1 %5335 }
 0x8e4   :  { %5873 = vmatprep.subr.mxu1 %v9511_v3 }
 0x8e5   :  { %v5149_v25 = vpop.permute.xlu0 %5148 }
 0x8e7   :  { %5874 = vmatpush3.xpose.msk.msra.mxu1 %vm5605_vm15, %v8941_v52  ;;  %v5556_v52 = vsel %vm5547_vm7, %v5539_v30, %v8791_v0 }
 0x8e8   :  { %5875 = vmatprep.subr.mxu1 %v9511_v3  ;;  %v5573_v55 = vsel %vm5564_vm3, %v5556_v52, %v8808_v18  ;;  %v5589_v18 = vsel %vm5581_vm2, %v5572_v32, %v8506_v37  ;;  %v5487_v37 = vsel %vm9785_vm4, %v5472_v63, %v8720_v44  ;;  %v9791_v63 = vmov 2  }
 0x8e9   :  { %v5194_v34 = vpop.permute.xlu0 %5193  ;;  %v5502_v53 = vsel %vm9786_vm5, %v5487_v37, %v8727_v33 }
 0x8ea   :  { %v5518_v60 = vsel %vm4682_vm8, %v5502_v53, %v8744_v59 }
 0x8eb   :  { %5876 = vmatpush3.xpose.msk.msra.mxu1 %vm5605_vm15, %v8909_v36  ;;  %v5590_v36 = vsel %vm5581_vm2, %v5573_v55, %v8818_v41  ;;  %v5486_v41 = vsel %vm9783_vm14, %v5471_v35, %v8697_v43  ;;  %v5470_v43 = vsel %vm4581_vm12, %v8834_v4, %v5104_v11  ;;  %v5535_v4 = vsel %vm5530_vm9, %v5518_v60, %v8713_v24 }
 0x8ec   :  { %5877 = vmatprep.subr.mxu1 %v9511_v3  ;;  %v5501_v31 = vsel %vm9784_vm1, %v5486_v41, %v5196_v2  ;;  %v5485_v7 = vsel %vm9787_vm6, %v5470_v43, %v5149_v25  ;;  %v5552_v59 = vsel %vm5547_vm7, %v5535_v4, %v8973_v22 }
 0x8ed   :  { %v5242_v26 = vpop.permute.xlu0 %5241  ;;  %v5517_v15 = vsel %vm4682_vm8, %v5501_v31, %v5244_v17  ;;  %v5500_v2 = vsel %vm9788_vm10, %v5485_v7, %v5194_v34 }
 0x8ee   :  { %v5534_v44 = vsel %vm5530_vm9, %v5517_v15, %v8979_v54  ;;  %v5516_v33 = vsel %vm4682_vm8, %v5500_v2, %v5242_v26  ;;  %v5569_v54 = vsel %vm5564_vm3, %v5552_v59, %v8975_v50 }
 0x8ef   :  { %5878 = vmatpush3.xpose.msk.msra.mxu1 %vm5605_vm15, %v5591_v51  ;;  %v5551_v27 = vsel %vm5547_vm7, %v5534_v44, %v8987_v12  ;;  %v5533_v8 = vsel %vm5530_vm9, %v5516_v33, %v5290_v19 }
 0x8f0   :  { %5879 = vmatprep.subr.mxu1 %v9511_v3  ;;  %v5568_v12 = vsel %vm5564_vm3, %v5551_v27, %v8998_v45  ;;  %v5550_v50 = vsel %vm5547_vm7, %v5533_v8, %v5338_v10 }
 0x8f1   :  { %v5102_v0 = vpop.permute.xlu0 %5101  ;;  %v5567_v17 = vsel %vm5564_vm3, %v5550_v50, %v5383_v14 }
 0x8f2   :  { %v5469_v24 = vsel %vm4581_vm12, %v8924_v58, %v5102_v0  ;;  %v5584_v11 = vsel %vm5581_vm2, %v5567_v17, %v5428_v23  ;;  %vm9790_vm12 = vmmov %vm9781_vm0 }
 0x8f3   :  { %5880 = vmatpush3.xpose.msk.msra.mxu1 %vm5605_vm15, %v5590_v36 }
 0x8f4   :  { %5881 = vmatprep.subr.mxu1 %v9511_v3 }
 0x8f5   :  { %v5147_v21 = vpop.permute.xlu0 %5146 }
 0x8f6   :  { %v5484_v22 = vsel %vm9789_vm11, %v5469_v24, %v5147_v21 }
 0x8f7   :  { %5882 = vmatpush3.xpose.msk.msra.mxu1 %vm5605_vm15, %v5589_v18 }
 0x8f8   :  { %5883 = vmatprep.subr.mxu1 %v9511_v3 }
 0x8f9   :  { %v5192_v9 = vpop.permute.xlu0 %5191 }
 0x8fa   :  { %v5499_v29 = vsel %vm9781_vm0, %v5484_v22, %v5192_v9 }
 0x8fb   :  { %5884 = vmatpush3.xpose.msk.msra.mxu1 %vm5605_vm15, %v8830_v40  ;;  %v5381_v40 = vpop.permute.xlu1 %5380 }
 0x8fc   :  { %5885 = vmatprep.subr.mxu1 %v9511_v3 }
 0x8fd   :  { %v5240_v62 = vpop.permute.xlu0 %5239 }
 0x8fe   :  { %v5515_v38 = vsel %vm4682_vm8, %v5499_v29, %v5240_v62 }
 0x8ff   :  { %5886 = vmatpush3.xpose.msk.msra.mxu1 %vm5605_vm15, %v8785_v46  ;;  %v5586_v46 = vsel %vm5581_vm2, %v5569_v54, %v8977_v1  ;;  %v5426_v28 = vpop.permute.xlu1 %5425  ;;  %v5585_v1 = vsel %vm5581_vm2, %v5568_v12, %v9006_v6 }
 0x900   :  { %5887 = vmatprep.subr.mxu1 %v9511_v3 }
 0x901   :  { %v5288_v5 = vpop.permute.xlu0 %5287 }
 0x902   :  { %v5532_v58 = vsel %vm5530_vm9, %v5515_v38, %v5288_v5 }
 0x903   :  { %5888 = vmatpush3.xpose.msk.msra.mxu1 %vm5605_vm15, %v5586_v46  ;;  %v5549_v20 = vsel %vm5547_vm7, %v5532_v58, %v5336_v61  ;;  %v5334_v19 = vpop.permute.xlu1 %5333 }
 0x904   :  { %5889 = vmatprep.subr.mxu1 %v9511_v3  ;;  %v5566_v39 = vsel %vm5564_vm3, %v5549_v20, %v5381_v40 }
 0x905   :  { %v5190_v42 = vpop.permute.xlu0 %5189  ;;  %v5583_v10 = vsel %vm5581_vm2, %v5566_v39, %v5426_v28 }
 0x906   :  { %v5498_v49 = vsel %vm9790_vm12, %v8863_v13, %v5190_v42 }
 0x907   :  { %5890 = vmatpush3.xpose.msk.msra.mxu1 %vm5605_vm15, %v5585_v1  ;;  %v5424_v16 = vpop.permute.xlu1 %5423 }
 0x908   :  { %5891 = vmatprep.subr.mxu1 %v9511_v3 }
 0x909   :  { %v5238_v45 = vpop.permute.xlu0 %5237 }
 0x90a   :  { %v5514_v6 = vsel %vm4682_vm8, %v5498_v49, %v5238_v45 }
 0x90b   :  { %5892 = vmatpush3.xpose.msk.msra.mxu1 %vm5605_vm15, %v5584_v11 }
 0x90c   :  { %5893 = vmatprep.subr.mxu1 %v9511_v3 }
 0x90d   :  { %v5286_v25 = vpop.permute.xlu0 %5285 }
 0x90e   :  { %v5531_v48 = vsel %vm5530_vm9, %v5514_v6, %v5286_v25 }
 0x90f   :  { %5894 = vmatpush3.xpose.msk.msra.mxu1 %vm5605_vm15, %v5583_v10  ;;  %v5548_v34 = vsel %vm5547_vm7, %v5531_v48, %v5334_v19 }
 0x910   :  { %5895 = vmatprep.subr.mxu1 %v9511_v3 }
 0x911   :  { %v5379_v30 = vpop.permute.xlu0 %5378 }
 0x912   :  { %v5565_v52 = vsel %vm5564_vm3, %v5548_v34, %v5379_v30 }
 0x913   :  { %v5582_v13 = vsel %vm5581_vm2, %v5565_v52, %v5424_v16 }
 0x914   :  { %5896 = vmatpush3.xpose.msk.msra.mxu1 %vm5605_vm15, %v5582_v13 }
 0x917   :  { %5898 = vmatmul.mubr.msk.f32.vlgmr.msra.gmra.mxu1 %vm5605_vm15, %v5598_v57 }
 0x91e   :  { %v5603_v26 = vpop.permute.xlu0 %5602 }
 0x9d7   :  { %v5723_v14 = vpop.f32.mrf.mxu1 }
 0x9d8   :  { %v5724_v51 = vadd.f32 %v5723_v14, %v5603_v26 }
 0x9d9   :  { %v5899_v3 = vpop.f32.mrf.mxu1 }
 0x9da   :  { %5727 = vadd.xlane.f32.xlu1 %v5724_v51 }
 0xa63   :  { %v5728_v55 = vpop.xlane.xlu1 %5727 }
 0xa64   :  { %v5729_v56 = vmul.f32 0.0078125, %v5728_v55 }
 0xa66   :  { %v5730_v0 = vsub.f32 %v5724_v51, %v5729_v56 }
 0xa68   :  { %v5731_v36 = vmul.f32 %v5730_v0, %v5730_v0 }
 0xa6a   :  { %5732 = vadd.xlane.f32.xlu0 %v5731_v36 }
 0xaf3   :  { %v5733_v32 = vpop.xlane.xlu0 %5732 }
 0xaf4   :  { %v5734_v23 = vmul.f32 0.0078125, %v5733_v32 }
 0xaf6   :  { %v5735_v21 = vadd.f32 1e-05, %v5734_v23 }
 0xaf8   :  { %5929 = vrsqrt.f32 %v5735_v21 }
 0xb05   :  { %v5930_v18 = vpop.eup %5929 }
 0xb06   :  { %v5737_v35 = vmul.f32 %v5930_v18, %v8968_v47 }
 0xb08   :  { %5746 = vperm.xlu0 %5923, %v5737_v35   ;;  %v5738_v41 = vmul.f32 %v5737_v35, %v5729_v56 }
 0xb0a   :  { %5740 = vrot.lane.b32.xlu1 %v5738_v41, %s5948_s9 }
 0xb0c   :  { %5924 = vset.pattern.permute.xlu0 %v9791_v63 }
 0xb7c   :  { %v5741_v31 = vpop.permute.xlu1 %5740 }
 0xb7d   :  { %v5743_v9 = vsub.f32 %v8968_v47, %v5741_v31 }
 0xb7f   :  { %5752 = vperm.xlu1 %5921, %v5743_v9  }
 0xb83   :  { %v5747_v37 = vpop.permute.xlu0 %5746 }
 0xb84   :  { %v5749_v61 = vmul.f32 %v5747_v37, %v5724_v51 }
 0xbfa   :  { %v5753_v15 = vpop.permute.xlu1 %5752 }
 0xbfb   :  { %v5755_v53 = vadd.f32 %v5753_v15, %v5749_v61 }
 0xbfd   :  { %v5756_v43 = vmax.f32 %v5755_v53, 0.0 }
 0xbff   :  { %5757 = vst [vmem:[%s9145_s5] sm:$0xff] %v5756_v43 }

</bundles_post_ra>
